<compile_context>
chip_gen: v7x
topology: tpu7x:2x2x1
jax: 0.10.0
libtpu: 0.0.40
codegen_flags: <defaults>
</compile_context>

<pallas_src>
import functools

import jax
import jax.numpy as jnp
from jax.experimental import pallas as pl
from jax.experimental.pallas import tpu as pltpu

LANE = 128  # per-batch lane stride of the activation slabs (one vreg lane row)


# ----------------------------------------------------------------------------
# Fused kernel factory (all sizes are Python ints baked into the trace)
# ----------------------------------------------------------------------------
def _make_kernel(*, B, Cin, L, K, H):
    S = LANE
    Lc = L - K + 1           # valid-conv output length (67 for L=70, K=4)
    T = H                    # LSTM seq length == conv hidden channels
    BH = B * H
    BS = B * S
    PAD = S                  # one 128-lane zero block on each side of the slab
    DOT = functools.partial(jnp.dot, preferred_element_type=jnp.float32,
                            precision=jax.lax.Precision.DEFAULT)

    def kernel(x_ref, w1_ref, a1_ref, c1_ref, w2_ref, a2_ref, c2_ref,
               w3_ref, a3_ref, c3_ref, wihf_ref, whh_ref, bl_ref,
               wat_ref, wfc_ref, bfc_ref, out_ref,
               z_sc, gx_sc, xo_sc):
        f32 = jnp.float32

        # Per-block lane mask: only columns [0, Lc) of each 128-lane batch block
        # hold a valid conv output.  Everything else is zeroed before the store so
        # that shifted windowed reads pull in exact zeros (= the F.pad zeros).
        lane = jax.lax.broadcasted_iota(jnp.int32, (H, BS), 1)
        valid = (lane & (S - 1)) < Lc

        def conv_taps(w_ref, src_ref, base, cin):
            # Valid conv as K accumulated MXU matmuls; tap k is a windowed READ at a
            # static lane offset (no shifted/masked stores, no im2col scatter).
            acc = DOT(w_ref[:, 0:cin], src_ref[:, pl.ds(base, BS)])
            for k in range(1, K):
                acc = acc + DOT(w_ref[:, k * cin:(k + 1) * cin],
                                src_ref[:, pl.ds(base + k, BS)])
            return acc                                             # (H, BS)

        def bn_swish(raw, a_ref, c_ref):
            # eval-mode BatchNorm (+ folded conv bias): v = a*raw + c ; Swish.
            v = raw * a_ref[...] + c_ref[...]
            return v * jax.nn.sigmoid(v)

        # ------------------------------ ConvNormPool ------------------------------
        z_sc[...] = jnp.zeros((H, PAD + BS + PAD), f32)    # zero the pad regions once

        # conv1 reads the lane-aligned input slab directly (data at [PAD, PAD+L)).
        raw1 = conv_taps(w1_ref, x_ref, PAD, Cin)
        z_sc[:, pl.ds(PAD, BS)] = jnp.where(valid, bn_swish(raw1, a1_ref, c1_ref), 0.0)

        # conv2 / conv3: F.pad(., (K-1, 0)) is absorbed into the read base PAD-(K-1).
        raw2 = conv_taps(w2_ref, z_sc, PAD - (K - 1), H)
        z_sc[:, pl.ds(PAD, BS)] = jnp.where(valid, bn_swish(raw2, a2_ref, c2_ref), 0.0)

        raw3 = conv_taps(w3_ref, z_sc, PAD - (K - 1), H)
        z_sc[:, pl.ds(PAD, BS)] = jnp.where(
            valid, bn_swish(raw1 + raw3, a3_ref, c3_ref), 0.0)     # skip connection

        # MaxPool1d(2) on the left-padded sequence: neighbour max of two shifted
        # windows.  The even-column selection is pre-folded into wih_fold.
        m = jnp.maximum(z_sc[:, pl.ds(PAD - (K - 1), BS)],
                        z_sc[:, pl.ds(PAD - (K - 1) + 1, BS)])     # (T, BS)

        # --------------------- LSTM (batch folded into lanes) ---------------------
        # Hoisted input projection with the pool selection folded in: one matmul.
        gx_sc[...] = DOT(m, wihf_ref[...])                         # (T, 4*BH)
        whh = whh_ref[...]                                         # (BH, 4*BH)
        bias = bl_ref[...]                                         # (1, 4*BH)
        h = jnp.zeros((1, BH), f32)
        c = jnp.zeros((1, BH), f32)
        # Fully unrolled recurrence; h/c stay in vregs (no VMEM round trip).
        # TODO(synk): pltpu.matmul_push_rhs/acc_lhs/pop could keep Whh staged in the
        # MXU across all T steps; jnp.dot kept here for portability.
        for t in range(T):
            gates = gx_sc[pl.ds(t, 1), :] + DOT(h, whh) + bias     # (1,4*BH) [i|f|g|o]
            i_g = jax.nn.sigmoid(gates[:, 0:BH])
            f_g = jax.nn.sigmoid(gates[:, BH:2 * BH])
            g_g = jnp.tanh(gates[:, 2 * BH:3 * BH])
            o_g = jax.nn.sigmoid(gates[:, 3 * BH:4 * BH])
            c = f_g * c + i_g * g_g
            h = o_g * jnp.tanh(c)
            xo_sc[pl.ds(t, 1), :] = h                              # x_out row t

        # ------------------------ attention + fc + softmax ------------------------
        # TODO(synk): Dropout(p=0.3) on x_out is identity in eval mode (no RNG here).
        # hid_states[-1] of nn.LSTM is the cell state c_n -> attention query.
        attn = jnp.tanh(DOT(c, wat_ref[...]))                      # (1, BH)
        # ctx[b] = attn[b] @ x_out[b] (contracts the seq axis; valid because T == H).
        ctx = jnp.concatenate(
            [DOT(attn[:, b * H:(b + 1) * H], xo_sc[:, b * H:(b + 1) * H])
             for b in range(B)], axis=0)                           # (B, H)
        logits = DOT(ctx, wfc_ref[...]) + bfc_ref[...]             # (B, n_classes)
        mx = jnp.max(logits, axis=-1, keepdims=True)
        e = jnp.exp(logits - mx)
        out_ref[...] = e / jnp.sum(e, axis=-1, keepdims=True)      # exact softmax

    return kernel


# ----------------------------------------------------------------------------
# Forward wrapper: one fused pallas_call, everything lives in VMEM.
# ----------------------------------------------------------------------------
@jax.jit
def rnn_attention_forward(x, dp):
    B, Cin, L = x.shape
    H = dp["a1"].shape[0]
    K = dp["w1m"].shape[1] // Cin
    C = dp["wfc_t"].shape[1]
    S = LANE
    T, BH = H, B * H

    # Lane-align each batch's sequence to a 128-lane stride and add one 128-lane zero
    # block on either side so the in-kernel windowed conv reads (offsets
    # PAD-(K-1) .. PAD+K-1) always stay in bounds and read exact zeros where
    # valid-conv / F.pad semantics require them.  (Layout plumbing outside the kernel.)
    xs = jnp.pad(x, ((0, 0), (0, 0), (0, S - L)))             # (B, Cin, S)
    xs = jnp.transpose(xs, (1, 0, 2)).reshape(Cin, B * S)     # (Cin, B*S)
    xs = jnp.pad(xs, ((0, 0), (S, S)))                        # (Cin, S + B*S + S)

    kernel = _make_kernel(B=B, Cin=Cin, L=L, K=K, H=H)
    # The whole model fits in VMEM -> single grid point, whole-array default blocks.
    # TODO(synk): for large serving batches, add a leading batch grid axis with
    # dimension_semantics=("parallel",) to light up the second TensorCore on v7x.
    return pl.pallas_call(
        kernel,
        out_shape=jax.ShapeDtypeStruct((B, C), jnp.float32),
        scratch_shapes=[
            pltpu.VMEM((H, S + B * S + S), jnp.float32),   # padded activation slab
            pltpu.VMEM((T, 4 * BH), jnp.float32),          # hoisted LSTM input proj
            pltpu.VMEM((T, BH), jnp.float32),              # LSTM outputs, time-major
        ],
    )(xs, dp["w1m"], dp["a1"], dp["c1"], dp["w2m"], dp["a2"], dp["c2"],
      dp["w3m"], dp["a3"], dp["c3"],
      dp["wih_fold"], dp["whh_blk"], dp["bias_blk"],
      dp["wattn_blk"], dp["wfc_t"], dp["bfc"])


# ----------------------------------------------------------------------------
# One-time parameter layout prep (outside the per-call path)
# ----------------------------------------------------------------------------
def prepare_params(p, batch, length):
    H, Cin, K = p["conv1_w"].shape
    B, L, S = batch, length, LANE
    F = L // 2
    BH = B * H
    dp = {}
    # conv weights in matmul layout: Wm[h, k*C + c] = w[h, c, k]
    dp["w1m"] = jnp.transpose(p["conv1_w"], (0, 2, 1)).reshape(H, K * Cin)
    dp["w2m"] = jnp.transpose(p["conv2_w"], (0, 2, 1)).reshape(H, K * H)
    dp["w3m"] = jnp.transpose(p["conv3_w"], (0, 2, 1)).reshape(H, K * H)
    # eval-mode BN + conv bias folded to per-channel scale/shift (skip folds b1+b3)
    dp["a1"], dp["c1"] = p["s1"], p["s1"] * p["conv1_b"][:, None] + p["t1"]
    dp["a2"], dp["c2"] = p["s2"], p["s2"] * p["conv2_b"][:, None] + p["t2"]
    dp["a3"] = p["s3"]
    dp["c3"] = p["s3"] * (p["conv1_b"] + p["conv3_b"])[:, None] + p["t3"]
    # LSTM weights with batch folded into the lane axis (block-diagonal),
    # gate-major column layout [ i(B*H) | f(B*H) | g(B*H) | o(B*H) ].
    eye_b = jnp.eye(B, dtype=jnp.float32)
    w_ih_r = p["w_ih"].reshape(4, H, F)
    w_hh_r = p["w_hh"].reshape(4, H, H)
    wih_blk = jnp.einsum("ghf,bc->bfgch", w_ih_r, eye_b).reshape(B * F, 4 * BH)
    # Fold the MaxPool even-column selection into the input projection:
    # row (b*S + 2*j) of wih_fold <- row (b*F + j) of wih_blk, all other rows zero.
    src = jnp.arange(B * F)
    dst = (src // F) * S + 2 * (src % F)
    dp["wih_fold"] = jnp.zeros((B * S, 4 * BH), jnp.float32).at[dst].set(wih_blk)
    dp["whh_blk"] = jnp.einsum("ghj,bc->bjgch", w_hh_r, eye_b).reshape(BH, 4 * BH)
    bias = (p["b_ih"] + p["b_hh"]).reshape(4, 1, H)
    dp["bias_blk"] = jnp.broadcast_to(bias, (4, B, H)).reshape(1, 4 * BH)
    # attention linear (no bias), block-diagonal so all batches go in one matmul
    dp["wattn_blk"] = jnp.einsum("oh,bc->bhco", p["w_attn"], eye_b).reshape(BH, BH)
    dp["wfc_t"] = p["w_fc"].T
    dp["bfc"] = p["b_fc"][None, :]
    return dp


# ----------------------------------------------------------------------------
# Deterministic parameter init (shapes mirror the torch module, eval mode)
# ----------------------------------------------------------------------------
def init_params(key, c_in=4, hid=32, n_classes=4, k=4, lstm_in=35):
    ks = jax.random.split(key, 16)

    def u(k_, shape, fan):
        s = (1.0 / fan) ** 0.5
        return jax.random.uniform(k_, shape, jnp.float32, -s, s)

    p = {}
    p["conv1_w"] = u(ks[0], (hid, c_in, k), c_in * k)
    p["conv1_b"] = u(ks[1], (hid,), c_in * k)
    p["conv2_w"] = u(ks[2], (hid, hid, k), hid * k)
    p["conv2_b"] = u(ks[3], (hid,), hid * k)
    p["conv3_w"] = u(ks[4], (hid, hid, k), hid * k)
    p["conv3_b"] = u(ks[5], (hid,), hid * k)
    # BatchNorm1d eval: running_mean=0, running_var=1 folded to scale/shift
    for i, kk in zip((1, 2, 3), (ks[6], ks[7], ks[8])):
        gamma = jax.random.uniform(kk, (hid, 1), jnp.float32, 0.5, 1.5)
        beta = jax.random.uniform(jax.random.fold_in(kk, 1), (hid, 1),
                                  jnp.float32, -0.1, 0.1)
        p[f"s{i}"] = gamma / jnp.sqrt(1.0 + 1e-5)
        p[f"t{i}"] = beta
    # LSTM (PyTorch layout: (4H, in), gate order i,f,g,o)
    p["w_ih"] = u(ks[9], (4 * hid, lstm_in), hid)
    p["w_hh"] = u(ks[10], (4 * hid, hid), hid)
    p["b_ih"] = u(ks[11], (4 * hid,), hid)
    p["b_hh"] = u(ks[12], (4 * hid,), hid)
    # attention linear (no bias) + final fc
    p["w_attn"] = u(ks[13], (hid, hid), hid)
    p["w_fc"] = u(ks[14], (n_classes, hid), hid)
    p["b_fc"] = u(ks[15], (n_classes,), hid)
    return p


# ----------------------------------------------------------------------------
# Pure-JAX reference of the torch forward (eval mode), explicit f32 precision
# ----------------------------------------------------------------------------
@jax.jit
def reference_forward(x, p):
    HI = jax.lax.Precision.HIGHEST
    K = p["conv1_w"].shape[-1]

    def conv1d(inp, w, b):
        out = jax.lax.conv_general_dilated(
            inp, w, window_strides=(1,), padding="VALID",
            dimension_numbers=("NCH", "OIH", "NCH"), precision=HI)
        return out + b[None, :, None]

    def bn_swish(v, s, t):
        v = v * s[None] + t[None]
        return v * jax.nn.sigmoid(v)

    pad = lambda v: jnp.pad(v, ((0, 0), (0, 0), (K - 1, 0)))

    conv1 = conv1d(x, p["conv1_w"], p["conv1_b"])
    z = pad(bn_swish(conv1, p["s1"], p["t1"]))
    z = pad(bn_swish(conv1d(z, p["conv2_w"], p["conv2_b"]), p["s2"], p["t2"]))
    conv3 = conv1d(z, p["conv3_w"], p["conv3_b"])
    z = pad(bn_swish(conv1 + conv3, p["s3"], p["t3"]))
    Bz, Hz, Lz = z.shape
    feat = jnp.max(z.reshape(Bz, Hz, Lz // 2, 2), axis=-1)      # MaxPool1d(2)

    hdim = p["w_hh"].shape[1]

    def step(carry, x_t):
        h, c = carry
        gates = (jnp.dot(x_t, p["w_ih"].T, precision=HI)
                 + jnp.dot(h, p["w_hh"].T, precision=HI)
                 + p["b_ih"] + p["b_hh"])
        i, f, g, o = jnp.split(gates, 4, axis=-1)
        c = jax.nn.sigmoid(f) * c + jax.nn.sigmoid(i) * jnp.tanh(g)
        h = jax.nn.sigmoid(o) * jnp.tanh(c)
        return (h, c), h

    h0 = jnp.zeros((Bz, hdim), jnp.float32)
    (_, c_n), hs = jax.lax.scan(step, (h0, h0), jnp.swapaxes(feat, 0, 1))
    x_out = jnp.swapaxes(hs, 0, 1)                              # (B, T, H)

    attn = jnp.tanh(jnp.dot(c_n, p["w_attn"].T, precision=HI))  # (B, H)
    ctx = jnp.einsum("bt,bth->bh", attn, x_out, precision=HI)   # bmm (T == H)
    logits = jnp.dot(ctx, p["w_fc"].T, precision=HI) + p["b_fc"]
    return jax.nn.softmax(logits, axis=-1)


if __name__ == "__main__":
    key = jax.random.PRNGKey(0)
    kx, kp = jax.random.split(key)
    # L=70 so that L//2 == 35 == the LSTM input_size hardcoded in the torch model.
    B, C_IN, L, HID, N_CLASSES, KSIZE = 2, 4, 70, 32, 4, 4
    params = init_params(kp, c_in=C_IN, hid=HID, n_classes=N_CLASSES,
                         k=KSIZE, lstm_in=L // 2)
    x = jax.random.normal(kx, (B, C_IN, L), jnp.float32)

    dev_params = prepare_params(params, batch=B, length=L)
    out = jax.block_until_ready(rnn_attention_forward(x, dev_params))

    ref = reference_forward(x, params)

    assert out.shape == (B, N_CLASSES)
    assert bool(jnp.all(jnp.isfinite(out)))
    # exact softmax divide -> rows sum to 1 tightly
    assert bool(jnp.allclose(jnp.sum(out, axis=-1), 1.0, atol=1e-5))
    # kernel uses DEFAULT-precision (bf16-pass, f32-accumulate) matmuls vs the
    # HIGHEST-precision f32 reference -> 1e-2 slack is ample at these scales
    assert bool(jnp.allclose(out, ref, atol=1e-2)), (out, ref)
    print("KERNEL_OK")
</pallas_src>

<mosaic_0001>
module attributes {stable_mosaic.version = 11 : i64} {
  func.func @kernel(%arg0: memref<4x512xf32, #tpu.memory_space<vmem>>, %arg1: memref<32x16xf32, #tpu.memory_space<vmem>>, %arg2: memref<32x1xf32, #tpu.memory_space<vmem>>, %arg3: memref<32x1xf32, #tpu.memory_space<vmem>>, %arg4: memref<32x128xf32, #tpu.memory_space<vmem>>, %arg5: memref<32x1xf32, #tpu.memory_space<vmem>>, %arg6: memref<32x1xf32, #tpu.memory_space<vmem>>, %arg7: memref<32x128xf32, #tpu.memory_space<vmem>>, %arg8: memref<32x1xf32, #tpu.memory_space<vmem>>, %arg9: memref<32x1xf32, #tpu.memory_space<vmem>>, %arg10: memref<256x256xf32, #tpu.memory_space<vmem>>, %arg11: memref<64x256xf32, #tpu.memory_space<vmem>>, %arg12: memref<1x256xf32, #tpu.memory_space<vmem>>, %arg13: memref<64x64xf32, #tpu.memory_space<vmem>>, %arg14: memref<32x4xf32, #tpu.memory_space<vmem>>, %arg15: memref<1x4xf32, #tpu.memory_space<vmem>>, %arg16: memref<2x4xf32, #tpu.memory_space<vmem>>, %arg17: memref<32x512xf32, #tpu.memory_space<vmem>>, %arg18: memref<32x256xf32, #tpu.memory_space<vmem>>, %arg19: memref<32x64xf32, #tpu.memory_space<vmem>>) attributes {dimension_semantics = [], scalar_prefetch = 0 : i64, scratch_operands = 3 : i64, tpu.core_type = #tpu.core_type<tc>} {
    %0 = tpu.iota {dimensions = array<i32: 1>} : vector<32x256xi32>
    %c127_i32 = arith.constant 127 : i32
    %1 = vector.broadcast %c127_i32 : i32 to vector<32x256xi32>
    %2 = arith.andi %0, %1 : vector<32x256xi32>
    %c67_i32 = arith.constant 67 : i32
    %3 = vector.broadcast %c67_i32 : i32 to vector<32x256xi32>
    %4 = arith.cmpi slt, %2, %3 : vector<32x256xi32>
    %cst = arith.constant 0.000000e+00 : f32
    %5 = vector.broadcast %cst : f32 to vector<32x512xf32>
    %c0 = arith.constant 0 : index
    %c0_0 = arith.constant 0 : index
    %6 = vector.load %arg17[%c0, %c0_0] : memref<32x512xf32, #tpu.memory_space<vmem>>, vector<32x512xf32>
    tpu.vector_store %arg17[%c0, %c0_0], %5 {strides = array<i32>} : memref<32x512xf32, #tpu.memory_space<vmem>>, vector<32x512xf32>,
    %c0_1 = arith.constant 0 : index
    %c0_2 = arith.constant 0 : index
    %7 = vector.load %arg1[%c0_1, %c0_2] : memref<32x16xf32, #tpu.memory_space<vmem>>, vector<32x4xf32>
    %c0_3 = arith.constant 0 : index
    %c128 = arith.constant 128 : index
    %8 = vector.load %arg0[%c0_3, %c128] : memref<4x512xf32, #tpu.memory_space<vmem>>, vector<4x256xf32>
    %cst_4 = arith.constant dense<0.000000e+00> : vector<32x256xf32>
    %9 = tpu.matmul %7, %8, %cst_4 {dimension_numbers = #tpu.dot_dimension_numbers<[1], [0], [0], [1], [0, 0, 1, 1], [], []>} : vector<32x4xf32>, vector<4x256xf32>, vector<32x256xf32> -> vector<32x256xf32>
    %c0_5 = arith.constant 0 : index
    %c4 = arith.constant 4 : index
    %10 = vector.load %arg1[%c0_5, %c4] : memref<32x16xf32, #tpu.memory_space<vmem>>, vector<32x4xf32>
    %c0_6 = arith.constant 0 : index
    %c129 = arith.constant 129 : index
    %11 = vector.load %arg0[%c0_6, %c129] : memref<4x512xf32, #tpu.memory_space<vmem>>, vector<4x256xf32>
    %cst_7 = arith.constant dense<0.000000e+00> : vector<32x256xf32>
    %12 = tpu.matmul %10, %11, %cst_7 {dimension_numbers = #tpu.dot_dimension_numbers<[1], [0], [0], [1], [0, 0, 1, 1], [], []>} : vector<32x4xf32>, vector<4x256xf32>, vector<32x256xf32> -> vector<32x256xf32>
    %13 = arith.addf %9, %12 : vector<32x256xf32>
    %c0_8 = arith.constant 0 : index
    %c8 = arith.constant 8 : index
    %14 = vector.load %arg1[%c0_8, %c8] : memref<32x16xf32, #tpu.memory_space<vmem>>, vector<32x4xf32>
    %c0_9 = arith.constant 0 : index
    %c130 = arith.constant 130 : index
    %15 = vector.load %arg0[%c0_9, %c130] : memref<4x512xf32, #tpu.memory_space<vmem>>, vector<4x256xf32>
    %cst_10 = arith.constant dense<0.000000e+00> : vector<32x256xf32>
    %16 = tpu.matmul %14, %15, %cst_10 {dimension_numbers = #tpu.dot_dimension_numbers<[1], [0], [0], [1], [0, 0, 1, 1], [], []>} : vector<32x4xf32>, vector<4x256xf32>, vector<32x256xf32> -> vector<32x256xf32>
    %17 = arith.addf %13, %16 : vector<32x256xf32>
    %c0_11 = arith.constant 0 : index
    %c12 = arith.constant 12 : index
    %18 = vector.load %arg1[%c0_11, %c12] : memref<32x16xf32, #tpu.memory_space<vmem>>, vector<32x4xf32>
    %c0_12 = arith.constant 0 : index
    %c131 = arith.constant 131 : index
    %19 = vector.load %arg0[%c0_12, %c131] : memref<4x512xf32, #tpu.memory_space<vmem>>, vector<4x256xf32>
    %cst_13 = arith.constant dense<0.000000e+00> : vector<32x256xf32>
    %20 = tpu.matmul %18, %19, %cst_13 {dimension_numbers = #tpu.dot_dimension_numbers<[1], [0], [0], [1], [0, 0, 1, 1], [], []>} : vector<32x4xf32>, vector<4x256xf32>, vector<32x256xf32> -> vector<32x256xf32>
    %21 = arith.addf %17, %20 : vector<32x256xf32>
    %c0_14 = arith.constant 0 : index
    %c0_15 = arith.constant 0 : index
    %22 = vector.load %arg2[%c0_14, %c0_15] : memref<32x1xf32, #tpu.memory_space<vmem>>, vector<32x1xf32>
    %23 = vector.broadcast %22 : vector<32x1xf32> to vector<32x256xf32>
    %24 = arith.mulf %21, %23 : vector<32x256xf32>
    %c0_16 = arith.constant 0 : index
    %c0_17 = arith.constant 0 : index
    %25 = vector.load %arg3[%c0_16, %c0_17] : memref<32x1xf32, #tpu.memory_space<vmem>>, vector<32x1xf32>
    %26 = vector.broadcast %25 : vector<32x1xf32> to vector<32x256xf32>
    %27 = arith.addf %24, %26 : vector<32x256xf32>
    %28 = arith.negf %27 : vector<32x256xf32>
    %29 = math.exp %28 : vector<32x256xf32>
    %cst_18 = arith.constant 1.000000e+00 : f32
    %30 = vector.broadcast %cst_18 : f32 to vector<32x256xf32>
    %31 = arith.addf %30, %29 : vector<32x256xf32>
    %32 = arith.divf %30, %31 : vector<32x256xf32>
    %33 = arith.mulf %27, %32 : vector<32x256xf32>
    %cst_19 = arith.constant 0.000000e+00 : f32
    %34 = vector.broadcast %cst_19 : f32 to vector<32x256xf32>
    %35 = arith.select %4, %33, %34 : vector<32x256xi1>, vector<32x256xf32>
    %c0_20 = arith.constant 0 : index
    %c128_21 = arith.constant 128 : index
    %36 = vector.load %arg17[%c0_20, %c128_21] : memref<32x512xf32, #tpu.memory_space<vmem>>, vector<32x256xf32>
    tpu.vector_store %arg17[%c0_20, %c128_21], %35 {strides = array<i32>} : memref<32x512xf32, #tpu.memory_space<vmem>>, vector<32x256xf32>,
    %c0_22 = arith.constant 0 : index
    %c0_23 = arith.constant 0 : index
    %37 = vector.load %arg4[%c0_22, %c0_23] : memref<32x128xf32, #tpu.memory_space<vmem>>, vector<32x32xf32>
    %c0_24 = arith.constant 0 : index
    %c125 = arith.constant 125 : index
    %38 = vector.load %arg17[%c0_24, %c125] : memref<32x512xf32, #tpu.memory_space<vmem>>, vector<32x256xf32>
    %cst_25 = arith.constant dense<0.000000e+00> : vector<32x256xf32>
    %39 = tpu.matmul %37, %38, %cst_25 {dimension_numbers = #tpu.dot_dimension_numbers<[1], [0], [0], [1], [0, 0, 1, 1], [], []>} : vector<32x32xf32>, vector<32x256xf32>, vector<32x256xf32> -> vector<32x256xf32>
    %c0_26 = arith.constant 0 : index
    %c32 = arith.constant 32 : index
    %40 = vector.load %arg4[%c0_26, %c32] : memref<32x128xf32, #tpu.memory_space<vmem>>, vector<32x32xf32>
    %c0_27 = arith.constant 0 : index
    %c126 = arith.constant 126 : index
    %41 = vector.load %arg17[%c0_27, %c126] : memref<32x512xf32, #tpu.memory_space<vmem>>, vector<32x256xf32>
    %cst_28 = arith.constant dense<0.000000e+00> : vector<32x256xf32>
    %42 = tpu.matmul %40, %41, %cst_28 {dimension_numbers = #tpu.dot_dimension_numbers<[1], [0], [0], [1], [0, 0, 1, 1], [], []>} : vector<32x32xf32>, vector<32x256xf32>, vector<32x256xf32> -> vector<32x256xf32>
    %43 = arith.addf %39, %42 : vector<32x256xf32>
    %c0_29 = arith.constant 0 : index
    %c64 = arith.constant 64 : index
    %44 = vector.load %arg4[%c0_29, %c64] : memref<32x128xf32, #tpu.memory_space<vmem>>, vector<32x32xf32>
    %c0_30 = arith.constant 0 : index
    %c127 = arith.constant 127 : index
    %45 = vector.load %arg17[%c0_30, %c127] : memref<32x512xf32, #tpu.memory_space<vmem>>, vector<32x256xf32>
    %cst_31 = arith.constant dense<0.000000e+00> : vector<32x256xf32>
    %46 = tpu.matmul %44, %45, %cst_31 {dimension_numbers = #tpu.dot_dimension_numbers<[1], [0], [0], [1], [0, 0, 1, 1], [], []>} : vector<32x32xf32>, vector<32x256xf32>, vector<32x256xf32> -> vector<32x256xf32>
    %47 = arith.addf %43, %46 : vector<32x256xf32>
    %c0_32 = arith.constant 0 : index
    %c96 = arith.constant 96 : index
    %48 = vector.load %arg4[%c0_32, %c96] : memref<32x128xf32, #tpu.memory_space<vmem>>, vector<32x32xf32>
    %c0_33 = arith.constant 0 : index
    %c128_34 = arith.constant 128 : index
    %49 = vector.load %arg17[%c0_33, %c128_34] : memref<32x512xf32, #tpu.memory_space<vmem>>, vector<32x256xf32>
    %cst_35 = arith.constant dense<0.000000e+00> : vector<32x256xf32>
    %50 = tpu.matmul %48, %49, %cst_35 {dimension_numbers = #tpu.dot_dimension_numbers<[1], [0], [0], [1], [0, 0, 1, 1], [], []>} : vector<32x32xf32>, vector<32x256xf32>, vector<32x256xf32> -> vector<32x256xf32>
    %51 = arith.addf %47, %50 : vector<32x256xf32>
    %c0_36 = arith.constant 0 : index
    %c0_37 = arith.constant 0 : index
    %52 = vector.load %arg5[%c0_36, %c0_37] : memref<32x1xf32, #tpu.memory_space<vmem>>, vector<32x1xf32>
    %53 = vector.broadcast %52 : vector<32x1xf32> to vector<32x256xf32>
    %54 = arith.mulf %51, %53 : vector<32x256xf32>
    %c0_38 = arith.constant 0 : index
    %c0_39 = arith.constant 0 : index
    %55 = vector.load %arg6[%c0_38, %c0_39] : memref<32x1xf32, #tpu.memory_space<vmem>>, vector<32x1xf32>
    %56 = vector.broadcast %55 : vector<32x1xf32> to vector<32x256xf32>
    %57 = arith.addf %54, %56 : vector<32x256xf32>
    %58 = arith.negf %57 : vector<32x256xf32>
    %59 = math.exp %58 : vector<32x256xf32>
    %cst_40 = arith.constant 1.000000e+00 : f32
    %60 = vector.broadcast %cst_40 : f32 to vector<32x256xf32>
    %61 = arith.addf %60, %59 : vector<32x256xf32>
    %62 = arith.divf %60, %61 : vector<32x256xf32>
    %63 = arith.mulf %57, %62 : vector<32x256xf32>
    %cst_41 = arith.constant 0.000000e+00 : f32
    %64 = vector.broadcast %cst_41 : f32 to vector<32x256xf32>
    %65 = arith.select %4, %63, %64 : vector<32x256xi1>, vector<32x256xf32>
    %c0_42 = arith.constant 0 : index
    %c128_43 = arith.constant 128 : index
    %66 = vector.load %arg17[%c0_42, %c128_43] : memref<32x512xf32, #tpu.memory_space<vmem>>, vector<32x256xf32>
    tpu.vector_store %arg17[%c0_42, %c128_43], %65 {strides = array<i32>} : memref<32x512xf32, #tpu.memory_space<vmem>>, vector<32x256xf32>,
    %c0_44 = arith.constant 0 : index
    %c0_45 = arith.constant 0 : index
    %67 = vector.load %arg7[%c0_44, %c0_45] : memref<32x128xf32, #tpu.memory_space<vmem>>, vector<32x32xf32>
    %c0_46 = arith.constant 0 : index
    %c125_47 = arith.constant 125 : index
    %68 = vector.load %arg17[%c0_46, %c125_47] : memref<32x512xf32, #tpu.memory_space<vmem>>, vector<32x256xf32>
    %cst_48 = arith.constant dense<0.000000e+00> : vector<32x256xf32>
    %69 = tpu.matmul %67, %68, %cst_48 {dimension_numbers = #tpu.dot_dimension_numbers<[1], [0], [0], [1], [0, 0, 1, 1], [], []>} : vector<32x32xf32>, vector<32x256xf32>, vector<32x256xf32> -> vector<32x256xf32>
    %c0_49 = arith.constant 0 : index
    %c32_50 = arith.constant 32 : index
    %70 = vector.load %arg7[%c0_49, %c32_50] : memref<32x128xf32, #tpu.memory_space<vmem>>, vector<32x32xf32>
    %c0_51 = arith.constant 0 : index
    %c126_52 = arith.constant 126 : index
    %71 = vector.load %arg17[%c0_51, %c126_52] : memref<32x512xf32, #tpu.memory_space<vmem>>, vector<32x256xf32>
    %cst_53 = arith.constant dense<0.000000e+00> : vector<32x256xf32>
    %72 = tpu.matmul %70, %71, %cst_53 {dimension_numbers = #tpu.dot_dimension_numbers<[1], [0], [0], [1], [0, 0, 1, 1], [], []>} : vector<32x32xf32>, vector<32x256xf32>, vector<32x256xf32> -> vector<32x256xf32>
    %73 = arith.addf %69, %72 : vector<32x256xf32>
    %c0_54 = arith.constant 0 : index
    %c64_55 = arith.constant 64 : index
    %74 = vector.load %arg7[%c0_54, %c64_55] : memref<32x128xf32, #tpu.memory_space<vmem>>, vector<32x32xf32>
    %c0_56 = arith.constant 0 : index
    %c127_57 = arith.constant 127 : index
    %75 = vector.load %arg17[%c0_56, %c127_57] : memref<32x512xf32, #tpu.memory_space<vmem>>, vector<32x256xf32>
    %cst_58 = arith.constant dense<0.000000e+00> : vector<32x256xf32>
    %76 = tpu.matmul %74, %75, %cst_58 {dimension_numbers = #tpu.dot_dimension_numbers<[1], [0], [0], [1], [0, 0, 1, 1], [], []>} : vector<32x32xf32>, vector<32x256xf32>, vector<32x256xf32> -> vector<32x256xf32>
    %77 = arith.addf %73, %76 : vector<32x256xf32>
    %c0_59 = arith.constant 0 : index
    %c96_60 = arith.constant 96 : index
    %78 = vector.load %arg7[%c0_59, %c96_60] : memref<32x128xf32, #tpu.memory_space<vmem>>, vector<32x32xf32>
    %c0_61 = arith.constant 0 : index
    %c128_62 = arith.constant 128 : index
    %79 = vector.load %arg17[%c0_61, %c128_62] : memref<32x512xf32, #tpu.memory_space<vmem>>, vector<32x256xf32>
    %cst_63 = arith.constant dense<0.000000e+00> : vector<32x256xf32>
    %80 = tpu.matmul %78, %79, %cst_63 {dimension_numbers = #tpu.dot_dimension_numbers<[1], [0], [0], [1], [0, 0, 1, 1], [], []>} : vector<32x32xf32>, vector<32x256xf32>, vector<32x256xf32> -> vector<32x256xf32>
    %81 = arith.addf %77, %80 : vector<32x256xf32>
    %82 = arith.addf %21, %81 : vector<32x256xf32>
    %c0_64 = arith.constant 0 : index
    %c0_65 = arith.constant 0 : index
    %83 = vector.load %arg8[%c0_64, %c0_65] : memref<32x1xf32, #tpu.memory_space<vmem>>, vector<32x1xf32>
    %84 = vector.broadcast %83 : vector<32x1xf32> to vector<32x256xf32>
    %85 = arith.mulf %82, %84 : vector<32x256xf32>
    %c0_66 = arith.constant 0 : index
    %c0_67 = arith.constant 0 : index
    %86 = vector.load %arg9[%c0_66, %c0_67] : memref<32x1xf32, #tpu.memory_space<vmem>>, vector<32x1xf32>
    %87 = vector.broadcast %86 : vector<32x1xf32> to vector<32x256xf32>
    %88 = arith.addf %85, %87 : vector<32x256xf32>
    %89 = arith.negf %88 : vector<32x256xf32>
    %90 = math.exp %89 : vector<32x256xf32>
    %cst_68 = arith.constant 1.000000e+00 : f32
    %91 = vector.broadcast %cst_68 : f32 to vector<32x256xf32>
    %92 = arith.addf %91, %90 : vector<32x256xf32>
    %93 = arith.divf %91, %92 : vector<32x256xf32>
    %94 = arith.mulf %88, %93 : vector<32x256xf32>
    %cst_69 = arith.constant 0.000000e+00 : f32
    %95 = vector.broadcast %cst_69 : f32 to vector<32x256xf32>
    %96 = arith.select %4, %94, %95 : vector<32x256xi1>, vector<32x256xf32>
    %c0_70 = arith.constant 0 : index
    %c128_71 = arith.constant 128 : index
    %97 = vector.load %arg17[%c0_70, %c128_71] : memref<32x512xf32, #tpu.memory_space<vmem>>, vector<32x256xf32>
    tpu.vector_store %arg17[%c0_70, %c128_71], %96 {strides = array<i32>} : memref<32x512xf32, #tpu.memory_space<vmem>>, vector<32x256xf32>,
    %c0_72 = arith.constant 0 : index
    %c125_73 = arith.constant 125 : index
    %98 = vector.load %arg17[%c0_72, %c125_73] : memref<32x512xf32, #tpu.memory_space<vmem>>, vector<32x256xf32>
    %c0_74 = arith.constant 0 : index
    %c126_75 = arith.constant 126 : index
    %99 = vector.load %arg17[%c0_74, %c126_75] : memref<32x512xf32, #tpu.memory_space<vmem>>, vector<32x256xf32>
    %100 = arith.maximumf %98, %99 : vector<32x256xf32>
    %c0_76 = arith.constant 0 : index
    %c0_77 = arith.constant 0 : index
    %101 = vector.load %arg10[%c0_76, %c0_77] : memref<256x256xf32, #tpu.memory_space<vmem>>, vector<256x256xf32>
    %cst_78 = arith.constant dense<0.000000e+00> : vector<32x256xf32>
    %102 = tpu.matmul %100, %101, %cst_78 {dimension_numbers = #tpu.dot_dimension_numbers<[1], [0], [0], [1], [0, 0, 1, 1], [], []>} : vector<32x256xf32>, vector<256x256xf32>, vector<32x256xf32> -> vector<32x256xf32>
    %c0_79 = arith.constant 0 : index
    %c0_80 = arith.constant 0 : index
    %103 = vector.load %arg18[%c0_79, %c0_80] : memref<32x256xf32, #tpu.memory_space<vmem>>, vector<32x256xf32>
    tpu.vector_store %arg18[%c0_79, %c0_80], %102 {strides = array<i32>} : memref<32x256xf32, #tpu.memory_space<vmem>>, vector<32x256xf32>,
    %c0_81 = arith.constant 0 : index
    %c0_82 = arith.constant 0 : index
    %104 = vector.load %arg11[%c0_81, %c0_82] : memref<64x256xf32, #tpu.memory_space<vmem>>, vector<64x256xf32>
    %c0_83 = arith.constant 0 : index
    %c0_84 = arith.constant 0 : index
    %105 = vector.load %arg12[%c0_83, %c0_84] : memref<1x256xf32, #tpu.memory_space<vmem>>, vector<1x256xf32>
    %cst_85 = arith.constant 0.000000e+00 : f32
    %106 = vector.broadcast %cst_85 : f32 to vector<1x64xf32>
    %cst_86 = arith.constant 0.000000e+00 : f32
    %107 = vector.broadcast %cst_86 : f32 to vector<1x64xf32>
    %c0_87 = arith.constant 0 : index
    %c0_88 = arith.constant 0 : index
    %108 = vector.load %arg18[%c0_87, %c0_88] : memref<32x256xf32, #tpu.memory_space<vmem>>, vector<1x256xf32>
    %cst_89 = arith.constant dense<0.000000e+00> : vector<1x256xf32>
    %109 = tpu.matmul %106, %104, %cst_89 {dimension_numbers = #tpu.dot_dimension_numbers<[1], [0], [0], [1], [0, 0, 1, 1], [], []>} : vector<1x64xf32>, vector<64x256xf32>, vector<1x256xf32> -> vector<1x256xf32>
    %110 = arith.addf %108, %109 : vector<1x256xf32>
    %111 = arith.addf %110, %105 : vector<1x256xf32>
    %112 = vector.extract_strided_slice %111 {offsets = [0, 0], sizes = [1, 64], strides = [1, 1]} : vector<1x256xf32> to vector<1x64xf32>
    %113 = arith.negf %112 : vector<1x64xf32>
    %114 = math.exp %113 : vector<1x64xf32>
    %cst_90 = arith.constant 1.000000e+00 : f32
    %115 = vector.broadcast %cst_90 : f32 to vector<1x64xf32>
    %116 = arith.addf %115, %114 : vector<1x64xf32>
    %117 = arith.divf %115, %116 : vector<1x64xf32>
    %118 = vector.extract_strided_slice %111 {offsets = [0, 64], sizes = [1, 64], strides = [1, 1]} : vector<1x256xf32> to vector<1x64xf32>
    %119 = arith.negf %118 : vector<1x64xf32>
    %120 = math.exp %119 : vector<1x64xf32>
    %cst_91 = arith.constant 1.000000e+00 : f32
    %121 = vector.broadcast %cst_91 : f32 to vector<1x64xf32>
    %122 = arith.addf %121, %120 : vector<1x64xf32>
    %123 = arith.divf %121, %122 : vector<1x64xf32>
    %124 = vector.extract_strided_slice %111 {offsets = [0, 128], sizes = [1, 64], strides = [1, 1]} : vector<1x256xf32> to vector<1x64xf32>
    %125 = math.tanh %124 : vector<1x64xf32>
    %126 = vector.extract_strided_slice %111 {offsets = [0, 192], sizes = [1, 64], strides = [1, 1]} : vector<1x256xf32> to vector<1x64xf32>
    %127 = arith.negf %126 : vector<1x64xf32>
    %128 = math.exp %127 : vector<1x64xf32>
    %cst_92 = arith.constant 1.000000e+00 : f32
    %129 = vector.broadcast %cst_92 : f32 to vector<1x64xf32>
    %130 = arith.addf %129, %128 : vector<1x64xf32>
    %131 = arith.divf %129, %130 : vector<1x64xf32>
    %132 = arith.mulf %123, %107 : vector<1x64xf32>
    %133 = arith.mulf %117, %125 : vector<1x64xf32>
    %134 = arith.addf %132, %133 : vector<1x64xf32>
    %135 = math.tanh %134 : vector<1x64xf32>
    %136 = arith.mulf %131, %135 : vector<1x64xf32>
    %c0_93 = arith.constant 0 : index
    %c0_94 = arith.constant 0 : index
    %137 = vector.load %arg19[%c0_93, %c0_94] : memref<32x64xf32, #tpu.memory_space<vmem>>, vector<1x64xf32>
    tpu.vector_store %arg19[%c0_93, %c0_94], %136 {strides = array<i32>} : memref<32x64xf32, #tpu.memory_space<vmem>>, vector<1x64xf32>,
    %c1 = arith.constant 1 : index
    %c0_95 = arith.constant 0 : index
    %138 = vector.load %arg18[%c1, %c0_95] : memref<32x256xf32, #tpu.memory_space<vmem>>, vector<1x256xf32>
    %cst_96 = arith.constant dense<0.000000e+00> : vector<1x256xf32>
    %139 = tpu.matmul %136, %104, %cst_96 {dimension_numbers = #tpu.dot_dimension_numbers<[1], [0], [0], [1], [0, 0, 1, 1], [], []>} : vector<1x64xf32>, vector<64x256xf32>, vector<1x256xf32> -> vector<1x256xf32>
    %140 = arith.addf %138, %139 : vector<1x256xf32>
    %141 = arith.addf %140, %105 : vector<1x256xf32>
    %142 = vector.extract_strided_slice %141 {offsets = [0, 0], sizes = [1, 64], strides = [1, 1]} : vector<1x256xf32> to vector<1x64xf32>
    %143 = arith.negf %142 : vector<1x64xf32>
    %144 = math.exp %143 : vector<1x64xf32>
    %cst_97 = arith.constant 1.000000e+00 : f32
    %145 = vector.broadcast %cst_97 : f32 to vector<1x64xf32>
    %146 = arith.addf %145, %144 : vector<1x64xf32>
    %147 = arith.divf %145, %146 : vector<1x64xf32>
    %148 = vector.extract_strided_slice %141 {offsets = [0, 64], sizes = [1, 64], strides = [1, 1]} : vector<1x256xf32> to vector<1x64xf32>
    %149 = arith.negf %148 : vector<1x64xf32>
    %150 = math.exp %149 : vector<1x64xf32>
    %cst_98 = arith.constant 1.000000e+00 : f32
    %151 = vector.broadcast %cst_98 : f32 to vector<1x64xf32>
    %152 = arith.addf %151, %150 : vector<1x64xf32>
    %153 = arith.divf %151, %152 : vector<1x64xf32>
    %154 = vector.extract_strided_slice %141 {offsets = [0, 128], sizes = [1, 64], strides = [1, 1]} : vector<1x256xf32> to vector<1x64xf32>
    %155 = math.tanh %154 : vector<1x64xf32>
    %156 = vector.extract_strided_slice %141 {offsets = [0, 192], sizes = [1, 64], strides = [1, 1]} : vector<1x256xf32> to vector<1x64xf32>
    %157 = arith.negf %156 : vector<1x64xf32>
    %158 = math.exp %157 : vector<1x64xf32>
    %cst_99 = arith.constant 1.000000e+00 : f32
    %159 = vector.broadcast %cst_99 : f32 to vector<1x64xf32>
    %160 = arith.addf %159, %158 : vector<1x64xf32>
    %161 = arith.divf %159, %160 : vector<1x64xf32>
    %162 = arith.mulf %153, %134 : vector<1x64xf32>
    %163 = arith.mulf %147, %155 : vector<1x64xf32>
    %164 = arith.addf %162, %163 : vector<1x64xf32>
    %165 = math.tanh %164 : vector<1x64xf32>
    %166 = arith.mulf %161, %165 : vector<1x64xf32>
    %c1_100 = arith.constant 1 : index
    %c0_101 = arith.constant 0 : index
    %167 = vector.load %arg19[%c1_100, %c0_101] : memref<32x64xf32, #tpu.memory_space<vmem>>, vector<1x64xf32>
    tpu.vector_store %arg19[%c1_100, %c0_101], %166 {strides = array<i32>} : memref<32x64xf32, #tpu.memory_space<vmem>>, vector<1x64xf32>,
    %c2 = arith.constant 2 : index
    %c0_102 = arith.constant 0 : index
    %168 = vector.load %arg18[%c2, %c0_102] : memref<32x256xf32, #tpu.memory_space<vmem>>, vector<1x256xf32>
    %cst_103 = arith.constant dense<0.000000e+00> : vector<1x256xf32>
    %169 = tpu.matmul %166, %104, %cst_103 {dimension_numbers = #tpu.dot_dimension_numbers<[1], [0], [0], [1], [0, 0, 1, 1], [], []>} : vector<1x64xf32>, vector<64x256xf32>, vector<1x256xf32> -> vector<1x256xf32>
    %170 = arith.addf %168, %169 : vector<1x256xf32>
    %171 = arith.addf %170, %105 : vector<1x256xf32>
    %172 = vector.extract_strided_slice %171 {offsets = [0, 0], sizes = [1, 64], strides = [1, 1]} : vector<1x256xf32> to vector<1x64xf32>
    %173 = arith.negf %172 : vector<1x64xf32>
    %174 = math.exp %173 : vector<1x64xf32>
    %cst_104 = arith.constant 1.000000e+00 : f32
    %175 = vector.broadcast %cst_104 : f32 to vector<1x64xf32>
    %176 = arith.addf %175, %174 : vector<1x64xf32>
    %177 = arith.divf %175, %176 : vector<1x64xf32>
    %178 = vector.extract_strided_slice %171 {offsets = [0, 64], sizes = [1, 64], strides = [1, 1]} : vector<1x256xf32> to vector<1x64xf32>
    %179 = arith.negf %178 : vector<1x64xf32>
    %180 = math.exp %179 : vector<1x64xf32>
    %cst_105 = arith.constant 1.000000e+00 : f32
    %181 = vector.broadcast %cst_105 : f32 to vector<1x64xf32>
    %182 = arith.addf %181, %180 : vector<1x64xf32>
    %183 = arith.divf %181, %182 : vector<1x64xf32>
    %184 = vector.extract_strided_slice %171 {offsets = [0, 128], sizes = [1, 64], strides = [1, 1]} : vector<1x256xf32> to vector<1x64xf32>
    %185 = math.tanh %184 : vector<1x64xf32>
    %186 = vector.extract_strided_slice %171 {offsets = [0, 192], sizes = [1, 64], strides = [1, 1]} : vector<1x256xf32> to vector<1x64xf32>
    %187 = arith.negf %186 : vector<1x64xf32>
    %188 = math.exp %187 : vector<1x64xf32>
    %cst_106 = arith.constant 1.000000e+00 : f32
    %189 = vector.broadcast %cst_106 : f32 to vector<1x64xf32>
    %190 = arith.addf %189, %188 : vector<1x64xf32>
    %191 = arith.divf %189, %190 : vector<1x64xf32>
    %192 = arith.mulf %183, %164 : vector<1x64xf32>
    %193 = arith.mulf %177, %185 : vector<1x64xf32>
    %194 = arith.addf %192, %193 : vector<1x64xf32>
    %195 = math.tanh %194 : vector<1x64xf32>
    %196 = arith.mulf %191, %195 : vector<1x64xf32>
    %c2_107 = arith.constant 2 : index
    %c0_108 = arith.constant 0 : index
    %197 = vector.load %arg19[%c2_107, %c0_108] : memref<32x64xf32, #tpu.memory_space<vmem>>, vector<1x64xf32>
    tpu.vector_store %arg19[%c2_107, %c0_108], %196 {strides = array<i32>} : memref<32x64xf32, #tpu.memory_space<vmem>>, vector<1x64xf32>,
    %c3 = arith.constant 3 : index
    %c0_109 = arith.constant 0 : index
    %198 = vector.load %arg18[%c3, %c0_109] : memref<32x256xf32, #tpu.memory_space<vmem>>, vector<1x256xf32>
    %cst_110 = arith.constant dense<0.000000e+00> : vector<1x256xf32>
    %199 = tpu.matmul %196, %104, %cst_110 {dimension_numbers = #tpu.dot_dimension_numbers<[1], [0], [0], [1], [0, 0, 1, 1], [], []>} : vector<1x64xf32>, vector<64x256xf32>, vector<1x256xf32> -> vector<1x256xf32>
    %200 = arith.addf %198, %199 : vector<1x256xf32>
    %201 = arith.addf %200, %105 : vector<1x256xf32>
    %202 = vector.extract_strided_slice %201 {offsets = [0, 0], sizes = [1, 64], strides = [1, 1]} : vector<1x256xf32> to vector<1x64xf32>
    %203 = arith.negf %202 : vector<1x64xf32>
    %204 = math.exp %203 : vector<1x64xf32>
    %cst_111 = arith.constant 1.000000e+00 : f32
    %205 = vector.broadcast %cst_111 : f32 to vector<1x64xf32>
    %206 = arith.addf %205, %204 : vector<1x64xf32>
    %207 = arith.divf %205, %206 : vector<1x64xf32>
    %208 = vector.extract_strided_slice %201 {offsets = [0, 64], sizes = [1, 64], strides = [1, 1]} : vector<1x256xf32> to vector<1x64xf32>
    %209 = arith.negf %208 : vector<1x64xf32>
    %210 = math.exp %209 : vector<1x64xf32>
    %cst_112 = arith.constant 1.000000e+00 : f32
    %211 = vector.broadcast %cst_112 : f32 to vector<1x64xf32>
    %212 = arith.addf %211, %210 : vector<1x64xf32>
    %213 = arith.divf %211, %212 : vector<1x64xf32>
    %214 = vector.extract_strided_slice %201 {offsets = [0, 128], sizes = [1, 64], strides = [1, 1]} : vector<1x256xf32> to vector<1x64xf32>
    %215 = math.tanh %214 : vector<1x64xf32>
    %216 = vector.extract_strided_slice %201 {offsets = [0, 192], sizes = [1, 64], strides = [1, 1]} : vector<1x256xf32> to vector<1x64xf32>
    %217 = arith.negf %216 : vector<1x64xf32>
    %218 = math.exp %217 : vector<1x64xf32>
    %cst_113 = arith.constant 1.000000e+00 : f32
    %219 = vector.broadcast %cst_113 : f32 to vector<1x64xf32>
    %220 = arith.addf %219, %218 : vector<1x64xf32>
    %221 = arith.divf %219, %220 : vector<1x64xf32>
    %222 = arith.mulf %213, %194 : vector<1x64xf32>
    %223 = arith.mulf %207, %215 : vector<1x64xf32>
    %224 = arith.addf %222, %223 : vector<1x64xf32>
    %225 = math.tanh %224 : vector<1x64xf32>
    %226 = arith.mulf %221, %225 : vector<1x64xf32>
    %c3_114 = arith.constant 3 : index
    %c0_115 = arith.constant 0 : index
    %227 = vector.load %arg19[%c3_114, %c0_115] : memref<32x64xf32, #tpu.memory_space<vmem>>, vector<1x64xf32>
    tpu.vector_store %arg19[%c3_114, %c0_115], %226 {strides = array<i32>} : memref<32x64xf32, #tpu.memory_space<vmem>>, vector<1x64xf32>,
    %c4_116 = arith.constant 4 : index
    %c0_117 = arith.constant 0 : index
    %228 = vector.load %arg18[%c4_116, %c0_117] : memref<32x256xf32, #tpu.memory_space<vmem>>, vector<1x256xf32>
    %cst_118 = arith.constant dense<0.000000e+00> : vector<1x256xf32>
    %229 = tpu.matmul %226, %104, %cst_118 {dimension_numbers = #tpu.dot_dimension_numbers<[1], [0], [0], [1], [0, 0, 1, 1], [], []>} : vector<1x64xf32>, vector<64x256xf32>, vector<1x256xf32> -> vector<1x256xf32>
    %230 = arith.addf %228, %229 : vector<1x256xf32>
    %231 = arith.addf %230, %105 : vector<1x256xf32>
    %232 = vector.extract_strided_slice %231 {offsets = [0, 0], sizes = [1, 64], strides = [1, 1]} : vector<1x256xf32> to vector<1x64xf32>
    %233 = arith.negf %232 : vector<1x64xf32>
    %234 = math.exp %233 : vector<1x64xf32>
    %cst_119 = arith.constant 1.000000e+00 : f32
    %235 = vector.broadcast %cst_119 : f32 to vector<1x64xf32>
    %236 = arith.addf %235, %234 : vector<1x64xf32>
    %237 = arith.divf %235, %236 : vector<1x64xf32>
    %238 = vector.extract_strided_slice %231 {offsets = [0, 64], sizes = [1, 64], strides = [1, 1]} : vector<1x256xf32> to vector<1x64xf32>
    %239 = arith.negf %238 : vector<1x64xf32>
    %240 = math.exp %239 : vector<1x64xf32>
    %cst_120 = arith.constant 1.000000e+00 : f32
    %241 = vector.broadcast %cst_120 : f32 to vector<1x64xf32>
    %242 = arith.addf %241, %240 : vector<1x64xf32>
    %243 = arith.divf %241, %242 : vector<1x64xf32>
    %244 = vector.extract_strided_slice %231 {offsets = [0, 128], sizes = [1, 64], strides = [1, 1]} : vector<1x256xf32> to vector<1x64xf32>
    %245 = math.tanh %244 : vector<1x64xf32>
    %246 = vector.extract_strided_slice %231 {offsets = [0, 192], sizes = [1, 64], strides = [1, 1]} : vector<1x256xf32> to vector<1x64xf32>
    %247 = arith.negf %246 : vector<1x64xf32>
    %248 = math.exp %247 : vector<1x64xf32>
    %cst_121 = arith.constant 1.000000e+00 : f32
    %249 = vector.broadcast %cst_121 : f32 to vector<1x64xf32>
    %250 = arith.addf %249, %248 : vector<1x64xf32>
    %251 = arith.divf %249, %250 : vector<1x64xf32>
    %252 = arith.mulf %243, %224 : vector<1x64xf32>
    %253 = arith.mulf %237, %245 : vector<1x64xf32>
    %254 = arith.addf %252, %253 : vector<1x64xf32>
    %255 = math.tanh %254 : vector<1x64xf32>
    %256 = arith.mulf %251, %255 : vector<1x64xf32>
    %c4_122 = arith.constant 4 : index
    %c0_123 = arith.constant 0 : index
    %257 = vector.load %arg19[%c4_122, %c0_123] : memref<32x64xf32, #tpu.memory_space<vmem>>, vector<1x64xf32>
    tpu.vector_store %arg19[%c4_122, %c0_123], %256 {strides = array<i32>} : memref<32x64xf32, #tpu.memory_space<vmem>>, vector<1x64xf32>,
    %c5 = arith.constant 5 : index
    %c0_124 = arith.constant 0 : index
    %258 = vector.load %arg18[%c5, %c0_124] : memref<32x256xf32, #tpu.memory_space<vmem>>, vector<1x256xf32>
    %cst_125 = arith.constant dense<0.000000e+00> : vector<1x256xf32>
    %259 = tpu.matmul %256, %104, %cst_125 {dimension_numbers = #tpu.dot_dimension_numbers<[1], [0], [0], [1], [0, 0, 1, 1], [], []>} : vector<1x64xf32>, vector<64x256xf32>, vector<1x256xf32> -> vector<1x256xf32>
    %260 = arith.addf %258, %259 : vector<1x256xf32>
    %261 = arith.addf %260, %105 : vector<1x256xf32>
    %262 = vector.extract_strided_slice %261 {offsets = [0, 0], sizes = [1, 64], strides = [1, 1]} : vector<1x256xf32> to vector<1x64xf32>
    %263 = arith.negf %262 : vector<1x64xf32>
    %264 = math.exp %263 : vector<1x64xf32>
    %cst_126 = arith.constant 1.000000e+00 : f32
    %265 = vector.broadcast %cst_126 : f32 to vector<1x64xf32>
    %266 = arith.addf %265, %264 : vector<1x64xf32>
    %267 = arith.divf %265, %266 : vector<1x64xf32>
    %268 = vector.extract_strided_slice %261 {offsets = [0, 64], sizes = [1, 64], strides = [1, 1]} : vector<1x256xf32> to vector<1x64xf32>
    %269 = arith.negf %268 : vector<1x64xf32>
    %270 = math.exp %269 : vector<1x64xf32>
    %cst_127 = arith.constant 1.000000e+00 : f32
    %271 = vector.broadcast %cst_127 : f32 to vector<1x64xf32>
    %272 = arith.addf %271, %270 : vector<1x64xf32>
    %273 = arith.divf %271, %272 : vector<1x64xf32>
    %274 = vector.extract_strided_slice %261 {offsets = [0, 128], sizes = [1, 64], strides = [1, 1]} : vector<1x256xf32> to vector<1x64xf32>
    %275 = math.tanh %274 : vector<1x64xf32>
    %276 = vector.extract_strided_slice %261 {offsets = [0, 192], sizes = [1, 64], strides = [1, 1]} : vector<1x256xf32> to vector<1x64xf32>
    %277 = arith.negf %276 : vector<1x64xf32>
    %278 = math.exp %277 : vector<1x64xf32>
    %cst_128 = arith.constant 1.000000e+00 : f32
    %279 = vector.broadcast %cst_128 : f32 to vector<1x64xf32>
    %280 = arith.addf %279, %278 : vector<1x64xf32>
    %281 = arith.divf %279, %280 : vector<1x64xf32>
    %282 = arith.mulf %273, %254 : vector<1x64xf32>
    %283 = arith.mulf %267, %275 : vector<1x64xf32>
    %284 = arith.addf %282, %283 : vector<1x64xf32>
    %285 = math.tanh %284 : vector<1x64xf32>
    %286 = arith.mulf %281, %285 : vector<1x64xf32>
    %c5_129 = arith.constant 5 : index
    %c0_130 = arith.constant 0 : index
    %287 = vector.load %arg19[%c5_129, %c0_130] : memref<32x64xf32, #tpu.memory_space<vmem>>, vector<1x64xf32>
    tpu.vector_store %arg19[%c5_129, %c0_130], %286 {strides = array<i32>} : memref<32x64xf32, #tpu.memory_space<vmem>>, vector<1x64xf32>,
    %c6 = arith.constant 6 : index
    %c0_131 = arith.constant 0 : index
    %288 = vector.load %arg18[%c6, %c0_131] : memref<32x256xf32, #tpu.memory_space<vmem>>, vector<1x256xf32>
    %cst_132 = arith.constant dense<0.000000e+00> : vector<1x256xf32>
    %289 = tpu.matmul %286, %104, %cst_132 {dimension_numbers = #tpu.dot_dimension_numbers<[1], [0], [0], [1], [0, 0, 1, 1], [], []>} : vector<1x64xf32>, vector<64x256xf32>, vector<1x256xf32> -> vector<1x256xf32>
    %290 = arith.addf %288, %289 : vector<1x256xf32>
    %291 = arith.addf %290, %105 : vector<1x256xf32>
    %292 = vector.extract_strided_slice %291 {offsets = [0, 0], sizes = [1, 64], strides = [1, 1]} : vector<1x256xf32> to vector<1x64xf32>
    %293 = arith.negf %292 : vector<1x64xf32>
    %294 = math.exp %293 : vector<1x64xf32>
    %cst_133 = arith.constant 1.000000e+00 : f32
    %295 = vector.broadcast %cst_133 : f32 to vector<1x64xf32>
    %296 = arith.addf %295, %294 : vector<1x64xf32>
    %297 = arith.divf %295, %296 : vector<1x64xf32>
    %298 = vector.extract_strided_slice %291 {offsets = [0, 64], sizes = [1, 64], strides = [1, 1]} : vector<1x256xf32> to vector<1x64xf32>
    %299 = arith.negf %298 : vector<1x64xf32>
    %300 = math.exp %299 : vector<1x64xf32>
    %cst_134 = arith.constant 1.000000e+00 : f32
    %301 = vector.broadcast %cst_134 : f32 to vector<1x64xf32>
    %302 = arith.addf %301, %300 : vector<1x64xf32>
    %303 = arith.divf %301, %302 : vector<1x64xf32>
    %304 = vector.extract_strided_slice %291 {offsets = [0, 128], sizes = [1, 64], strides = [1, 1]} : vector<1x256xf32> to vector<1x64xf32>
    %305 = math.tanh %304 : vector<1x64xf32>
    %306 = vector.extract_strided_slice %291 {offsets = [0, 192], sizes = [1, 64], strides = [1, 1]} : vector<1x256xf32> to vector<1x64xf32>
    %307 = arith.negf %306 : vector<1x64xf32>
    %308 = math.exp %307 : vector<1x64xf32>
    %cst_135 = arith.constant 1.000000e+00 : f32
    %309 = vector.broadcast %cst_135 : f32 to vector<1x64xf32>
    %310 = arith.addf %309, %308 : vector<1x64xf32>
    %311 = arith.divf %309, %310 : vector<1x64xf32>
    %312 = arith.mulf %303, %284 : vector<1x64xf32>
    %313 = arith.mulf %297, %305 : vector<1x64xf32>
    %314 = arith.addf %312, %313 : vector<1x64xf32>
    %315 = math.tanh %314 : vector<1x64xf32>
    %316 = arith.mulf %311, %315 : vector<1x64xf32>
    %c6_136 = arith.constant 6 : index
    %c0_137 = arith.constant 0 : index
    %317 = vector.load %arg19[%c6_136, %c0_137] : memref<32x64xf32, #tpu.memory_space<vmem>>, vector<1x64xf32>
    tpu.vector_store %arg19[%c6_136, %c0_137], %316 {strides = array<i32>} : memref<32x64xf32, #tpu.memory_space<vmem>>, vector<1x64xf32>,
    %c7 = arith.constant 7 : index
    %c0_138 = arith.constant 0 : index
    %318 = vector.load %arg18[%c7, %c0_138] : memref<32x256xf32, #tpu.memory_space<vmem>>, vector<1x256xf32>
    %cst_139 = arith.constant dense<0.000000e+00> : vector<1x256xf32>
    %319 = tpu.matmul %316, %104, %cst_139 {dimension_numbers = #tpu.dot_dimension_numbers<[1], [0], [0], [1], [0, 0, 1, 1], [], []>} : vector<1x64xf32>, vector<64x256xf32>, vector<1x256xf32> -> vector<1x256xf32>
    %320 = arith.addf %318, %319 : vector<1x256xf32>
    %321 = arith.addf %320, %105 : vector<1x256xf32>
    %322 = vector.extract_strided_slice %321 {offsets = [0, 0], sizes = [1, 64], strides = [1, 1]} : vector<1x256xf32> to vector<1x64xf32>
    %323 = arith.negf %322 : vector<1x64xf32>
    %324 = math.exp %323 : vector<1x64xf32>
    %cst_140 = arith.constant 1.000000e+00 : f32
    %325 = vector.broadcast %cst_140 : f32 to vector<1x64xf32>
    %326 = arith.addf %325, %324 : vector<1x64xf32>
    %327 = arith.divf %325, %326 : vector<1x64xf32>
    %328 = vector.extract_strided_slice %321 {offsets = [0, 64], sizes = [1, 64], strides = [1, 1]} : vector<1x256xf32> to vector<1x64xf32>
    %329 = arith.negf %328 : vector<1x64xf32>
    %330 = math.exp %329 : vector<1x64xf32>
    %cst_141 = arith.constant 1.000000e+00 : f32
    %331 = vector.broadcast %cst_141 : f32 to vector<1x64xf32>
    %332 = arith.addf %331, %330 : vector<1x64xf32>
    %333 = arith.divf %331, %332 : vector<1x64xf32>
    %334 = vector.extract_strided_slice %321 {offsets = [0, 128], sizes = [1, 64], strides = [1, 1]} : vector<1x256xf32> to vector<1x64xf32>
    %335 = math.tanh %334 : vector<1x64xf32>
    %336 = vector.extract_strided_slice %321 {offsets = [0, 192], sizes = [1, 64], strides = [1, 1]} : vector<1x256xf32> to vector<1x64xf32>
    %337 = arith.negf %336 : vector<1x64xf32>
    %338 = math.exp %337 : vector<1x64xf32>
    %cst_142 = arith.constant 1.000000e+00 : f32
    %339 = vector.broadcast %cst_142 : f32 to vector<1x64xf32>
    %340 = arith.addf %339, %338 : vector<1x64xf32>
    %341 = arith.divf %339, %340 : vector<1x64xf32>
    %342 = arith.mulf %333, %314 : vector<1x64xf32>
    %343 = arith.mulf %327, %335 : vector<1x64xf32>
    %344 = arith.addf %342, %343 : vector<1x64xf32>
    %345 = math.tanh %344 : vector<1x64xf32>
    %346 = arith.mulf %341, %345 : vector<1x64xf32>
    %c7_143 = arith.constant 7 : index
    %c0_144 = arith.constant 0 : index
    %347 = vector.load %arg19[%c7_143, %c0_144] : memref<32x64xf32, #tpu.memory_space<vmem>>, vector<1x64xf32>
    tpu.vector_store %arg19[%c7_143, %c0_144], %346 {strides = array<i32>} : memref<32x64xf32, #tpu.memory_space<vmem>>, vector<1x64xf32>,
    %c8_145 = arith.constant 8 : index
    %c0_146 = arith.constant 0 : index
    %348 = vector.load %arg18[%c8_145, %c0_146] : memref<32x256xf32, #tpu.memory_space<vmem>>, vector<1x256xf32>
    %cst_147 = arith.constant dense<0.000000e+00> : vector<1x256xf32>
    %349 = tpu.matmul %346, %104, %cst_147 {dimension_numbers = #tpu.dot_dimension_numbers<[1], [0], [0], [1], [0, 0, 1, 1], [], []>} : vector<1x64xf32>, vector<64x256xf32>, vector<1x256xf32> -> vector<1x256xf32>
    %350 = arith.addf %348, %349 : vector<1x256xf32>
    %351 = arith.addf %350, %105 : vector<1x256xf32>
    %352 = vector.extract_strided_slice %351 {offsets = [0, 0], sizes = [1, 64], strides = [1, 1]} : vector<1x256xf32> to vector<1x64xf32>
    %353 = arith.negf %352 : vector<1x64xf32>
    %354 = math.exp %353 : vector<1x64xf32>
    %cst_148 = arith.constant 1.000000e+00 : f32
    %355 = vector.broadcast %cst_148 : f32 to vector<1x64xf32>
    %356 = arith.addf %355, %354 : vector<1x64xf32>
    %357 = arith.divf %355, %356 : vector<1x64xf32>
    %358 = vector.extract_strided_slice %351 {offsets = [0, 64], sizes = [1, 64], strides = [1, 1]} : vector<1x256xf32> to vector<1x64xf32>
    %359 = arith.negf %358 : vector<1x64xf32>
    %360 = math.exp %359 : vector<1x64xf32>
    %cst_149 = arith.constant 1.000000e+00 : f32
    %361 = vector.broadcast %cst_149 : f32 to vector<1x64xf32>
    %362 = arith.addf %361, %360 : vector<1x64xf32>
    %363 = arith.divf %361, %362 : vector<1x64xf32>
    %364 = vector.extract_strided_slice %351 {offsets = [0, 128], sizes = [1, 64], strides = [1, 1]} : vector<1x256xf32> to vector<1x64xf32>
    %365 = math.tanh %364 : vector<1x64xf32>
    %366 = vector.extract_strided_slice %351 {offsets = [0, 192], sizes = [1, 64], strides = [1, 1]} : vector<1x256xf32> to vector<1x64xf32>
    %367 = arith.negf %366 : vector<1x64xf32>
    %368 = math.exp %367 : vector<1x64xf32>
    %cst_150 = arith.constant 1.000000e+00 : f32
    %369 = vector.broadcast %cst_150 : f32 to vector<1x64xf32>
    %370 = arith.addf %369, %368 : vector<1x64xf32>
    %371 = arith.divf %369, %370 : vector<1x64xf32>
    %372 = arith.mulf %363, %344 : vector<1x64xf32>
    %373 = arith.mulf %357, %365 : vector<1x64xf32>
    %374 = arith.addf %372, %373 : vector<1x64xf32>
    %375 = math.tanh %374 : vector<1x64xf32>
    %376 = arith.mulf %371, %375 : vector<1x64xf32>
    %c8_151 = arith.constant 8 : index
    %c0_152 = arith.constant 0 : index
    %377 = vector.load %arg19[%c8_151, %c0_152] : memref<32x64xf32, #tpu.memory_space<vmem>>, vector<1x64xf32>
    tpu.vector_store %arg19[%c8_151, %c0_152], %376 {strides = array<i32>} : memref<32x64xf32, #tpu.memory_space<vmem>>, vector<1x64xf32>,
    %c9 = arith.constant 9 : index
    %c0_153 = arith.constant 0 : index
    %378 = vector.load %arg18[%c9, %c0_153] : memref<32x256xf32, #tpu.memory_space<vmem>>, vector<1x256xf32>
    %cst_154 = arith.constant dense<0.000000e+00> : vector<1x256xf32>
    %379 = tpu.matmul %376, %104, %cst_154 {dimension_numbers = #tpu.dot_dimension_numbers<[1], [0], [0], [1], [0, 0, 1, 1], [], []>} : vector<1x64xf32>, vector<64x256xf32>, vector<1x256xf32> -> vector<1x256xf32>
    %380 = arith.addf %378, %379 : vector<1x256xf32>
    %381 = arith.addf %380, %105 : vector<1x256xf32>
    %382 = vector.extract_strided_slice %381 {offsets = [0, 0], sizes = [1, 64], strides = [1, 1]} : vector<1x256xf32> to vector<1x64xf32>
    %383 = arith.negf %382 : vector<1x64xf32>
    %384 = math.exp %383 : vector<1x64xf32>
    %cst_155 = arith.constant 1.000000e+00 : f32
    %385 = vector.broadcast %cst_155 : f32 to vector<1x64xf32>
    %386 = arith.addf %385, %384 : vector<1x64xf32>
    %387 = arith.divf %385, %386 : vector<1x64xf32>
    %388 = vector.extract_strided_slice %381 {offsets = [0, 64], sizes = [1, 64], strides = [1, 1]} : vector<1x256xf32> to vector<1x64xf32>
    %389 = arith.negf %388 : vector<1x64xf32>
    %390 = math.exp %389 : vector<1x64xf32>
    %cst_156 = arith.constant 1.000000e+00 : f32
    %391 = vector.broadcast %cst_156 : f32 to vector<1x64xf32>
    %392 = arith.addf %391, %390 : vector<1x64xf32>
    %393 = arith.divf %391, %392 : vector<1x64xf32>
    %394 = vector.extract_strided_slice %381 {offsets = [0, 128], sizes = [1, 64], strides = [1, 1]} : vector<1x256xf32> to vector<1x64xf32>
    %395 = math.tanh %394 : vector<1x64xf32>
    %396 = vector.extract_strided_slice %381 {offsets = [0, 192], sizes = [1, 64], strides = [1, 1]} : vector<1x256xf32> to vector<1x64xf32>
    %397 = arith.negf %396 : vector<1x64xf32>
    %398 = math.exp %397 : vector<1x64xf32>
    %cst_157 = arith.constant 1.000000e+00 : f32
    %399 = vector.broadcast %cst_157 : f32 to vector<1x64xf32>
    %400 = arith.addf %399, %398 : vector<1x64xf32>
    %401 = arith.divf %399, %400 : vector<1x64xf32>
    %402 = arith.mulf %393, %374 : vector<1x64xf32>
    %403 = arith.mulf %387, %395 : vector<1x64xf32>
    %404 = arith.addf %402, %403 : vector<1x64xf32>
    %405 = math.tanh %404 : vector<1x64xf32>
    %406 = arith.mulf %401, %405 : vector<1x64xf32>
    %c9_158 = arith.constant 9 : index
    %c0_159 = arith.constant 0 : index
    %407 = vector.load %arg19[%c9_158, %c0_159] : memref<32x64xf32, #tpu.memory_space<vmem>>, vector<1x64xf32>
    tpu.vector_store %arg19[%c9_158, %c0_159], %406 {strides = array<i32>} : memref<32x64xf32, #tpu.memory_space<vmem>>, vector<1x64xf32>,
    %c10 = arith.constant 10 : index
    %c0_160 = arith.constant 0 : index
    %408 = vector.load %arg18[%c10, %c0_160] : memref<32x256xf32, #tpu.memory_space<vmem>>, vector<1x256xf32>
    %cst_161 = arith.constant dense<0.000000e+00> : vector<1x256xf32>
    %409 = tpu.matmul %406, %104, %cst_161 {dimension_numbers = #tpu.dot_dimension_numbers<[1], [0], [0], [1], [0, 0, 1, 1], [], []>} : vector<1x64xf32>, vector<64x256xf32>, vector<1x256xf32> -> vector<1x256xf32>
    %410 = arith.addf %408, %409 : vector<1x256xf32>
    %411 = arith.addf %410, %105 : vector<1x256xf32>
    %412 = vector.extract_strided_slice %411 {offsets = [0, 0], sizes = [1, 64], strides = [1, 1]} : vector<1x256xf32> to vector<1x64xf32>
    %413 = arith.negf %412 : vector<1x64xf32>
    %414 = math.exp %413 : vector<1x64xf32>
    %cst_162 = arith.constant 1.000000e+00 : f32
    %415 = vector.broadcast %cst_162 : f32 to vector<1x64xf32>
    %416 = arith.addf %415, %414 : vector<1x64xf32>
    %417 = arith.divf %415, %416 : vector<1x64xf32>
    %418 = vector.extract_strided_slice %411 {offsets = [0, 64], sizes = [1, 64], strides = [1, 1]} : vector<1x256xf32> to vector<1x64xf32>
    %419 = arith.negf %418 : vector<1x64xf32>
    %420 = math.exp %419 : vector<1x64xf32>
    %cst_163 = arith.constant 1.000000e+00 : f32
    %421 = vector.broadcast %cst_163 : f32 to vector<1x64xf32>
    %422 = arith.addf %421, %420 : vector<1x64xf32>
    %423 = arith.divf %421, %422 : vector<1x64xf32>
    %424 = vector.extract_strided_slice %411 {offsets = [0, 128], sizes = [1, 64], strides = [1, 1]} : vector<1x256xf32> to vector<1x64xf32>
    %425 = math.tanh %424 : vector<1x64xf32>
    %426 = vector.extract_strided_slice %411 {offsets = [0, 192], sizes = [1, 64], strides = [1, 1]} : vector<1x256xf32> to vector<1x64xf32>
    %427 = arith.negf %426 : vector<1x64xf32>
    %428 = math.exp %427 : vector<1x64xf32>
    %cst_164 = arith.constant 1.000000e+00 : f32
    %429 = vector.broadcast %cst_164 : f32 to vector<1x64xf32>
    %430 = arith.addf %429, %428 : vector<1x64xf32>
    %431 = arith.divf %429, %430 : vector<1x64xf32>
    %432 = arith.mulf %423, %404 : vector<1x64xf32>
    %433 = arith.mulf %417, %425 : vector<1x64xf32>
    %434 = arith.addf %432, %433 : vector<1x64xf32>
    %435 = math.tanh %434 : vector<1x64xf32>
    %436 = arith.mulf %431, %435 : vector<1x64xf32>
    %c10_165 = arith.constant 10 : index
    %c0_166 = arith.constant 0 : index
    %437 = vector.load %arg19[%c10_165, %c0_166] : memref<32x64xf32, #tpu.memory_space<vmem>>, vector<1x64xf32>
    tpu.vector_store %arg19[%c10_165, %c0_166], %436 {strides = array<i32>} : memref<32x64xf32, #tpu.memory_space<vmem>>, vector<1x64xf32>,
    %c11 = arith.constant 11 : index
    %c0_167 = arith.constant 0 : index
    %438 = vector.load %arg18[%c11, %c0_167] : memref<32x256xf32, #tpu.memory_space<vmem>>, vector<1x256xf32>
    %cst_168 = arith.constant dense<0.000000e+00> : vector<1x256xf32>
    %439 = tpu.matmul %436, %104, %cst_168 {dimension_numbers = #tpu.dot_dimension_numbers<[1], [0], [0], [1], [0, 0, 1, 1], [], []>} : vector<1x64xf32>, vector<64x256xf32>, vector<1x256xf32> -> vector<1x256xf32>
    %440 = arith.addf %438, %439 : vector<1x256xf32>
    %441 = arith.addf %440, %105 : vector<1x256xf32>
    %442 = vector.extract_strided_slice %441 {offsets = [0, 0], sizes = [1, 64], strides = [1, 1]} : vector<1x256xf32> to vector<1x64xf32>
    %443 = arith.negf %442 : vector<1x64xf32>
    %444 = math.exp %443 : vector<1x64xf32>
    %cst_169 = arith.constant 1.000000e+00 : f32
    %445 = vector.broadcast %cst_169 : f32 to vector<1x64xf32>
    %446 = arith.addf %445, %444 : vector<1x64xf32>
    %447 = arith.divf %445, %446 : vector<1x64xf32>
    %448 = vector.extract_strided_slice %441 {offsets = [0, 64], sizes = [1, 64], strides = [1, 1]} : vector<1x256xf32> to vector<1x64xf32>
    %449 = arith.negf %448 : vector<1x64xf32>
    %450 = math.exp %449 : vector<1x64xf32>
    %cst_170 = arith.constant 1.000000e+00 : f32
    %451 = vector.broadcast %cst_170 : f32 to vector<1x64xf32>
    %452 = arith.addf %451, %450 : vector<1x64xf32>
    %453 = arith.divf %451, %452 : vector<1x64xf32>
    %454 = vector.extract_strided_slice %441 {offsets = [0, 128], sizes = [1, 64], strides = [1, 1]} : vector<1x256xf32> to vector<1x64xf32>
    %455 = math.tanh %454 : vector<1x64xf32>
    %456 = vector.extract_strided_slice %441 {offsets = [0, 192], sizes = [1, 64], strides = [1, 1]} : vector<1x256xf32> to vector<1x64xf32>
    %457 = arith.negf %456 : vector<1x64xf32>
    %458 = math.exp %457 : vector<1x64xf32>
    %cst_171 = arith.constant 1.000000e+00 : f32
    %459 = vector.broadcast %cst_171 : f32 to vector<1x64xf32>
    %460 = arith.addf %459, %458 : vector<1x64xf32>
    %461 = arith.divf %459, %460 : vector<1x64xf32>
    %462 = arith.mulf %453, %434 : vector<1x64xf32>
    %463 = arith.mulf %447, %455 : vector<1x64xf32>
    %464 = arith.addf %462, %463 : vector<1x64xf32>
    %465 = math.tanh %464 : vector<1x64xf32>
    %466 = arith.mulf %461, %465 : vector<1x64xf32>
    %c11_172 = arith.constant 11 : index
    %c0_173 = arith.constant 0 : index
    %467 = vector.load %arg19[%c11_172, %c0_173] : memref<32x64xf32, #tpu.memory_space<vmem>>, vector<1x64xf32>
    tpu.vector_store %arg19[%c11_172, %c0_173], %466 {strides = array<i32>} : memref<32x64xf32, #tpu.memory_space<vmem>>, vector<1x64xf32>,
    %c12_174 = arith.constant 12 : index
    %c0_175 = arith.constant 0 : index
    %468 = vector.load %arg18[%c12_174, %c0_175] : memref<32x256xf32, #tpu.memory_space<vmem>>, vector<1x256xf32>
    %cst_176 = arith.constant dense<0.000000e+00> : vector<1x256xf32>
    %469 = tpu.matmul %466, %104, %cst_176 {dimension_numbers = #tpu.dot_dimension_numbers<[1], [0], [0], [1], [0, 0, 1, 1], [], []>} : vector<1x64xf32>, vector<64x256xf32>, vector<1x256xf32> -> vector<1x256xf32>
    %470 = arith.addf %468, %469 : vector<1x256xf32>
    %471 = arith.addf %470, %105 : vector<1x256xf32>
    %472 = vector.extract_strided_slice %471 {offsets = [0, 0], sizes = [1, 64], strides = [1, 1]} : vector<1x256xf32> to vector<1x64xf32>
    %473 = arith.negf %472 : vector<1x64xf32>
    %474 = math.exp %473 : vector<1x64xf32>
    %cst_177 = arith.constant 1.000000e+00 : f32
    %475 = vector.broadcast %cst_177 : f32 to vector<1x64xf32>
    %476 = arith.addf %475, %474 : vector<1x64xf32>
    %477 = arith.divf %475, %476 : vector<1x64xf32>
    %478 = vector.extract_strided_slice %471 {offsets = [0, 64], sizes = [1, 64], strides = [1, 1]} : vector<1x256xf32> to vector<1x64xf32>
    %479 = arith.negf %478 : vector<1x64xf32>
    %480 = math.exp %479 : vector<1x64xf32>
    %cst_178 = arith.constant 1.000000e+00 : f32
    %481 = vector.broadcast %cst_178 : f32 to vector<1x64xf32>
    %482 = arith.addf %481, %480 : vector<1x64xf32>
    %483 = arith.divf %481, %482 : vector<1x64xf32>
    %484 = vector.extract_strided_slice %471 {offsets = [0, 128], sizes = [1, 64], strides = [1, 1]} : vector<1x256xf32> to vector<1x64xf32>
    %485 = math.tanh %484 : vector<1x64xf32>
    %486 = vector.extract_strided_slice %471 {offsets = [0, 192], sizes = [1, 64], strides = [1, 1]} : vector<1x256xf32> to vector<1x64xf32>
    %487 = arith.negf %486 : vector<1x64xf32>
    %488 = math.exp %487 : vector<1x64xf32>
    %cst_179 = arith.constant 1.000000e+00 : f32
    %489 = vector.broadcast %cst_179 : f32 to vector<1x64xf32>
    %490 = arith.addf %489, %488 : vector<1x64xf32>
    %491 = arith.divf %489, %490 : vector<1x64xf32>
    %492 = arith.mulf %483, %464 : vector<1x64xf32>
    %493 = arith.mulf %477, %485 : vector<1x64xf32>
    %494 = arith.addf %492, %493 : vector<1x64xf32>
    %495 = math.tanh %494 : vector<1x64xf32>
    %496 = arith.mulf %491, %495 : vector<1x64xf32>
    %c12_180 = arith.constant 12 : index
    %c0_181 = arith.constant 0 : index
    %497 = vector.load %arg19[%c12_180, %c0_181] : memref<32x64xf32, #tpu.memory_space<vmem>>, vector<1x64xf32>
    tpu.vector_store %arg19[%c12_180, %c0_181], %496 {strides = array<i32>} : memref<32x64xf32, #tpu.memory_space<vmem>>, vector<1x64xf32>,
    %c13 = arith.constant 13 : index
    %c0_182 = arith.constant 0 : index
    %498 = vector.load %arg18[%c13, %c0_182] : memref<32x256xf32, #tpu.memory_space<vmem>>, vector<1x256xf32>
    %cst_183 = arith.constant dense<0.000000e+00> : vector<1x256xf32>
    %499 = tpu.matmul %496, %104, %cst_183 {dimension_numbers = #tpu.dot_dimension_numbers<[1], [0], [0], [1], [0, 0, 1, 1], [], []>} : vector<1x64xf32>, vector<64x256xf32>, vector<1x256xf32> -> vector<1x256xf32>
    %500 = arith.addf %498, %499 : vector<1x256xf32>
    %501 = arith.addf %500, %105 : vector<1x256xf32>
    %502 = vector.extract_strided_slice %501 {offsets = [0, 0], sizes = [1, 64], strides = [1, 1]} : vector<1x256xf32> to vector<1x64xf32>
    %503 = arith.negf %502 : vector<1x64xf32>
    %504 = math.exp %503 : vector<1x64xf32>
    %cst_184 = arith.constant 1.000000e+00 : f32
    %505 = vector.broadcast %cst_184 : f32 to vector<1x64xf32>
    %506 = arith.addf %505, %504 : vector<1x64xf32>
    %507 = arith.divf %505, %506 : vector<1x64xf32>
    %508 = vector.extract_strided_slice %501 {offsets = [0, 64], sizes = [1, 64], strides = [1, 1]} : vector<1x256xf32> to vector<1x64xf32>
    %509 = arith.negf %508 : vector<1x64xf32>
    %510 = math.exp %509 : vector<1x64xf32>
    %cst_185 = arith.constant 1.000000e+00 : f32
    %511 = vector.broadcast %cst_185 : f32 to vector<1x64xf32>
    %512 = arith.addf %511, %510 : vector<1x64xf32>
    %513 = arith.divf %511, %512 : vector<1x64xf32>
    %514 = vector.extract_strided_slice %501 {offsets = [0, 128], sizes = [1, 64], strides = [1, 1]} : vector<1x256xf32> to vector<1x64xf32>
    %515 = math.tanh %514 : vector<1x64xf32>
    %516 = vector.extract_strided_slice %501 {offsets = [0, 192], sizes = [1, 64], strides = [1, 1]} : vector<1x256xf32> to vector<1x64xf32>
    %517 = arith.negf %516 : vector<1x64xf32>
    %518 = math.exp %517 : vector<1x64xf32>
    %cst_186 = arith.constant 1.000000e+00 : f32
    %519 = vector.broadcast %cst_186 : f32 to vector<1x64xf32>
    %520 = arith.addf %519, %518 : vector<1x64xf32>
    %521 = arith.divf %519, %520 : vector<1x64xf32>
    %522 = arith.mulf %513, %494 : vector<1x64xf32>
    %523 = arith.mulf %507, %515 : vector<1x64xf32>
    %524 = arith.addf %522, %523 : vector<1x64xf32>
    %525 = math.tanh %524 : vector<1x64xf32>
    %526 = arith.mulf %521, %525 : vector<1x64xf32>
    %c13_187 = arith.constant 13 : index
    %c0_188 = arith.constant 0 : index
    %527 = vector.load %arg19[%c13_187, %c0_188] : memref<32x64xf32, #tpu.memory_space<vmem>>, vector<1x64xf32>
    tpu.vector_store %arg19[%c13_187, %c0_188], %526 {strides = array<i32>} : memref<32x64xf32, #tpu.memory_space<vmem>>, vector<1x64xf32>,
    %c14 = arith.constant 14 : index
    %c0_189 = arith.constant 0 : index
    %528 = vector.load %arg18[%c14, %c0_189] : memref<32x256xf32, #tpu.memory_space<vmem>>, vector<1x256xf32>
    %cst_190 = arith.constant dense<0.000000e+00> : vector<1x256xf32>
    %529 = tpu.matmul %526, %104, %cst_190 {dimension_numbers = #tpu.dot_dimension_numbers<[1], [0], [0], [1], [0, 0, 1, 1], [], []>} : vector<1x64xf32>, vector<64x256xf32>, vector<1x256xf32> -> vector<1x256xf32>
    %530 = arith.addf %528, %529 : vector<1x256xf32>
    %531 = arith.addf %530, %105 : vector<1x256xf32>
    %532 = vector.extract_strided_slice %531 {offsets = [0, 0], sizes = [1, 64], strides = [1, 1]} : vector<1x256xf32> to vector<1x64xf32>
    %533 = arith.negf %532 : vector<1x64xf32>
    %534 = math.exp %533 : vector<1x64xf32>
    %cst_191 = arith.constant 1.000000e+00 : f32
    %535 = vector.broadcast %cst_191 : f32 to vector<1x64xf32>
    %536 = arith.addf %535, %534 : vector<1x64xf32>
    %537 = arith.divf %535, %536 : vector<1x64xf32>
    %538 = vector.extract_strided_slice %531 {offsets = [0, 64], sizes = [1, 64], strides = [1, 1]} : vector<1x256xf32> to vector<1x64xf32>
    %539 = arith.negf %538 : vector<1x64xf32>
    %540 = math.exp %539 : vector<1x64xf32>
    %cst_192 = arith.constant 1.000000e+00 : f32
    %541 = vector.broadcast %cst_192 : f32 to vector<1x64xf32>
    %542 = arith.addf %541, %540 : vector<1x64xf32>
    %543 = arith.divf %541, %542 : vector<1x64xf32>
    %544 = vector.extract_strided_slice %531 {offsets = [0, 128], sizes = [1, 64], strides = [1, 1]} : vector<1x256xf32> to vector<1x64xf32>
    %545 = math.tanh %544 : vector<1x64xf32>
    %546 = vector.extract_strided_slice %531 {offsets = [0, 192], sizes = [1, 64], strides = [1, 1]} : vector<1x256xf32> to vector<1x64xf32>
    %547 = arith.negf %546 : vector<1x64xf32>
    %548 = math.exp %547 : vector<1x64xf32>
    %cst_193 = arith.constant 1.000000e+00 : f32
    %549 = vector.broadcast %cst_193 : f32 to vector<1x64xf32>
    %550 = arith.addf %549, %548 : vector<1x64xf32>
    %551 = arith.divf %549, %550 : vector<1x64xf32>
    %552 = arith.mulf %543, %524 : vector<1x64xf32>
    %553 = arith.mulf %537, %545 : vector<1x64xf32>
    %554 = arith.addf %552, %553 : vector<1x64xf32>
    %555 = math.tanh %554 : vector<1x64xf32>
    %556 = arith.mulf %551, %555 : vector<1x64xf32>
    %c14_194 = arith.constant 14 : index
    %c0_195 = arith.constant 0 : index
    %557 = vector.load %arg19[%c14_194, %c0_195] : memref<32x64xf32, #tpu.memory_space<vmem>>, vector<1x64xf32>
    tpu.vector_store %arg19[%c14_194, %c0_195], %556 {strides = array<i32>} : memref<32x64xf32, #tpu.memory_space<vmem>>, vector<1x64xf32>,
    %c15 = arith.constant 15 : index
    %c0_196 = arith.constant 0 : index
    %558 = vector.load %arg18[%c15, %c0_196] : memref<32x256xf32, #tpu.memory_space<vmem>>, vector<1x256xf32>
    %cst_197 = arith.constant dense<0.000000e+00> : vector<1x256xf32>
    %559 = tpu.matmul %556, %104, %cst_197 {dimension_numbers = #tpu.dot_dimension_numbers<[1], [0], [0], [1], [0, 0, 1, 1], [], []>} : vector<1x64xf32>, vector<64x256xf32>, vector<1x256xf32> -> vector<1x256xf32>
    %560 = arith.addf %558, %559 : vector<1x256xf32>
    %561 = arith.addf %560, %105 : vector<1x256xf32>
    %562 = vector.extract_strided_slice %561 {offsets = [0, 0], sizes = [1, 64], strides = [1, 1]} : vector<1x256xf32> to vector<1x64xf32>
    %563 = arith.negf %562 : vector<1x64xf32>
    %564 = math.exp %563 : vector<1x64xf32>
    %cst_198 = arith.constant 1.000000e+00 : f32
    %565 = vector.broadcast %cst_198 : f32 to vector<1x64xf32>
    %566 = arith.addf %565, %564 : vector<1x64xf32>
    %567 = arith.divf %565, %566 : vector<1x64xf32>
    %568 = vector.extract_strided_slice %561 {offsets = [0, 64], sizes = [1, 64], strides = [1, 1]} : vector<1x256xf32> to vector<1x64xf32>
    %569 = arith.negf %568 : vector<1x64xf32>
    %570 = math.exp %569 : vector<1x64xf32>
    %cst_199 = arith.constant 1.000000e+00 : f32
    %571 = vector.broadcast %cst_199 : f32 to vector<1x64xf32>
    %572 = arith.addf %571, %570 : vector<1x64xf32>
    %573 = arith.divf %571, %572 : vector<1x64xf32>
    %574 = vector.extract_strided_slice %561 {offsets = [0, 128], sizes = [1, 64], strides = [1, 1]} : vector<1x256xf32> to vector<1x64xf32>
    %575 = math.tanh %574 : vector<1x64xf32>
    %576 = vector.extract_strided_slice %561 {offsets = [0, 192], sizes = [1, 64], strides = [1, 1]} : vector<1x256xf32> to vector<1x64xf32>
    %577 = arith.negf %576 : vector<1x64xf32>
    %578 = math.exp %577 : vector<1x64xf32>
    %cst_200 = arith.constant 1.000000e+00 : f32
    %579 = vector.broadcast %cst_200 : f32 to vector<1x64xf32>
    %580 = arith.addf %579, %578 : vector<1x64xf32>
    %581 = arith.divf %579, %580 : vector<1x64xf32>
    %582 = arith.mulf %573, %554 : vector<1x64xf32>
    %583 = arith.mulf %567, %575 : vector<1x64xf32>
    %584 = arith.addf %582, %583 : vector<1x64xf32>
    %585 = math.tanh %584 : vector<1x64xf32>
    %586 = arith.mulf %581, %585 : vector<1x64xf32>
    %c15_201 = arith.constant 15 : index
    %c0_202 = arith.constant 0 : index
    %587 = vector.load %arg19[%c15_201, %c0_202] : memref<32x64xf32, #tpu.memory_space<vmem>>, vector<1x64xf32>
    tpu.vector_store %arg19[%c15_201, %c0_202], %586 {strides = array<i32>} : memref<32x64xf32, #tpu.memory_space<vmem>>, vector<1x64xf32>,
    %c16 = arith.constant 16 : index
    %c0_203 = arith.constant 0 : index
    %588 = vector.load %arg18[%c16, %c0_203] : memref<32x256xf32, #tpu.memory_space<vmem>>, vector<1x256xf32>
    %cst_204 = arith.constant dense<0.000000e+00> : vector<1x256xf32>
    %589 = tpu.matmul %586, %104, %cst_204 {dimension_numbers = #tpu.dot_dimension_numbers<[1], [0], [0], [1], [0, 0, 1, 1], [], []>} : vector<1x64xf32>, vector<64x256xf32>, vector<1x256xf32> -> vector<1x256xf32>
    %590 = arith.addf %588, %589 : vector<1x256xf32>
    %591 = arith.addf %590, %105 : vector<1x256xf32>
    %592 = vector.extract_strided_slice %591 {offsets = [0, 0], sizes = [1, 64], strides = [1, 1]} : vector<1x256xf32> to vector<1x64xf32>
    %593 = arith.negf %592 : vector<1x64xf32>
    %594 = math.exp %593 : vector<1x64xf32>
    %cst_205 = arith.constant 1.000000e+00 : f32
    %595 = vector.broadcast %cst_205 : f32 to vector<1x64xf32>
    %596 = arith.addf %595, %594 : vector<1x64xf32>
    %597 = arith.divf %595, %596 : vector<1x64xf32>
    %598 = vector.extract_strided_slice %591 {offsets = [0, 64], sizes = [1, 64], strides = [1, 1]} : vector<1x256xf32> to vector<1x64xf32>
    %599 = arith.negf %598 : vector<1x64xf32>
    %600 = math.exp %599 : vector<1x64xf32>
    %cst_206 = arith.constant 1.000000e+00 : f32
    %601 = vector.broadcast %cst_206 : f32 to vector<1x64xf32>
    %602 = arith.addf %601, %600 : vector<1x64xf32>
    %603 = arith.divf %601, %602 : vector<1x64xf32>
    %604 = vector.extract_strided_slice %591 {offsets = [0, 128], sizes = [1, 64], strides = [1, 1]} : vector<1x256xf32> to vector<1x64xf32>
    %605 = math.tanh %604 : vector<1x64xf32>
    %606 = vector.extract_strided_slice %591 {offsets = [0, 192], sizes = [1, 64], strides = [1, 1]} : vector<1x256xf32> to vector<1x64xf32>
    %607 = arith.negf %606 : vector<1x64xf32>
    %608 = math.exp %607 : vector<1x64xf32>
    %cst_207 = arith.constant 1.000000e+00 : f32
    %609 = vector.broadcast %cst_207 : f32 to vector<1x64xf32>
    %610 = arith.addf %609, %608 : vector<1x64xf32>
    %611 = arith.divf %609, %610 : vector<1x64xf32>
    %612 = arith.mulf %603, %584 : vector<1x64xf32>
    %613 = arith.mulf %597, %605 : vector<1x64xf32>
    %614 = arith.addf %612, %613 : vector<1x64xf32>
    %615 = math.tanh %614 : vector<1x64xf32>
    %616 = arith.mulf %611, %615 : vector<1x64xf32>
    %c16_208 = arith.constant 16 : index
    %c0_209 = arith.constant 0 : index
    %617 = vector.load %arg19[%c16_208, %c0_209] : memref<32x64xf32, #tpu.memory_space<vmem>>, vector<1x64xf32>
    tpu.vector_store %arg19[%c16_208, %c0_209], %616 {strides = array<i32>} : memref<32x64xf32, #tpu.memory_space<vmem>>, vector<1x64xf32>,
    %c17 = arith.constant 17 : index
    %c0_210 = arith.constant 0 : index
    %618 = vector.load %arg18[%c17, %c0_210] : memref<32x256xf32, #tpu.memory_space<vmem>>, vector<1x256xf32>
    %cst_211 = arith.constant dense<0.000000e+00> : vector<1x256xf32>
    %619 = tpu.matmul %616, %104, %cst_211 {dimension_numbers = #tpu.dot_dimension_numbers<[1], [0], [0], [1], [0, 0, 1, 1], [], []>} : vector<1x64xf32>, vector<64x256xf32>, vector<1x256xf32> -> vector<1x256xf32>
    %620 = arith.addf %618, %619 : vector<1x256xf32>
    %621 = arith.addf %620, %105 : vector<1x256xf32>
    %622 = vector.extract_strided_slice %621 {offsets = [0, 0], sizes = [1, 64], strides = [1, 1]} : vector<1x256xf32> to vector<1x64xf32>
    %623 = arith.negf %622 : vector<1x64xf32>
    %624 = math.exp %623 : vector<1x64xf32>
    %cst_212 = arith.constant 1.000000e+00 : f32
    %625 = vector.broadcast %cst_212 : f32 to vector<1x64xf32>
    %626 = arith.addf %625, %624 : vector<1x64xf32>
    %627 = arith.divf %625, %626 : vector<1x64xf32>
    %628 = vector.extract_strided_slice %621 {offsets = [0, 64], sizes = [1, 64], strides = [1, 1]} : vector<1x256xf32> to vector<1x64xf32>
    %629 = arith.negf %628 : vector<1x64xf32>
    %630 = math.exp %629 : vector<1x64xf32>
    %cst_213 = arith.constant 1.000000e+00 : f32
    %631 = vector.broadcast %cst_213 : f32 to vector<1x64xf32>
    %632 = arith.addf %631, %630 : vector<1x64xf32>
    %633 = arith.divf %631, %632 : vector<1x64xf32>
    %634 = vector.extract_strided_slice %621 {offsets = [0, 128], sizes = [1, 64], strides = [1, 1]} : vector<1x256xf32> to vector<1x64xf32>
    %635 = math.tanh %634 : vector<1x64xf32>
    %636 = vector.extract_strided_slice %621 {offsets = [0, 192], sizes = [1, 64], strides = [1, 1]} : vector<1x256xf32> to vector<1x64xf32>
    %637 = arith.negf %636 : vector<1x64xf32>
    %638 = math.exp %637 : vector<1x64xf32>
    %cst_214 = arith.constant 1.000000e+00 : f32
    %639 = vector.broadcast %cst_214 : f32 to vector<1x64xf32>
    %640 = arith.addf %639, %638 : vector<1x64xf32>
    %641 = arith.divf %639, %640 : vector<1x64xf32>
    %642 = arith.mulf %633, %614 : vector<1x64xf32>
    %643 = arith.mulf %627, %635 : vector<1x64xf32>
    %644 = arith.addf %642, %643 : vector<1x64xf32>
    %645 = math.tanh %644 : vector<1x64xf32>
    %646 = arith.mulf %641, %645 : vector<1x64xf32>
    %c17_215 = arith.constant 17 : index
    %c0_216 = arith.constant 0 : index
    %647 = vector.load %arg19[%c17_215, %c0_216] : memref<32x64xf32, #tpu.memory_space<vmem>>, vector<1x64xf32>
    tpu.vector_store %arg19[%c17_215, %c0_216], %646 {strides = array<i32>} : memref<32x64xf32, #tpu.memory_space<vmem>>, vector<1x64xf32>,
    %c18 = arith.constant 18 : index
    %c0_217 = arith.constant 0 : index
    %648 = vector.load %arg18[%c18, %c0_217] : memref<32x256xf32, #tpu.memory_space<vmem>>, vector<1x256xf32>
    %cst_218 = arith.constant dense<0.000000e+00> : vector<1x256xf32>
    %649 = tpu.matmul %646, %104, %cst_218 {dimension_numbers = #tpu.dot_dimension_numbers<[1], [0], [0], [1], [0, 0, 1, 1], [], []>} : vector<1x64xf32>, vector<64x256xf32>, vector<1x256xf32> -> vector<1x256xf32>
    %650 = arith.addf %648, %649 : vector<1x256xf32>
    %651 = arith.addf %650, %105 : vector<1x256xf32>
    %652 = vector.extract_strided_slice %651 {offsets = [0, 0], sizes = [1, 64], strides = [1, 1]} : vector<1x256xf32> to vector<1x64xf32>
    %653 = arith.negf %652 : vector<1x64xf32>
    %654 = math.exp %653 : vector<1x64xf32>
    %cst_219 = arith.constant 1.000000e+00 : f32
    %655 = vector.broadcast %cst_219 : f32 to vector<1x64xf32>
    %656 = arith.addf %655, %654 : vector<1x64xf32>
    %657 = arith.divf %655, %656 : vector<1x64xf32>
    %658 = vector.extract_strided_slice %651 {offsets = [0, 64], sizes = [1, 64], strides = [1, 1]} : vector<1x256xf32> to vector<1x64xf32>
    %659 = arith.negf %658 : vector<1x64xf32>
    %660 = math.exp %659 : vector<1x64xf32>
    %cst_220 = arith.constant 1.000000e+00 : f32
    %661 = vector.broadcast %cst_220 : f32 to vector<1x64xf32>
    %662 = arith.addf %661, %660 : vector<1x64xf32>
    %663 = arith.divf %661, %662 : vector<1x64xf32>
    %664 = vector.extract_strided_slice %651 {offsets = [0, 128], sizes = [1, 64], strides = [1, 1]} : vector<1x256xf32> to vector<1x64xf32>
    %665 = math.tanh %664 : vector<1x64xf32>
    %666 = vector.extract_strided_slice %651 {offsets = [0, 192], sizes = [1, 64], strides = [1, 1]} : vector<1x256xf32> to vector<1x64xf32>
    %667 = arith.negf %666 : vector<1x64xf32>
    %668 = math.exp %667 : vector<1x64xf32>
    %cst_221 = arith.constant 1.000000e+00 : f32
    %669 = vector.broadcast %cst_221 : f32 to vector<1x64xf32>
    %670 = arith.addf %669, %668 : vector<1x64xf32>
    %671 = arith.divf %669, %670 : vector<1x64xf32>
    %672 = arith.mulf %663, %644 : vector<1x64xf32>
    %673 = arith.mulf %657, %665 : vector<1x64xf32>
    %674 = arith.addf %672, %673 : vector<1x64xf32>
    %675 = math.tanh %674 : vector<1x64xf32>
    %676 = arith.mulf %671, %675 : vector<1x64xf32>
    %c18_222 = arith.constant 18 : index
    %c0_223 = arith.constant 0 : index
    %677 = vector.load %arg19[%c18_222, %c0_223] : memref<32x64xf32, #tpu.memory_space<vmem>>, vector<1x64xf32>
    tpu.vector_store %arg19[%c18_222, %c0_223], %676 {strides = array<i32>} : memref<32x64xf32, #tpu.memory_space<vmem>>, vector<1x64xf32>,
    %c19 = arith.constant 19 : index
    %c0_224 = arith.constant 0 : index
    %678 = vector.load %arg18[%c19, %c0_224] : memref<32x256xf32, #tpu.memory_space<vmem>>, vector<1x256xf32>
    %cst_225 = arith.constant dense<0.000000e+00> : vector<1x256xf32>
    %679 = tpu.matmul %676, %104, %cst_225 {dimension_numbers = #tpu.dot_dimension_numbers<[1], [0], [0], [1], [0, 0, 1, 1], [], []>} : vector<1x64xf32>, vector<64x256xf32>, vector<1x256xf32> -> vector<1x256xf32>
    %680 = arith.addf %678, %679 : vector<1x256xf32>
    %681 = arith.addf %680, %105 : vector<1x256xf32>
    %682 = vector.extract_strided_slice %681 {offsets = [0, 0], sizes = [1, 64], strides = [1, 1]} : vector<1x256xf32> to vector<1x64xf32>
    %683 = arith.negf %682 : vector<1x64xf32>
    %684 = math.exp %683 : vector<1x64xf32>
    %cst_226 = arith.constant 1.000000e+00 : f32
    %685 = vector.broadcast %cst_226 : f32 to vector<1x64xf32>
    %686 = arith.addf %685, %684 : vector<1x64xf32>
    %687 = arith.divf %685, %686 : vector<1x64xf32>
    %688 = vector.extract_strided_slice %681 {offsets = [0, 64], sizes = [1, 64], strides = [1, 1]} : vector<1x256xf32> to vector<1x64xf32>
    %689 = arith.negf %688 : vector<1x64xf32>
    %690 = math.exp %689 : vector<1x64xf32>
    %cst_227 = arith.constant 1.000000e+00 : f32
    %691 = vector.broadcast %cst_227 : f32 to vector<1x64xf32>
    %692 = arith.addf %691, %690 : vector<1x64xf32>
    %693 = arith.divf %691, %692 : vector<1x64xf32>
    %694 = vector.extract_strided_slice %681 {offsets = [0, 128], sizes = [1, 64], strides = [1, 1]} : vector<1x256xf32> to vector<1x64xf32>
    %695 = math.tanh %694 : vector<1x64xf32>
    %696 = vector.extract_strided_slice %681 {offsets = [0, 192], sizes = [1, 64], strides = [1, 1]} : vector<1x256xf32> to vector<1x64xf32>
    %697 = arith.negf %696 : vector<1x64xf32>
    %698 = math.exp %697 : vector<1x64xf32>
    %cst_228 = arith.constant 1.000000e+00 : f32
    %699 = vector.broadcast %cst_228 : f32 to vector<1x64xf32>
    %700 = arith.addf %699, %698 : vector<1x64xf32>
    %701 = arith.divf %699, %700 : vector<1x64xf32>
    %702 = arith.mulf %693, %674 : vector<1x64xf32>
    %703 = arith.mulf %687, %695 : vector<1x64xf32>
    %704 = arith.addf %702, %703 : vector<1x64xf32>
    %705 = math.tanh %704 : vector<1x64xf32>
    %706 = arith.mulf %701, %705 : vector<1x64xf32>
    %c19_229 = arith.constant 19 : index
    %c0_230 = arith.constant 0 : index
    %707 = vector.load %arg19[%c19_229, %c0_230] : memref<32x64xf32, #tpu.memory_space<vmem>>, vector<1x64xf32>
    tpu.vector_store %arg19[%c19_229, %c0_230], %706 {strides = array<i32>} : memref<32x64xf32, #tpu.memory_space<vmem>>, vector<1x64xf32>,
    %c20 = arith.constant 20 : index
    %c0_231 = arith.constant 0 : index
    %708 = vector.load %arg18[%c20, %c0_231] : memref<32x256xf32, #tpu.memory_space<vmem>>, vector<1x256xf32>
    %cst_232 = arith.constant dense<0.000000e+00> : vector<1x256xf32>
    %709 = tpu.matmul %706, %104, %cst_232 {dimension_numbers = #tpu.dot_dimension_numbers<[1], [0], [0], [1], [0, 0, 1, 1], [], []>} : vector<1x64xf32>, vector<64x256xf32>, vector<1x256xf32> -> vector<1x256xf32>
    %710 = arith.addf %708, %709 : vector<1x256xf32>
    %711 = arith.addf %710, %105 : vector<1x256xf32>
    %712 = vector.extract_strided_slice %711 {offsets = [0, 0], sizes = [1, 64], strides = [1, 1]} : vector<1x256xf32> to vector<1x64xf32>
    %713 = arith.negf %712 : vector<1x64xf32>
    %714 = math.exp %713 : vector<1x64xf32>
    %cst_233 = arith.constant 1.000000e+00 : f32
    %715 = vector.broadcast %cst_233 : f32 to vector<1x64xf32>
    %716 = arith.addf %715, %714 : vector<1x64xf32>
    %717 = arith.divf %715, %716 : vector<1x64xf32>
    %718 = vector.extract_strided_slice %711 {offsets = [0, 64], sizes = [1, 64], strides = [1, 1]} : vector<1x256xf32> to vector<1x64xf32>
    %719 = arith.negf %718 : vector<1x64xf32>
    %720 = math.exp %719 : vector<1x64xf32>
    %cst_234 = arith.constant 1.000000e+00 : f32
    %721 = vector.broadcast %cst_234 : f32 to vector<1x64xf32>
    %722 = arith.addf %721, %720 : vector<1x64xf32>
    %723 = arith.divf %721, %722 : vector<1x64xf32>
    %724 = vector.extract_strided_slice %711 {offsets = [0, 128], sizes = [1, 64], strides = [1, 1]} : vector<1x256xf32> to vector<1x64xf32>
    %725 = math.tanh %724 : vector<1x64xf32>
    %726 = vector.extract_strided_slice %711 {offsets = [0, 192], sizes = [1, 64], strides = [1, 1]} : vector<1x256xf32> to vector<1x64xf32>
    %727 = arith.negf %726 : vector<1x64xf32>
    %728 = math.exp %727 : vector<1x64xf32>
    %cst_235 = arith.constant 1.000000e+00 : f32
    %729 = vector.broadcast %cst_235 : f32 to vector<1x64xf32>
    %730 = arith.addf %729, %728 : vector<1x64xf32>
    %731 = arith.divf %729, %730 : vector<1x64xf32>
    %732 = arith.mulf %723, %704 : vector<1x64xf32>
    %733 = arith.mulf %717, %725 : vector<1x64xf32>
    %734 = arith.addf %732, %733 : vector<1x64xf32>
    %735 = math.tanh %734 : vector<1x64xf32>
    %736 = arith.mulf %731, %735 : vector<1x64xf32>
    %c20_236 = arith.constant 20 : index
    %c0_237 = arith.constant 0 : index
    %737 = vector.load %arg19[%c20_236, %c0_237] : memref<32x64xf32, #tpu.memory_space<vmem>>, vector<1x64xf32>
    tpu.vector_store %arg19[%c20_236, %c0_237], %736 {strides = array<i32>} : memref<32x64xf32, #tpu.memory_space<vmem>>, vector<1x64xf32>,
    %c21 = arith.constant 21 : index
    %c0_238 = arith.constant 0 : index
    %738 = vector.load %arg18[%c21, %c0_238] : memref<32x256xf32, #tpu.memory_space<vmem>>, vector<1x256xf32>
    %cst_239 = arith.constant dense<0.000000e+00> : vector<1x256xf32>
    %739 = tpu.matmul %736, %104, %cst_239 {dimension_numbers = #tpu.dot_dimension_numbers<[1], [0], [0], [1], [0, 0, 1, 1], [], []>} : vector<1x64xf32>, vector<64x256xf32>, vector<1x256xf32> -> vector<1x256xf32>
    %740 = arith.addf %738, %739 : vector<1x256xf32>
    %741 = arith.addf %740, %105 : vector<1x256xf32>
    %742 = vector.extract_strided_slice %741 {offsets = [0, 0], sizes = [1, 64], strides = [1, 1]} : vector<1x256xf32> to vector<1x64xf32>
    %743 = arith.negf %742 : vector<1x64xf32>
    %744 = math.exp %743 : vector<1x64xf32>
    %cst_240 = arith.constant 1.000000e+00 : f32
    %745 = vector.broadcast %cst_240 : f32 to vector<1x64xf32>
    %746 = arith.addf %745, %744 : vector<1x64xf32>
    %747 = arith.divf %745, %746 : vector<1x64xf32>
    %748 = vector.extract_strided_slice %741 {offsets = [0, 64], sizes = [1, 64], strides = [1, 1]} : vector<1x256xf32> to vector<1x64xf32>
    %749 = arith.negf %748 : vector<1x64xf32>
    %750 = math.exp %749 : vector<1x64xf32>
    %cst_241 = arith.constant 1.000000e+00 : f32
    %751 = vector.broadcast %cst_241 : f32 to vector<1x64xf32>
    %752 = arith.addf %751, %750 : vector<1x64xf32>
    %753 = arith.divf %751, %752 : vector<1x64xf32>
    %754 = vector.extract_strided_slice %741 {offsets = [0, 128], sizes = [1, 64], strides = [1, 1]} : vector<1x256xf32> to vector<1x64xf32>
    %755 = math.tanh %754 : vector<1x64xf32>
    %756 = vector.extract_strided_slice %741 {offsets = [0, 192], sizes = [1, 64], strides = [1, 1]} : vector<1x256xf32> to vector<1x64xf32>
    %757 = arith.negf %756 : vector<1x64xf32>
    %758 = math.exp %757 : vector<1x64xf32>
    %cst_242 = arith.constant 1.000000e+00 : f32
    %759 = vector.broadcast %cst_242 : f32 to vector<1x64xf32>
    %760 = arith.addf %759, %758 : vector<1x64xf32>
    %761 = arith.divf %759, %760 : vector<1x64xf32>
    %762 = arith.mulf %753, %734 : vector<1x64xf32>
    %763 = arith.mulf %747, %755 : vector<1x64xf32>
    %764 = arith.addf %762, %763 : vector<1x64xf32>
    %765 = math.tanh %764 : vector<1x64xf32>
    %766 = arith.mulf %761, %765 : vector<1x64xf32>
    %c21_243 = arith.constant 21 : index
    %c0_244 = arith.constant 0 : index
    %767 = vector.load %arg19[%c21_243, %c0_244] : memref<32x64xf32, #tpu.memory_space<vmem>>, vector<1x64xf32>
    tpu.vector_store %arg19[%c21_243, %c0_244], %766 {strides = array<i32>} : memref<32x64xf32, #tpu.memory_space<vmem>>, vector<1x64xf32>,
    %c22 = arith.constant 22 : index
    %c0_245 = arith.constant 0 : index
    %768 = vector.load %arg18[%c22, %c0_245] : memref<32x256xf32, #tpu.memory_space<vmem>>, vector<1x256xf32>
    %cst_246 = arith.constant dense<0.000000e+00> : vector<1x256xf32>
    %769 = tpu.matmul %766, %104, %cst_246 {dimension_numbers = #tpu.dot_dimension_numbers<[1], [0], [0], [1], [0, 0, 1, 1], [], []>} : vector<1x64xf32>, vector<64x256xf32>, vector<1x256xf32> -> vector<1x256xf32>
    %770 = arith.addf %768, %769 : vector<1x256xf32>
    %771 = arith.addf %770, %105 : vector<1x256xf32>
    %772 = vector.extract_strided_slice %771 {offsets = [0, 0], sizes = [1, 64], strides = [1, 1]} : vector<1x256xf32> to vector<1x64xf32>
    %773 = arith.negf %772 : vector<1x64xf32>
    %774 = math.exp %773 : vector<1x64xf32>
    %cst_247 = arith.constant 1.000000e+00 : f32
    %775 = vector.broadcast %cst_247 : f32 to vector<1x64xf32>
    %776 = arith.addf %775, %774 : vector<1x64xf32>
    %777 = arith.divf %775, %776 : vector<1x64xf32>
    %778 = vector.extract_strided_slice %771 {offsets = [0, 64], sizes = [1, 64], strides = [1, 1]} : vector<1x256xf32> to vector<1x64xf32>
    %779 = arith.negf %778 : vector<1x64xf32>
    %780 = math.exp %779 : vector<1x64xf32>
    %cst_248 = arith.constant 1.000000e+00 : f32
    %781 = vector.broadcast %cst_248 : f32 to vector<1x64xf32>
    %782 = arith.addf %781, %780 : vector<1x64xf32>
    %783 = arith.divf %781, %782 : vector<1x64xf32>
    %784 = vector.extract_strided_slice %771 {offsets = [0, 128], sizes = [1, 64], strides = [1, 1]} : vector<1x256xf32> to vector<1x64xf32>
    %785 = math.tanh %784 : vector<1x64xf32>
    %786 = vector.extract_strided_slice %771 {offsets = [0, 192], sizes = [1, 64], strides = [1, 1]} : vector<1x256xf32> to vector<1x64xf32>
    %787 = arith.negf %786 : vector<1x64xf32>
    %788 = math.exp %787 : vector<1x64xf32>
    %cst_249 = arith.constant 1.000000e+00 : f32
    %789 = vector.broadcast %cst_249 : f32 to vector<1x64xf32>
    %790 = arith.addf %789, %788 : vector<1x64xf32>
    %791 = arith.divf %789, %790 : vector<1x64xf32>
    %792 = arith.mulf %783, %764 : vector<1x64xf32>
    %793 = arith.mulf %777, %785 : vector<1x64xf32>
    %794 = arith.addf %792, %793 : vector<1x64xf32>
    %795 = math.tanh %794 : vector<1x64xf32>
    %796 = arith.mulf %791, %795 : vector<1x64xf32>
    %c22_250 = arith.constant 22 : index
    %c0_251 = arith.constant 0 : index
    %797 = vector.load %arg19[%c22_250, %c0_251] : memref<32x64xf32, #tpu.memory_space<vmem>>, vector<1x64xf32>
    tpu.vector_store %arg19[%c22_250, %c0_251], %796 {strides = array<i32>} : memref<32x64xf32, #tpu.memory_space<vmem>>, vector<1x64xf32>,
    %c23 = arith.constant 23 : index
    %c0_252 = arith.constant 0 : index
    %798 = vector.load %arg18[%c23, %c0_252] : memref<32x256xf32, #tpu.memory_space<vmem>>, vector<1x256xf32>
    %cst_253 = arith.constant dense<0.000000e+00> : vector<1x256xf32>
    %799 = tpu.matmul %796, %104, %cst_253 {dimension_numbers = #tpu.dot_dimension_numbers<[1], [0], [0], [1], [0, 0, 1, 1], [], []>} : vector<1x64xf32>, vector<64x256xf32>, vector<1x256xf32> -> vector<1x256xf32>
    %800 = arith.addf %798, %799 : vector<1x256xf32>
    %801 = arith.addf %800, %105 : vector<1x256xf32>
    %802 = vector.extract_strided_slice %801 {offsets = [0, 0], sizes = [1, 64], strides = [1, 1]} : vector<1x256xf32> to vector<1x64xf32>
    %803 = arith.negf %802 : vector<1x64xf32>
    %804 = math.exp %803 : vector<1x64xf32>
    %cst_254 = arith.constant 1.000000e+00 : f32
    %805 = vector.broadcast %cst_254 : f32 to vector<1x64xf32>
    %806 = arith.addf %805, %804 : vector<1x64xf32>
    %807 = arith.divf %805, %806 : vector<1x64xf32>
    %808 = vector.extract_strided_slice %801 {offsets = [0, 64], sizes = [1, 64], strides = [1, 1]} : vector<1x256xf32> to vector<1x64xf32>
    %809 = arith.negf %808 : vector<1x64xf32>
    %810 = math.exp %809 : vector<1x64xf32>
    %cst_255 = arith.constant 1.000000e+00 : f32
    %811 = vector.broadcast %cst_255 : f32 to vector<1x64xf32>
    %812 = arith.addf %811, %810 : vector<1x64xf32>
    %813 = arith.divf %811, %812 : vector<1x64xf32>
    %814 = vector.extract_strided_slice %801 {offsets = [0, 128], sizes = [1, 64], strides = [1, 1]} : vector<1x256xf32> to vector<1x64xf32>
    %815 = math.tanh %814 : vector<1x64xf32>
    %816 = vector.extract_strided_slice %801 {offsets = [0, 192], sizes = [1, 64], strides = [1, 1]} : vector<1x256xf32> to vector<1x64xf32>
    %817 = arith.negf %816 : vector<1x64xf32>
    %818 = math.exp %817 : vector<1x64xf32>
    %cst_256 = arith.constant 1.000000e+00 : f32
    %819 = vector.broadcast %cst_256 : f32 to vector<1x64xf32>
    %820 = arith.addf %819, %818 : vector<1x64xf32>
    %821 = arith.divf %819, %820 : vector<1x64xf32>
    %822 = arith.mulf %813, %794 : vector<1x64xf32>
    %823 = arith.mulf %807, %815 : vector<1x64xf32>
    %824 = arith.addf %822, %823 : vector<1x64xf32>
    %825 = math.tanh %824 : vector<1x64xf32>
    %826 = arith.mulf %821, %825 : vector<1x64xf32>
    %c23_257 = arith.constant 23 : index
    %c0_258 = arith.constant 0 : index
    %827 = vector.load %arg19[%c23_257, %c0_258] : memref<32x64xf32, #tpu.memory_space<vmem>>, vector<1x64xf32>
    tpu.vector_store %arg19[%c23_257, %c0_258], %826 {strides = array<i32>} : memref<32x64xf32, #tpu.memory_space<vmem>>, vector<1x64xf32>,
    %c24 = arith.constant 24 : index
    %c0_259 = arith.constant 0 : index
    %828 = vector.load %arg18[%c24, %c0_259] : memref<32x256xf32, #tpu.memory_space<vmem>>, vector<1x256xf32>
    %cst_260 = arith.constant dense<0.000000e+00> : vector<1x256xf32>
    %829 = tpu.matmul %826, %104, %cst_260 {dimension_numbers = #tpu.dot_dimension_numbers<[1], [0], [0], [1], [0, 0, 1, 1], [], []>} : vector<1x64xf32>, vector<64x256xf32>, vector<1x256xf32> -> vector<1x256xf32>
    %830 = arith.addf %828, %829 : vector<1x256xf32>
    %831 = arith.addf %830, %105 : vector<1x256xf32>
    %832 = vector.extract_strided_slice %831 {offsets = [0, 0], sizes = [1, 64], strides = [1, 1]} : vector<1x256xf32> to vector<1x64xf32>
    %833 = arith.negf %832 : vector<1x64xf32>
    %834 = math.exp %833 : vector<1x64xf32>
    %cst_261 = arith.constant 1.000000e+00 : f32
    %835 = vector.broadcast %cst_261 : f32 to vector<1x64xf32>
    %836 = arith.addf %835, %834 : vector<1x64xf32>
    %837 = arith.divf %835, %836 : vector<1x64xf32>
    %838 = vector.extract_strided_slice %831 {offsets = [0, 64], sizes = [1, 64], strides = [1, 1]} : vector<1x256xf32> to vector<1x64xf32>
    %839 = arith.negf %838 : vector<1x64xf32>
    %840 = math.exp %839 : vector<1x64xf32>
    %cst_262 = arith.constant 1.000000e+00 : f32
    %841 = vector.broadcast %cst_262 : f32 to vector<1x64xf32>
    %842 = arith.addf %841, %840 : vector<1x64xf32>
    %843 = arith.divf %841, %842 : vector<1x64xf32>
    %844 = vector.extract_strided_slice %831 {offsets = [0, 128], sizes = [1, 64], strides = [1, 1]} : vector<1x256xf32> to vector<1x64xf32>
    %845 = math.tanh %844 : vector<1x64xf32>
    %846 = vector.extract_strided_slice %831 {offsets = [0, 192], sizes = [1, 64], strides = [1, 1]} : vector<1x256xf32> to vector<1x64xf32>
    %847 = arith.negf %846 : vector<1x64xf32>
    %848 = math.exp %847 : vector<1x64xf32>
    %cst_263 = arith.constant 1.000000e+00 : f32
    %849 = vector.broadcast %cst_263 : f32 to vector<1x64xf32>
    %850 = arith.addf %849, %848 : vector<1x64xf32>
    %851 = arith.divf %849, %850 : vector<1x64xf32>
    %852 = arith.mulf %843, %824 : vector<1x64xf32>
    %853 = arith.mulf %837, %845 : vector<1x64xf32>
    %854 = arith.addf %852, %853 : vector<1x64xf32>
    %855 = math.tanh %854 : vector<1x64xf32>
    %856 = arith.mulf %851, %855 : vector<1x64xf32>
    %c24_264 = arith.constant 24 : index
    %c0_265 = arith.constant 0 : index
    %857 = vector.load %arg19[%c24_264, %c0_265] : memref<32x64xf32, #tpu.memory_space<vmem>>, vector<1x64xf32>
    tpu.vector_store %arg19[%c24_264, %c0_265], %856 {strides = array<i32>} : memref<32x64xf32, #tpu.memory_space<vmem>>, vector<1x64xf32>,
    %c25 = arith.constant 25 : index
    %c0_266 = arith.constant 0 : index
    %858 = vector.load %arg18[%c25, %c0_266] : memref<32x256xf32, #tpu.memory_space<vmem>>, vector<1x256xf32>
    %cst_267 = arith.constant dense<0.000000e+00> : vector<1x256xf32>
    %859 = tpu.matmul %856, %104, %cst_267 {dimension_numbers = #tpu.dot_dimension_numbers<[1], [0], [0], [1], [0, 0, 1, 1], [], []>} : vector<1x64xf32>, vector<64x256xf32>, vector<1x256xf32> -> vector<1x256xf32>
    %860 = arith.addf %858, %859 : vector<1x256xf32>
    %861 = arith.addf %860, %105 : vector<1x256xf32>
    %862 = vector.extract_strided_slice %861 {offsets = [0, 0], sizes = [1, 64], strides = [1, 1]} : vector<1x256xf32> to vector<1x64xf32>
    %863 = arith.negf %862 : vector<1x64xf32>
    %864 = math.exp %863 : vector<1x64xf32>
    %cst_268 = arith.constant 1.000000e+00 : f32
    %865 = vector.broadcast %cst_268 : f32 to vector<1x64xf32>
    %866 = arith.addf %865, %864 : vector<1x64xf32>
    %867 = arith.divf %865, %866 : vector<1x64xf32>
    %868 = vector.extract_strided_slice %861 {offsets = [0, 64], sizes = [1, 64], strides = [1, 1]} : vector<1x256xf32> to vector<1x64xf32>
    %869 = arith.negf %868 : vector<1x64xf32>
    %870 = math.exp %869 : vector<1x64xf32>
    %cst_269 = arith.constant 1.000000e+00 : f32
    %871 = vector.broadcast %cst_269 : f32 to vector<1x64xf32>
    %872 = arith.addf %871, %870 : vector<1x64xf32>
    %873 = arith.divf %871, %872 : vector<1x64xf32>
    %874 = vector.extract_strided_slice %861 {offsets = [0, 128], sizes = [1, 64], strides = [1, 1]} : vector<1x256xf32> to vector<1x64xf32>
    %875 = math.tanh %874 : vector<1x64xf32>
    %876 = vector.extract_strided_slice %861 {offsets = [0, 192], sizes = [1, 64], strides = [1, 1]} : vector<1x256xf32> to vector<1x64xf32>
    %877 = arith.negf %876 : vector<1x64xf32>
    %878 = math.exp %877 : vector<1x64xf32>
    %cst_270 = arith.constant 1.000000e+00 : f32
    %879 = vector.broadcast %cst_270 : f32 to vector<1x64xf32>
    %880 = arith.addf %879, %878 : vector<1x64xf32>
    %881 = arith.divf %879, %880 : vector<1x64xf32>
    %882 = arith.mulf %873, %854 : vector<1x64xf32>
    %883 = arith.mulf %867, %875 : vector<1x64xf32>
    %884 = arith.addf %882, %883 : vector<1x64xf32>
    %885 = math.tanh %884 : vector<1x64xf32>
    %886 = arith.mulf %881, %885 : vector<1x64xf32>
    %c25_271 = arith.constant 25 : index
    %c0_272 = arith.constant 0 : index
    %887 = vector.load %arg19[%c25_271, %c0_272] : memref<32x64xf32, #tpu.memory_space<vmem>>, vector<1x64xf32>
    tpu.vector_store %arg19[%c25_271, %c0_272], %886 {strides = array<i32>} : memref<32x64xf32, #tpu.memory_space<vmem>>, vector<1x64xf32>,
    %c26 = arith.constant 26 : index
    %c0_273 = arith.constant 0 : index
    %888 = vector.load %arg18[%c26, %c0_273] : memref<32x256xf32, #tpu.memory_space<vmem>>, vector<1x256xf32>
    %cst_274 = arith.constant dense<0.000000e+00> : vector<1x256xf32>
    %889 = tpu.matmul %886, %104, %cst_274 {dimension_numbers = #tpu.dot_dimension_numbers<[1], [0], [0], [1], [0, 0, 1, 1], [], []>} : vector<1x64xf32>, vector<64x256xf32>, vector<1x256xf32> -> vector<1x256xf32>
    %890 = arith.addf %888, %889 : vector<1x256xf32>
    %891 = arith.addf %890, %105 : vector<1x256xf32>
    %892 = vector.extract_strided_slice %891 {offsets = [0, 0], sizes = [1, 64], strides = [1, 1]} : vector<1x256xf32> to vector<1x64xf32>
    %893 = arith.negf %892 : vector<1x64xf32>
    %894 = math.exp %893 : vector<1x64xf32>
    %cst_275 = arith.constant 1.000000e+00 : f32
    %895 = vector.broadcast %cst_275 : f32 to vector<1x64xf32>
    %896 = arith.addf %895, %894 : vector<1x64xf32>
    %897 = arith.divf %895, %896 : vector<1x64xf32>
    %898 = vector.extract_strided_slice %891 {offsets = [0, 64], sizes = [1, 64], strides = [1, 1]} : vector<1x256xf32> to vector<1x64xf32>
    %899 = arith.negf %898 : vector<1x64xf32>
    %900 = math.exp %899 : vector<1x64xf32>
    %cst_276 = arith.constant 1.000000e+00 : f32
    %901 = vector.broadcast %cst_276 : f32 to vector<1x64xf32>
    %902 = arith.addf %901, %900 : vector<1x64xf32>
    %903 = arith.divf %901, %902 : vector<1x64xf32>
    %904 = vector.extract_strided_slice %891 {offsets = [0, 128], sizes = [1, 64], strides = [1, 1]} : vector<1x256xf32> to vector<1x64xf32>
    %905 = math.tanh %904 : vector<1x64xf32>
    %906 = vector.extract_strided_slice %891 {offsets = [0, 192], sizes = [1, 64], strides = [1, 1]} : vector<1x256xf32> to vector<1x64xf32>
    %907 = arith.negf %906 : vector<1x64xf32>
    %908 = math.exp %907 : vector<1x64xf32>
    %cst_277 = arith.constant 1.000000e+00 : f32
    %909 = vector.broadcast %cst_277 : f32 to vector<1x64xf32>
    %910 = arith.addf %909, %908 : vector<1x64xf32>
    %911 = arith.divf %909, %910 : vector<1x64xf32>
    %912 = arith.mulf %903, %884 : vector<1x64xf32>
    %913 = arith.mulf %897, %905 : vector<1x64xf32>
    %914 = arith.addf %912, %913 : vector<1x64xf32>
    %915 = math.tanh %914 : vector<1x64xf32>
    %916 = arith.mulf %911, %915 : vector<1x64xf32>
    %c26_278 = arith.constant 26 : index
    %c0_279 = arith.constant 0 : index
    %917 = vector.load %arg19[%c26_278, %c0_279] : memref<32x64xf32, #tpu.memory_space<vmem>>, vector<1x64xf32>
    tpu.vector_store %arg19[%c26_278, %c0_279], %916 {strides = array<i32>} : memref<32x64xf32, #tpu.memory_space<vmem>>, vector<1x64xf32>,
    %c27 = arith.constant 27 : index
    %c0_280 = arith.constant 0 : index
    %918 = vector.load %arg18[%c27, %c0_280] : memref<32x256xf32, #tpu.memory_space<vmem>>, vector<1x256xf32>
    %cst_281 = arith.constant dense<0.000000e+00> : vector<1x256xf32>
    %919 = tpu.matmul %916, %104, %cst_281 {dimension_numbers = #tpu.dot_dimension_numbers<[1], [0], [0], [1], [0, 0, 1, 1], [], []>} : vector<1x64xf32>, vector<64x256xf32>, vector<1x256xf32> -> vector<1x256xf32>
    %920 = arith.addf %918, %919 : vector<1x256xf32>
    %921 = arith.addf %920, %105 : vector<1x256xf32>
    %922 = vector.extract_strided_slice %921 {offsets = [0, 0], sizes = [1, 64], strides = [1, 1]} : vector<1x256xf32> to vector<1x64xf32>
    %923 = arith.negf %922 : vector<1x64xf32>
    %924 = math.exp %923 : vector<1x64xf32>
    %cst_282 = arith.constant 1.000000e+00 : f32
    %925 = vector.broadcast %cst_282 : f32 to vector<1x64xf32>
    %926 = arith.addf %925, %924 : vector<1x64xf32>
    %927 = arith.divf %925, %926 : vector<1x64xf32>
    %928 = vector.extract_strided_slice %921 {offsets = [0, 64], sizes = [1, 64], strides = [1, 1]} : vector<1x256xf32> to vector<1x64xf32>
    %929 = arith.negf %928 : vector<1x64xf32>
    %930 = math.exp %929 : vector<1x64xf32>
    %cst_283 = arith.constant 1.000000e+00 : f32
    %931 = vector.broadcast %cst_283 : f32 to vector<1x64xf32>
    %932 = arith.addf %931, %930 : vector<1x64xf32>
    %933 = arith.divf %931, %932 : vector<1x64xf32>
    %934 = vector.extract_strided_slice %921 {offsets = [0, 128], sizes = [1, 64], strides = [1, 1]} : vector<1x256xf32> to vector<1x64xf32>
    %935 = math.tanh %934 : vector<1x64xf32>
    %936 = vector.extract_strided_slice %921 {offsets = [0, 192], sizes = [1, 64], strides = [1, 1]} : vector<1x256xf32> to vector<1x64xf32>
    %937 = arith.negf %936 : vector<1x64xf32>
    %938 = math.exp %937 : vector<1x64xf32>
    %cst_284 = arith.constant 1.000000e+00 : f32
    %939 = vector.broadcast %cst_284 : f32 to vector<1x64xf32>
    %940 = arith.addf %939, %938 : vector<1x64xf32>
    %941 = arith.divf %939, %940 : vector<1x64xf32>
    %942 = arith.mulf %933, %914 : vector<1x64xf32>
    %943 = arith.mulf %927, %935 : vector<1x64xf32>
    %944 = arith.addf %942, %943 : vector<1x64xf32>
    %945 = math.tanh %944 : vector<1x64xf32>
    %946 = arith.mulf %941, %945 : vector<1x64xf32>
    %c27_285 = arith.constant 27 : index
    %c0_286 = arith.constant 0 : index
    %947 = vector.load %arg19[%c27_285, %c0_286] : memref<32x64xf32, #tpu.memory_space<vmem>>, vector<1x64xf32>
    tpu.vector_store %arg19[%c27_285, %c0_286], %946 {strides = array<i32>} : memref<32x64xf32, #tpu.memory_space<vmem>>, vector<1x64xf32>,
    %c28 = arith.constant 28 : index
    %c0_287 = arith.constant 0 : index
    %948 = vector.load %arg18[%c28, %c0_287] : memref<32x256xf32, #tpu.memory_space<vmem>>, vector<1x256xf32>
    %cst_288 = arith.constant dense<0.000000e+00> : vector<1x256xf32>
    %949 = tpu.matmul %946, %104, %cst_288 {dimension_numbers = #tpu.dot_dimension_numbers<[1], [0], [0], [1], [0, 0, 1, 1], [], []>} : vector<1x64xf32>, vector<64x256xf32>, vector<1x256xf32> -> vector<1x256xf32>
    %950 = arith.addf %948, %949 : vector<1x256xf32>
    %951 = arith.addf %950, %105 : vector<1x256xf32>
    %952 = vector.extract_strided_slice %951 {offsets = [0, 0], sizes = [1, 64], strides = [1, 1]} : vector<1x256xf32> to vector<1x64xf32>
    %953 = arith.negf %952 : vector<1x64xf32>
    %954 = math.exp %953 : vector<1x64xf32>
    %cst_289 = arith.constant 1.000000e+00 : f32
    %955 = vector.broadcast %cst_289 : f32 to vector<1x64xf32>
    %956 = arith.addf %955, %954 : vector<1x64xf32>
    %957 = arith.divf %955, %956 : vector<1x64xf32>
    %958 = vector.extract_strided_slice %951 {offsets = [0, 64], sizes = [1, 64], strides = [1, 1]} : vector<1x256xf32> to vector<1x64xf32>
    %959 = arith.negf %958 : vector<1x64xf32>
    %960 = math.exp %959 : vector<1x64xf32>
    %cst_290 = arith.constant 1.000000e+00 : f32
    %961 = vector.broadcast %cst_290 : f32 to vector<1x64xf32>
    %962 = arith.addf %961, %960 : vector<1x64xf32>
    %963 = arith.divf %961, %962 : vector<1x64xf32>
    %964 = vector.extract_strided_slice %951 {offsets = [0, 128], sizes = [1, 64], strides = [1, 1]} : vector<1x256xf32> to vector<1x64xf32>
    %965 = math.tanh %964 : vector<1x64xf32>
    %966 = vector.extract_strided_slice %951 {offsets = [0, 192], sizes = [1, 64], strides = [1, 1]} : vector<1x256xf32> to vector<1x64xf32>
    %967 = arith.negf %966 : vector<1x64xf32>
    %968 = math.exp %967 : vector<1x64xf32>
    %cst_291 = arith.constant 1.000000e+00 : f32
    %969 = vector.broadcast %cst_291 : f32 to vector<1x64xf32>
    %970 = arith.addf %969, %968 : vector<1x64xf32>
    %971 = arith.divf %969, %970 : vector<1x64xf32>
    %972 = arith.mulf %963, %944 : vector<1x64xf32>
    %973 = arith.mulf %957, %965 : vector<1x64xf32>
    %974 = arith.addf %972, %973 : vector<1x64xf32>
    %975 = math.tanh %974 : vector<1x64xf32>
    %976 = arith.mulf %971, %975 : vector<1x64xf32>
    %c28_292 = arith.constant 28 : index
    %c0_293 = arith.constant 0 : index
    %977 = vector.load %arg19[%c28_292, %c0_293] : memref<32x64xf32, #tpu.memory_space<vmem>>, vector<1x64xf32>
    tpu.vector_store %arg19[%c28_292, %c0_293], %976 {strides = array<i32>} : memref<32x64xf32, #tpu.memory_space<vmem>>, vector<1x64xf32>,
    %c29 = arith.constant 29 : index
    %c0_294 = arith.constant 0 : index
    %978 = vector.load %arg18[%c29, %c0_294] : memref<32x256xf32, #tpu.memory_space<vmem>>, vector<1x256xf32>
    %cst_295 = arith.constant dense<0.000000e+00> : vector<1x256xf32>
    %979 = tpu.matmul %976, %104, %cst_295 {dimension_numbers = #tpu.dot_dimension_numbers<[1], [0], [0], [1], [0, 0, 1, 1], [], []>} : vector<1x64xf32>, vector<64x256xf32>, vector<1x256xf32> -> vector<1x256xf32>
    %980 = arith.addf %978, %979 : vector<1x256xf32>
    %981 = arith.addf %980, %105 : vector<1x256xf32>
    %982 = vector.extract_strided_slice %981 {offsets = [0, 0], sizes = [1, 64], strides = [1, 1]} : vector<1x256xf32> to vector<1x64xf32>
    %983 = arith.negf %982 : vector<1x64xf32>
    %984 = math.exp %983 : vector<1x64xf32>
    %cst_296 = arith.constant 1.000000e+00 : f32
    %985 = vector.broadcast %cst_296 : f32 to vector<1x64xf32>
    %986 = arith.addf %985, %984 : vector<1x64xf32>
    %987 = arith.divf %985, %986 : vector<1x64xf32>
    %988 = vector.extract_strided_slice %981 {offsets = [0, 64], sizes = [1, 64], strides = [1, 1]} : vector<1x256xf32> to vector<1x64xf32>
    %989 = arith.negf %988 : vector<1x64xf32>
    %990 = math.exp %989 : vector<1x64xf32>
    %cst_297 = arith.constant 1.000000e+00 : f32
    %991 = vector.broadcast %cst_297 : f32 to vector<1x64xf32>
    %992 = arith.addf %991, %990 : vector<1x64xf32>
    %993 = arith.divf %991, %992 : vector<1x64xf32>
    %994 = vector.extract_strided_slice %981 {offsets = [0, 128], sizes = [1, 64], strides = [1, 1]} : vector<1x256xf32> to vector<1x64xf32>
    %995 = math.tanh %994 : vector<1x64xf32>
    %996 = vector.extract_strided_slice %981 {offsets = [0, 192], sizes = [1, 64], strides = [1, 1]} : vector<1x256xf32> to vector<1x64xf32>
    %997 = arith.negf %996 : vector<1x64xf32>
    %998 = math.exp %997 : vector<1x64xf32>
    %cst_298 = arith.constant 1.000000e+00 : f32
    %999 = vector.broadcast %cst_298 : f32 to vector<1x64xf32>
    %1000 = arith.addf %999, %998 : vector<1x64xf32>
    %1001 = arith.divf %999, %1000 : vector<1x64xf32>
    %1002 = arith.mulf %993, %974 : vector<1x64xf32>
    %1003 = arith.mulf %987, %995 : vector<1x64xf32>
    %1004 = arith.addf %1002, %1003 : vector<1x64xf32>
    %1005 = math.tanh %1004 : vector<1x64xf32>
    %1006 = arith.mulf %1001, %1005 : vector<1x64xf32>
    %c29_299 = arith.constant 29 : index
    %c0_300 = arith.constant 0 : index
    %1007 = vector.load %arg19[%c29_299, %c0_300] : memref<32x64xf32, #tpu.memory_space<vmem>>, vector<1x64xf32>
    tpu.vector_store %arg19[%c29_299, %c0_300], %1006 {strides = array<i32>} : memref<32x64xf32, #tpu.memory_space<vmem>>, vector<1x64xf32>,
    %c30 = arith.constant 30 : index
    %c0_301 = arith.constant 0 : index
    %1008 = vector.load %arg18[%c30, %c0_301] : memref<32x256xf32, #tpu.memory_space<vmem>>, vector<1x256xf32>
    %cst_302 = arith.constant dense<0.000000e+00> : vector<1x256xf32>
    %1009 = tpu.matmul %1006, %104, %cst_302 {dimension_numbers = #tpu.dot_dimension_numbers<[1], [0], [0], [1], [0, 0, 1, 1], [], []>} : vector<1x64xf32>, vector<64x256xf32>, vector<1x256xf32> -> vector<1x256xf32>
    %1010 = arith.addf %1008, %1009 : vector<1x256xf32>
    %1011 = arith.addf %1010, %105 : vector<1x256xf32>
    %1012 = vector.extract_strided_slice %1011 {offsets = [0, 0], sizes = [1, 64], strides = [1, 1]} : vector<1x256xf32> to vector<1x64xf32>
    %1013 = arith.negf %1012 : vector<1x64xf32>
    %1014 = math.exp %1013 : vector<1x64xf32>
    %cst_303 = arith.constant 1.000000e+00 : f32
    %1015 = vector.broadcast %cst_303 : f32 to vector<1x64xf32>
    %1016 = arith.addf %1015, %1014 : vector<1x64xf32>
    %1017 = arith.divf %1015, %1016 : vector<1x64xf32>
    %1018 = vector.extract_strided_slice %1011 {offsets = [0, 64], sizes = [1, 64], strides = [1, 1]} : vector<1x256xf32> to vector<1x64xf32>
    %1019 = arith.negf %1018 : vector<1x64xf32>
    %1020 = math.exp %1019 : vector<1x64xf32>
    %cst_304 = arith.constant 1.000000e+00 : f32
    %1021 = vector.broadcast %cst_304 : f32 to vector<1x64xf32>
    %1022 = arith.addf %1021, %1020 : vector<1x64xf32>
    %1023 = arith.divf %1021, %1022 : vector<1x64xf32>
    %1024 = vector.extract_strided_slice %1011 {offsets = [0, 128], sizes = [1, 64], strides = [1, 1]} : vector<1x256xf32> to vector<1x64xf32>
    %1025 = math.tanh %1024 : vector<1x64xf32>
    %1026 = vector.extract_strided_slice %1011 {offsets = [0, 192], sizes = [1, 64], strides = [1, 1]} : vector<1x256xf32> to vector<1x64xf32>
    %1027 = arith.negf %1026 : vector<1x64xf32>
    %1028 = math.exp %1027 : vector<1x64xf32>
    %cst_305 = arith.constant 1.000000e+00 : f32
    %1029 = vector.broadcast %cst_305 : f32 to vector<1x64xf32>
    %1030 = arith.addf %1029, %1028 : vector<1x64xf32>
    %1031 = arith.divf %1029, %1030 : vector<1x64xf32>
    %1032 = arith.mulf %1023, %1004 : vector<1x64xf32>
    %1033 = arith.mulf %1017, %1025 : vector<1x64xf32>
    %1034 = arith.addf %1032, %1033 : vector<1x64xf32>
    %1035 = math.tanh %1034 : vector<1x64xf32>
    %1036 = arith.mulf %1031, %1035 : vector<1x64xf32>
    %c30_306 = arith.constant 30 : index
    %c0_307 = arith.constant 0 : index
    %1037 = vector.load %arg19[%c30_306, %c0_307] : memref<32x64xf32, #tpu.memory_space<vmem>>, vector<1x64xf32>
    tpu.vector_store %arg19[%c30_306, %c0_307], %1036 {strides = array<i32>} : memref<32x64xf32, #tpu.memory_space<vmem>>, vector<1x64xf32>,
    %c31 = arith.constant 31 : index
    %c0_308 = arith.constant 0 : index
    %1038 = vector.load %arg18[%c31, %c0_308] : memref<32x256xf32, #tpu.memory_space<vmem>>, vector<1x256xf32>
    %cst_309 = arith.constant dense<0.000000e+00> : vector<1x256xf32>
    %1039 = tpu.matmul %1036, %104, %cst_309 {dimension_numbers = #tpu.dot_dimension_numbers<[1], [0], [0], [1], [0, 0, 1, 1], [], []>} : vector<1x64xf32>, vector<64x256xf32>, vector<1x256xf32> -> vector<1x256xf32>
    %1040 = arith.addf %1038, %1039 : vector<1x256xf32>
    %1041 = arith.addf %1040, %105 : vector<1x256xf32>
    %1042 = vector.extract_strided_slice %1041 {offsets = [0, 0], sizes = [1, 64], strides = [1, 1]} : vector<1x256xf32> to vector<1x64xf32>
    %1043 = arith.negf %1042 : vector<1x64xf32>
    %1044 = math.exp %1043 : vector<1x64xf32>
    %cst_310 = arith.constant 1.000000e+00 : f32
    %1045 = vector.broadcast %cst_310 : f32 to vector<1x64xf32>
    %1046 = arith.addf %1045, %1044 : vector<1x64xf32>
    %1047 = arith.divf %1045, %1046 : vector<1x64xf32>
    %1048 = vector.extract_strided_slice %1041 {offsets = [0, 64], sizes = [1, 64], strides = [1, 1]} : vector<1x256xf32> to vector<1x64xf32>
    %1049 = arith.negf %1048 : vector<1x64xf32>
    %1050 = math.exp %1049 : vector<1x64xf32>
    %cst_311 = arith.constant 1.000000e+00 : f32
    %1051 = vector.broadcast %cst_311 : f32 to vector<1x64xf32>
    %1052 = arith.addf %1051, %1050 : vector<1x64xf32>
    %1053 = arith.divf %1051, %1052 : vector<1x64xf32>
    %1054 = vector.extract_strided_slice %1041 {offsets = [0, 128], sizes = [1, 64], strides = [1, 1]} : vector<1x256xf32> to vector<1x64xf32>
    %1055 = math.tanh %1054 : vector<1x64xf32>
    %1056 = vector.extract_strided_slice %1041 {offsets = [0, 192], sizes = [1, 64], strides = [1, 1]} : vector<1x256xf32> to vector<1x64xf32>
    %1057 = arith.negf %1056 : vector<1x64xf32>
    %1058 = math.exp %1057 : vector<1x64xf32>
    %cst_312 = arith.constant 1.000000e+00 : f32
    %1059 = vector.broadcast %cst_312 : f32 to vector<1x64xf32>
    %1060 = arith.addf %1059, %1058 : vector<1x64xf32>
    %1061 = arith.divf %1059, %1060 : vector<1x64xf32>
    %1062 = arith.mulf %1053, %1034 : vector<1x64xf32>
    %1063 = arith.mulf %1047, %1055 : vector<1x64xf32>
    %1064 = arith.addf %1062, %1063 : vector<1x64xf32>
    %1065 = math.tanh %1064 : vector<1x64xf32>
    %1066 = arith.mulf %1061, %1065 : vector<1x64xf32>
    %c31_313 = arith.constant 31 : index
    %c0_314 = arith.constant 0 : index
    %1067 = vector.load %arg19[%c31_313, %c0_314] : memref<32x64xf32, #tpu.memory_space<vmem>>, vector<1x64xf32>
    tpu.vector_store %arg19[%c31_313, %c0_314], %1066 {strides = array<i32>} : memref<32x64xf32, #tpu.memory_space<vmem>>, vector<1x64xf32>,
    %c0_315 = arith.constant 0 : index
    %c0_316 = arith.constant 0 : index
    %1068 = vector.load %arg13[%c0_315, %c0_316] : memref<64x64xf32, #tpu.memory_space<vmem>>, vector<64x64xf32>
    %cst_317 = arith.constant dense<0.000000e+00> : vector<1x64xf32>
    %1069 = tpu.matmul %1064, %1068, %cst_317 {dimension_numbers = #tpu.dot_dimension_numbers<[1], [0], [0], [1], [0, 0, 1, 1], [], []>} : vector<1x64xf32>, vector<64x64xf32>, vector<1x64xf32> -> vector<1x64xf32>
    %1070 = math.tanh %1069 : vector<1x64xf32>
    %1071 = vector.extract_strided_slice %1070 {offsets = [0, 0], sizes = [1, 32], strides = [1, 1]} : vector<1x64xf32> to vector<1x32xf32>
    %c0_318 = arith.constant 0 : index
    %c0_319 = arith.constant 0 : index
    %1072 = vector.load %arg19[%c0_318, %c0_319] : memref<32x64xf32, #tpu.memory_space<vmem>>, vector<32x32xf32>
    %cst_320 = arith.constant dense<0.000000e+00> : vector<1x32xf32>
    %1073 = tpu.matmul %1071, %1072, %cst_320 {dimension_numbers = #tpu.dot_dimension_numbers<[1], [0], [0], [1], [0, 0, 1, 1], [], []>} : vector<1x32xf32>, vector<32x32xf32>, vector<1x32xf32> -> vector<1x32xf32>
    %1074 = vector.extract_strided_slice %1070 {offsets = [0, 32], sizes = [1, 32], strides = [1, 1]} : vector<1x64xf32> to vector<1x32xf32>
    %c0_321 = arith.constant 0 : index
    %c32_322 = arith.constant 32 : index
    %1075 = vector.load %arg19[%c0_321, %c32_322] : memref<32x64xf32, #tpu.memory_space<vmem>>, vector<32x32xf32>
    %cst_323 = arith.constant dense<0.000000e+00> : vector<1x32xf32>
    %1076 = tpu.matmul %1074, %1075, %cst_323 {dimension_numbers = #tpu.dot_dimension_numbers<[1], [0], [0], [1], [0, 0, 1, 1], [], []>} : vector<1x32xf32>, vector<32x32xf32>, vector<1x32xf32> -> vector<1x32xf32>
    %1077 = tpu.concatenate %1073, %1076 in 0 : vector<1x32xf32>, vector<1x32xf32> -> vector<2x32xf32>
    %c0_324 = arith.constant 0 : index
    %c0_325 = arith.constant 0 : index
    %1078 = vector.load %arg14[%c0_324, %c0_325] : memref<32x4xf32, #tpu.memory_space<vmem>>, vector<32x4xf32>
    %cst_326 = arith.constant dense<0.000000e+00> : vector<2x4xf32>
    %1079 = tpu.matmul %1077, %1078, %cst_326 {dimension_numbers = #tpu.dot_dimension_numbers<[1], [0], [0], [1], [0, 0, 1, 1], [], []>} : vector<2x32xf32>, vector<32x4xf32>, vector<2x4xf32> -> vector<2x4xf32>
    %c0_327 = arith.constant 0 : index
    %c0_328 = arith.constant 0 : index
    %1080 = vector.load %arg15[%c0_327, %c0_328] : memref<1x4xf32, #tpu.memory_space<vmem>>, vector<1x4xf32>
    %1081 = vector.broadcast %1080 : vector<1x4xf32> to vector<2x4xf32>
    %1082 = arith.addf %1079, %1081 : vector<2x4xf32>
    %cst_329 = arith.constant dense<0xFF800000> : vector<2xf32>
    %1083 = vector.multi_reduction <maximumf>, %1082, %cst_329 [1] : vector<2x4xf32> to vector<2xf32>
    %1084 = vector.shape_cast %1083 : vector<2xf32> to vector<2x1xf32>
    %1085 = vector.broadcast %1084 : vector<2x1xf32> to vector<2x4xf32>
    %1086 = arith.subf %1082, %1085 : vector<2x4xf32>
    %1087 = math.exp %1086 : vector<2x4xf32>
    %cst_330 = arith.constant dense<0.000000e+00> : vector<2xf32>
    %1088 = vector.multi_reduction <add>, %1087, %cst_330 [1] : vector<2x4xf32> to vector<2xf32>
    %1089 = vector.shape_cast %1088 : vector<2xf32> to vector<2x1xf32>
    %1090 = vector.broadcast %1089 : vector<2x1xf32> to vector<2x4xf32>
    %1091 = arith.divf %1087, %1090 : vector<2x4xf32>
    %c0_331 = arith.constant 0 : index
    %c0_332 = arith.constant 0 : index
    %1092 = vector.load %arg16[%c0_331, %c0_332] : memref<2x4xf32, #tpu.memory_space<vmem>>, vector<2x4xf32>
    tpu.vector_store %arg16[%c0_331, %c0_332], %1091 {strides = array<i32>} : memref<2x4xf32, #tpu.memory_space<vmem>>, vector<2x4xf32>,
    return
  }
}

</mosaic_0001>

<bundles_post_ra>
// kernel: rnn_attention_forward.1
= control target key start
LH: loop header
LB: loop body
LE: loop exit
PB: predicated region body
PF: predicated region fallthrough
CT: control target
= control target key end

     0   :  { %s10422_s0 = inlined_call_operand.vmem [shape: f32[4,512], index: 0, kind: input, shape index: {}]   ;;  %s10423_s1 = inlined_call_operand.vmem [shape: f32[32,16], index: 1, kind: input, shape index: {}]   ;;  %s10424_s2 = inlined_call_operand.vmem [shape: f32[32,1], index: 2, kind: input, shape index: {}]   ;;  %s10425_s3 = inlined_call_operand.vmem [shape: f32[32,1], index: 3, kind: input, shape index: {}]   ;;  %s10426_s4 = inlined_call_operand.vmem [shape: f32[32,128], index: 4, kind: input, shape index: {}]   ;;  %s10427_s5 = inlined_call_operand.vmem [shape: f32[32,1], index: 5, kind: input, shape index: {}]   ;;  %s10428_s6 = inlined_call_operand.vmem [shape: f32[32,1], index: 6, kind: input, shape index: {}]   ;;  %s10429_s7 = inlined_call_operand.vmem [shape: f32[32,128], index: 7, kind: input, shape index: {}]   ;;  %s10430_s8 = inlined_call_operand.vmem [shape: f32[32,1], index: 8, kind: input, shape index: {}]   ;;  %s10431_s9 = inlined_call_operand.vmem [shape: f32[32,1], index: 9, kind: input, shape index: {}]   ;;  %s10432_s10 = inlined_call_operand.hbm [shape: f32[256,256], index: 10, kind: input, shape index: {}]   ;;  %s10433_s11 = inlined_call_operand.vmem [shape: f32[64,256], index: 11, kind: input, shape index: {}]   ;;  %s10434_s12 = inlined_call_operand.vmem [shape: f32[1,256], index: 12, kind: input, shape index: {}]   ;;  %s10435_s13 = inlined_call_operand.vmem [shape: f32[64,64], index: 13, kind: input, shape index: {}]   ;;  %s10436_s14 = inlined_call_operand.vmem [shape: f32[32,4], index: 14, kind: input, shape index: {}]   ;;  %s10437_s15 = inlined_call_operand.vmem [shape: f32[1,4], index: 15, kind: input, shape index: {}]   ;;  %s10438_s16 = inlined_call_operand.hbm [shape: f32[2,4], index: 16, kind: output, shape index: {}]  }
   0x1   :  { %10440 = sst [smem:[#allocation11_spill]] %s10422_s0 }
   0x2   :  { %21 = vsyncpa [#allocation6], 0 }
   0x3   :  { %22 = vsyncpa [#allocation7], 0  ;;  %s8853_s21 = smov [#allocation5]   ;;  %s8805_s25 = scalar_lea.hbm %s10432_s10, 8192 }
   0x4   :  { %s48_s22 = sshll.u32 %s8853_s21, 4  ;;  %p8806_p0 = scmp.ne.s32.totalorder %s10432_s10, %s8805_s25  ;;  %s49_s22 = int_to_ptr.vmem [resolvable:$true] %s48_s22 }
   0x5   :  { %p8809_p1 = scmp.lt.u32.totalorder %s8805_s25, %s10432_s10 }
   0x7   :  { %p8811_p2 = pnand %p8809_p1, %p8806_p0 }
   0x9   :  { %8814 = shalt.err (!%p8811_p2)
}
   0xa   :  { %s8815_s30 = scalar_lea.vmem %s49_s22, 8192  ;;  %p8820_p4 = scmp.lt.s32.totalorder %s49_s22, %s49_s22 }
   0xb   :  { %p8816_p3 = scmp.ne.s32.totalorder %s49_s22, %s8815_s30  ;;  %p8821_p5 = scmp.lt.s32.totalorder %s8815_s30, %s8815_s30 }
   0xd   :  { %p8822_p6 = por %p8821_p5, %p8820_p4 }
   0xf   :  { %p8823_p7 = pnand %p8822_p6, %p8816_p3 }
  0x11   :  { %8826 = shalt.err (!%p8823_p7)
}
  0x12   :  { %s8854_s0 = smov 256   ;;  %s8855_s17 = smov 16  }
  0x13   :  { %54 = dma.hbm_to_vmem [thread:$0]  %s10432_s10, 8192, %s49_s22, [#allocation6], %s8854_s0, %s8854_s0, %s8855_s17  }
  0x14   :  { %8849 = dma.done.wait [#allocation6], 8192  }
  0x15   :  { %8850 = vsyncadd [#allocation6], 4294959104  ;;  %v8856_v0 = vmov 0.0   ;;  %s10441_s23 = sld [smem:[#allocation11_spill]]  ;;  %s8857_s24 = smov 127   ;;  %v8987_v3 = vld [vmem:[%s10423_s1] sm:$0xff] }
  0x16   :  { %200 = vmatprep.mubr.f32.mxu0 %v8856_v0  ;;  %896 = vmatprep.mubr.f32.mxu1 %v8856_v0  ;;  %s8858_s27 = smov 124   ;;  %v8998_v5 = vld [vmem:[%s10423_s1 + $0x10] sm:$0xff]  ;;  %v9004_v6 = vld [vmem:[%s10423_s1 + $0x8] sm:$0xff]  ;;  %v9011_v7 = vld [vmem:[%s10423_s1 + $0x18] sm:$0xff]  ;;  %s8859_s19 = smov 126   ;;  %v8863_v11 = vmov 0  }
  0x17   :  { %s8860_s10 = smov 120   ;;  %s8861_s25 = smov 125   ;;  %v606_v10 = vld [vmem:[%s10424_s2] sm:$0xff]  ;;  %8072 = vset.pattern.permute.xlu1 %v8863_v11  ;;  %8073 = vset.pattern.permute.xlu0 %v8863_v11  ;;  %v607_v12 = vld [vmem:[%s10424_s2 + $0x8] sm:$0xff]  ;;  %v608_v14 = vld [vmem:[%s10424_s2 + $0x10] sm:$0xff]  ;;  %vm119_vm0 = vcmask 1039360  }
  0x18   :  { %s8862_s26 = smov 116   ;;  %v638_v13 = vld [vmem:[%s10425_s3] sm:$0xff]  ;;  %v639_v15 = vld [vmem:[%s10425_s3 + $0x8] sm:$0xff]  ;;  %v640_v16 = vld [vmem:[%s10425_s3 + $0x10] sm:$0xff]  ;;  %vm131_vm1 = vcmask 1043456   ;;  %vm122_vm2 = vcmask 31744  }
  0x19   :  { %v609_v17 = vld [vmem:[%s10424_s2 + $0x18] sm:$0xff]  ;;  %vm355_vm3 = vcmask 1031168   ;;  %vm494_vm4 = vcmask 1022976   ;;  %s8864_s2 = smov 2   ;;  %s8865_s28 = smov 96   ;;  %vm806_vm7 = vcmask 15360  }
  0x1a   :  { %v641_v18 = vld [vmem:[%s10425_s3 + $0x18] sm:$0xff]  ;;  %s8866_s30 = smov 3   ;;  %s8867_s20 = smov 1   ;;  %vm823_vm8 = vcmask 261120   ;;  %vm945_vm9 = vcmask 23552   ;;  %vm1091_vm10 = vcmask 7168  }
  0x1b   :  { %v8976_v1 = vld [vmem:[%s10441_s23 + $0x4] sm:$0xff]  ;;  %v97_v4 = vld [vmem:[%s10441_s23 + $0xc] sm:$0xf]  ;;  %s8869_s21 = smov 32   ;;  %vm2625_vm13 = vcmask 516096   ;;  %vm2497_vm14 = vcmask 523264  }
  0x1c   :  { %113 = vrot.lane.b32.xlu1 %v8976_v1, %s8857_s24  ;;  %v8982_v2 = vcombine.high %v8976_v1, %v8976_v1  ;;  %v333_v8 = vld [vmem:[%s10441_s23 + $0xc] sm:$0xf]  ;;  %vm8872_vm15 = vmmov 0  }
  0x1d   :  { %v472_v9 = vld [vmem:[%s10441_s23 + $0xc] sm:$0xf] }
  0x1e   :  { %115 = vrot.lane.b32.xlu0 %v8982_v2, %s8857_s24 }
  0x20   :  { %102 = vrot.lane.b32.xlu1 %v8987_v3, %s8858_s27 }
  0x22   :  { %117 = vrot.lane.b32.xlu0 %v97_v4, %s8857_s24 }
  0x24   :  { %106 = vrot.lane.b32.xlu1 %v8998_v5, %s8858_s27 }
  0x26   :  { %104 = vrot.lane.b32.xlu0 %v9004_v6, %s8858_s27 }
  0x28   :  { %351 = vrot.lane.b32.xlu1 %v8982_v2, %s8859_s19 }
  0x2a   :  { %108 = vrot.lane.b32.xlu0 %v9011_v7, %s8858_s27 }
  0x2c   :  { %349 = vrot.lane.b32.xlu1 %v8976_v1, %s8859_s19 }
  0x2e   :  { %353 = vrot.lane.b32.xlu0 %v333_v8, %s8859_s19 }
  0x30   :  { %340 = vrot.lane.b32.xlu1 %v9004_v6, %s8860_s10 }
  0x32   :  { %338 = vrot.lane.b32.xlu0 %v8987_v3, %s8860_s10 }
  0x34   :  { %344 = vrot.lane.b32.xlu1 %v9011_v7, %s8860_s10 }
  0x36   :  { %342 = vrot.lane.b32.xlu0 %v8998_v5, %s8860_s10 }
  0x38   :  { %492 = vrot.lane.b32.xlu1 %v472_v9, %s8861_s25 }
  0x3a   :  { %490 = vrot.lane.b32.xlu0 %v8982_v2, %s8861_s25 }
  0x3c   :  { %477 = vrot.lane.b32.xlu1 %v8987_v3, %s8862_s26 }
  0x3e   :  { %488 = vrot.lane.b32.xlu0 %v8976_v1, %s8861_s25 }
  0x40   :  { %481 = vrot.lane.b32.xlu1 %v8998_v5, %s8862_s26 }
  0x42   :  { %479 = vrot.lane.b32.xlu0 %v9004_v6, %s8862_s26 }
  0x44   :  { %612 = vperm.xlu1 %8072, %v606_v10  }
  0x46   :  { %483 = vrot.lane.b32.xlu0 %v9011_v7, %s8862_s26 }
  0x48   :  { %644 = vperm.xlu1 %8072, %v638_v13  }
  0x4a   :  { %617 = vperm.xlu0 %8073, %v607_v12  }
  0x4c   :  { %649 = vperm.xlu1 %8072, %v639_v15  }
  0x4e   :  { %622 = vperm.xlu0 %8073, %v608_v14  }
  0x50   :  { %627 = vperm.xlu1 %8072, %v609_v17  }
  0x52   :  { %654 = vperm.xlu0 %8073, %v640_v16  }
  0x54   :  { %659 = vperm.xlu1 %8072, %v641_v18  }
  0x56   :  { %8075 = vrot.lane.b32.xlu0 %v8856_v0, %s8864_s2 }
  0x58   :  { %8080 = vrot.lane.b32.xlu1 %v8856_v0, %s8864_s2 }
  0x8e   :  { %v114_v19 = vpop.permute.xlu1 %113 }
  0x90   :  { %v116_v20 = vpop.permute.xlu0 %115 }
  0x91   :  { %v120_v24 = vsel %vm119_vm0, %v114_v19, %v116_v20 }
  0x92   :  { %v103_v21 = vpop.permute.xlu1 %102 }
  0x94   :  { %v118_v22 = vpop.permute.xlu0 %117 }
  0x95   :  { %v121_v23 = vsel %vm119_vm0, %v116_v20, %v118_v22  ;;  %v68_v20 = vlaneseq }
  0x96   :  { %7029 = vmatprep.subr.msk.mxu0 %vm131_vm1, %v121_v23  ;;  %v107_v25 = vpop.permute.xlu1 %106 }
  0x97   :  { %7030 = vmatpush1.msk.msra.mxu0 %vm131_vm1, %v120_v24 }
  0x98   :  { %7031 = vmatmul.mubr.msk.f32.vlgmr.msra.gmra.mrb[0].mxu0 %vm122_vm2, %v103_v21  ;;  %v105_v26 = vpop.permute.xlu0 %104  ;;  %7035 = vmatprep.subr.msk.mxu0 %vm131_vm1, %v8982_v2 }
  0x99   :  { %206 = vmatprep.mubr.f32.mxu0 %v8856_v0  ;;  %7036 = vmatpush1.msk.msra.mxu0 %vm131_vm1, %v8976_v1 }
  0x9a   :  { %v352_v27 = vpop.permute.xlu1 %351 }
  0x9c   :  { %7032 = vmatmul.mubr.msk.f32.gmra.mrb[2].mxu0 %vm122_vm2, %v105_v26  ;;  %v109_v28 = vpop.permute.xlu0 %108 }
  0x9d   :  { %212 = vmatprep.mubr.f32.mxu0 %v8856_v0 }
  0x9e   :  { %v350_v29 = vpop.permute.xlu1 %349 }
  0x9f   :  { %v356_v34 = vsel %vm355_vm3, %v350_v29, %v352_v27 }
  0xa0   :  { %7033 = vmatmul.mubr.msk.f32.gmra.mrb[4].mxu0 %vm122_vm2, %v107_v25  ;;  %v354_v30 = vpop.permute.xlu0 %353 }
  0xa1   :  { %218 = vmatprep.mubr.f32.mxu0 %v8856_v0  ;;  %v357_v31 = vsel %vm355_vm3, %v352_v27, %v354_v30 }
  0xa2   :  { %7041 = vmatprep.subr.msk.mxu0 %vm131_vm1, %v357_v31  ;;  %v341_v32 = vpop.permute.xlu1 %340 }
  0xa4   :  { %7034 = vmatmul.mubr.msk.f32.gmra.mrb[6].mxu0 %vm122_vm2, %v109_v28  ;;  %v339_v33 = vpop.permute.xlu0 %338  ;;  %v9154_v28 = vand.u32 127, %v68_v20 }
  0xa5   :  { %303 = vmatprep.mubr.f32.mxu0 %v8856_v0 }
  0xa6   :  { %v345_v35 = vpop.permute.xlu1 %344  ;;  %vm73_vm5 = vcmp.lt.s32.totalorder %v9154_v28, 67 }
  0xa7   :  { %vm9364_vm12 = vmpackc.low %vm73_vm5, %vm73_vm5 }
  0xa8   :  { %7037 = vmatmul.mubr.msk.f32.vlgmr.msra.gmra.mrb[0].mxu0 %vm122_vm2, %v8987_v3  ;;  %v343_v36 = vpop.permute.xlu0 %342 }
  0xa9   :  { %7042 = vmatpush1.msk.msra.mxu0 %vm131_vm1, %v356_v34  ;;  %309 = vmatprep.mubr.f32.mxu0 %v8856_v0 }
  0xaa   :  { %v493_v37 = vpop.permute.xlu1 %492 }
  0xac   :  { %7038 = vmatmul.mubr.msk.f32.gmra.mrb[2].mxu0 %vm122_vm2, %v9004_v6  ;;  %v491_v38 = vpop.permute.xlu0 %490 }
  0xad   :  { %315 = vmatprep.mubr.f32.mxu0 %v8856_v0  ;;  %v496_v39 = vsel %vm494_vm4, %v491_v38, %v493_v37 }
  0xae   :  { %7047 = vmatprep.subr.msk.mxu0 %vm131_vm1, %v496_v39  ;;  %v478_v42 = vpop.permute.xlu1 %477 }
  0xb0   :  { %7039 = vmatmul.mubr.msk.f32.gmra.mrb[4].mxu0 %vm122_vm2, %v8998_v5  ;;  %v489_v40 = vpop.permute.xlu0 %488 }
  0xb1   :  { %321 = vmatprep.mubr.f32.mxu0 %v8856_v0  ;;  %v495_v41 = vsel %vm494_vm4, %v489_v40, %v491_v38 }
  0xb2   :  { %v482_v44 = vpop.permute.xlu1 %481 }
  0xb4   :  { %7040 = vmatmul.mubr.msk.f32.gmra.mrb[6].mxu0 %vm122_vm2, %v9011_v7  ;;  %v480_v43 = vpop.permute.xlu0 %479 }
  0xb5   :  { %434 = vmatprep.mubr.f32.mxu0 %v8856_v0 }
  0xb8   :  { %7043 = vmatmul.mubr.msk.f32.vlgmr.msra.gmra.mrb[0].mxu0 %vm122_vm2, %v339_v33  ;;  %v484_v45 = vpop.permute.xlu0 %483  ;;  %v70_v33 = vadd.s32 128, %v9154_v28 }
  0xb9   :  { %7048 = vmatpush1.msk.msra.mxu0 %vm131_vm1, %v495_v41  ;;  %440 = vmatprep.mubr.f32.mxu0 %v8856_v0  ;;  %vm7001_vm1 = vcmask 25600  }
  0xba   :  { %v72_v38 = vand.u32 127, %v70_v33  ;;  %v1328_v33 = vld [vmem:[%s10427_s5 + $0x10] sm:$0xff] }
  0xbc   :  { %7044 = vmatmul.mubr.msk.f32.gmra.mrb[2].mxu0 %vm122_vm2, %v341_v32  ;;  %vm9161_vm6 = vcmp.lt.s32.totalorder %v72_v38, 67 }
  0xbd   :  { %446 = vmatprep.mubr.f32.mxu0 %v8856_v0  ;;  %vm9348_vm11 = vmpackc.low %vm9161_vm6, %vm9161_vm6 }
  0xc0   :  { %7045 = vmatmul.mubr.msk.f32.gmra.mrb[4].mxu0 %vm122_vm2, %v343_v36 }
  0xc1   :  { %452 = vmatprep.mubr.f32.mxu0 %v8856_v0 }
  0xc3   :  { %v613_v46 = vpop.permute.xlu1 %612 }
  0xc4   :  { %7046 = vmatmul.mubr.msk.f32.gmra.mrb[6].mxu0 %vm122_vm2, %v345_v35 }
  0xc5   :  { %573 = vmatprep.mubr.f32.mxu0 %v8856_v0 }
  0xc7   :  { %v645_v47 = vpop.permute.xlu1 %644 }
  0xc8   :  { %7049 = vmatmul.mubr.msk.f32.vlgmr.msra.gmra.mrb[0].mxu0 %vm122_vm2, %v478_v42 }
  0xc9   :  { %579 = vmatprep.mubr.f32.mxu0 %v8856_v0  ;;  %v618_v48 = vpop.permute.xlu0 %617 }
  0xcb   :  { %v650_v50 = vpop.permute.xlu1 %649 }
  0xcc   :  { %7050 = vmatmul.mubr.msk.f32.gmra.mrb[2].mxu0 %vm122_vm2, %v480_v43 }
  0xcd   :  { %585 = vmatprep.mubr.f32.mxu0 %v8856_v0  ;;  %v623_v54 = vpop.permute.xlu0 %622 }
  0xcf   :  { %v628_v63 = vpop.permute.xlu1 %627 }
  0xd0   :  { %7051 = vmatmul.mubr.msk.f32.gmra.mrb[4].mxu0 %vm122_vm2, %v482_v44 }
  0xd1   :  { %591 = vmatprep.mubr.f32.mxu0 %v8856_v0  ;;  %v655_v4 = vpop.permute.xlu0 %654 }
  0xd3   :  { %v660_v16 = vpop.permute.xlu1 %659 }
  0xd4   :  { %7052 = vmatmul.mubr.msk.f32.gmra.mrb[6].mxu0 %vm122_vm2, %v484_v45 }
  0xd5   :  { %1614 = vmatprep.mubr.f32.mxu0 %v8856_v0 }
 0x19b   :  { %v9108_v49 = vpop.f32.mrb[0].mxu0 }
 0x19c   :  { %v630_v51 = vmul.f32 %v613_v46, %v9108_v49  ;;  %v9111_v52 = vpop.f32.mrb[1].mxu0 }
 0x19d   :  { %v631_v53 = vmul.f32 %v613_v46, %v9111_v52 }
 0x19e   :  { %v9114_v55 = vadd.f32 %v645_v47, %v630_v51 }
 0x19f   :  { %v9116_v56 = vadd.f32 %v645_v47, %v631_v53  ;;  %v9118_v57 = vpop.f32.mrb[2].mxu0 }
 0x1a0   :  { %v7053_v58 = vmul.f32 -1.442695, %v9114_v55  ;;  %v632_v59 = vmul.f32 %v618_v48, %v9118_v57  ;;  %v9122_v60 = vpop.f32.mrb[3].mxu0 }
 0x1a1   :  { %v7054_v61 = vmul.f32 -1.442695, %v9116_v56  ;;  %v633_v62 = vmul.f32 %v618_v48, %v9122_v60 }
 0x1a2   :  { %8315 = vpow2.f32 %v7053_v58  ;;  %v9126_v1 = vadd.f32 %v650_v50, %v632_v59 }
 0x1a3   :  { %8317 = vpow2.f32 %v7054_v61  ;;  %v9128_v2 = vadd.f32 %v650_v50, %v633_v62  ;;  %v9130_v3 = vpop.f32.mrb[4].mxu0 }
 0x1a4   :  { %v7055_v5 = vmul.f32 -1.442695, %v9126_v1  ;;  %v634_v6 = vmul.f32 %v623_v54, %v9130_v3  ;;  %v9134_v7 = vpop.f32.mrb[5].mxu0 }
 0x1a5   :  { %v7056_v8 = vmul.f32 -1.442695, %v9128_v2  ;;  %v635_v9 = vmul.f32 %v623_v54, %v9134_v7 }
 0x1a6   :  { %8319 = vpow2.f32 %v7055_v5  ;;  %v9138_v10 = vadd.f32 %v655_v4, %v634_v6 }
 0x1a7   :  { %8321 = vpow2.f32 %v7056_v8  ;;  %v9140_v11 = vadd.f32 %v655_v4, %v635_v9  ;;  %v9142_v12 = vpop.f32.mrb[6].mxu0 }
 0x1a8   :  { %v7057_v13 = vmul.f32 -1.442695, %v9138_v10  ;;  %v636_v14 = vmul.f32 %v628_v63, %v9142_v12  ;;  %v9146_v15 = vpop.f32.mrb[7].mxu0 }
 0x1a9   :  { %v7058_v17 = vmul.f32 -1.442695, %v9140_v11  ;;  %v637_v18 = vmul.f32 %v628_v63, %v9146_v15 }
 0x1aa   :  { %8323 = vpow2.f32 %v7057_v13  ;;  %v668_v19 = vadd.f32 %v660_v16, %v636_v14 }
 0x1ab   :  { %8325 = vpow2.f32 %v7058_v17  ;;  %v9150_v21 = vadd.f32 %v660_v16, %v637_v18  ;;  %v9215_v17 = vld [vmem:[%s10426_s4 + $0x8] sm:$0xff] }
 0x1ac   :  { %v8316_v22 = vpop.eup %8315  ;;  %v7059_v23 = vmul.f32 -1.442695, %v668_v19 }
 0x1ad   :  { %v8318_v24 = vpop.eup %8317  ;;  %v694_v25 = vadd.f32 1.0, %v8316_v22  ;;  %v7060_v26 = vmul.f32 -1.442695, %v9150_v21 }
 0x1ae   :  { %v695_v27 = vadd.f32 1.0, %v8318_v24  ;;  %8327 = vpow2.f32 %v7059_v23  ;;  %v9231_v23 = vld [vmem:[%s10426_s4] sm:$0xff]  ;;  %v9237_v24 = vld [vmem:[%s10426_s4 + $0x10] sm:$0xff] }
 0x1af   :  { %8329 = vrcp.f32 %v694_v25  ;;  %v9248_v25 = vld [vmem:[%s10426_s4 + $0x18] sm:$0xff]  ;;  %s8868_s4 = smov 64  }
 0x1b0   :  { %v8320_v29 = vpop.eup %8319  ;;  %8331 = vrcp.f32 %v695_v27  ;;  %v1359_v27 = vld [vmem:[%s10428_s6 + $0x8] sm:$0xff] }
 0x1b1   :  { %v8322_v30 = vpop.eup %8321  ;;  %v696_v31 = vadd.f32 1.0, %v8320_v29  ;;  %8333 = vpow2.f32 %v7060_v26  ;;  %v1327_v26 = vld [vmem:[%s10427_s5 + $0x8] sm:$0xff]  ;;  %v1326_v29 = vld [vmem:[%s10427_s5] sm:$0xff] }
 0x1b2   :  { %v697_v32 = vadd.f32 1.0, %v8322_v30  ;;  %v1329_v30 = vld [vmem:[%s10427_s5 + $0x18] sm:$0xff] }
 0x1b3   :  { %8335 = vrcp.f32 %v696_v31  ;;  %v1358_v31 = vld [vmem:[%s10428_s6] sm:$0xff] }
 0x1b4   :  { %v8324_v34 = vpop.eup %8323  ;;  %8337 = vrcp.f32 %v697_v32  ;;  %v1361_v32 = vld [vmem:[%s10428_s6 + $0x18] sm:$0xff] }
 0x1b5   :  { %v8326_v35 = vpop.eup %8325  ;;  %v698_v36 = vadd.f32 1.0, %v8324_v34  ;;  %v1360_v34 = vld [vmem:[%s10428_s6 + $0x10] sm:$0xff] }
 0x1b6   :  { %v699_v37 = vadd.f32 1.0, %v8326_v35  ;;  %v8076_v35 = vpop.permute.xlu0 %8075 }
 0x1b7   :  { %8339 = vrcp.f32 %v698_v36  ;;  %v8081_v36 = vpop.permute.xlu1 %8080  ;;  %v8078_v38 = vunpack.i.h.bf16 %v8076_v35 }
 0x1b8   :  { %v8328_v39 = vpop.eup %8327  ;;  %8341 = vrcp.f32 %v699_v37 }
 0x1b9   :  { %v8330_v40 = vpop.eup %8329  ;;  %v700_v41 = vadd.f32 1.0, %v8328_v39  ;;  %v8077_v39 = vunpack.i.l.bf16 %v8076_v35 }
 0x1ba   :  { %v8332_v42 = vpop.eup %8331  ;;  %v9159_v43 = vmul.f32 %v8330_v40, %v9114_v55 }
 0x1bb   :  { %v8334_v45 = vpop.eup %8333  ;;  %v9166_v46 = vmul.f32 %v8332_v42, %v9116_v56  ;;  %8343 = vrcp.f32 %v700_v41 }
 0x1bc   :  { %v701_v47 = vadd.f32 1.0, %v8334_v45  ;;  %v726_v48 = vsel %vm73_vm5, %v9159_v43, 0.0 }
 0x1bd   :  { %v8336_v50 = vpop.eup %8335  ;;  %v727_v51 = vsel %vm9161_vm6, %v9166_v46, 0.0 }
 0x1be   :  { %v8338_v53 = vpop.eup %8337  ;;  %v9175_v54 = vmul.f32 %v8336_v50, %v9126_v1  ;;  %8345 = vrcp.f32 %v701_v47  ;;  %v8084_v55 = vpack.i.bf16 %v727_v51, %v726_v48 }
 0x1bf   :  { %v9178_v56 = vmul.f32 %v8338_v53, %v9128_v2 }
 0x1c0   :  { %v7328_v58 = vpack.c.bf16 %v9175_v54, %v9159_v43  ;;  %8085 = vrot.lane.b32.xlu0 %v8084_v55, %s8864_s2  ;;  %v728_v59 = vsel %vm73_vm5, %v9175_v54, 0.0 }
 0x1c1   :  { %v8340_v61 = vpop.eup %8339  ;;  %v729_v62 = vsel %vm9161_vm6, %v9178_v56, 0.0  ;;  %v7325_v63 = vpack.c.bf16 %v9178_v56, %v9166_v46 }
 0x1c2   :  { %v8342_v1 = vpop.eup %8341  ;;  %v9192_v2 = vmul.f32 %v8340_v61, %v9138_v10  ;;  %v8089_v4 = vpack.i.bf16 %v729_v62, %v728_v59 }
 0x1c3   :  { %v9195_v5 = vmul.f32 %v8342_v1, %v9140_v11  ;;  %v8082_v1 = vunpack.i.l.bf16 %v8081_v36 }
 0x1c4   :  { %8090 = vrot.lane.b32.xlu1 %v8089_v4, %s8864_s2  ;;  %v730_v6 = vsel %vm73_vm5, %v9192_v2, 0.0 }
 0x1c5   :  { %v8344_v8 = vpop.eup %8343  ;;  %v731_v9 = vsel %vm9161_vm6, %v9195_v5, 0.0 }
 0x1c6   :  { %v9204_v13 = vmul.f32 %v8344_v8, %v668_v19  ;;  %v8094_v14 = vpack.i.bf16 %v731_v9, %v730_v6  ;;  %v8083_v9 = vunpack.i.h.bf16 %v8081_v36 }
 0x1c8   :  { %v8346_v10 = vpop.eup %8345  ;;  %v7334_v16 = vpack.c.bf16 %v9204_v13, %v9192_v2  ;;  %8095 = vrot.lane.b32.xlu1 %v8094_v14, %s8864_s2  ;;  %v732_v18 = vsel %vm73_vm5, %v9204_v13, 0.0 }
 0x1c9   :  { %v9210_v11 = vmul.f32 %v8346_v10, %v9150_v21 }
 0x1cb   :  { %v733_v19 = vsel %vm9161_vm6, %v9210_v11, 0.0  ;;  %v7331_v22 = vpack.c.bf16 %v9210_v11, %v9195_v5 }
 0x1cc   :  { %764 = vrot.lane.b32.xlu1 %v9215_v17, %s8865_s28  ;;  %v8099_v21 = vpack.i.bf16 %v733_v19, %v732_v18 }
 0x1ce   :  { %8100 = vrot.lane.b32.xlu0 %v8099_v21, %s8864_s2 }
 0x1d0   :  { %8110 = vrot.lane.b32.xlu1 %v8089_v4, %s8866_s30 }
 0x1d2   :  { %762 = vrot.lane.b32.xlu0 %v9231_v23, %s8865_s28 }
 0x1d4   :  { %766 = vrot.lane.b32.xlu1 %v9237_v24, %s8865_s28 }
 0x1d6   :  { %8105 = vrot.lane.b32.xlu0 %v8084_v55, %s8866_s30 }
 0x1d8   :  { %8130 = vrot.lane.b32.xlu1 %v8099_v21, %s8866_s30 }
 0x1da   :  { %8115 = vrot.lane.b32.xlu0 %v8856_v0, %s8866_s30 }
 0x1dc   :  { %768 = vrot.lane.b32.xlu1 %v9248_v25, %s8865_s28 }
 0x1de   :  { %8120 = vrot.lane.b32.xlu0 %v8094_v14, %s8866_s30 }
 0x1e0   :  { %8140 = vrot.lane.b32.xlu1 %v8089_v4, %s8867_s20 }
 0x1e2   :  { %8125 = vrot.lane.b32.xlu0 %v8856_v0, %s8866_s30 }
 0x1e4   :  { %8150 = vrot.lane.b32.xlu1 %v8094_v14, %s8867_s20 }
 0x1e6   :  { %8135 = vrot.lane.b32.xlu0 %v8084_v55, %s8867_s20 }
 0x1e8   :  { %8160 = vrot.lane.b32.xlu1 %v8856_v0, %s8867_s20 }
 0x1ea   :  { %8145 = vrot.lane.b32.xlu0 %v8856_v0, %s8867_s20 }
 0x1ec   :  { %1061 = vrot.lane.b32.xlu1 %v9215_v17, %s8868_s4 }
 0x1ee   :  { %8155 = vrot.lane.b32.xlu0 %v8099_v21, %s8867_s20 }
 0x1f0   :  { %1065 = vrot.lane.b32.xlu1 %v9248_v25, %s8868_s4 }
 0x1f2   :  { %1059 = vrot.lane.b32.xlu0 %v9231_v23, %s8868_s4 }
 0x1f4   :  { %1215 = vrot.lane.b32.xlu1 %v9215_v17, %s8869_s21 }
 0x1f6   :  { %1063 = vrot.lane.b32.xlu0 %v9237_v24, %s8868_s4 }
 0x1f8   :  { %1219 = vrot.lane.b32.xlu1 %v9248_v25, %s8869_s21 }
 0x1fa   :  { %1213 = vrot.lane.b32.xlu0 %v9231_v23, %s8869_s21 }
 0x1fc   :  { %1337 = vperm.xlu1 %8072, %v1327_v26  }
 0x1fe   :  { %1217 = vrot.lane.b32.xlu0 %v9237_v24, %s8869_s21 }
 0x200   :  { %1369 = vperm.xlu1 %8072, %v1359_v27  }
 0x202   :  { %1332 = vperm.xlu0 %8073, %v1326_v29  }
 0x204   :  { %1347 = vperm.xlu1 %8072, %v1329_v30  }
 0x206   :  { %1364 = vperm.xlu0 %8073, %v1358_v31  }
 0x208   :  { %1379 = vperm.xlu1 %8072, %v1361_v32  }
 0x20a   :  { %1342 = vperm.xlu0 %8073, %v1328_v33  }
 0x20c   :  { %8170 = vrot.lane.b32.xlu1 %v8856_v0, %s8864_s2 }
 0x20e   :  { %1374 = vperm.xlu0 %8073, %v1360_v34  }
 0x212   :  { %8165 = vrot.lane.b32.xlu0 %v8856_v0, %s8864_s2 }
 0x232   :  { %v8086_v37 = vpop.permute.xlu0 %8085 }
 0x233   :  { %v8088_v40 = vunpack.i.h.bf16 %v8086_v37  ;;  %v8087_v41 = vunpack.i.l.bf16 %v8086_v37 }
 0x235   :  { %v808_v48 = vsel %vm806_vm7, %v8087_v41, %v8088_v40  ;;  %v807_v51 = vsel %vm806_vm7, %v8077_v39, %v8087_v41 }
 0x236   :  { %v8091_v42 = vpop.permute.xlu1 %8090 }
 0x237   :  { %v8093_v45 = vunpack.i.h.bf16 %v8091_v42  ;;  %v8092_v47 = vunpack.i.l.bf16 %v8091_v42 }
 0x239   :  { %v810_v50 = vsel %vm806_vm7, %v8092_v47, %v8093_v45  ;;  %v809_v53 = vsel %vm806_vm7, %v8078_v38, %v8092_v47 }
 0x23a   :  { %v8096_v55 = vpop.permute.xlu1 %8095  ;;  %v7301_v59 = vpack.c.bf16 %v810_v50, %v808_v48  ;;  %v7303_v61 = vpack.c.bf16 %v809_v53, %v807_v51 }
 0x23b   :  { %v8098_v4 = vunpack.i.h.bf16 %v8096_v55  ;;  %v8097_v6 = vunpack.i.l.bf16 %v8096_v55 }
 0x23c   :  { %7302 = vmatprep.subr.bf16.mxu1 %v7301_v59 }
 0x23d   :  { %7304 = vmatpush1.bf16.msra.mxu1 %v7303_v61  ;;  %v812_v19 = vsel %vm806_vm7, %v8097_v6, %v8098_v4  ;;  %v811_v26 = vsel %vm806_vm7, %v8082_v1, %v8097_v6 }
 0x23e   :  { %v765_v62 = vpop.permute.xlu1 %764 }
 0x240   :  { %v8101_v8 = vpop.permute.xlu0 %8100 }
 0x241   :  { %v8103_v14 = vunpack.i.h.bf16 %v8101_v8  ;;  %v8102_v10 = vunpack.i.l.bf16 %v8101_v8 }
 0x242   :  { %v8111_v18 = vpop.permute.xlu1 %8110 }
 0x243   :  { %v814_v21 = vsel %vm806_vm7, %v8102_v10, %v8103_v14  ;;  %v813_v27 = vsel %vm806_vm7, %v8083_v9, %v8102_v10  ;;  %v8113_v33 = vunpack.i.h.bf16 %v8111_v18  ;;  %v8112_v34 = vunpack.i.l.bf16 %v8111_v18 }
 0x244   :  { %v763_v29 = vpop.permute.xlu0 %762  ;;  %v7305_v30 = vpack.c.bf16 %v814_v21, %v812_v19  ;;  %v7307_v31 = vpack.c.bf16 %v813_v27, %v811_v26 }
 0x245   :  { %v949_v40 = vsel %vm945_vm9, %v8112_v34, %v8113_v33 }
 0x246   :  { %7306 = vmatprep.subr.bf16.mxu1 %v7305_v30  ;;  %v767_v32 = vpop.permute.xlu1 %766 }
 0x247   :  { %7308 = vmatpush1.bf16.msra.mxu1 %v7307_v31 }
 0x248   :  { %v8106_v35 = vpop.permute.xlu0 %8105 }
 0x249   :  { %v8108_v36 = vunpack.i.h.bf16 %v8106_v35  ;;  %v8107_v37 = vunpack.i.l.bf16 %v8106_v35 }
 0x24a   :  { %7061 = vmatmul.mubr.msk.f32.vlgmr.msra.gmra.mrb[0].mxu1 %vm823_vm8, %v763_v29  ;;  %v8131_v38 = vpop.permute.xlu1 %8130 }
 0x24b   :  { %902 = vmatprep.mubr.f32.mxu1 %v8856_v0  ;;  %v947_v39 = vsel %vm945_vm9, %v8107_v37, %v8108_v36  ;;  %v8133_v53 = vunpack.i.h.bf16 %v8131_v38  ;;  %v8132_v55 = vunpack.i.l.bf16 %v8131_v38 }
 0x24c   :  { %v8116_v41 = vpop.permute.xlu0 %8115  ;;  %v7309_v42 = vpack.c.bf16 %v949_v40, %v947_v39 }
 0x24d   :  { %v8118_v45 = vunpack.i.h.bf16 %v8116_v41  ;;  %v8117_v47 = vunpack.i.l.bf16 %v8116_v41  ;;  %v953_v8 = vsel %vm945_vm9, %v8132_v55, %v8133_v53 }
 0x24e   :  { %7062 = vmatmul.mubr.msk.f32.gmra.mrb[2].mxu1 %vm823_vm8, %v765_v62  ;;  %7310 = vmatprep.subr.bf16.mxu1 %v7309_v42  ;;  %v769_v48 = vpop.permute.xlu1 %768 }
 0x24f   :  { %v946_v50 = vsel %vm945_vm9, %v8117_v47, %v8107_v37  ;;  %v948_v51 = vsel %vm945_vm9, %v8118_v45, %v8112_v34  ;;  %908 = vmatprep.mubr.f32.mxu1 %v8856_v0 }
 0x250   :  { %v8121_v59 = vpop.permute.xlu0 %8120  ;;  %v7311_v61 = vpack.c.bf16 %v948_v51, %v946_v50 }
 0x251   :  { %v8123_v1 = vunpack.i.h.bf16 %v8121_v59  ;;  %v8122_v4 = vunpack.i.l.bf16 %v8121_v59 }
 0x252   :  { %7063 = vmatmul.mubr.msk.f32.gmra.mrb[4].mxu1 %vm823_vm8, %v767_v32  ;;  %v8141_v6 = vpop.permute.xlu1 %8140 }
 0x253   :  { %7312 = vmatpush1.bf16.msra.mxu1 %v7311_v61  ;;  %v951_v62 = vsel %vm945_vm9, %v8122_v4, %v8123_v1  ;;  %914 = vmatprep.mubr.f32.mxu1 %v8856_v0  ;;  %v8143_v27 = vunpack.i.h.bf16 %v8141_v6  ;;  %v8142_v29 = vunpack.i.l.bf16 %v8141_v6 }
 0x254   :  { %v8126_v9 = vpop.permute.xlu0 %8125  ;;  %v7313_v14 = vpack.c.bf16 %v953_v8, %v951_v62 }
 0x255   :  { %v8128_v10 = vunpack.i.h.bf16 %v8126_v9  ;;  %v8127_v18 = vunpack.i.l.bf16 %v8126_v9  ;;  %v1095_v35 = vsel %vm1091_vm10, %v8142_v29, %v8143_v27 }
 0x256   :  { %7314 = vmatprep.subr.bf16.mxu1 %v7313_v14  ;;  %v8151_v19 = vpop.permute.xlu1 %8150  ;;  %7064 = vmatmul.mubr.msk.f32.gmra.mrb[6].mxu1 %vm823_vm8, %v769_v48 }
 0x257   :  { %v950_v21 = vsel %vm945_vm9, %v8127_v18, %v8122_v4  ;;  %v952_v26 = vsel %vm945_vm9, %v8128_v10, %v8132_v55  ;;  %1034 = vmatprep.mubr.f32.mxu1 %v8856_v0  ;;  %v8153_v41 = vunpack.i.h.bf16 %v8151_v19  ;;  %v8152_v42 = vunpack.i.l.bf16 %v8151_v19 }
 0x258   :  { %v8136_v30 = vpop.permute.xlu0 %8135  ;;  %v7315_v31 = vpack.c.bf16 %v952_v26, %v950_v21 }
 0x259   :  { %v8138_v32 = vunpack.i.h.bf16 %v8136_v30  ;;  %v8137_v33 = vunpack.i.l.bf16 %v8136_v30  ;;  %v1097_v1 = vsel %vm1091_vm10, %v8152_v42, %v8153_v41 }
 0x25a   :  { %7316 = vmatpush1.bf16.msra.mxu1 %v7315_v31  ;;  %v8161_v37 = vpop.permute.xlu1 %8160 }
 0x25b   :  { %v1093_v34 = vsel %vm1091_vm10, %v8137_v33, %v8138_v32  ;;  %v8163_v48 = vunpack.i.h.bf16 %v8161_v37  ;;  %v8162_v50 = vunpack.i.l.bf16 %v8161_v37 }
 0x25c   :  { %v8146_v36 = vpop.permute.xlu0 %8145  ;;  %v7317_v38 = vpack.c.bf16 %v1095_v35, %v1093_v34 }
 0x25d   :  { %v8148_v39 = vunpack.i.h.bf16 %v8146_v36  ;;  %v8147_v40 = vunpack.i.l.bf16 %v8146_v36  ;;  %7065 = vmatmul.mubr.msk.f32.vlgmr.msra.gmra.mrb[0].mxu1 %vm823_vm8, %v9231_v23  ;;  %v1096_v23 = vsel %vm1091_vm10, %v8162_v50, %v8152_v42 }
 0x25e   :  { %7318 = vmatprep.subr.bf16.mxu1 %v7317_v38  ;;  %1040 = vmatprep.mubr.f32.mxu1 %v8856_v0  ;;  %v1062_v46 = vpop.permute.xlu1 %1061 }
 0x25f   :  { %v1092_v45 = vsel %vm1091_vm10, %v8147_v40, %v8137_v33  ;;  %v1094_v47 = vsel %vm1091_vm10, %v8148_v39, %v8142_v29 }
 0x260   :  { %v8156_v51 = vpop.permute.xlu0 %8155  ;;  %v7319_v53 = vpack.c.bf16 %v1094_v47, %v1092_v45 }
 0x261   :  { %v8158_v55 = vunpack.i.h.bf16 %v8156_v51  ;;  %v8157_v59 = vunpack.i.l.bf16 %v8156_v51  ;;  %7066 = vmatmul.mubr.msk.f32.gmra.mrb[2].mxu1 %vm823_vm8, %v9215_v17 }
 0x262   :  { %7320 = vmatpush1.bf16.msra.mxu1 %v7319_v53  ;;  %1046 = vmatprep.mubr.f32.mxu1 %v8856_v0  ;;  %v1066_v54 = vpop.permute.xlu1 %1065 }
 0x263   :  { %v1098_v61 = vsel %vm1091_vm10, %v8163_v48, %v8157_v59  ;;  %v1099_v4 = vsel %vm1091_vm10, %v8157_v59, %v8158_v55 }
 0x264   :  { %v7321_v6 = vpack.c.bf16 %v1099_v4, %v1097_v1  ;;  %v7323_v62 = vpack.c.bf16 %v1098_v61, %v1096_v23 }
 0x265   :  { %7067 = vmatmul.mubr.msk.f32.gmra.mrb[4].mxu1 %vm823_vm8, %v9237_v24  ;;  %v1060_v24 = vpop.permute.xlu0 %1059 }
 0x266   :  { %7322 = vmatprep.subr.bf16.mxu1 %v7321_v6  ;;  %1052 = vmatprep.mubr.f32.mxu1 %v8856_v0 }
 0x267   :  { %7324 = vmatpush1.bf16.msra.mxu1 %v7323_v62 }
 0x268   :  { %7327 = vmatprep.subr.msk.bf16.mxu1 %vm9348_vm11, %v7325_v63 }
 0x269   :  { %7068 = vmatmul.mubr.msk.f32.gmra.mrb[6].mxu1 %vm823_vm8, %v9248_v25  ;;  %v1064_v43 = vpop.permute.xlu0 %1063 }
 0x26a   :  { %1180 = vmatprep.mubr.f32.mxu1 %v8856_v0 }
 0x26d   :  { %7069 = vmatmul.mubr.msk.f32.vlgmr.msra.gmra.mrb[0].mxu1 %vm823_vm8, %v1060_v24  ;;  %v1214_v56 = vpop.permute.xlu0 %1213 }
 0x26e   :  { %7330 = vmatpush1.bf16.msk.msra.mxu1 %vm9364_vm12, %v7328_v58  ;;  %1186 = vmatprep.mubr.f32.mxu1 %v8856_v0  ;;  %v1216_v58 = vpop.permute.xlu1 %1215 }
 0x26f   :  { %7333 = vmatprep.subr.msk.bf16.mxu1 %vm9348_vm11, %v7331_v22 }
 0x271   :  { %7070 = vmatmul.mubr.msk.f32.gmra.mrb[2].mxu1 %vm823_vm8, %v1062_v46  ;;  %v1218_v63 = vpop.permute.xlu0 %1217 }
 0x272   :  { %7336 = vmatpush1.bf16.msk.msra.mxu1 %vm9364_vm12, %v7334_v16  ;;  %1192 = vmatprep.mubr.f32.mxu1 %v8856_v0  ;;  %v1220_v2 = vpop.permute.xlu1 %1219 }
 0x275   :  { %7071 = vmatmul.mubr.msk.f32.gmra.mrb[4].mxu1 %vm823_vm8, %v1064_v43 }
 0x276   :  { %1198 = vmatprep.mubr.f32.mxu1 %v8856_v0 }
 0x279   :  { %7072 = vmatmul.mubr.msk.f32.gmra.mrb[6].mxu1 %vm823_vm8, %v1066_v54 }
 0x27a   :  { %1293 = vmatprep.mubr.f32.mxu1 %v8856_v0 }
 0x27b   :  { %v1338_v13 = vpop.permute.xlu1 %1337 }
 0x27d   :  { %7073 = vmatmul.mubr.msk.f32.vlgmr.msra.gmra.mrb[0].mxu1 %vm823_vm8, %v1214_v56 }
 0x27e   :  { %1299 = vmatprep.mubr.f32.mxu1 %v8856_v0 }
 0x27f   :  { %v1370_v9 = vpop.permute.xlu1 %1369 }
 0x281   :  { %7074 = vmatmul.mubr.msk.f32.gmra.mrb[2].mxu1 %vm823_vm8, %v1216_v58  ;;  %v1333_v5 = vpop.permute.xlu0 %1332 }
 0x282   :  { %1305 = vmatprep.mubr.f32.mxu1 %v8856_v0 }
 0x283   :  { %v1348_v33 = vpop.permute.xlu1 %1347 }
 0x285   :  { %7075 = vmatmul.mubr.msk.f32.gmra.mrb[4].mxu1 %vm823_vm8, %v1218_v63  ;;  %v1365_v16 = vpop.permute.xlu0 %1364 }
 0x286   :  { %1311 = vmatprep.mubr.f32.mxu1 %v8856_v0 }
 0x287   :  { %v1380_v53 = vpop.permute.xlu1 %1379 }
 0x289   :  { %7076 = vmatmul.mubr.msk.f32.gmra.mrb[6].mxu1 %vm823_vm8, %v1220_v2  ;;  %v1343_v18 = vpop.permute.xlu0 %1342 }
 0x28d   :  { %v1375_v39 = vpop.permute.xlu0 %1374 }
 0x350   :  { %v1295_v11 = vpop.f32.mrb[0].mxu1 }
 0x351   :  { %v1350_v22 = vmul.f32 %v1333_v5, %v1295_v11  ;;  %v1297_v25 = vpop.f32.mrb[1].mxu1 }
 0x352   :  { %v1351_v14 = vmul.f32 %v1333_v5, %v1297_v25 }
 0x353   :  { %v1382_v10 = vadd.f32 %v1365_v16, %v1350_v22 }
 0x354   :  { %v1383_v19 = vadd.f32 %v1365_v16, %v1351_v14  ;;  %v1301_v21 = vpop.f32.mrb[2].mxu1 }
 0x355   :  { %v7077_v26 = vmul.f32 -1.442695, %v1382_v10  ;;  %v1352_v27 = vmul.f32 %v1338_v13, %v1301_v21  ;;  %v1303_v29 = vpop.f32.mrb[3].mxu1 }
 0x356   :  { %v7078_v30 = vmul.f32 -1.442695, %v1383_v19  ;;  %v1353_v31 = vmul.f32 %v1338_v13, %v1303_v29 }
 0x357   :  { %8347 = vpow2.f32 %v7077_v26  ;;  %v1384_v32 = vadd.f32 %v1370_v9, %v1352_v27 }
 0x358   :  { %8349 = vpow2.f32 %v7078_v30  ;;  %v1385_v34 = vadd.f32 %v1370_v9, %v1353_v31  ;;  %v1307_v35 = vpop.f32.mrb[4].mxu1 }
 0x359   :  { %v7079_v36 = vmul.f32 -1.442695, %v1384_v32  ;;  %v1354_v37 = vmul.f32 %v1343_v18, %v1307_v35  ;;  %v1309_v38 = vpop.f32.mrb[5].mxu1 }
 0x35a   :  { %v7080_v40 = vmul.f32 -1.442695, %v1385_v34  ;;  %v1355_v41 = vmul.f32 %v1343_v18, %v1309_v38 }
 0x35b   :  { %8351 = vpow2.f32 %v7079_v36  ;;  %v1386_v42 = vadd.f32 %v1375_v39, %v1354_v37 }
 0x35c   :  { %8353 = vpow2.f32 %v7080_v40  ;;  %v1387_v45 = vadd.f32 %v1375_v39, %v1355_v41  ;;  %v1313_v47 = vpop.f32.mrb[6].mxu1 }
 0x35d   :  { %v7081_v48 = vmul.f32 -1.442695, %v1386_v42  ;;  %v1356_v50 = vmul.f32 %v1348_v33, %v1313_v47  ;;  %v1315_v51 = vpop.f32.mrb[7].mxu1 }
 0x35e   :  { %v7082_v55 = vmul.f32 -1.442695, %v1387_v45  ;;  %v1357_v59 = vmul.f32 %v1348_v33, %v1315_v51 }
 0x35f   :  { %8355 = vpow2.f32 %v7081_v48  ;;  %v1388_v23 = vadd.f32 %v1380_v53, %v1356_v50 }
 0x360   :  { %8357 = vpow2.f32 %v7082_v55  ;;  %v1389_v61 = vadd.f32 %v1380_v53, %v1357_v59  ;;  %v9448_v55 = vld [vmem:[%s10429_s7 + $0x8] sm:$0xff] }
 0x361   :  { %v8348_v1 = vpop.eup %8347  ;;  %v7083_v4 = vmul.f32 -1.442695, %v1388_v23 }
 0x362   :  { %v8350_v6 = vpop.eup %8349  ;;  %v1414_v62 = vadd.f32 1.0, %v8348_v1  ;;  %v7084_v24 = vmul.f32 -1.442695, %v1389_v61 }
 0x363   :  { %v1415_v46 = vadd.f32 1.0, %v8350_v6  ;;  %8359 = vpow2.f32 %v7083_v4  ;;  %v9464_v4 = vld [vmem:[%s10429_s7] sm:$0xff]  ;;  %v9470_v6 = vld [vmem:[%s10429_s7 + $0x10] sm:$0xff] }
 0x364   :  { %8361 = vrcp.f32 %v1414_v62  ;;  %v9481_v62 = vld [vmem:[%s10429_s7 + $0x18] sm:$0xff] }
 0x365   :  { %v8352_v43 = vpop.eup %8351  ;;  %8363 = vrcp.f32 %v1415_v46  ;;  %v2082_v46 = vld [vmem:[%s10431_s9] sm:$0xff] }
 0x366   :  { %v8354_v54 = vpop.eup %8353  ;;  %v1416_v56 = vadd.f32 1.0, %v8352_v43  ;;  %8365 = vpow2.f32 %v7084_v24  ;;  %v2050_v24 = vld [vmem:[%s10430_s8] sm:$0xff]  ;;  %v8166_v43 = vpop.permute.xlu0 %8165 }
 0x367   :  { %v1417_v58 = vadd.f32 1.0, %v8354_v54  ;;  %v8171_v54 = vpop.permute.xlu1 %8170 }
 0x368   :  { %8367 = vrcp.f32 %v1416_v56 }
 0x369   :  { %v8356_v63 = vpop.eup %8355  ;;  %8369 = vrcp.f32 %v1417_v58  ;;  %v8168_v58 = vunpack.i.h.bf16 %v8166_v43 }
 0x36a   :  { %v8358_v2 = vpop.eup %8357  ;;  %v1418_v5 = vadd.f32 1.0, %v8356_v63  ;;  %v8167_v63 = vunpack.i.l.bf16 %v8166_v43 }
 0x36b   :  { %v1419_v13 = vadd.f32 1.0, %v8358_v2 }
 0x36c   :  { %8371 = vrcp.f32 %v1418_v5 }
 0x36d   :  { %v8360_v16 = vpop.eup %8359  ;;  %8373 = vrcp.f32 %v1419_v13 }
 0x36e   :  { %v8362_v11 = vpop.eup %8361  ;;  %v1420_v22 = vadd.f32 1.0, %v8360_v16 }
 0x36f   :  { %v8364_v25 = vpop.eup %8363  ;;  %v9402_v9 = vmul.f32 %v8362_v11, %v1382_v10 }
 0x370   :  { %v8366_v14 = vpop.eup %8365  ;;  %v9404_v18 = vmul.f32 %v8364_v25, %v1383_v19  ;;  %8375 = vrcp.f32 %v1420_v22 }
 0x371   :  { %v1421_v21 = vadd.f32 1.0, %v8366_v14  ;;  %v1446_v26 = vsel %vm73_vm5, %v9402_v9, 0.0 }
 0x372   :  { %v8368_v27 = vpop.eup %8367  ;;  %v1447_v29 = vsel %vm9161_vm6, %v9404_v18, 0.0 }
 0x373   :  { %v8370_v30 = vpop.eup %8369  ;;  %v9412_v31 = vmul.f32 %v8368_v27, %v1384_v32  ;;  %8377 = vrcp.f32 %v1421_v21  ;;  %v8174_v10 = vpack.i.bf16 %v1447_v29, %v1446_v26 }
 0x374   :  { %v9414_v33 = vmul.f32 %v8370_v30, %v1385_v34 }
 0x375   :  { %v7364_v19 = vpack.c.bf16 %v9412_v31, %v9402_v9  ;;  %8175 = vrot.lane.b32.xlu0 %v8174_v10, %s8864_s2  ;;  %v1448_v35 = vsel %vm73_vm5, %v9412_v31, 0.0 }
 0x376   :  { %v8372_v36 = vpop.eup %8371  ;;  %v7361_v37 = vpack.c.bf16 %v9414_v33, %v9404_v18  ;;  %v1449_v32 = vsel %vm9161_vm6, %v9414_v33, 0.0 }
 0x377   :  { %v8374_v38 = vpop.eup %8373  ;;  %v9427_v34 = vmul.f32 %v8372_v36, %v1386_v42  ;;  %v8179_v39 = vpack.i.bf16 %v1449_v32, %v1448_v35 }
 0x378   :  { %v9429_v40 = vmul.f32 %v8374_v38, %v1387_v45  ;;  %v8173_v38 = vunpack.i.h.bf16 %v8171_v54 }
 0x379   :  { %8180 = vrot.lane.b32.xlu1 %v8179_v39, %s8864_s2  ;;  %v1450_v41 = vsel %vm73_vm5, %v9427_v34, 0.0 }
 0x37a   :  { %v8376_v47 = vpop.eup %8375  ;;  %v1451_v48 = vsel %vm9161_vm6, %v9429_v40, 0.0 }
 0x37b   :  { %v9438_v50 = vmul.f32 %v8376_v47, %v1388_v23  ;;  %v8184_v51 = vpack.i.bf16 %v1451_v48, %v1450_v41 }
 0x37d   :  { %v8378_v53 = vpop.eup %8377  ;;  %v7370_v42 = vpack.c.bf16 %v9438_v50, %v9427_v34  ;;  %8185 = vrot.lane.b32.xlu1 %v8184_v51, %s8864_s2  ;;  %v1452_v59 = vsel %vm73_vm5, %v9438_v50, 0.0 }
 0x37e   :  { %v9443_v45 = vmul.f32 %v8378_v53, %v1389_v61 }
 0x380   :  { %v7367_v23 = vpack.c.bf16 %v9443_v45, %v9429_v40  ;;  %v1453_v1 = vsel %vm9161_vm6, %v9443_v45, 0.0 }
 0x381   :  { %1484 = vrot.lane.b32.xlu1 %v9448_v55, %s8865_s28  ;;  %v8189_v61 = vpack.i.bf16 %v1453_v1, %v1452_v59 }
 0x383   :  { %8190 = vrot.lane.b32.xlu0 %v8189_v61, %s8864_s2 }
 0x385   :  { %8200 = vrot.lane.b32.xlu1 %v8179_v39, %s8866_s30 }
 0x387   :  { %1482 = vrot.lane.b32.xlu0 %v9464_v4, %s8865_s28 }
 0x389   :  { %1486 = vrot.lane.b32.xlu1 %v9470_v6, %s8865_s28 }
 0x38b   :  { %8195 = vrot.lane.b32.xlu0 %v8174_v10, %s8866_s30 }
 0x38d   :  { %8220 = vrot.lane.b32.xlu1 %v8189_v61, %s8866_s30 }
 0x38f   :  { %8205 = vrot.lane.b32.xlu0 %v8856_v0, %s8866_s30 }
 0x391   :  { %1488 = vrot.lane.b32.xlu1 %v9481_v62, %s8865_s28 }
 0x393   :  { %8210 = vrot.lane.b32.xlu0 %v8184_v51, %s8866_s30 }
 0x395   :  { %8230 = vrot.lane.b32.xlu1 %v8179_v39, %s8867_s20 }
 0x397   :  { %8215 = vrot.lane.b32.xlu0 %v8856_v0, %s8866_s30 }
 0x399   :  { %8240 = vrot.lane.b32.xlu1 %v8184_v51, %s8867_s20 }
 0x39b   :  { %8225 = vrot.lane.b32.xlu0 %v8174_v10, %s8867_s20  ;;  %v8172_v10 = vunpack.i.l.bf16 %v8171_v54 }
 0x39d   :  { %8250 = vrot.lane.b32.xlu1 %v8856_v0, %s8867_s20 }
 0x39f   :  { %8235 = vrot.lane.b32.xlu0 %v8856_v0, %s8867_s20 }
 0x3a1   :  { %1778 = vrot.lane.b32.xlu1 %v9448_v55, %s8868_s4 }
 0x3a3   :  { %8245 = vrot.lane.b32.xlu0 %v8189_v61, %s8867_s20 }
 0x3a5   :  { %1782 = vrot.lane.b32.xlu1 %v9481_v62, %s8868_s4 }
 0x3a7   :  { %1776 = vrot.lane.b32.xlu0 %v9464_v4, %s8868_s4 }
 0x3a9   :  { %2056 = vperm.xlu1 %8072, %v2050_v24  }
 0x3ab   :  { %1780 = vrot.lane.b32.xlu0 %v9470_v6, %s8868_s4 }
 0x3af   :  { %1929 = vrot.lane.b32.xlu0 %v9464_v4, %s8869_s21 }
 0x3b3   :  { %2088 = vperm.xlu0 %8073, %v2082_v46  }
 0x3b7   :  { %2210 = vrot.lane.b32.xlu0 %v8856_v0, %s8857_s24 }
 0x3bb   :  { %1933 = vrot.lane.b32.xlu0 %v9470_v6, %s8869_s21 }
 0x3e7   :  { %v8176_v56 = vpop.permute.xlu0 %8175 }
 0x3e8   :  { %v8178_v2 = vunpack.i.h.bf16 %v8176_v56  ;;  %v8177_v5 = vunpack.i.l.bf16 %v8176_v56 }
 0x3ea   :  { %v1526_v22 = vsel %vm806_vm7, %v8167_v63, %v8177_v5  ;;  %v1527_v14 = vsel %vm806_vm7, %v8177_v5, %v8178_v2 }
 0x3eb   :  { %v8181_v13 = vpop.permute.xlu1 %8180 }
 0x3ec   :  { %v8183_v16 = vunpack.i.h.bf16 %v8181_v13  ;;  %v8182_v11 = vunpack.i.l.bf16 %v8181_v13 }
 0x3ee   :  { %v1528_v25 = vsel %vm806_vm7, %v8168_v58, %v8182_v11  ;;  %v1529_v21 = vsel %vm806_vm7, %v8182_v11, %v8183_v16 }
 0x3ef   :  { %v8186_v26 = vpop.permute.xlu1 %8185  ;;  %v7337_v27 = vpack.c.bf16 %v1529_v21, %v1527_v14  ;;  %v7339_v29 = vpack.c.bf16 %v1528_v25, %v1526_v22 }
 0x3f0   :  { %v8188_v35 = vunpack.i.h.bf16 %v8186_v26  ;;  %v8187_v36 = vunpack.i.l.bf16 %v8186_v26 }
 0x3f1   :  { %7338 = vmatprep.subr.bf16.mxu0 %v7337_v27 }
 0x3f2   :  { %7340 = vmatpush1.bf16.msra.mxu0 %v7339_v29  ;;  %v1530_v48 = vsel %vm806_vm7, %v8172_v10, %v8187_v36  ;;  %v1531_v53 = vsel %vm806_vm7, %v8187_v36, %v8188_v35 }
 0x3f3   :  { %v1485_v30 = vpop.permute.xlu1 %1484 }
 0x3f5   :  { %v8191_v32 = vpop.permute.xlu0 %8190 }
 0x3f6   :  { %v8193_v39 = vunpack.i.h.bf16 %v8191_v32  ;;  %v8192_v41 = vunpack.i.l.bf16 %v8191_v32 }
 0x3f7   :  { %v8201_v47 = vpop.permute.xlu1 %8200 }
 0x3f8   :  { %v1532_v51 = vsel %vm806_vm7, %v8173_v38, %v8192_v41  ;;  %v1533_v59 = vsel %vm806_vm7, %v8192_v41, %v8193_v39  ;;  %v8203_v43 = vunpack.i.h.bf16 %v8201_v47  ;;  %v8202_v56 = vunpack.i.l.bf16 %v8201_v47 }
 0x3f9   :  { %v1483_v1 = vpop.permute.xlu0 %1482  ;;  %v7341_v61 = vpack.c.bf16 %v1533_v59, %v1531_v53  ;;  %v7343_v24 = vpack.c.bf16 %v1532_v51, %v1530_v48 }
 0x3fa   :  { %v1666_v13 = vsel %vm945_vm9, %v8202_v56, %v8203_v43 }
 0x3fb   :  { %7342 = vmatprep.subr.bf16.mxu0 %v7341_v61  ;;  %v1487_v46 = vpop.permute.xlu1 %1486 }
 0x3fc   :  { %7344 = vmatpush1.bf16.msra.mxu0 %v7343_v24 }
 0x3fd   :  { %v8196_v54 = vpop.permute.xlu0 %8195 }
 0x3fe   :  { %v8198_v58 = vunpack.i.h.bf16 %v8196_v54  ;;  %v8197_v63 = vunpack.i.l.bf16 %v8196_v54 }
 0x3ff   :  { %7085 = vmatmul.mubr.msk.f32.vlgmr.msra.gmra.mrb[8].mxu0 %vm823_vm8, %v1483_v1  ;;  %v8221_v2 = vpop.permute.xlu1 %8220 }
 0x400   :  { %1620 = vmatprep.mubr.f32.mxu0 %v8856_v0  ;;  %v1664_v5 = vsel %vm945_vm9, %v8197_v63, %v8198_v58  ;;  %v8223_v21 = vunpack.i.h.bf16 %v8221_v2  ;;  %v8222_v26 = vunpack.i.l.bf16 %v8221_v2 }
 0x401   :  { %v8206_v16 = vpop.permute.xlu0 %8205  ;;  %v7345_v11 = vpack.c.bf16 %v1666_v13, %v1664_v5 }
 0x402   :  { %v8208_v22 = vunpack.i.h.bf16 %v8206_v16  ;;  %v8207_v25 = vunpack.i.l.bf16 %v8206_v16  ;;  %v1670_v39 = vsel %vm945_vm9, %v8222_v26, %v8223_v21 }
 0x403   :  { %7086 = vmatmul.mubr.msk.f32.gmra.mrb[10].mxu0 %vm823_vm8, %v1485_v30  ;;  %7346 = vmatprep.subr.bf16.mxu0 %v7345_v11  ;;  %v1489_v14 = vpop.permute.xlu1 %1488 }
 0x404   :  { %v1665_v27 = vsel %vm945_vm9, %v8208_v22, %v8202_v56  ;;  %v1663_v29 = vsel %vm945_vm9, %v8207_v25, %v8197_v63  ;;  %1626 = vmatprep.mubr.f32.mxu0 %v8856_v0 }
 0x405   :  { %v8211_v10 = vpop.permute.xlu0 %8210  ;;  %v7347_v35 = vpack.c.bf16 %v1665_v27, %v1663_v29 }
 0x406   :  { %v8213_v36 = vunpack.i.h.bf16 %v8211_v10  ;;  %v8212_v32 = vunpack.i.l.bf16 %v8211_v10 }
 0x407   :  { %7087 = vmatmul.mubr.msk.f32.gmra.mrb[12].mxu0 %vm823_vm8, %v1487_v46  ;;  %v8231_v38 = vpop.permute.xlu1 %8230 }
 0x408   :  { %7348 = vmatpush1.bf16.msra.mxu0 %v7347_v35  ;;  %v1668_v30 = vsel %vm945_vm9, %v8212_v32, %v8213_v36  ;;  %1632 = vmatprep.mubr.f32.mxu0 %v8856_v0  ;;  %v8233_v59 = vunpack.i.h.bf16 %v8231_v38  ;;  %v8232_v1 = vunpack.i.l.bf16 %v8231_v38 }
 0x409   :  { %v8216_v41 = vpop.permute.xlu0 %8215  ;;  %v7349_v47 = vpack.c.bf16 %v1670_v39, %v1668_v30 }
 0x40a   :  { %v8218_v48 = vunpack.i.h.bf16 %v8216_v41  ;;  %v8217_v51 = vunpack.i.l.bf16 %v8216_v41  ;;  %v1811_v63 = vsel %vm1091_vm10, %v8232_v1, %v8233_v59 }
 0x40b   :  { %7350 = vmatprep.subr.bf16.mxu0 %v7349_v47  ;;  %v8241_v53 = vpop.permute.xlu1 %8240  ;;  %7088 = vmatmul.mubr.msk.f32.gmra.mrb[14].mxu0 %vm823_vm8, %v1489_v14 }
 0x40c   :  { %v1669_v61 = vsel %vm945_vm9, %v8218_v48, %v8222_v26  ;;  %v1667_v24 = vsel %vm945_vm9, %v8217_v51, %v8212_v32  ;;  %1751 = vmatprep.mubr.f32.mxu0 %v8856_v0  ;;  %v8243_v22 = vunpack.i.h.bf16 %v8241_v53  ;;  %v8242_v25 = vunpack.i.l.bf16 %v8241_v53 }
 0x40d   :  { %v8226_v46 = vpop.permute.xlu0 %8225  ;;  %v7351_v43 = vpack.c.bf16 %v1669_v61, %v1667_v24 }
 0x40e   :  { %v8228_v56 = vunpack.i.h.bf16 %v8226_v46  ;;  %v8227_v54 = vunpack.i.l.bf16 %v8226_v46  ;;  %v1813_v38 = vsel %vm1091_vm10, %v8242_v25, %v8243_v22 }
 0x40f   :  { %7352 = vmatpush1.bf16.msra.mxu0 %v7351_v43  ;;  %v8251_v2 = vpop.permute.xlu1 %8250 }
 0x410   :  { %v1809_v58 = vsel %vm1091_vm10, %v8227_v54, %v8228_v56  ;;  %v8253_v14 = vunpack.i.h.bf16 %v8251_v2  ;;  %v8252_v21 = vunpack.i.l.bf16 %v8251_v2 }
 0x411   :  { %v8236_v5 = vpop.permute.xlu0 %8235  ;;  %v7353_v13 = vpack.c.bf16 %v1811_v63, %v1809_v58  ;;  %v2269_v58 = vld [vmem:[#allocation5 + $0x18] sm:$0xff]  ;;  %v2266_v63 = vld [vmem:[#allocation5] sm:$0xff] }
 0x412   :  { %v8238_v16 = vunpack.i.h.bf16 %v8236_v5  ;;  %v8237_v11 = vunpack.i.l.bf16 %v8236_v5  ;;  %7089 = vmatmul.mubr.msk.f32.vlgmr.msra.gmra.mrb[8].mxu0 %vm823_vm8, %v9464_v4  ;;  %v1812_v4 = vsel %vm1091_vm10, %v8252_v21, %v8242_v25  ;;  %v2268_v5 = vld [vmem:[#allocation5 + $0x10] sm:$0xff]  ;;  %v2270_v25 = vld [vmem:[#allocation5 + $0x20] sm:$0xff]  ;;  %v2275_v21 = vld [vmem:[#allocation5 + $0x48] sm:$0xff] }
 0x413   :  { %7354 = vmatprep.subr.bf16.mxu0 %v7353_v13  ;;  %1757 = vmatprep.mubr.f32.mxu0 %v8856_v0  ;;  %v1779_v18 = vpop.permute.xlu1 %1778  ;;  %v2271_v13 = vld [vmem:[#allocation5 + $0x28] sm:$0xff] }
 0x414   :  { %v1810_v26 = vsel %vm1091_vm10, %v8238_v16, %v8232_v1  ;;  %v1808_v27 = vsel %vm1091_vm10, %v8237_v11, %v8227_v54  ;;  %v2267_v54 = vld [vmem:[#allocation5 + $0x8] sm:$0xff]  ;;  %v2273_v16 = vld [vmem:[#allocation5 + $0x38] sm:$0xff]  ;;  %v7375_v11 = vpack.c.bf16 %v2268_v5, %v2266_v63 }
 0x415   :  { %v8246_v29 = vpop.permute.xlu0 %8245  ;;  %v7355_v10 = vpack.c.bf16 %v1810_v26, %v1808_v27  ;;  %v7373_v2 = vpack.c.bf16 %v2269_v58, %v2267_v54  ;;  %v7377_v22 = vpack.c.bf16 %v2273_v16, %v2271_v13  ;;  %v2277_v26 = vld [vmem:[#allocation5 + $0x58] sm:$0xff]  ;;  %v2295_v54 = vld [vmem:[#allocation5 + $0xe8] sm:$0xff]  ;;  %v2294_v13 = vld [vmem:[#allocation5 + $0xe0] sm:$0xff] }
 0x416   :  { %v8248_v35 = vunpack.i.h.bf16 %v8246_v29  ;;  %v8247_v36 = vunpack.i.l.bf16 %v8246_v29  ;;  %7090 = vmatmul.mubr.msk.f32.gmra.mrb[10].mxu0 %vm823_vm8, %v9448_v55  ;;  %v2274_v29 = vld [vmem:[#allocation5 + $0x40] sm:$0xff]  ;;  %v2297_v58 = vld [vmem:[#allocation5 + $0xf8] sm:$0xff]  ;;  %v2296_v16 = vld [vmem:[#allocation5 + $0xf0] sm:$0xff] }
 0x417   :  { %7356 = vmatpush1.bf16.msra.mxu0 %v7355_v10  ;;  %1763 = vmatprep.mubr.f32.mxu0 %v8856_v0  ;;  %v1783_v31 = vpop.permute.xlu1 %1782  ;;  %v2276_v10 = vld [vmem:[#allocation5 + $0x50] sm:$0xff]  ;;  %v7401_v5 = vpack.c.bf16 %v2297_v58, %v2295_v54  ;;  %v2488_v58 = vld [vmem:[%s10433_s11 + $0x48] sm:$0xff] }
 0x418   :  { %v1814_v32 = vsel %vm1091_vm10, %v8253_v14, %v8247_v36  ;;  %v1815_v30 = vsel %vm1091_vm10, %v8247_v36, %v8248_v35  ;;  %v2272_v14 = vld [vmem:[#allocation5 + $0x30] sm:$0xff]  ;;  %7374 = vmatprep.subr.bf16.mxu1 %v7373_v2  ;;  %v2279_v35 = vld [vmem:[#allocation5 + $0x68] sm:$0xff]  ;;  %v2281_v36 = vld [vmem:[#allocation5 + $0x78] sm:$0xff] }
 0x419   :  { %v7357_v39 = vpack.c.bf16 %v1815_v30, %v1813_v38  ;;  %v7359_v41 = vpack.c.bf16 %v1814_v32, %v1812_v4  ;;  %v1777_v47 = vpop.permute.xlu0 %1776  ;;  %7376 = vmatpush1.bf16.msra.mxu1 %v7375_v11  ;;  %v7379_v27 = vpack.c.bf16 %v2272_v14, %v2270_v25  ;;  %v7383_v4 = vpack.c.bf16 %v2276_v10, %v2274_v29  ;;  %v2280_v38 = vld [vmem:[#allocation5 + $0x70] sm:$0xff]  ;;  %v2283_v30 = vld [vmem:[#allocation5 + $0x88] sm:$0xff] }
 0x41a   :  { %7091 = vmatmul.mubr.msk.f32.gmra.mrb[12].mxu0 %vm823_vm8, %v9470_v6  ;;  %7378 = vmatprep.subr.bf16.mxu1 %v7377_v22  ;;  %v7385_v32 = vpack.c.bf16 %v2281_v36, %v2279_v35  ;;  %v2299_v11 = vld [vmem:[#allocation5 + $0x108] sm:$0xff]  ;;  %v2301_v22 = vld [vmem:[#allocation5 + $0x118] sm:$0xff]  ;;  %v7403_v25 = vpack.c.bf16 %v2296_v16, %v2294_v13  ;;  %v2302_v35 = vld [vmem:[#allocation5 + $0x120] sm:$0xff] }
 0x41b   :  { %7358 = vmatprep.subr.bf16.mxu0 %v7357_v39  ;;  %1769 = vmatprep.mubr.f32.mxu0 %v8856_v0  ;;  %v2285_v39 = vld [vmem:[#allocation5 + $0x98] sm:$0xff]  ;;  %v7405_v14 = vpack.c.bf16 %v2301_v22, %v2299_v11  ;;  %v2304_v36 = vld [vmem:[#allocation5 + $0x130] sm:$0xff]  ;;  %v2489_v16 = vld [vmem:[%s10433_s11 + $0x50] sm:$0xff] }
 0x41c   :  { %7360 = vmatpush1.bf16.msra.mxu0 %v7359_v41  ;;  %v2487_v13 = vld [vmem:[%s10433_s11 + $0x40] sm:$0xff]  ;;  %v2327_v22 = vld [vmem:[#allocation5 + $0x1e8] sm:$0xff] }
 0x41d   :  { %7363 = vmatprep.subr.msk.bf16.mxu0 %vm9348_vm11, %v7361_v37  ;;  %v1781_v9 = vpop.permute.xlu0 %1780  ;;  %7380 = vmatpush1.bf16.msra.mxu1 %v7379_v27  ;;  %v2303_v27 = vld [vmem:[#allocation5 + $0x128] sm:$0xff]  ;;  %v9659_v11 = vpack.c.bf16 %v2489_v16, %v2487_v13 }
 0x41e   :  { %7092 = vmatmul.mubr.msk.f32.gmra.mrb[14].mxu0 %vm823_vm8, %v9481_v62 }
 0x41f   :  { %1896 = vmatprep.mubr.f32.mxu0 %v8856_v0 }
 0x421   :  { %v1930_v17 = vpop.permute.xlu0 %1929 }
 0x422   :  { %7093 = vmatmul.mubr.msk.f32.vlgmr.msra.gmra.mrb[8].mxu0 %vm823_vm8, %v1777_v47  ;;  %v7389_v47 = vpack.c.bf16 %v2285_v39, %v2283_v30  ;;  %v2306_v30 = vld [vmem:[#allocation5 + $0x140] sm:$0xff]  ;;  %v2308_v39 = vld [vmem:[#allocation5 + $0x150] sm:$0xff] }
 0x423   :  { %7366 = vmatpush1.bf16.msk.msra.mxu0 %vm9364_vm12, %v7364_v19  ;;  %1902 = vmatprep.mubr.f32.mxu0 %v8856_v0 }
 0x424   :  { %7369 = vmatprep.subr.msk.bf16.mxu0 %vm9348_vm11, %v7367_v23 }
 0x426   :  { %7094 = vmatmul.mubr.msk.f32.gmra.mrb[10].mxu0 %vm823_vm8, %v1779_v18  ;;  %v2282_v18 = vld [vmem:[#allocation5 + $0x80] sm:$0xff] }
 0x427   :  { %7372 = vmatpush1.bf16.msk.msra.mxu0 %vm9364_vm12, %v7370_v42  ;;  %1908 = vmatprep.mubr.f32.mxu0 %v8856_v0 }
 0x428   :  { %v2057_v37 = vpop.permute.xlu1 %2056 }
 0x42a   :  { %7095 = vmatmul.mubr.msk.f32.gmra.mrb[12].mxu0 %vm823_vm8, %v1781_v9  ;;  %v2284_v9 = vld [vmem:[#allocation5 + $0x90] sm:$0xff] }
 0x42b   :  { %1914 = vmatprep.mubr.f32.mxu0 %v8856_v0 }
 0x42e   :  { %7096 = vmatmul.mubr.msk.f32.gmra.mrb[14].mxu0 %vm823_vm8, %v1783_v31  ;;  %v2287_v31 = vld [vmem:[#allocation5 + $0xa8] sm:$0xff] }
 0x42f   :  { %2009 = vmatprep.mubr.f32.mxu0 %v8856_v0 }
 0x432   :  { %7097 = vmatmul.mubr.msk.f32.vlgmr.msra.gmra.mrb[8].mxu0 %vm823_vm8, %v1930_v17  ;;  %v2089_v50 = vpop.permute.xlu0 %2088  ;;  %v2289_v17 = vld [vmem:[#allocation5 + $0xb8] sm:$0xff] }
 0x433   :  { %2015 = vmatprep.mubr.f32.mxu0 %v8856_v0 }
 0x505   :  { %v2011_v33 = vpop.f32.mrb[8].mxu0 }
 0x506   :  { %v2042_v8 = vadd.f32 %v2011_v33, %v9108_v49  ;;  %v2013_v19 = vpop.f32.mrb[9].mxu0  ;;  %v7391_v33 = vpack.c.bf16 %v2284_v9, %v2282_v18  ;;  %v7415_v18 = vpack.c.bf16 %v2308_v39, %v2306_v30 }
 0x507   :  { %v2043_v34 = vadd.f32 %v2013_v19, %v9111_v52  ;;  %v2288_v19 = vld [vmem:[#allocation5 + $0xb0] sm:$0xff] }
 0x508   :  { %v2074_v40 = vmul.f32 %v2057_v37, %v2042_v8  ;;  %v2286_v8 = vld [vmem:[#allocation5 + $0xa0] sm:$0xff] }
 0x509   :  { %v2075_v42 = vmul.f32 %v2057_v37, %v2043_v34  ;;  %v7393_v37 = vpack.c.bf16 %v2289_v17, %v2287_v31  ;;  %v2291_v34 = vld [vmem:[#allocation5 + $0xc8] sm:$0xff]  ;;  %v2310_v31 = vld [vmem:[#allocation5 + $0x160] sm:$0xff]  ;;  %v2312_v17 = vld [vmem:[#allocation5 + $0x170] sm:$0xff] }
 0x50a   :  { %v2106_v45 = vadd.f32 %v2089_v50, %v2074_v40  ;;  %v2480_v40 = vld [vmem:[%s10433_s11 + $0x8] sm:$0xff] }
 0x50b   :  { %v2107_v23 = vadd.f32 %v2089_v50, %v2075_v42  ;;  %v2482_v50 = vld [vmem:[%s10433_s11 + $0x18] sm:$0xff]  ;;  %v2293_v42 = vld [vmem:[#allocation5 + $0xd8] sm:$0xff] }
 0x50c   :  { %v7101_v6 = vmul.f32 -1.442695, %v2106_v45 }
 0x50d   :  { %v7102_v48 = vmul.f32 -1.442695, %v2107_v23 }
 0x50e   :  { %8379 = vpow2.f32 %v7101_v6  ;;  %v2481_v6 = vld [vmem:[%s10433_s11 + $0x10] sm:$0xff] }
 0x50f   :  { %8381 = vpow2.f32 %v7102_v48 }
 0x518   :  { %v8380_v51 = vpop.eup %8379 }
 0x519   :  { %v8382_v53 = vpop.eup %8381  ;;  %v2138_v59 = vadd.f32 1.0, %v8380_v51  ;;  %v7395_v51 = vpack.c.bf16 %v2288_v19, %v2286_v8  ;;  %v2317_v8 = vld [vmem:[#allocation5 + $0x198] sm:$0xff]  ;;  %v7419_v19 = vpack.c.bf16 %v2312_v17, %v2310_v31 }
 0x51a   :  { %v2139_v1 = vadd.f32 1.0, %v8382_v53  ;;  %v2484_v53 = vld [vmem:[%s10433_s11 + $0x28] sm:$0xff] }
 0x51b   :  { %8383 = vrcp.f32 %v2138_v59  ;;  %v2486_v59 = vld [vmem:[%s10433_s11 + $0x38] sm:$0xff] }
 0x51c   :  { %8385 = vrcp.f32 %v2139_v1  ;;  %v2483_v1 = vld [vmem:[%s10433_s11 + $0x20] sm:$0xff] }
 0x525   :  { %v8384_v49 = vpop.eup %8383 }
 0x526   :  { %v8386_v61 = vpop.eup %8385  ;;  %v2162_v24 = vmul.f32 %v8384_v49, %v2106_v45  ;;  %v9615_v45 = vpack.c.bf16 %v2482_v50, %v2480_v40  ;;  %v7397_v49 = vpack.c.bf16 %v2293_v42, %v2291_v34  ;;  %v2314_v34 = vld [vmem:[#allocation5 + $0x180] sm:$0xff]  ;;  %v2316_v40 = vld [vmem:[#allocation5 + $0x190] sm:$0xff]  ;;  %v2319_v50 = vld [vmem:[#allocation5 + $0x1a8] sm:$0xff] }
 0x527   :  { %v2163_v46 = vmul.f32 %v8386_v61, %v2107_v23  ;;  %v2479_v23 = vld [vmem:[%s10433_s11] sm:$0xff]  ;;  %v2290_v61 = vld [vmem:[#allocation5 + $0xc0] sm:$0xff]  ;;  %v2321_v42 = vld [vmem:[#allocation5 + $0x1b8] sm:$0xff] }
 0x528   :  { %v9596_v52 = vsel %vm73_vm5, %v2162_v24, 0.0  ;;  %v9623_v48 = vpack.c.bf16 %v2481_v6, %v2479_v23  ;;  %7438 = vmatprep.subr.bf16.mxu0 %v9615_v45  ;;  %v2292_v24 = vld [vmem:[#allocation5 + $0xd0] sm:$0xff]  ;;  %v7423_v23 = vpack.c.bf16 %v2316_v40, %v2314_v34  ;;  %v7425_v6 = vpack.c.bf16 %v2321_v42, %v2319_v50  ;;  %v2085_v34 = vld [vmem:[%s10431_s9 + $0x18] sm:$0xff] }
 0x529   :  { %v9600_v43 = vsel %vm9161_vm6, %v2163_v46, 0.0  ;;  %v9636_v46 = vpack.c.bf16 %v2486_v59, %v2484_v53  ;;  %v7399_v2 = vpack.c.bf16 %v2292_v24, %v2290_v61  ;;  %v2320_v53 = vld [vmem:[#allocation5 + $0x1b0] sm:$0xff]  ;;  %v2323_v59 = vld [vmem:[#allocation5 + $0x1c8] sm:$0xff]  ;;  %v2322_v24 = vld [vmem:[#allocation5 + $0x1c0] sm:$0xff] }
 0x52a   :  { %v8254_v56 = vpack.i.bf16 %v9600_v43, %v9596_v52  ;;  %7440 = vmatpush1.bf16.msra.mxu0 %v9623_v48  ;;  %v2053_v40 = vld [vmem:[%s10430_s8 + $0x18] sm:$0xff] }
 0x52b   :  { %7442 = vmatprep.subr.bf16.mxu0 %v9636_v46 }
 0x52c   :  { %8255 = vrot.lane.b32.xlu1 %v8254_v56, %s8857_s24  ;;  %v2485_v56 = vld [vmem:[%s10433_s11 + $0x30] sm:$0xff] }
 0x52d   :  { %v9641_v63 = vpack.c.bf16 %v2485_v56, %v2483_v1  ;;  %v2325_v1 = vld [vmem:[#allocation5 + $0x1d8] sm:$0xff]  ;;  %v2324_v56 = vld [vmem:[#allocation5 + $0x1d0] sm:$0xff] }
 0x52e   :  { %v7429_v61 = vpack.c.bf16 %v2325_v1, %v2323_v59  ;;  %v7431_v54 = vpack.c.bf16 %v2324_v56, %v2322_v24 }
 0x52f   :  { %7444 = vmatpush1.bf16.msra.mxu0 %v9641_v63 }
 0x530   :  { %1931 = vrot.lane.b32.xlu1 %v9448_v55, %s8869_s21  ;;  %v7381_v55 = vpack.c.bf16 %v2277_v26, %v2275_v21  ;;  %v2298_v21 = vld [vmem:[#allocation5 + $0x100] sm:$0xff]  ;;  %v2300_v26 = vld [vmem:[#allocation5 + $0x110] sm:$0xff] }
 0x531   :  { %v7407_v29 = vpack.c.bf16 %v2300_v26, %v2298_v21  ;;  %v2326_v21 = vld [vmem:[#allocation5 + $0x1e0] sm:$0xff]  ;;  %v2328_v26 = vld [vmem:[#allocation5 + $0x1f0] sm:$0xff] }
 0x532   :  { %7382 = vmatprep.subr.bf16.mxu1 %v7381_v55  ;;  %v2305_v55 = vld [vmem:[#allocation5 + $0x138] sm:$0xff] }
 0x533   :  { %7384 = vmatpush1.bf16.msra.mxu1 %v7383_v4  ;;  %v7409_v10 = vpack.c.bf16 %v2305_v55, %v2303_v27  ;;  %v2307_v4 = vld [vmem:[#allocation5 + $0x148] sm:$0xff]  ;;  %v2492_v27 = vld [vmem:[%s10433_s11 + $0x68] sm:$0xff]  ;;  %v7435_v55 = vpack.c.bf16 %v2328_v26, %v2326_v21 }
 0x534   :  { %1935 = vrot.lane.b32.xlu1 %v9481_v62, %s8869_s21  ;;  %v2278_v62 = vld [vmem:[#allocation5 + $0x60] sm:$0xff]  ;;  %7386 = vmatprep.subr.bf16.mxu1 %v7385_v32  ;;  %v2309_v32 = vld [vmem:[#allocation5 + $0x158] sm:$0xff] }
 0x535   :  { %v7387_v41 = vpack.c.bf16 %v2280_v38, %v2278_v62  ;;  %v7411_v62 = vpack.c.bf16 %v2304_v36, %v2302_v35  ;;  %v7413_v38 = vpack.c.bf16 %v2309_v32, %v2307_v4  ;;  %v2493_v35 = vld [vmem:[%s10433_s11 + $0x70] sm:$0xff] }
 0x537   :  { %7388 = vmatpush1.bf16.msra.mxu1 %v7387_v41  ;;  %v2311_v41 = vld [vmem:[#allocation5 + $0x168] sm:$0xff] }
 0x538   :  { %7390 = vmatprep.subr.bf16.mxu1 %v7389_v47  ;;  %v2313_v47 = vld [vmem:[#allocation5 + $0x178] sm:$0xff] }
 0x539   :  { %v7417_v9 = vpack.c.bf16 %v2313_v47, %v2311_v41 }
 0x53b   :  { %7392 = vmatpush1.bf16.msra.mxu1 %v7391_v33  ;;  %v2315_v33 = vld [vmem:[#allocation5 + $0x188] sm:$0xff] }
 0x53c   :  { %7394 = vmatprep.subr.bf16.mxu1 %v7393_v37  ;;  %v7421_v37 = vpack.c.bf16 %v2317_v8, %v2315_v33 }
 0x53f   :  { %7396 = vmatpush1.bf16.msra.mxu1 %v7395_v51  ;;  %v2318_v51 = vld [vmem:[#allocation5 + $0x1a0] sm:$0xff] }
 0x540   :  { %7398 = vmatprep.subr.bf16.mxu1 %v7397_v49  ;;  %v7427_v49 = vpack.c.bf16 %v2320_v53, %v2318_v51 }
 0x543   :  { %7400 = vmatpush1.bf16.msra.mxu1 %v7399_v2  ;;  %v2490_v2 = vld [vmem:[%s10433_s11 + $0x58] sm:$0xff] }
 0x544   :  { %7402 = vmatprep.subr.bf16.mxu1 %v7401_v5  ;;  %v9651_v5 = vpack.c.bf16 %v2490_v2, %v2488_v58 }
 0x546   :  { %7446 = vmatprep.subr.bf16.mxu0 %v9651_v5 }
 0x547   :  { %7404 = vmatpush1.bf16.msra.mxu1 %v7403_v25  ;;  %v2329_v25 = vld [vmem:[#allocation5 + $0x1f8] sm:$0xff]  ;;  %7448 = vmatpush1.bf16.msra.mxu0 %v9659_v11 }
 0x548   :  { %7406 = vmatprep.subr.bf16.mxu1 %v7405_v14  ;;  %v7433_v14 = vpack.c.bf16 %v2329_v25, %v2327_v22 }
 0x54b   :  { %7408 = vmatpush1.bf16.msra.mxu1 %v7407_v29  ;;  %v2494_v29 = vld [vmem:[%s10433_s11 + $0x78] sm:$0xff] }
 0x54c   :  { %7410 = vmatprep.subr.bf16.mxu1 %v7409_v10  ;;  %v2491_v10 = vld [vmem:[%s10433_s11 + $0x60] sm:$0xff]  ;;  %v9675_v36 = vpack.c.bf16 %v2494_v29, %v2492_v27 }
 0x54d   :  { %v9677_v4 = vpack.c.bf16 %v2493_v35, %v2491_v10 }
 0x54e   :  { %7450 = vmatprep.subr.bf16.mxu0 %v9675_v36 }
 0x54f   :  { %7412 = vmatpush1.bf16.msra.mxu1 %v7411_v62  ;;  %7452 = vmatpush1.bf16.msra.mxu0 %v9677_v4  ;;  %v2211_v62 = vpop.permute.xlu0 %2210 }
 0x550   :  { %7414 = vmatprep.subr.bf16.mxu1 %v7413_v38  ;;  %7470 = vmatprep.subr.bf16.mxu0 %v9615_v45 }
 0x553   :  { %7416 = vmatpush1.bf16.msra.mxu1 %v7415_v18  ;;  %v1934_v17 = vpop.permute.xlu0 %1933 }
 0x554   :  { %7418 = vmatprep.subr.bf16.mxu1 %v7417_v9 }
 0x557   :  { %7420 = vmatpush1.bf16.msra.mxu1 %v7419_v19  ;;  %v2084_v19 = vld [vmem:[%s10431_s9 + $0x10] sm:$0xff] }
 0x558   :  { %7422 = vmatprep.subr.bf16.mxu1 %v7421_v37  ;;  %v2052_v37 = vld [vmem:[%s10430_s8 + $0x10] sm:$0xff] }
 0x55b   :  { %7424 = vmatpush1.bf16.msra.mxu1 %v7423_v23 }
 0x55c   :  { %7426 = vmatprep.subr.bf16.mxu1 %v7425_v6 }
 0x55f   :  { %7428 = vmatpush1.bf16.msra.mxu1 %v7427_v49 }
 0x560   :  { %7430 = vmatprep.subr.bf16.mxu1 %v7429_v61 }
 0x563   :  { %7432 = vmatpush1.bf16.msra.mxu1 %v7431_v54 }
 0x564   :  { %7434 = vmatprep.subr.bf16.mxu1 %v7433_v14 }
 0x567   :  { %7436 = vmatpush1.bf16.msra.mxu1 %v7435_v55 }
 0x568   :  { %7454 = vmatprep.subr.bf16.mxu1 %v9615_v45 }
 0x59e   :  { %v8256_v32 = vpop.permute.xlu1 %8255 }
 0x59f   :  { %v8258_v38 = vunpack.i.h.bf16 %v8256_v32  ;;  %v8257_v30 = vunpack.i.l.bf16 %v8256_v32 }
 0x5a1   :  { %v2256_v39 = vmax.f32 %v9600_v43, %v8258_v38  ;;  %v2235_v41 = vsel %vm119_vm0, %v8257_v30, %v8258_v38  ;;  %v2234_v47 = vsel %vm119_vm0, %v2211_v62, %v8257_v30  ;;  %v2083_v43 = vld [vmem:[%s10431_s9 + $0x8] sm:$0xff] }
 0x5a2   :  { %v2255_v18 = vmax.f32 %v9596_v52, %v2235_v41  ;;  %v2254_v9 = vmax.f32 %v2234_v47, 0.0  ;;  %v1932_v31 = vpop.permute.xlu1 %1931  ;;  %v2051_v52 = vld [vmem:[%s10430_s8 + $0x8] sm:$0xff] }
 0x5a3   :  { %7098 = vmatmul.mubr.msk.f32.gmra.mrb[10].mxu0 %vm823_vm8, %v1932_v31 }
 0x5a4   :  { %2342 = vrot.lane.b32.xlu1 %v2254_v9, %s8866_s30  ;;  %2021 = vmatprep.mubr.f32.mxu0 %v8856_v0  ;;  %v8259_v33 = vpack.i.bf16 %v2256_v39, %v2255_v18 }
 0x5a6   :  { %8260 = vrot.lane.b32.xlu0 %v8259_v33, %s8866_s30  ;;  %v1936_v8 = vpop.permute.xlu1 %1935 }
 0x5a7   :  { %7099 = vmatmul.mubr.msk.f32.gmra.mrb[12].mxu0 %vm823_vm8, %v1934_v17 }
 0x5a8   :  { %2093 = vperm.xlu1 %8072, %v2083_v43   ;;  %2027 = vmatprep.mubr.f32.mxu0 %v8856_v0 }
 0x5aa   :  { %2061 = vperm.xlu0 %8073, %v2051_v52  }
 0x5ab   :  { %7100 = vmatmul.mubr.msk.f32.gmra.mrb[14].mxu0 %vm823_vm8, %v1936_v8 }
 0x5ac   :  { %2098 = vperm.xlu1 %8072, %v2084_v19   ;;  %2565 = vmatprep.mubr.f32.mxu0 %v8856_v0 }
 0x5ae   :  { %2066 = vperm.xlu0 %8073, %v2052_v37  }
 0x5af   :  { %2566 = vmatmul.mubr.f32.vlgmr.msra.gmra.mrb[16].mxu0 %v8856_v0 }
 0x5b0   :  { %2103 = vperm.xlu1 %8072, %v2085_v34   ;;  %7472 = vmatpush1.bf16.msra.mxu0 %v9623_v48 }
 0x5b1   :  { %7474 = vmatprep.subr.bf16.mxu0 %v9636_v46  ;;  %2826 = vmatprep.mubr.f32.mxu0 %v8856_v0 }
 0x5b2   :  { %2071 = vperm.xlu0 %8073, %v2053_v40  }
 0x5b4   :  { %7476 = vmatpush1.bf16.msra.mxu0 %v9641_v63 }
 0x5b5   :  { %7478 = vmatprep.subr.bf16.mxu0 %v9651_v5 }
 0x5b8   :  { %7480 = vmatpush1.bf16.msra.mxu0 %v9659_v11 }
 0x5b9   :  { %7482 = vmatprep.subr.bf16.mxu0 %v9675_v36 }
 0x5bc   :  { %7484 = vmatpush1.bf16.msra.mxu0 %v9677_v4 }
 0x5bd   :  { %7502 = vmatprep.subr.bf16.mxu0 %v9615_v45 }
 0x616   :  { %v2343_v6 = vpop.permute.xlu1 %2342 }
 0x618   :  { %v8261_v50 = vpop.permute.xlu0 %8260 }
 0x619   :  { %v8263_v42 = vunpack.i.h.bf16 %v8261_v50  ;;  %v8262_v23 = vunpack.i.l.bf16 %v8261_v50 }
 0x61b   :  { %v2367_v51 = vsel %vm945_vm9, %v8262_v23, %v8263_v42  ;;  %v2366_v53 = vsel %vm945_vm9, %v2343_v6, %v8262_v23 }
 0x61c   :  { %2446 = vmatprep.mubr.f32.mxu1 %v2367_v51 }
 0x61d   :  { %2447 = vmatmul.mubr.f32.vlgmr.msra.gmra.mrb[8].mxu1 %v2366_v53 }
 0x61e   :  { %7456 = vmatpush1.bf16.msra.mxu1 %v9623_v48 }
 0x61f   :  { %7458 = vmatprep.subr.bf16.mxu1 %v9636_v46 }
 0x622   :  { %7460 = vmatpush1.bf16.msra.mxu1 %v9641_v63 }
 0x623   :  { %7462 = vmatprep.subr.bf16.mxu1 %v9651_v5 }
 0x626   :  { %7464 = vmatpush1.bf16.msra.mxu1 %v9659_v11 }
 0x627   :  { %7466 = vmatprep.subr.bf16.mxu1 %v9675_v36  ;;  %v2094_v24 = vpop.permute.xlu1 %2093 }
 0x629   :  { %v2062_v59 = vpop.permute.xlu0 %2061 }
 0x62a   :  { %7468 = vmatpush1.bf16.msra.mxu1 %v9677_v4 }
 0x62b   :  { %7486 = vmatprep.subr.bf16.mxu1 %v9615_v45  ;;  %v2099_v55 = vpop.permute.xlu1 %2098 }
 0x62d   :  { %v2067_v25 = vpop.permute.xlu0 %2066 }
 0x676   :  { %v2017_v1 = vpop.f32.mrb[10].mxu0 }
 0x677   :  { %v2044_v49 = vadd.f32 %v2017_v1, %v9118_v57  ;;  %v2019_v61 = vpop.f32.mrb[11].mxu0 }
 0x678   :  { %v2045_v56 = vadd.f32 %v2019_v61, %v9122_v60 }
 0x679   :  { %v2076_v54 = vmul.f32 %v2062_v59, %v2044_v49  ;;  %v8870_v49 = vmov 1966171168  }
 0x67a   :  { %v2077_v58 = vmul.f32 %v2062_v59, %v2045_v56  ;;  %v2023_v2 = vpop.f32.mrb[12].mxu0  ;;  %v2576_v61 = vunpack.c.l.s4 %v8870_v49 }
 0x67b   :  { %v2108_v13 = vadd.f32 %v2094_v24, %v2076_v54  ;;  %v2046_v16 = vadd.f32 %v2023_v2, %v9130_v3  ;;  %v2025_v22 = vpop.f32.mrb[13].mxu0  ;;  %v9764_v54 = vshrl.u32 %v68_v20, 7 }
 0x67c   :  { %v2109_v14 = vadd.f32 %v2094_v24, %v2077_v58  ;;  %v2047_v21 = vadd.f32 %v2025_v22, %v9134_v7  ;;  %v2072_v24 = vpop.permute.xlu0 %2071  ;;  %v2577_v56 = vunpack.c.0.s8 %v2576_v61 }
 0x67d   :  { %v7103_v26 = vmul.f32 -1.442695, %v2108_v13  ;;  %v2078_v27 = vmul.f32 %v2067_v25, %v2046_v16 }
 0x67e   :  { %v7104_v29 = vmul.f32 -1.442695, %v2109_v14  ;;  %v2079_v57 = vmul.f32 %v2067_v25, %v2047_v21  ;;  %v2029_v10 = vpop.f32.mrb[14].mxu0  ;;  %v9767_v16 = vsub.s32 %v2577_v56, %v9764_v54 }
 0x67f   :  { %8387 = vpow2.f32 %v7103_v26  ;;  %v2110_v35 = vadd.f32 %v2099_v55, %v2078_v27  ;;  %v2048_v60 = vadd.f32 %v2029_v10, %v9142_v12  ;;  %v2031_v32 = vpop.f32.mrb[15].mxu0 }
 0x680   :  { %8389 = vpow2.f32 %v7104_v29  ;;  %v2111_v62 = vadd.f32 %v2099_v55, %v2079_v57  ;;  %v2049_v3 = vadd.f32 %v2031_v32, %v9146_v15  ;;  %v9774_v29 = vld [vmem:[%s10434_s12] sm:$0x3] }
 0x681   :  { %v7105_v38 = vmul.f32 -1.442695, %v2110_v35  ;;  %v2080_v58 = vmul.f32 %v2072_v24, %v2048_v60 }
 0x682   :  { %v7106_v30 = vmul.f32 -1.442695, %v2111_v62  ;;  %v2567_v39 = vpop.f32.mrb[16].mxu0  ;;  %v2081_v2 = vmul.f32 %v2072_v24, %v2049_v3 }
 0x683   :  { %8391 = vpow2.f32 %v7105_v38  ;;  %v2569_v7 = vpop.f32.mrb[17].mxu0 }
 0x684   :  { %8393 = vpow2.f32 %v7106_v30  ;;  %v2574_v41 = vcombine.low %v2567_v39, %v2569_v7 }
 0x686   :  { %v2581_v27 = vrot.slane %v2574_v41, %v9767_v16 }
 0x688   :  { %v2588_v20 = vrot.slane %v2581_v27, %v9767_v16 }
 0x689   :  { %v8388_v47 = vpop.eup %8387 }
 0x68a   :  { %v8390_v18 = vpop.eup %8389  ;;  %v2140_v9 = vadd.f32 1.0, %v8388_v47 }
 0x68b   :  { %v2141_v31 = vadd.f32 1.0, %v8390_v18 }
 0x68c   :  { %8395 = vrcp.f32 %v2140_v9 }
 0x68d   :  { %v8392_v17 = vpop.eup %8391  ;;  %8397 = vrcp.f32 %v2141_v31 }
 0x68e   :  { %v8394_v12 = vpop.eup %8393  ;;  %v2142_v33 = vadd.f32 1.0, %v8392_v17 }
 0x68f   :  { %v2143_v43 = vadd.f32 1.0, %v8394_v12 }
 0x690   :  { %8399 = vrcp.f32 %v2142_v33 }
 0x691   :  { %8401 = vrcp.f32 %v2143_v43 }
 0x696   :  { %v8396_v15 = vpop.eup %8395 }
 0x697   :  { %v8398_v52 = vpop.eup %8397  ;;  %v2164_v8 = vmul.f32 %v8396_v15, %v2108_v13  ;;  %v2104_v13 = vpop.permute.xlu1 %2103 }
 0x698   :  { %v2165_v19 = vmul.f32 %v8398_v52, %v2109_v14  ;;  %v2112_v22 = vadd.f32 %v2104_v13, %v2080_v58  ;;  %v2113_v25 = vadd.f32 %v2104_v13, %v2081_v2 }
 0x699   :  { %v9741_v37 = vsel %vm73_vm5, %v2164_v8, 0.0 }
 0x69a   :  { %v8400_v34 = vpop.eup %8399  ;;  %v2173_v40 = vsel %vm9161_vm6, %v2165_v19, 0.0  ;;  %v7107_v26 = vmul.f32 -1.442695, %v2112_v22  ;;  %v7108_v55 = vmul.f32 -1.442695, %v2113_v25 }
 0x69b   :  { %v8402_v50 = vpop.eup %8401  ;;  %v2166_v42 = vmul.f32 %v8400_v34, %v2110_v35  ;;  %v8264_v23 = vpack.i.bf16 %v2173_v40, %v9741_v37 }
 0x69c   :  { %v2167_v6 = vmul.f32 %v8402_v50, %v2111_v62  ;;  %8403 = vpow2.f32 %v7107_v26 }
 0x69d   :  { %8265 = vrot.lane.b32.xlu0 %v8264_v23, %s8857_s24  ;;  %v9749_v51 = vsel %vm73_vm5, %v2166_v42, 0.0  ;;  %8405 = vpow2.f32 %v7108_v55 }
 0x69e   :  { %v8269_v53 = vpack.i.bf16 %v9749_v51, %v8856_v0  ;;  %v9755_v59 = vsel %vm9161_vm6, %v2167_v6, 0.0 }
 0x69f   :  { %v8274_v1 = vpack.i.bf16 %v8856_v0, %v9755_v59 }
 0x6a0   :  { %8270 = vrot.lane.b32.xlu1 %v8269_v53, %s8857_s24 }
 0x6a4   :  { %8275 = vrot.lane.b32.xlu1 %v8274_v1, %s8857_s24 }
 0x6a6   :  { %v8404_v32 = vpop.eup %8403 }
 0x6a7   :  { %v8406_v62 = vpop.eup %8405  ;;  %v2144_v3 = vadd.f32 1.0, %v8404_v32 }
 0x6a8   :  { %2228 = vrot.lane.b32.xlu1 %v8856_v0, %s8857_s24  ;;  %v2145_v38 = vadd.f32 1.0, %v8406_v62 }
 0x6f0   :  { %v2448_v14 = vpop.f32.mrb[8].mxu1 }
 0x6f1   :  { %2471 = vst [vmem:[#allocation3] sm:$0xff] %v2448_v14  ;;  %v2450_v21 = vpop.f32.mrb[9].mxu1 }
 0x6f2   :  { %2472 = vst [vmem:[#allocation3 + $0x8] sm:$0xff] %v2450_v21 }
 0x6f9   :  { %v2496_v57 = vld [vmem:[#allocation3] ss:$8 sm:$0x3] }
 0x6fa   :  { %v2590_v10 = vadd.f32 %v2588_v20, %v2496_v57 }
 0x6fc   :  { %v2591_v35 = vadd.f32 %v2590_v10, %v9774_v29 }
 0x6fe   :  { %v7109_v60 = vmul.f32 -1.442695, %v2591_v35  ;;  %v2599_v30 = vrot.slane %v2591_v35, 1 }
 0x700   :  { %8407 = vpow2.f32 %v7109_v60 }
 0x701   :  { %8409 = vrcp.f32 %v2144_v3 }
 0x702   :  { %8411 = vrcp.f32 %v2145_v38 }
 0x703   :  { %8413 = vtanh.f32 %v2599_v30 }
 0x70a   :  { %v8408_v39 = vpop.eup %8407 }
 0x70b   :  { %v2595_v7 = vadd.f32 1.0, %v8408_v39  ;;  %v8410_v9 = vpop.eup %8409 }
 0x70c   :  { %v8412_v31 = vpop.eup %8411  ;;  %v2168_v15 = vmul.f32 %v8410_v9, %v2112_v22 }
 0x70d   :  { %8415 = vrcp.f32 %v2595_v7  ;;  %v2169_v52 = vmul.f32 %v8412_v31, %v2113_v25  ;;  %v8414_v19 = vpop.eup %8413 }
 0x70e   :  { %v2176_v49 = vsel %vm73_vm5, %v2168_v15, 0.0 }
 0x70f   :  { %v8266_v41 = vpop.permute.xlu0 %8265 }
 0x710   :  { %v8268_v47 = vunpack.i.h.bf16 %v8266_v41  ;;  %v8267_v18 = vunpack.i.l.bf16 %v8266_v41 }
 0x712   :  { %v2259_v17 = vmax.f32 %v2173_v40, %v8268_v47  ;;  %v2237_v12 = vsel %vm119_vm0, %v8267_v18, %v8268_v47  ;;  %v8271_v33 = vpop.permute.xlu1 %8270 }
 0x713   :  { %v2258_v43 = vmax.f32 %v9741_v37, %v2237_v12  ;;  %v8273_v42 = vunpack.i.h.bf16 %v8271_v33  ;;  %v2177_v37 = vsel %vm9161_vm6, %v2169_v52, 0.0  ;;  %v8272_v24 = vunpack.i.l.bf16 %v8271_v33 }
 0x714   :  { %v8279_v56 = vpack.i.bf16 %v2177_v37, %v2176_v49 }
 0x715   :  { %v8284_v8 = vpack.i.bf16 %v2259_v17, %v2258_v43 }
 0x716   :  { %v8276_v34 = vpop.permute.xlu1 %8275 }
 0x717   :  { %v8416_v50 = vpop.eup %8415  ;;  %v8278_v23 = vunpack.i.h.bf16 %v8276_v34  ;;  %v8277_v6 = vunpack.i.l.bf16 %v8276_v34  ;;  %8285 = vrot.lane.b32.xlu1 %v8284_v8, %s8866_s30 }
 0x718   :  { %v2613_v53 = vmul.f32 %v8416_v50, %v8414_v19  ;;  %v2612_v26 = vmul.f32 0.0, %v8416_v50 }
 0x719   :  { %v2238_v1 = vsel %vm119_vm0, %v8278_v23, %v8273_v42  ;;  %v2262_v40 = vmax.f32 %v9755_v59, %v8277_v6  ;;  %v2239_v2 = vsel %vm119_vm0, %v8273_v42, %v8277_v6  ;;  %v2236_v59 = vsel %vm119_vm0, %v8272_v24, %v8267_v18 }
 0x71a   :  { %v2260_v61 = vmax.f32 %v2238_v1, 0.0  ;;  %2615 = vrot.lane.b32.xlu0 %v2613_v53, %s8868_s4  ;;  %v2261_v28 = vmax.f32 %v9749_v51, %v2239_v2  ;;  %v2257_v13 = vmax.f32 %v2236_v59, 0.0  ;;  %v2229_v22 = vpop.permute.xlu1 %2228 }
 0x71c   :  { %v8294_v58 = vpack.i.bf16 %v2260_v61, %v2262_v40  ;;  %v8289_v44 = vpack.i.bf16 %v2261_v28, %v2257_v13 }
 0x71e   :  { %8280 = vrot.lane.b32.xlu0 %v8279_v56, %s8857_s24  ;;  %8295 = vrot.lane.b32.xlu1 %v8294_v58, %s8866_s30 }
 0x722   :  { %2602 = vrot.lane.b32.xlu0 %v2591_v35, %s8868_s4 }
 0x726   :  { %8290 = vrot.lane.b32.xlu0 %v8289_v44, %s8866_s30 }
 0x789   :  { %v8286_v25 = vpop.permute.xlu1 %8285 }
 0x78a   :  { %v8288_v14 = vunpack.i.h.bf16 %v8286_v25  ;;  %v8287_v21 = vunpack.i.l.bf16 %v8286_v25 }
 0x78c   :  { %v2616_v27 = vpop.permute.xlu0 %2615  ;;  %v2369_v55 = vsel %vm945_vm9, %v8287_v21, %v8288_v14 }
 0x78d   :  { %v9795_v20 = vadd.f32 %v2616_v27, %v2612_v26  ;;  %2452 = vmatprep.mubr.f32.mxu1 %v2369_v55 }
 0x78f   :  { %8417 = vtanh.f32 %v9795_v20 }
 0x790   :  { %v8281_v57 = vpop.permute.xlu0 %8280  ;;  %v8296_v30 = vpop.permute.xlu1 %8295 }
 0x791   :  { %v8283_v51 = vunpack.i.h.bf16 %v8281_v57  ;;  %v8282_v10 = vunpack.i.l.bf16 %v8281_v57  ;;  %v8297_v41 = vunpack.i.l.bf16 %v8296_v30  ;;  %v8298_v12 = vunpack.i.h.bf16 %v8296_v30 }
 0x793   :  { %v2265_v35 = vmax.f32 %v2177_v37, %v8283_v51  ;;  %v2241_v60 = vsel %vm119_vm0, %v8282_v10, %v8283_v51  ;;  %v2240_v32 = vsel %vm119_vm0, %v2229_v22, %v8282_v10  ;;  %v2628_v22 = vld [vmem:[#allocation3 + $0x1] ss:$8 sm:$0x3]  ;;  %vm6915_vm0 = vcmask 1040384  }
 0x794   :  { %v2264_v62 = vmax.f32 %v2176_v49, %v2241_v60  ;;  %v2603_v3 = vpop.permute.xlu0 %2602  ;;  %v2263_v38 = vmax.f32 %v2240_v32, 0.0 }
 0x795   :  { %v2604_v43 = vrot.slane %v2603_v3, 1 }
 0x796   :  { %2360 = vrot.lane.b32.xlu1 %v2263_v38, %s8866_s30  ;;  %v8299_v39 = vpack.i.bf16 %v2265_v35, %v2264_v62 }
 0x797   :  { %v7110_v15 = vmul.f32 -1.442695, %v2604_v43 }
 0x798   :  { %8300 = vrot.lane.b32.xlu0 %v8299_v39, %s8866_s30  ;;  %v8291_v7 = vpop.permute.xlu0 %8290 }
 0x799   :  { %v8293_v47 = vunpack.i.h.bf16 %v8291_v7  ;;  %v8292_v18 = vunpack.i.l.bf16 %v8291_v7  ;;  %v8418_v9 = vpop.eup %8417  ;;  %8419 = vpow2.f32 %v7110_v15 }
 0x79b   :  { %v2368_v31 = vsel %vm945_vm9, %v8292_v18, %v8287_v21  ;;  %v2371_v17 = vsel %vm945_vm9, %v8293_v47, %v8297_v41  ;;  %v2370_v33 = vsel %vm945_vm9, %v8298_v12, %v8293_v47 }
 0x79c   :  { %2621 = vrot.lane.b32.xlu0 %v8418_v9, %s8868_s4  ;;  %2453 = vmatmul.mubr.f32.gmra.mrb[10].mxu1 %v2368_v31 }
 0x79d   :  { %2458 = vmatprep.mubr.f32.mxu1 %v2371_v17 }
 0x7a0   :  { %2459 = vmatmul.mubr.f32.gmra.mrb[12].mxu1 %v2370_v33  ;;  %v2758_v33 = vld [vmem:[#allocation3 + $0x2] ss:$8 sm:$0x3] }
 0x7a3   :  { %v8420_v52 = vpop.eup %8419 }
 0x7a4   :  { %v2609_v8 = vadd.f32 1.0, %v8420_v52 }
 0x7a6   :  { %8421 = vrcp.f32 %v2609_v8 }
 0x7b0   :  { %v8422_v53 = vpop.eup %8421 }
 0x808   :  { %v2361_v42 = vpop.permute.xlu1 %2360 }
 0x80a   :  { %v8301_v19 = vpop.permute.xlu0 %8300 }
 0x80b   :  { %v8303_v34 = vunpack.i.h.bf16 %v8301_v19  ;;  %v8302_v50 = vunpack.i.l.bf16 %v8301_v19 }
 0x80d   :  { %v2373_v23 = vsel %vm945_vm9, %v8302_v50, %v8303_v34  ;;  %v2372_v6 = vsel %vm945_vm9, %v2361_v42, %v8302_v50 }
 0x80e   :  { %v2622_v1 = vpop.permute.xlu0 %2621  ;;  %2464 = vmatprep.mubr.f32.mxu1 %v2373_v23 }
 0x80f   :  { %v2624_v40 = vmul.f32 %v8422_v53, %v2622_v1  ;;  %2465 = vmatmul.mubr.f32.gmra.mrb[14].mxu1 %v2372_v6 }
 0x810   :  { %2696 = vmatprep.mubr.f32.mxu1 %v8856_v0 }
 0x811   :  { %2626 = vst.msk [vmem:[#allocation4] sm:$0x1] %vm2625_vm13, %v2624_v40 }
 0x813   :  { %7111 = vmatmul.mubr.msk.f32.vlgmr.msra.gmra.mrb[16].mxu1 %vm2497_vm14, %v2624_v40 }
 0x814   :  { %7488 = vmatpush1.bf16.msra.mxu1 %v9623_v48  ;;  %2956 = vmatprep.mubr.f32.mxu1 %v8856_v0 }
 0x815   :  { %7490 = vmatprep.subr.bf16.mxu1 %v9636_v46 }
 0x818   :  { %7492 = vmatpush1.bf16.msra.mxu1 %v9641_v63 }
 0x819   :  { %7494 = vmatprep.subr.bf16.mxu1 %v9651_v5 }
 0x81c   :  { %7496 = vmatpush1.bf16.msra.mxu1 %v9659_v11 }
 0x81d   :  { %7498 = vmatprep.subr.bf16.mxu1 %v9675_v36 }
 0x820   :  { %7500 = vmatpush1.bf16.msra.mxu1 %v9677_v4 }
 0x821   :  { %7518 = vmatprep.subr.bf16.mxu1 %v9615_v45 }
 0x86f   :  { %v2454_v49 = vpop.f32.mrb[10].mxu1 }
 0x870   :  { %2473 = vst [vmem:[#allocation3 + $0x10] sm:$0xff] %v2454_v49  ;;  %v2456_v37 = vpop.f32.mrb[11].mxu1 }
 0x871   :  { %2474 = vst [vmem:[#allocation3 + $0x18] sm:$0xff] %v2456_v37 }
 0x873   :  { %v2460_v61 = vpop.f32.mrb[12].mxu1 }
 0x874   :  { %2475 = vst [vmem:[#allocation3 + $0x20] sm:$0xff] %v2460_v61  ;;  %v2462_v24 = vpop.f32.mrb[13].mxu1 }
 0x875   :  { %2476 = vst [vmem:[#allocation3 + $0x28] sm:$0xff] %v2462_v24 }
 0x8e2   :  { %v2466_v56 = vpop.f32.mrb[14].mxu1 }
 0x8e3   :  { %2477 = vst [vmem:[#allocation3 + $0x30] sm:$0xff] %v2466_v56  ;;  %v2468_v58 = vpop.f32.mrb[15].mxu1 }
 0x8e4   :  { %2478 = vst [vmem:[#allocation3 + $0x38] sm:$0xff] %v2468_v58 }
 0x8e6   :  { %v2698_v2 = vpop.f32.mrb[16].mxu1 }
 0x8e7   :  { %v2700_v59 = vpop.f32.mrb[17].mxu1 }
 0x8e8   :  { %v2705_v28 = vcombine.low %v2698_v2, %v2700_v59 }
 0x8ea   :  { %v2712_v13 = vrot.slane %v2705_v28, %v9767_v16 }
 0x8ec   :  { %v2719_v44 = vrot.slane %v2712_v13, %v9767_v16 }
 0x8ee   :  { %v2721_v25 = vadd.f32 %v2719_v44, %v2628_v22 }
 0x8f0   :  { %v2722_v14 = vadd.f32 %v2721_v25, %v9774_v29 }
 0x8f2   :  { %2733 = vrot.lane.b32.xlu0 %v2722_v14, %s8868_s4  ;;  %v7112_v21 = vmul.f32 -1.442695, %v2722_v14  ;;  %v2730_v26 = vrot.slane %v2722_v14, 1  ;;  %v2888_v14 = vld [vmem:[#allocation3 + $0x3] ss:$8 sm:$0x3] }
 0x8f4   :  { %8423 = vpow2.f32 %v7112_v21 }
 0x8f5   :  { %8425 = vtanh.f32 %v2730_v26 }
 0x8fe   :  { %v8424_v27 = vpop.eup %8423 }
 0x8ff   :  { %v2726_v55 = vadd.f32 1.0, %v8424_v27  ;;  %v8426_v57 = vpop.eup %8425 }
 0x901   :  { %8427 = vrcp.f32 %v2726_v55 }
 0x90b   :  { %v8428_v51 = vpop.eup %8427 }
 0x90c   :  { %v2744_v10 = vmul.f32 %v8428_v51, %v8426_v57  ;;  %v2743_v35 = vmul.f32 %v8428_v51, %v9795_v20 }
 0x90e   :  { %2746 = vrot.lane.b32.xlu1 %v2744_v10, %s8868_s4 }
 0x964   :  { %v2734_v3 = vpop.permute.xlu0 %2733 }
 0x965   :  { %v2735_v38 = vrot.slane %v2734_v3, 1 }
 0x967   :  { %v7113_v30 = vmul.f32 -1.442695, %v2735_v38 }
 0x980   :  { %v2747_v60 = vpop.permute.xlu1 %2746 }
 0x981   :  { %v2749_v32 = vadd.f32 %v2747_v60, %v2743_v35 }
 0x983   :  { %8429 = vtanh.f32 %v2749_v32 }
 0x984   :  { %8431 = vpow2.f32 %v7113_v30 }
 0x98d   :  { %v8430_v62 = vpop.eup %8429 }
 0x98e   :  { %2752 = vrot.lane.b32.xlu1 %v8430_v62, %s8868_s4  ;;  %v8432_v39 = vpop.eup %8431 }
 0x98f   :  { %v2740_v7 = vadd.f32 1.0, %v8432_v39 }
 0x991   :  { %8433 = vrcp.f32 %v2740_v7 }
 0x99b   :  { %v8434_v41 = vpop.eup %8433 }
 0xa00   :  { %v2753_v47 = vpop.permute.xlu1 %2752 }
 0xa01   :  { %v2755_v18 = vmul.f32 %v8434_v41, %v2753_v47 }
 0xa03   :  { %2756 = vst.msk [vmem:[#allocation4 + $0x1] sm:$0x1] %vm2625_vm13, %v2755_v18  ;;  %7114 = vmatmul.mubr.msk.f32.vlgmr.msra.gmra.mrb[18].mxu0 %vm2497_vm14, %v2755_v18 }
 0xa04   :  { %7504 = vmatpush1.bf16.msra.mxu0 %v9623_v48  ;;  %3086 = vmatprep.mubr.f32.mxu0 %v8856_v0 }
 0xa05   :  { %7506 = vmatprep.subr.bf16.mxu0 %v9636_v46 }
 0xa08   :  { %7508 = vmatpush1.bf16.msra.mxu0 %v9641_v63 }
 0xa09   :  { %7510 = vmatprep.subr.bf16.mxu0 %v9651_v5 }
 0xa0c   :  { %7512 = vmatpush1.bf16.msra.mxu0 %v9659_v11 }
 0xa0d   :  { %7514 = vmatprep.subr.bf16.mxu0 %v9675_v36 }
 0xa10   :  { %7516 = vmatpush1.bf16.msra.mxu0 %v9677_v4 }
 0xa11   :  { %7534 = vmatprep.subr.bf16.mxu0 %v9615_v45 }
 0xad6   :  { %v2828_v20 = vpop.f32.mrb[18].mxu0 }
 0xad7   :  { %v2830_v9 = vpop.f32.mrb[19].mxu0 }
 0xad8   :  { %v2835_v31 = vcombine.low %v2828_v20, %v2830_v9 }
 0xada   :  { %v2842_v17 = vrot.slane %v2835_v31, %v9767_v16 }
 0xadc   :  { %v2849_v12 = vrot.slane %v2842_v17, %v9767_v16 }
 0xade   :  { %v2851_v43 = vadd.f32 %v2849_v12, %v2758_v33 }
 0xae0   :  { %v2852_v15 = vadd.f32 %v2851_v43, %v9774_v29 }
 0xae2   :  { %2863 = vrot.lane.b32.xlu1 %v2852_v15, %s8868_s4  ;;  %v7115_v52 = vmul.f32 -1.442695, %v2852_v15  ;;  %v2860_v8 = vrot.slane %v2852_v15, 1  ;;  %v3018_v15 = vld [vmem:[#allocation3 + $0x4] ss:$8 sm:$0x3] }
 0xae4   :  { %8435 = vpow2.f32 %v7115_v52 }
 0xae5   :  { %8437 = vtanh.f32 %v2860_v8 }
 0xaee   :  { %v8436_v19 = vpop.eup %8435 }
 0xaef   :  { %v2856_v34 = vadd.f32 1.0, %v8436_v19  ;;  %v8438_v50 = vpop.eup %8437 }
 0xaf1   :  { %8439 = vrcp.f32 %v2856_v34 }
 0xafb   :  { %v8440_v42 = vpop.eup %8439 }
 0xafc   :  { %v2874_v23 = vmul.f32 %v8440_v42, %v8438_v50  ;;  %v2873_v6 = vmul.f32 %v8440_v42, %v2749_v32 }
 0xafe   :  { %2876 = vrot.lane.b32.xlu0 %v2874_v23, %s8868_s4 }
 0xb54   :  { %v2864_v49 = vpop.permute.xlu1 %2863 }
 0xb55   :  { %v2865_v37 = vrot.slane %v2864_v49, 1 }
 0xb57   :  { %v7116_v61 = vmul.f32 -1.442695, %v2865_v37 }
 0xb70   :  { %v2877_v53 = vpop.permute.xlu0 %2876 }
 0xb71   :  { %v2879_v1 = vadd.f32 %v2877_v53, %v2873_v6 }
 0xb73   :  { %8441 = vtanh.f32 %v2879_v1 }
 0xb74   :  { %8443 = vpow2.f32 %v7116_v61 }
 0xb7d   :  { %v8442_v40 = vpop.eup %8441 }
 0xb7e   :  { %2882 = vrot.lane.b32.xlu0 %v8442_v40, %s8868_s4  ;;  %v8444_v24 = vpop.eup %8443 }
 0xb7f   :  { %v2870_v56 = vadd.f32 1.0, %v8444_v24 }
 0xb81   :  { %8445 = vrcp.f32 %v2870_v56 }
 0xb8b   :  { %v8446_v58 = vpop.eup %8445 }
 0xbf0   :  { %v2883_v2 = vpop.permute.xlu0 %2882 }
 0xbf1   :  { %v2885_v59 = vmul.f32 %v8446_v58, %v2883_v2 }
 0xbf3   :  { %2886 = vst.msk [vmem:[#allocation4 + $0x2] sm:$0x1] %vm2625_vm13, %v2885_v59  ;;  %7117 = vmatmul.mubr.msk.f32.vlgmr.msra.gmra.mrb[18].mxu1 %vm2497_vm14, %v2885_v59 }
 0xbf4   :  { %7520 = vmatpush1.bf16.msra.mxu1 %v9623_v48  ;;  %3216 = vmatprep.mubr.f32.mxu1 %v8856_v0 }
 0xbf5   :  { %7522 = vmatprep.subr.bf16.mxu1 %v9636_v46 }
 0xbf8   :  { %7524 = vmatpush1.bf16.msra.mxu1 %v9641_v63 }
 0xbf9   :  { %7526 = vmatprep.subr.bf16.mxu1 %v9651_v5 }
 0xbfc   :  { %7528 = vmatpush1.bf16.msra.mxu1 %v9659_v11 }
 0xbfd   :  { %7530 = vmatprep.subr.bf16.mxu1 %v9675_v36 }
 0xc00   :  { %7532 = vmatpush1.bf16.msra.mxu1 %v9677_v4 }
 0xc01   :  { %7550 = vmatprep.subr.bf16.mxu1 %v9615_v45 }
 0xcc6   :  { %v2958_v28 = vpop.f32.mrb[18].mxu1 }
 0xcc7   :  { %v2960_v13 = vpop.f32.mrb[19].mxu1 }
 0xcc8   :  { %v2965_v44 = vcombine.low %v2958_v28, %v2960_v13 }
 0xcca   :  { %v2972_v22 = vrot.slane %v2965_v44, %v9767_v16 }
 0xccc   :  { %v2979_v25 = vrot.slane %v2972_v22, %v9767_v16 }
 0xcce   :  { %v2981_v21 = vadd.f32 %v2979_v25, %v2888_v14 }
 0xcd0   :  { %v2982_v26 = vadd.f32 %v2981_v21, %v9774_v29 }
 0xcd2   :  { %2993 = vrot.lane.b32.xlu0 %v2982_v26, %s8868_s4  ;;  %v7118_v27 = vmul.f32 -1.442695, %v2982_v26  ;;  %v2990_v55 = vrot.slane %v2982_v26, 1  ;;  %v3148_v26 = vld [vmem:[#allocation3 + $0x5] ss:$8 sm:$0x3] }
 0xcd4   :  { %8447 = vpow2.f32 %v7118_v27 }
 0xcd5   :  { %8449 = vtanh.f32 %v2990_v55 }
 0xcde   :  { %v8448_v57 = vpop.eup %8447 }
 0xcdf   :  { %v2986_v51 = vadd.f32 1.0, %v8448_v57  ;;  %v8450_v10 = vpop.eup %8449 }
 0xce1   :  { %8451 = vrcp.f32 %v2986_v51 }
 0xceb   :  { %v8452_v35 = vpop.eup %8451 }
 0xcec   :  { %v3004_v60 = vmul.f32 %v8452_v35, %v8450_v10  ;;  %v3003_v32 = vmul.f32 %v8452_v35, %v2879_v1 }
 0xcee   :  { %3006 = vrot.lane.b32.xlu1 %v3004_v60, %s8868_s4 }
 0xd44   :  { %v2994_v30 = vpop.permute.xlu0 %2993 }
 0xd45   :  { %v2995_v39 = vrot.slane %v2994_v30, 1 }
 0xd47   :  { %v7119_v7 = vmul.f32 -1.442695, %v2995_v39 }
 0xd60   :  { %v3007_v62 = vpop.permute.xlu1 %3006 }
 0xd61   :  { %v3009_v3 = vadd.f32 %v3007_v62, %v3003_v32 }
 0xd63   :  { %8453 = vtanh.f32 %v3009_v3 }
 0xd64   :  { %8455 = vpow2.f32 %v7119_v7 }
 0xd6d   :  { %v8454_v38 = vpop.eup %8453 }
 0xd6e   :  { %3012 = vrot.lane.b32.xlu1 %v8454_v38, %s8868_s4  ;;  %v8456_v41 = vpop.eup %8455 }
 0xd6f   :  { %v3000_v47 = vadd.f32 1.0, %v8456_v41 }
 0xd71   :  { %8457 = vrcp.f32 %v3000_v47 }
 0xd7b   :  { %v8458_v18 = vpop.eup %8457 }
 0xde0   :  { %v3013_v20 = vpop.permute.xlu1 %3012 }
 0xde1   :  { %v3015_v9 = vmul.f32 %v8458_v18, %v3013_v20 }
 0xde3   :  { %3016 = vst.msk [vmem:[#allocation4 + $0x3] sm:$0x1] %vm2625_vm13, %v3015_v9  ;;  %7120 = vmatmul.mubr.msk.f32.vlgmr.msra.gmra.mrb[20].mxu0 %vm2497_vm14, %v3015_v9 }
 0xde4   :  { %7536 = vmatpush1.bf16.msra.mxu0 %v9623_v48  ;;  %3346 = vmatprep.mubr.f32.mxu0 %v8856_v0 }
 0xde5   :  { %7538 = vmatprep.subr.bf16.mxu0 %v9636_v46 }
 0xde8   :  { %7540 = vmatpush1.bf16.msra.mxu0 %v9641_v63 }
 0xde9   :  { %7542 = vmatprep.subr.bf16.mxu0 %v9651_v5 }
 0xdec   :  { %7544 = vmatpush1.bf16.msra.mxu0 %v9659_v11 }
 0xded   :  { %7546 = vmatprep.subr.bf16.mxu0 %v9675_v36 }
 0xdf0   :  { %7548 = vmatpush1.bf16.msra.mxu0 %v9677_v4 }
 0xdf1   :  { %7566 = vmatprep.subr.bf16.mxu0 %v9615_v45 }
 0xeb6   :  { %v3088_v31 = vpop.f32.mrb[20].mxu0 }
 0xeb7   :  { %v3090_v17 = vpop.f32.mrb[21].mxu0 }
 0xeb8   :  { %v3095_v12 = vcombine.low %v3088_v31, %v3090_v17 }
 0xeba   :  { %v3102_v33 = vrot.slane %v3095_v12, %v9767_v16 }
 0xebc   :  { %v3109_v43 = vrot.slane %v3102_v33, %v9767_v16 }
 0xebe   :  { %v3111_v52 = vadd.f32 %v3109_v43, %v3018_v15 }
 0xec0   :  { %v3112_v8 = vadd.f32 %v3111_v52, %v9774_v29 }
 0xec2   :  { %3123 = vrot.lane.b32.xlu1 %v3112_v8, %s8868_s4  ;;  %v7121_v19 = vmul.f32 -1.442695, %v3112_v8  ;;  %v3120_v34 = vrot.slane %v3112_v8, 1  ;;  %v3278_v8 = vld [vmem:[#allocation3 + $0x6] ss:$8 sm:$0x3] }
 0xec4   :  { %8459 = vpow2.f32 %v7121_v19 }
 0xec5   :  { %8461 = vtanh.f32 %v3120_v34 }
 0xece   :  { %v8460_v50 = vpop.eup %8459 }
 0xecf   :  { %v3116_v42 = vadd.f32 1.0, %v8460_v50  ;;  %v8462_v23 = vpop.eup %8461 }
 0xed1   :  { %8463 = vrcp.f32 %v3116_v42 }
 0xedb   :  { %v8464_v6 = vpop.eup %8463 }
 0xedc   :  { %v3134_v53 = vmul.f32 %v8464_v6, %v8462_v23  ;;  %v3133_v1 = vmul.f32 %v8464_v6, %v3009_v3 }
 0xede   :  { %3136 = vrot.lane.b32.xlu0 %v3134_v53, %s8868_s4 }
 0xf34   :  { %v3124_v61 = vpop.permute.xlu1 %3123 }
 0xf35   :  { %v3125_v24 = vrot.slane %v3124_v61, 1 }
 0xf37   :  { %v7122_v56 = vmul.f32 -1.442695, %v3125_v24 }
 0xf50   :  { %v3137_v40 = vpop.permute.xlu0 %3136 }
 0xf51   :  { %v3139_v49 = vadd.f32 %v3137_v40, %v3133_v1 }
 0xf53   :  { %8465 = vtanh.f32 %v3139_v49 }
 0xf54   :  { %8467 = vpow2.f32 %v7122_v56 }
 0xf5d   :  { %v8466_v37 = vpop.eup %8465 }
 0xf5e   :  { %3142 = vrot.lane.b32.xlu0 %v8466_v37, %s8868_s4  ;;  %v8468_v58 = vpop.eup %8467 }
 0xf5f   :  { %v3130_v2 = vadd.f32 1.0, %v8468_v58 }
 0xf61   :  { %8469 = vrcp.f32 %v3130_v2 }
 0xf6b   :  { %v8470_v59 = vpop.eup %8469 }
 0xfd0   :  { %v3143_v28 = vpop.permute.xlu0 %3142 }
 0xfd1   :  { %v3145_v13 = vmul.f32 %v8470_v59, %v3143_v28 }
 0xfd3   :  { %3146 = vst.msk [vmem:[#allocation4 + $0x4] sm:$0x1] %vm2625_vm13, %v3145_v13  ;;  %7123 = vmatmul.mubr.msk.f32.vlgmr.msra.gmra.mrb[20].mxu1 %vm2497_vm14, %v3145_v13 }
 0xfd4   :  { %7552 = vmatpush1.bf16.msra.mxu1 %v9623_v48  ;;  %3476 = vmatprep.mubr.f32.mxu1 %v8856_v0 }
 0xfd5   :  { %7554 = vmatprep.subr.bf16.mxu1 %v9636_v46 }
 0xfd8   :  { %7556 = vmatpush1.bf16.msra.mxu1 %v9641_v63 }
 0xfd9   :  { %7558 = vmatprep.subr.bf16.mxu1 %v9651_v5 }
 0xfdc   :  { %7560 = vmatpush1.bf16.msra.mxu1 %v9659_v11 }
 0xfdd   :  { %7562 = vmatprep.subr.bf16.mxu1 %v9675_v36 }
 0xfe0   :  { %7564 = vmatpush1.bf16.msra.mxu1 %v9677_v4 }
 0xfe1   :  { %7582 = vmatprep.subr.bf16.mxu1 %v9615_v45 }
0x10a6   :  { %v3218_v44 = vpop.f32.mrb[20].mxu1 }
0x10a7   :  { %v3220_v22 = vpop.f32.mrb[21].mxu1 }
0x10a8   :  { %v3225_v25 = vcombine.low %v3218_v44, %v3220_v22 }
0x10aa   :  { %v3232_v14 = vrot.slane %v3225_v25, %v9767_v16 }
0x10ac   :  { %v3239_v21 = vrot.slane %v3232_v14, %v9767_v16 }
0x10ae   :  { %v3241_v27 = vadd.f32 %v3239_v21, %v3148_v26 }
0x10b0   :  { %v3242_v55 = vadd.f32 %v3241_v27, %v9774_v29 }
0x10b2   :  { %3253 = vrot.lane.b32.xlu0 %v3242_v55, %s8868_s4  ;;  %v7124_v57 = vmul.f32 -1.442695, %v3242_v55  ;;  %v3250_v51 = vrot.slane %v3242_v55, 1  ;;  %v3408_v55 = vld [vmem:[#allocation3 + $0x7] ss:$8 sm:$0x3] }
0x10b4   :  { %8471 = vpow2.f32 %v7124_v57 }
0x10b5   :  { %8473 = vtanh.f32 %v3250_v51 }
0x10be   :  { %v8472_v10 = vpop.eup %8471 }
0x10bf   :  { %v3246_v35 = vadd.f32 1.0, %v8472_v10  ;;  %v8474_v60 = vpop.eup %8473 }
0x10c1   :  { %8475 = vrcp.f32 %v3246_v35 }
0x10cb   :  { %v8476_v32 = vpop.eup %8475 }
0x10cc   :  { %v3264_v62 = vmul.f32 %v8476_v32, %v8474_v60  ;;  %v3263_v3 = vmul.f32 %v8476_v32, %v3139_v49 }
0x10ce   :  { %3266 = vrot.lane.b32.xlu1 %v3264_v62, %s8868_s4 }
0x1124   :  { %v3254_v7 = vpop.permute.xlu0 %3253 }
0x1125   :  { %v3255_v41 = vrot.slane %v3254_v7, 1 }
0x1127   :  { %v7125_v47 = vmul.f32 -1.442695, %v3255_v41 }
0x1140   :  { %v3267_v38 = vpop.permute.xlu1 %3266 }
0x1141   :  { %v3269_v30 = vadd.f32 %v3267_v38, %v3263_v3 }
0x1143   :  { %8477 = vtanh.f32 %v3269_v30 }
0x1144   :  { %8479 = vpow2.f32 %v7125_v47 }
0x114d   :  { %v8478_v39 = vpop.eup %8477 }
0x114e   :  { %3272 = vrot.lane.b32.xlu1 %v8478_v39, %s8868_s4  ;;  %v8480_v18 = vpop.eup %8479 }
0x114f   :  { %v3260_v20 = vadd.f32 1.0, %v8480_v18 }
0x1151   :  { %8481 = vrcp.f32 %v3260_v20 }
0x115b   :  { %v8482_v9 = vpop.eup %8481 }
0x11c0   :  { %v3273_v31 = vpop.permute.xlu1 %3272 }
0x11c1   :  { %v3275_v17 = vmul.f32 %v8482_v9, %v3273_v31 }
0x11c3   :  { %3276 = vst.msk [vmem:[#allocation4 + $0x5] sm:$0x1] %vm2625_vm13, %v3275_v17  ;;  %7126 = vmatmul.mubr.msk.f32.vlgmr.msra.gmra.mrb[22].mxu0 %vm2497_vm14, %v3275_v17 }
0x11c4   :  { %7568 = vmatpush1.bf16.msra.mxu0 %v9623_v48  ;;  %3606 = vmatprep.mubr.f32.mxu0 %v8856_v0 }
0x11c5   :  { %7570 = vmatprep.subr.bf16.mxu0 %v9636_v46 }
0x11c8   :  { %7572 = vmatpush1.bf16.msra.mxu0 %v9641_v63 }
0x11c9   :  { %7574 = vmatprep.subr.bf16.mxu0 %v9651_v5 }
0x11cc   :  { %7576 = vmatpush1.bf16.msra.mxu0 %v9659_v11 }
0x11cd   :  { %7578 = vmatprep.subr.bf16.mxu0 %v9675_v36 }
0x11d0   :  { %7580 = vmatpush1.bf16.msra.mxu0 %v9677_v4 }
0x11d1   :  { %7598 = vmatprep.subr.bf16.mxu0 %v9615_v45 }
0x1296   :  { %v3348_v12 = vpop.f32.mrb[22].mxu0 }
0x1297   :  { %v3350_v33 = vpop.f32.mrb[23].mxu0 }
0x1298   :  { %v3355_v43 = vcombine.low %v3348_v12, %v3350_v33 }
0x129a   :  { %v3362_v15 = vrot.slane %v3355_v43, %v9767_v16 }
0x129c   :  { %v3369_v52 = vrot.slane %v3362_v15, %v9767_v16 }
0x129e   :  { %v3371_v19 = vadd.f32 %v3369_v52, %v3278_v8 }
0x12a0   :  { %v3372_v34 = vadd.f32 %v3371_v19, %v9774_v29 }
0x12a2   :  { %3383 = vrot.lane.b32.xlu1 %v3372_v34, %s8868_s4  ;;  %v7127_v50 = vmul.f32 -1.442695, %v3372_v34  ;;  %v3380_v42 = vrot.slane %v3372_v34, 1  ;;  %v3538_v34 = vld [vmem:[#allocation3 + $0x10] ss:$8 sm:$0x3] }
0x12a4   :  { %8483 = vpow2.f32 %v7127_v50 }
0x12a5   :  { %8485 = vtanh.f32 %v3380_v42 }
0x12ae   :  { %v8484_v23 = vpop.eup %8483 }
0x12af   :  { %v3376_v6 = vadd.f32 1.0, %v8484_v23  ;;  %v8486_v53 = vpop.eup %8485 }
0x12b1   :  { %8487 = vrcp.f32 %v3376_v6 }
0x12bb   :  { %v8488_v1 = vpop.eup %8487 }
0x12bc   :  { %v3394_v40 = vmul.f32 %v8488_v1, %v8486_v53  ;;  %v3393_v49 = vmul.f32 %v8488_v1, %v3269_v30 }
0x12be   :  { %3396 = vrot.lane.b32.xlu0 %v3394_v40, %s8868_s4 }
0x1314   :  { %v3384_v56 = vpop.permute.xlu1 %3383 }
0x1315   :  { %v3385_v58 = vrot.slane %v3384_v56, 1 }
0x1317   :  { %v7128_v2 = vmul.f32 -1.442695, %v3385_v58 }
0x1330   :  { %v3397_v37 = vpop.permute.xlu0 %3396 }
0x1331   :  { %v3399_v61 = vadd.f32 %v3397_v37, %v3393_v49 }
0x1333   :  { %8489 = vtanh.f32 %v3399_v61 }
0x1334   :  { %8491 = vpow2.f32 %v7128_v2 }
0x133d   :  { %v8490_v24 = vpop.eup %8489 }
0x133e   :  { %3402 = vrot.lane.b32.xlu0 %v8490_v24, %s8868_s4  ;;  %v8492_v59 = vpop.eup %8491 }
0x133f   :  { %v3390_v28 = vadd.f32 1.0, %v8492_v59 }
0x1341   :  { %8493 = vrcp.f32 %v3390_v28 }
0x134b   :  { %v8494_v13 = vpop.eup %8493 }
0x13b0   :  { %v3403_v44 = vpop.permute.xlu0 %3402 }
0x13b1   :  { %v3405_v22 = vmul.f32 %v8494_v13, %v3403_v44 }
0x13b3   :  { %3406 = vst.msk [vmem:[#allocation4 + $0x6] sm:$0x1] %vm2625_vm13, %v3405_v22  ;;  %7129 = vmatmul.mubr.msk.f32.vlgmr.msra.gmra.mrb[22].mxu1 %vm2497_vm14, %v3405_v22 }
0x13b4   :  { %7584 = vmatpush1.bf16.msra.mxu1 %v9623_v48  ;;  %3736 = vmatprep.mubr.f32.mxu1 %v8856_v0 }
0x13b5   :  { %7586 = vmatprep.subr.bf16.mxu1 %v9636_v46 }
0x13b8   :  { %7588 = vmatpush1.bf16.msra.mxu1 %v9641_v63 }
0x13b9   :  { %7590 = vmatprep.subr.bf16.mxu1 %v9651_v5 }
0x13bc   :  { %7592 = vmatpush1.bf16.msra.mxu1 %v9659_v11 }
0x13bd   :  { %7594 = vmatprep.subr.bf16.mxu1 %v9675_v36 }
0x13c0   :  { %7596 = vmatpush1.bf16.msra.mxu1 %v9677_v4 }
0x13c1   :  { %7614 = vmatprep.subr.bf16.mxu1 %v9615_v45 }
0x1486   :  { %v3478_v25 = vpop.f32.mrb[22].mxu1 }
0x1487   :  { %v3480_v14 = vpop.f32.mrb[23].mxu1 }
0x1488   :  { %v3485_v21 = vcombine.low %v3478_v25, %v3480_v14 }
0x148a   :  { %v3492_v26 = vrot.slane %v3485_v21, %v9767_v16 }
0x148c   :  { %v3499_v27 = vrot.slane %v3492_v26, %v9767_v16 }
0x148e   :  { %v3501_v57 = vadd.f32 %v3499_v27, %v3408_v55 }
0x1490   :  { %v3502_v51 = vadd.f32 %v3501_v57, %v9774_v29  ;;  %v3668_v57 = vld [vmem:[#allocation3 + $0x11] ss:$8 sm:$0x3] }
0x1492   :  { %3513 = vrot.lane.b32.xlu0 %v3502_v51, %s8868_s4  ;;  %v7130_v10 = vmul.f32 -1.442695, %v3502_v51  ;;  %v3510_v35 = vrot.slane %v3502_v51, 1 }
0x1494   :  { %8495 = vpow2.f32 %v7130_v10  ;;  %v9962_v10 = vld [vmem:[%s10434_s12] sm:$0x3] }
0x1495   :  { %8497 = vtanh.f32 %v3510_v35 }
0x149e   :  { %v8496_v60 = vpop.eup %8495 }
0x149f   :  { %v3506_v32 = vadd.f32 1.0, %v8496_v60  ;;  %v8498_v62 = vpop.eup %8497 }
0x14a1   :  { %8499 = vrcp.f32 %v3506_v32 }
0x14ab   :  { %v8500_v3 = vpop.eup %8499 }
0x14ac   :  { %v3524_v38 = vmul.f32 %v8500_v3, %v8498_v62  ;;  %v3523_v30 = vmul.f32 %v8500_v3, %v3399_v61 }
0x14ae   :  { %3526 = vrot.lane.b32.xlu1 %v3524_v38, %s8868_s4 }
0x1504   :  { %v3514_v47 = vpop.permute.xlu0 %3513 }
0x1505   :  { %v3515_v18 = vrot.slane %v3514_v47, 1 }
0x1507   :  { %v7131_v20 = vmul.f32 -1.442695, %v3515_v18 }
0x1520   :  { %v3527_v39 = vpop.permute.xlu1 %3526 }
0x1521   :  { %v3529_v7 = vadd.f32 %v3527_v39, %v3523_v30 }
0x1523   :  { %8501 = vtanh.f32 %v3529_v7 }
0x1524   :  { %8503 = vpow2.f32 %v7131_v20 }
0x152d   :  { %v8502_v41 = vpop.eup %8501 }
0x152e   :  { %3532 = vrot.lane.b32.xlu1 %v8502_v41, %s8868_s4  ;;  %v8504_v9 = vpop.eup %8503 }
0x152f   :  { %v3520_v31 = vadd.f32 1.0, %v8504_v9 }
0x1531   :  { %8505 = vrcp.f32 %v3520_v31 }
0x153b   :  { %v8506_v17 = vpop.eup %8505 }
0x15a0   :  { %v3533_v12 = vpop.permute.xlu1 %3532 }
0x15a1   :  { %v3535_v33 = vmul.f32 %v8506_v17, %v3533_v12 }
0x15a3   :  { %3536 = vst.msk [vmem:[#allocation4 + $0x7] sm:$0x1] %vm2625_vm13, %v3535_v33  ;;  %7132 = vmatmul.mubr.msk.f32.vlgmr.msra.gmra.mrb[24].mxu0 %vm2497_vm14, %v3535_v33 }
0x15a4   :  { %7600 = vmatpush1.bf16.msra.mxu0 %v9623_v48  ;;  %3866 = vmatprep.mubr.f32.mxu0 %v8856_v0 }
0x15a5   :  { %7602 = vmatprep.subr.bf16.mxu0 %v9636_v46 }
0x15a8   :  { %7604 = vmatpush1.bf16.msra.mxu0 %v9641_v63 }
0x15a9   :  { %7606 = vmatprep.subr.bf16.mxu0 %v9651_v5 }
0x15ac   :  { %7608 = vmatpush1.bf16.msra.mxu0 %v9659_v11 }
0x15ad   :  { %7610 = vmatprep.subr.bf16.mxu0 %v9675_v36 }
0x15b0   :  { %7612 = vmatpush1.bf16.msra.mxu0 %v9677_v4 }
0x15b1   :  { %7630 = vmatprep.subr.bf16.mxu0 %v9615_v45 }
0x1676   :  { %v3608_v43 = vpop.f32.mrb[24].mxu0 }
0x1677   :  { %v3610_v15 = vpop.f32.mrb[25].mxu0 }
0x1678   :  { %v3615_v52 = vcombine.low %v3608_v43, %v3610_v15 }
0x167a   :  { %v3622_v8 = vrot.slane %v3615_v52, %v9767_v16 }
0x167c   :  { %v3629_v19 = vrot.slane %v3622_v8, %v9767_v16 }
0x167e   :  { %v3631_v50 = vadd.f32 %v3629_v19, %v3538_v34 }
0x1680   :  { %v3632_v42 = vadd.f32 %v3631_v50, %v9774_v29 }
0x1682   :  { %3643 = vrot.lane.b32.xlu1 %v3632_v42, %s8868_s4  ;;  %v7133_v23 = vmul.f32 -1.442695, %v3632_v42  ;;  %v3640_v6 = vrot.slane %v3632_v42, 1  ;;  %v3798_v42 = vld [vmem:[#allocation3 + $0x12] ss:$8 sm:$0x3] }
0x1684   :  { %8507 = vpow2.f32 %v7133_v23 }
0x1685   :  { %8509 = vtanh.f32 %v3640_v6 }
0x168e   :  { %v8508_v53 = vpop.eup %8507 }
0x168f   :  { %v3636_v1 = vadd.f32 1.0, %v8508_v53  ;;  %v8510_v40 = vpop.eup %8509 }
0x1691   :  { %8511 = vrcp.f32 %v3636_v1 }
0x169b   :  { %v8512_v49 = vpop.eup %8511 }
0x169c   :  { %v3654_v37 = vmul.f32 %v8512_v49, %v8510_v40  ;;  %v3653_v61 = vmul.f32 %v8512_v49, %v3529_v7 }
0x169e   :  { %3656 = vrot.lane.b32.xlu0 %v3654_v37, %s8868_s4 }
0x16f4   :  { %v3644_v29 = vpop.permute.xlu1 %3643 }
0x16f5   :  { %v3645_v2 = vrot.slane %v3644_v29, 1 }
0x16f7   :  { %v7134_v59 = vmul.f32 -1.442695, %v3645_v2 }
0x1710   :  { %v3657_v24 = vpop.permute.xlu0 %3656 }
0x1711   :  { %v3659_v56 = vadd.f32 %v3657_v24, %v3653_v61 }
0x1713   :  { %8513 = vtanh.f32 %v3659_v56 }
0x1714   :  { %8515 = vpow2.f32 %v7134_v59 }
0x171d   :  { %v8514_v58 = vpop.eup %8513 }
0x171e   :  { %3662 = vrot.lane.b32.xlu0 %v8514_v58, %s8868_s4  ;;  %v8516_v28 = vpop.eup %8515 }
0x171f   :  { %v3650_v13 = vadd.f32 1.0, %v8516_v28 }
0x1721   :  { %8517 = vrcp.f32 %v3650_v13 }
0x172b   :  { %v8518_v44 = vpop.eup %8517 }
0x1790   :  { %v3663_v22 = vpop.permute.xlu0 %3662 }
0x1791   :  { %v3665_v25 = vmul.f32 %v8518_v44, %v3663_v22 }
0x1793   :  { %3666 = vst.msk [vmem:[#allocation4 + $0x8] sm:$0x1] %vm2625_vm13, %v3665_v25  ;;  %7135 = vmatmul.mubr.msk.f32.vlgmr.msra.gmra.mrb[24].mxu1 %vm2497_vm14, %v3665_v25 }
0x1794   :  { %7616 = vmatpush1.bf16.msra.mxu1 %v9623_v48  ;;  %3996 = vmatprep.mubr.f32.mxu1 %v8856_v0 }
0x1795   :  { %7618 = vmatprep.subr.bf16.mxu1 %v9636_v46 }
0x1798   :  { %7620 = vmatpush1.bf16.msra.mxu1 %v9641_v63 }
0x1799   :  { %7622 = vmatprep.subr.bf16.mxu1 %v9651_v5 }
0x179c   :  { %7624 = vmatpush1.bf16.msra.mxu1 %v9659_v11 }
0x179d   :  { %7626 = vmatprep.subr.bf16.mxu1 %v9675_v36 }
0x17a0   :  { %7628 = vmatpush1.bf16.msra.mxu1 %v9677_v4 }
0x17a1   :  { %7646 = vmatprep.subr.bf16.mxu1 %v9615_v45 }
0x1866   :  { %v3738_v14 = vpop.f32.mrb[24].mxu1 }
0x1867   :  { %v3740_v21 = vpop.f32.mrb[25].mxu1 }
0x1868   :  { %v3745_v26 = vcombine.low %v3738_v14, %v3740_v21 }
0x186a   :  { %v3752_v27 = vrot.slane %v3745_v26, %v9767_v16 }
0x186c   :  { %v3759_v55 = vrot.slane %v3752_v27, %v9767_v16 }
0x186e   :  { %v3761_v51 = vadd.f32 %v3759_v55, %v3668_v57 }
0x1870   :  { %v3762_v35 = vadd.f32 %v9962_v10, %v3761_v51 }
0x1872   :  { %3773 = vrot.lane.b32.xlu0 %v3762_v35, %s8868_s4  ;;  %v7136_v60 = vmul.f32 -1.442695, %v3762_v35  ;;  %v3770_v32 = vrot.slane %v3762_v35, 1  ;;  %v3928_v35 = vld [vmem:[#allocation3 + $0x13] ss:$8 sm:$0x3] }
0x1874   :  { %8519 = vpow2.f32 %v7136_v60 }
0x1875   :  { %8521 = vtanh.f32 %v3770_v32 }
0x187e   :  { %v8520_v62 = vpop.eup %8519 }
0x187f   :  { %v3766_v3 = vadd.f32 1.0, %v8520_v62  ;;  %v8522_v38 = vpop.eup %8521 }
0x1881   :  { %8523 = vrcp.f32 %v3766_v3 }
0x188b   :  { %v8524_v30 = vpop.eup %8523 }
0x188c   :  { %v3784_v39 = vmul.f32 %v8524_v30, %v8522_v38  ;;  %v3783_v7 = vmul.f32 %v8524_v30, %v3659_v56 }
0x188e   :  { %3786 = vrot.lane.b32.xlu1 %v3784_v39, %s8868_s4 }
0x18e4   :  { %v3774_v20 = vpop.permute.xlu0 %3773 }
0x18e5   :  { %v3775_v9 = vrot.slane %v3774_v20, 1 }
0x18e7   :  { %v7137_v31 = vmul.f32 -1.442695, %v3775_v9 }
0x1900   :  { %v3787_v41 = vpop.permute.xlu1 %3786 }
0x1901   :  { %v3789_v47 = vadd.f32 %v3787_v41, %v3783_v7 }
0x1903   :  { %8525 = vtanh.f32 %v3789_v47 }
0x1904   :  { %8527 = vpow2.f32 %v7137_v31 }
0x190d   :  { %v8526_v18 = vpop.eup %8525 }
0x190e   :  { %3792 = vrot.lane.b32.xlu1 %v8526_v18, %s8868_s4  ;;  %v8528_v17 = vpop.eup %8527 }
0x190f   :  { %v3780_v12 = vadd.f32 1.0, %v8528_v17 }
0x1911   :  { %8529 = vrcp.f32 %v3780_v12 }
0x191b   :  { %v8530_v33 = vpop.eup %8529 }
0x1980   :  { %v3793_v43 = vpop.permute.xlu1 %3792 }
0x1981   :  { %v3795_v15 = vmul.f32 %v8530_v33, %v3793_v43 }
0x1983   :  { %3796 = vst.msk [vmem:[#allocation4 + $0x9] sm:$0x1] %vm2625_vm13, %v3795_v15  ;;  %7138 = vmatmul.mubr.msk.f32.vlgmr.msra.gmra.mrb[26].mxu0 %vm2497_vm14, %v3795_v15 }
0x1984   :  { %7632 = vmatpush1.bf16.msra.mxu0 %v9623_v48  ;;  %4126 = vmatprep.mubr.f32.mxu0 %v8856_v0 }
0x1985   :  { %7634 = vmatprep.subr.bf16.mxu0 %v9636_v46 }
0x1988   :  { %7636 = vmatpush1.bf16.msra.mxu0 %v9641_v63 }
0x1989   :  { %7638 = vmatprep.subr.bf16.mxu0 %v9651_v5 }
0x198c   :  { %7640 = vmatpush1.bf16.msra.mxu0 %v9659_v11 }
0x198d   :  { %7642 = vmatprep.subr.bf16.mxu0 %v9675_v36 }
0x1990   :  { %7644 = vmatpush1.bf16.msra.mxu0 %v9677_v4 }
0x1991   :  { %7662 = vmatprep.subr.bf16.mxu0 %v9615_v45 }
0x1a56   :  { %v3868_v52 = vpop.f32.mrb[26].mxu0 }
0x1a57   :  { %v3870_v8 = vpop.f32.mrb[27].mxu0 }
0x1a58   :  { %v3875_v19 = vcombine.low %v3868_v52, %v3870_v8 }
0x1a5a   :  { %v3882_v34 = vrot.slane %v3875_v19, %v9767_v16 }
0x1a5c   :  { %v3889_v50 = vrot.slane %v3882_v34, %v9767_v16 }
0x1a5e   :  { %v3891_v23 = vadd.f32 %v3889_v50, %v3798_v42 }
0x1a60   :  { %v3892_v6 = vadd.f32 %v9962_v10, %v3891_v23 }
0x1a62   :  { %3903 = vrot.lane.b32.xlu1 %v3892_v6, %s8868_s4  ;;  %v7139_v53 = vmul.f32 -1.442695, %v3892_v6  ;;  %v3900_v1 = vrot.slane %v3892_v6, 1  ;;  %v4058_v6 = vld [vmem:[#allocation3 + $0x14] ss:$8 sm:$0x3] }
0x1a64   :  { %8531 = vpow2.f32 %v7139_v53 }
0x1a65   :  { %8533 = vtanh.f32 %v3900_v1 }
0x1a6e   :  { %v8532_v40 = vpop.eup %8531 }
0x1a6f   :  { %v3896_v49 = vadd.f32 1.0, %v8532_v40  ;;  %v8534_v37 = vpop.eup %8533 }
0x1a71   :  { %8535 = vrcp.f32 %v3896_v49 }
0x1a7b   :  { %v8536_v61 = vpop.eup %8535 }
0x1a7c   :  { %v3914_v24 = vmul.f32 %v8536_v61, %v8534_v37  ;;  %v3913_v56 = vmul.f32 %v8536_v61, %v3789_v47 }
0x1a7e   :  { %3916 = vrot.lane.b32.xlu0 %v3914_v24, %s8868_s4 }
0x1ad4   :  { %v3904_v59 = vpop.permute.xlu1 %3903 }
0x1ad5   :  { %v3905_v28 = vrot.slane %v3904_v59, 1 }
0x1ad7   :  { %v7140_v13 = vmul.f32 -1.442695, %v3905_v28 }
0x1af0   :  { %v3917_v58 = vpop.permute.xlu0 %3916 }
0x1af1   :  { %v3919_v29 = vadd.f32 %v3917_v58, %v3913_v56 }
0x1af3   :  { %8537 = vtanh.f32 %v3919_v29 }
0x1af4   :  { %8539 = vpow2.f32 %v7140_v13 }
0x1afd   :  { %v8538_v2 = vpop.eup %8537 }
0x1afe   :  { %3922 = vrot.lane.b32.xlu0 %v8538_v2, %s8868_s4  ;;  %v8540_v44 = vpop.eup %8539 }
0x1aff   :  { %v3910_v22 = vadd.f32 1.0, %v8540_v44 }
0x1b01   :  { %8541 = vrcp.f32 %v3910_v22 }
0x1b0b   :  { %v8542_v25 = vpop.eup %8541 }
0x1b70   :  { %v3923_v14 = vpop.permute.xlu0 %3922 }
0x1b71   :  { %v3925_v21 = vmul.f32 %v8542_v25, %v3923_v14 }
0x1b73   :  { %3926 = vst.msk [vmem:[#allocation4 + $0xa] sm:$0x1] %vm2625_vm13, %v3925_v21  ;;  %7141 = vmatmul.mubr.msk.f32.vlgmr.msra.gmra.mrb[26].mxu1 %vm2497_vm14, %v3925_v21 }
0x1b74   :  { %7648 = vmatpush1.bf16.msra.mxu1 %v9623_v48  ;;  %4256 = vmatprep.mubr.f32.mxu1 %v8856_v0 }
0x1b75   :  { %7650 = vmatprep.subr.bf16.mxu1 %v9636_v46 }
0x1b78   :  { %7652 = vmatpush1.bf16.msra.mxu1 %v9641_v63 }
0x1b79   :  { %7654 = vmatprep.subr.bf16.mxu1 %v9651_v5 }
0x1b7c   :  { %7656 = vmatpush1.bf16.msra.mxu1 %v9659_v11 }
0x1b7d   :  { %7658 = vmatprep.subr.bf16.mxu1 %v9675_v36 }
0x1b80   :  { %7660 = vmatpush1.bf16.msra.mxu1 %v9677_v4 }
0x1b81   :  { %7678 = vmatprep.subr.bf16.mxu1 %v9615_v45 }
0x1c46   :  { %v3998_v26 = vpop.f32.mrb[26].mxu1 }
0x1c47   :  { %v4000_v27 = vpop.f32.mrb[27].mxu1 }
0x1c48   :  { %v4005_v55 = vcombine.low %v3998_v26, %v4000_v27 }
0x1c4a   :  { %v4012_v57 = vrot.slane %v4005_v55, %v9767_v16 }
0x1c4c   :  { %v4019_v51 = vrot.slane %v4012_v57, %v9767_v16 }
0x1c4e   :  { %v4021_v60 = vadd.f32 %v4019_v51, %v3928_v35 }
0x1c50   :  { %v4022_v32 = vadd.f32 %v9962_v10, %v4021_v60 }
0x1c52   :  { %4033 = vrot.lane.b32.xlu0 %v4022_v32, %s8868_s4  ;;  %v7142_v62 = vmul.f32 -1.442695, %v4022_v32  ;;  %v4030_v3 = vrot.slane %v4022_v32, 1  ;;  %v4188_v32 = vld [vmem:[#allocation3 + $0x15] ss:$8 sm:$0x3] }
0x1c54   :  { %8543 = vpow2.f32 %v7142_v62 }
0x1c55   :  { %8545 = vtanh.f32 %v4030_v3 }
0x1c5e   :  { %v8544_v38 = vpop.eup %8543 }
0x1c5f   :  { %v4026_v30 = vadd.f32 1.0, %v8544_v38  ;;  %v8546_v39 = vpop.eup %8545 }
0x1c61   :  { %8547 = vrcp.f32 %v4026_v30 }
0x1c6b   :  { %v8548_v7 = vpop.eup %8547 }
0x1c6c   :  { %v4044_v41 = vmul.f32 %v8548_v7, %v8546_v39  ;;  %v4043_v47 = vmul.f32 %v8548_v7, %v3919_v29 }
0x1c6e   :  { %4046 = vrot.lane.b32.xlu1 %v4044_v41, %s8868_s4 }
0x1cc4   :  { %v4034_v31 = vpop.permute.xlu0 %4033 }
0x1cc5   :  { %v4035_v17 = vrot.slane %v4034_v31, 1 }
0x1cc7   :  { %v7143_v12 = vmul.f32 -1.442695, %v4035_v17 }
0x1ce0   :  { %v4047_v18 = vpop.permute.xlu1 %4046 }
0x1ce1   :  { %v4049_v20 = vadd.f32 %v4047_v18, %v4043_v47 }
0x1ce3   :  { %8549 = vtanh.f32 %v4049_v20 }
0x1ce4   :  { %8551 = vpow2.f32 %v7143_v12 }
0x1ced   :  { %v8550_v9 = vpop.eup %8549 }
0x1cee   :  { %4052 = vrot.lane.b32.xlu1 %v8550_v9, %s8868_s4  ;;  %v8552_v33 = vpop.eup %8551 }
0x1cef   :  { %v4040_v43 = vadd.f32 1.0, %v8552_v33 }
0x1cf1   :  { %8553 = vrcp.f32 %v4040_v43 }
0x1cfb   :  { %v8554_v15 = vpop.eup %8553 }
0x1d60   :  { %v4053_v52 = vpop.permute.xlu1 %4052 }
0x1d61   :  { %v4055_v8 = vmul.f32 %v8554_v15, %v4053_v52 }
0x1d63   :  { %4056 = vst.msk [vmem:[#allocation4 + $0xb] sm:$0x1] %vm2625_vm13, %v4055_v8  ;;  %7144 = vmatmul.mubr.msk.f32.vlgmr.msra.gmra.mrb[28].mxu0 %vm2497_vm14, %v4055_v8 }
0x1d64   :  { %7664 = vmatpush1.bf16.msra.mxu0 %v9623_v48  ;;  %4386 = vmatprep.mubr.f32.mxu0 %v8856_v0 }
0x1d65   :  { %7666 = vmatprep.subr.bf16.mxu0 %v9636_v46 }
0x1d68   :  { %7668 = vmatpush1.bf16.msra.mxu0 %v9641_v63 }
0x1d69   :  { %7670 = vmatprep.subr.bf16.mxu0 %v9651_v5 }
0x1d6c   :  { %7672 = vmatpush1.bf16.msra.mxu0 %v9659_v11 }
0x1d6d   :  { %7674 = vmatprep.subr.bf16.mxu0 %v9675_v36 }
0x1d70   :  { %7676 = vmatpush1.bf16.msra.mxu0 %v9677_v4 }
0x1d71   :  { %7694 = vmatprep.subr.bf16.mxu0 %v9615_v45 }
0x1e36   :  { %v4128_v19 = vpop.f32.mrb[28].mxu0 }
0x1e37   :  { %v4130_v34 = vpop.f32.mrb[29].mxu0 }
0x1e38   :  { %v4135_v50 = vcombine.low %v4128_v19, %v4130_v34 }
0x1e3a   :  { %v4142_v42 = vrot.slane %v4135_v50, %v9767_v16 }
0x1e3c   :  { %v4149_v23 = vrot.slane %v4142_v42, %v9767_v16 }
0x1e3e   :  { %v4151_v53 = vadd.f32 %v4149_v23, %v4058_v6 }
0x1e40   :  { %v4152_v1 = vadd.f32 %v9962_v10, %v4151_v53 }
0x1e42   :  { %4163 = vrot.lane.b32.xlu1 %v4152_v1, %s8868_s4  ;;  %v7145_v40 = vmul.f32 -1.442695, %v4152_v1  ;;  %v4160_v49 = vrot.slane %v4152_v1, 1  ;;  %v4318_v1 = vld [vmem:[#allocation3 + $0x16] ss:$8 sm:$0x3] }
0x1e44   :  { %8555 = vpow2.f32 %v7145_v40 }
0x1e45   :  { %8557 = vtanh.f32 %v4160_v49 }
0x1e4e   :  { %v8556_v37 = vpop.eup %8555 }
0x1e4f   :  { %v4156_v61 = vadd.f32 1.0, %v8556_v37  ;;  %v8558_v24 = vpop.eup %8557 }
0x1e51   :  { %8559 = vrcp.f32 %v4156_v61 }
0x1e5b   :  { %v8560_v56 = vpop.eup %8559 }
0x1e5c   :  { %v4174_v58 = vmul.f32 %v8560_v56, %v8558_v24  ;;  %v4173_v29 = vmul.f32 %v8560_v56, %v4049_v20 }
0x1e5e   :  { %4176 = vrot.lane.b32.xlu0 %v4174_v58, %s8868_s4 }
0x1eb4   :  { %v4164_v13 = vpop.permute.xlu1 %4163 }
0x1eb5   :  { %v4165_v44 = vrot.slane %v4164_v13, 1 }
0x1eb7   :  { %v7146_v22 = vmul.f32 -1.442695, %v4165_v44 }
0x1ed0   :  { %v4177_v2 = vpop.permute.xlu0 %4176 }
0x1ed1   :  { %v4179_v59 = vadd.f32 %v4177_v2, %v4173_v29 }
0x1ed3   :  { %8561 = vtanh.f32 %v4179_v59 }
0x1ed4   :  { %8563 = vpow2.f32 %v7146_v22 }
0x1edd   :  { %v8562_v28 = vpop.eup %8561 }
0x1ede   :  { %4182 = vrot.lane.b32.xlu0 %v8562_v28, %s8868_s4  ;;  %v8564_v25 = vpop.eup %8563 }
0x1edf   :  { %v4170_v14 = vadd.f32 1.0, %v8564_v25 }
0x1ee1   :  { %8565 = vrcp.f32 %v4170_v14 }
0x1eeb   :  { %v8566_v21 = vpop.eup %8565 }
0x1f50   :  { %v4183_v26 = vpop.permute.xlu0 %4182 }
0x1f51   :  { %v4185_v27 = vmul.f32 %v8566_v21, %v4183_v26 }
0x1f53   :  { %4186 = vst.msk [vmem:[#allocation4 + $0xc] sm:$0x1] %vm2625_vm13, %v4185_v27  ;;  %7147 = vmatmul.mubr.msk.f32.vlgmr.msra.gmra.mrb[28].mxu1 %vm2497_vm14, %v4185_v27 }
0x1f54   :  { %7680 = vmatpush1.bf16.msra.mxu1 %v9623_v48  ;;  %4516 = vmatprep.mubr.f32.mxu1 %v8856_v0 }
0x1f55   :  { %7682 = vmatprep.subr.bf16.mxu1 %v9636_v46 }
0x1f58   :  { %7684 = vmatpush1.bf16.msra.mxu1 %v9641_v63 }
0x1f59   :  { %7686 = vmatprep.subr.bf16.mxu1 %v9651_v5 }
0x1f5c   :  { %7688 = vmatpush1.bf16.msra.mxu1 %v9659_v11 }
0x1f5d   :  { %7690 = vmatprep.subr.bf16.mxu1 %v9675_v36 }
0x1f60   :  { %7692 = vmatpush1.bf16.msra.mxu1 %v9677_v4 }
0x1f61   :  { %7710 = vmatprep.subr.bf16.mxu1 %v9615_v45 }
0x2026   :  { %v4258_v55 = vpop.f32.mrb[28].mxu1 }
0x2027   :  { %v4260_v57 = vpop.f32.mrb[29].mxu1 }
0x2028   :  { %v4265_v51 = vcombine.low %v4258_v55, %v4260_v57 }
0x202a   :  { %v4272_v35 = vrot.slane %v4265_v51, %v9767_v16 }
0x202c   :  { %v4279_v60 = vrot.slane %v4272_v35, %v9767_v16 }
0x202e   :  { %v4281_v62 = vadd.f32 %v4279_v60, %v4188_v32 }
0x2030   :  { %v4282_v3 = vadd.f32 %v9962_v10, %v4281_v62 }
0x2032   :  { %4293 = vrot.lane.b32.xlu0 %v4282_v3, %s8868_s4  ;;  %v7148_v38 = vmul.f32 -1.442695, %v4282_v3  ;;  %v4290_v30 = vrot.slane %v4282_v3, 1  ;;  %v4448_v3 = vld [vmem:[#allocation3 + $0x17] ss:$8 sm:$0x3] }
0x2034   :  { %8567 = vpow2.f32 %v7148_v38 }
0x2035   :  { %8569 = vtanh.f32 %v4290_v30 }
0x203e   :  { %v8568_v39 = vpop.eup %8567 }
0x203f   :  { %v4286_v7 = vadd.f32 1.0, %v8568_v39  ;;  %v8570_v41 = vpop.eup %8569 }
0x2041   :  { %8571 = vrcp.f32 %v4286_v7 }
0x204b   :  { %v8572_v47 = vpop.eup %8571 }
0x204c   :  { %v4304_v18 = vmul.f32 %v8572_v47, %v8570_v41  ;;  %v4303_v20 = vmul.f32 %v8572_v47, %v4179_v59 }
0x204e   :  { %4306 = vrot.lane.b32.xlu1 %v4304_v18, %s8868_s4 }
0x20a4   :  { %v4294_v12 = vpop.permute.xlu0 %4293 }
0x20a5   :  { %v4295_v33 = vrot.slane %v4294_v12, 1 }
0x20a7   :  { %v7149_v43 = vmul.f32 -1.442695, %v4295_v33 }
0x20c0   :  { %v4307_v9 = vpop.permute.xlu1 %4306 }
0x20c1   :  { %v4309_v31 = vadd.f32 %v4307_v9, %v4303_v20 }
0x20c3   :  { %8573 = vtanh.f32 %v4309_v31 }
0x20c4   :  { %8575 = vpow2.f32 %v7149_v43 }
0x20cd   :  { %v8574_v17 = vpop.eup %8573 }
0x20ce   :  { %4312 = vrot.lane.b32.xlu1 %v8574_v17, %s8868_s4  ;;  %v8576_v15 = vpop.eup %8575 }
0x20cf   :  { %v4300_v52 = vadd.f32 1.0, %v8576_v15 }
0x20d1   :  { %8577 = vrcp.f32 %v4300_v52 }
0x20db   :  { %v8578_v8 = vpop.eup %8577 }
0x2140   :  { %v4313_v19 = vpop.permute.xlu1 %4312 }
0x2141   :  { %v4315_v34 = vmul.f32 %v8578_v8, %v4313_v19 }
0x2143   :  { %4316 = vst.msk [vmem:[#allocation4 + $0xd] sm:$0x1] %vm2625_vm13, %v4315_v34  ;;  %7150 = vmatmul.mubr.msk.f32.vlgmr.msra.gmra.mrb[30].mxu0 %vm2497_vm14, %v4315_v34 }
0x2144   :  { %7696 = vmatpush1.bf16.msra.mxu0 %v9623_v48  ;;  %4646 = vmatprep.mubr.f32.mxu0 %v8856_v0 }
0x2145   :  { %7698 = vmatprep.subr.bf16.mxu0 %v9636_v46 }
0x2148   :  { %7700 = vmatpush1.bf16.msra.mxu0 %v9641_v63 }
0x2149   :  { %7702 = vmatprep.subr.bf16.mxu0 %v9651_v5 }
0x214c   :  { %7704 = vmatpush1.bf16.msra.mxu0 %v9659_v11 }
0x214d   :  { %7706 = vmatprep.subr.bf16.mxu0 %v9675_v36 }
0x2150   :  { %7708 = vmatpush1.bf16.msra.mxu0 %v9677_v4 }
0x2151   :  { %7726 = vmatprep.subr.bf16.mxu0 %v9615_v45 }
0x2216   :  { %v4388_v50 = vpop.f32.mrb[30].mxu0 }
0x2217   :  { %v4390_v42 = vpop.f32.mrb[31].mxu0 }
0x2218   :  { %v4395_v23 = vcombine.low %v4388_v50, %v4390_v42 }
0x221a   :  { %v4402_v6 = vrot.slane %v4395_v23, %v9767_v16  ;;  %v10077_v23 = vld [vmem:[#allocation4] sm:$0xff] }
0x221c   :  { %v4409_v53 = vrot.slane %v4402_v6, %v9767_v16 }
0x221e   :  { %v4411_v40 = vadd.f32 %v4409_v53, %v4318_v1 }
0x2220   :  { %v4412_v49 = vadd.f32 %v9962_v10, %v4411_v40 }
0x2222   :  { %4423 = vrot.lane.b32.xlu1 %v4412_v49, %s8868_s4  ;;  %v7151_v37 = vmul.f32 -1.442695, %v4412_v49  ;;  %v4420_v61 = vrot.slane %v4412_v49, 1 }
0x2224   :  { %8579 = vpow2.f32 %v7151_v37 }
0x2225   :  { %8581 = vtanh.f32 %v4420_v61 }
0x222e   :  { %v8580_v24 = vpop.eup %8579 }
0x222f   :  { %v4416_v56 = vadd.f32 1.0, %v8580_v24  ;;  %v8582_v58 = vpop.eup %8581  ;;  %v4578_v24 = vld [vmem:[#allocation3 + $0x20] ss:$8 sm:$0x3] }
0x2231   :  { %8583 = vrcp.f32 %v4416_v56 }
0x223b   :  { %v8584_v29 = vpop.eup %8583 }
0x223c   :  { %v4434_v2 = vmul.f32 %v8584_v29, %v8582_v58  ;;  %v4433_v59 = vmul.f32 %v8584_v29, %v4309_v31 }
0x223e   :  { %4436 = vrot.lane.b32.xlu0 %v4434_v2, %s8868_s4 }
0x2294   :  { %v4424_v22 = vpop.permute.xlu1 %4423 }
0x2295   :  { %v4425_v25 = vrot.slane %v4424_v22, 1 }
0x2297   :  { %v7152_v14 = vmul.f32 -1.442695, %v4425_v25 }
0x22b0   :  { %v4437_v28 = vpop.permute.xlu0 %4436 }
0x22b1   :  { %v4439_v13 = vadd.f32 %v4437_v28, %v4433_v59 }
0x22b3   :  { %8585 = vtanh.f32 %v4439_v13 }
0x22b4   :  { %8587 = vpow2.f32 %v7152_v14 }
0x22bd   :  { %v8586_v44 = vpop.eup %8585 }
0x22be   :  { %4442 = vrot.lane.b32.xlu0 %v8586_v44, %s8868_s4  ;;  %v8588_v21 = vpop.eup %8587 }
0x22bf   :  { %v4430_v26 = vadd.f32 1.0, %v8588_v21 }
0x22c1   :  { %8589 = vrcp.f32 %v4430_v26 }
0x22cb   :  { %v8590_v27 = vpop.eup %8589 }
0x2330   :  { %v4443_v55 = vpop.permute.xlu0 %4442 }
0x2331   :  { %v4445_v57 = vmul.f32 %v8590_v27, %v4443_v55 }
0x2333   :  { %4446 = vst.msk [vmem:[#allocation4 + $0xe] sm:$0x1] %vm2625_vm13, %v4445_v57  ;;  %7153 = vmatmul.mubr.msk.f32.vlgmr.msra.gmra.mrb[30].mxu1 %vm2497_vm14, %v4445_v57 }
0x2334   :  { %7712 = vmatpush1.bf16.msra.mxu1 %v9623_v48  ;;  %4776 = vmatprep.mubr.f32.mxu1 %v8856_v0 }
0x2335   :  { %7714 = vmatprep.subr.bf16.mxu1 %v9636_v46 }
0x2338   :  { %7716 = vmatpush1.bf16.msra.mxu1 %v9641_v63 }
0x2339   :  { %7718 = vmatprep.subr.bf16.mxu1 %v9651_v5 }
0x233c   :  { %7720 = vmatpush1.bf16.msra.mxu1 %v9659_v11 }
0x233d   :  { %7722 = vmatprep.subr.bf16.mxu1 %v9675_v36 }
0x2340   :  { %7724 = vmatpush1.bf16.msra.mxu1 %v9677_v4 }
0x2341   :  { %7742 = vmatprep.subr.bf16.mxu1 %v9615_v45 }
0x2406   :  { %v4518_v51 = vpop.f32.mrb[30].mxu1 }
0x2407   :  { %v4520_v35 = vpop.f32.mrb[31].mxu1 }
0x2408   :  { %v4525_v60 = vcombine.low %v4518_v51, %v4520_v35 }
0x240a   :  { %v4532_v32 = vrot.slane %v4525_v60, %v9767_v16 }
0x240c   :  { %v4539_v62 = vrot.slane %v4532_v32, %v9767_v16 }
0x240e   :  { %v4541_v38 = vadd.f32 %v4539_v62, %v4448_v3 }
0x2410   :  { %v4542_v30 = vadd.f32 %v9962_v10, %v4541_v38 }
0x2412   :  { %4553 = vrot.lane.b32.xlu0 %v4542_v30, %s8868_s4  ;;  %v7154_v39 = vmul.f32 -1.442695, %v4542_v30  ;;  %v4550_v7 = vrot.slane %v4542_v30, 1 }
0x2414   :  { %8591 = vpow2.f32 %v7154_v39 }
0x2415   :  { %8593 = vtanh.f32 %v4550_v7 }
0x241e   :  { %v8592_v41 = vpop.eup %8591 }
0x241f   :  { %v4546_v47 = vadd.f32 1.0, %v8592_v41  ;;  %v8594_v18 = vpop.eup %8593  ;;  %v4708_v41 = vld [vmem:[#allocation3 + $0x21] ss:$8 sm:$0x3] }
0x2421   :  { %8595 = vrcp.f32 %v4546_v47 }
0x242b   :  { %v8596_v20 = vpop.eup %8595 }
0x242c   :  { %v4564_v9 = vmul.f32 %v8596_v20, %v8594_v18  ;;  %v4563_v31 = vmul.f32 %v8596_v20, %v4439_v13 }
0x242e   :  { %4566 = vrot.lane.b32.xlu1 %v4564_v9, %s8868_s4 }
0x2484   :  { %v4554_v43 = vpop.permute.xlu0 %4553 }
0x2485   :  { %v4555_v15 = vrot.slane %v4554_v43, 1 }
0x2487   :  { %v7155_v52 = vmul.f32 -1.442695, %v4555_v15 }
0x24a0   :  { %v4567_v17 = vpop.permute.xlu1 %4566 }
0x24a1   :  { %v4569_v12 = vadd.f32 %v4567_v17, %v4563_v31 }
0x24a3   :  { %8597 = vtanh.f32 %v4569_v12 }
0x24a4   :  { %8599 = vpow2.f32 %v7155_v52 }
0x24ad   :  { %v8598_v33 = vpop.eup %8597 }
0x24ae   :  { %4572 = vrot.lane.b32.xlu1 %v8598_v33, %s8868_s4  ;;  %v8600_v8 = vpop.eup %8599 }
0x24af   :  { %v4560_v19 = vadd.f32 1.0, %v8600_v8 }
0x24b1   :  { %8601 = vrcp.f32 %v4560_v19 }
0x24bb   :  { %v8602_v34 = vpop.eup %8601 }
0x2520   :  { %v4573_v50 = vpop.permute.xlu1 %4572 }
0x2521   :  { %v4575_v42 = vmul.f32 %v8602_v34, %v4573_v50 }
0x2523   :  { %4576 = vst.msk [vmem:[#allocation4 + $0xf] sm:$0x1] %vm2625_vm13, %v4575_v42  ;;  %7156 = vmatmul.mubr.msk.f32.vlgmr.msra.gmra.mrb[32].mxu0 %vm2497_vm14, %v4575_v42 }
0x2524   :  { %7728 = vmatpush1.bf16.msra.mxu0 %v9623_v48  ;;  %4906 = vmatprep.mubr.f32.mxu0 %v8856_v0 }
0x2525   :  { %7730 = vmatprep.subr.bf16.mxu0 %v9636_v46 }
0x2528   :  { %7732 = vmatpush1.bf16.msra.mxu0 %v9641_v63 }
0x2529   :  { %7734 = vmatprep.subr.bf16.mxu0 %v9651_v5 }
0x252a   :  { %v10079_v6 = vld [vmem:[#allocation4 + $0x8] sm:$0xff] }
0x252b   :  { %v8304_v53 = vpack.i.bf16 %v10079_v6, %v10077_v23  ;;  %v6661_v6 = vld [vmem:[%s10435_s13 + $0x20] sm:$0xff] }
0x252c   :  { %7736 = vmatpush1.bf16.msra.mxu0 %v9659_v11 }
0x252d   :  { %7738 = vmatprep.subr.bf16.mxu0 %v9675_v36 }
0x2530   :  { %7740 = vmatpush1.bf16.msra.mxu0 %v9677_v4 }
0x2531   :  { %7758 = vmatprep.subr.bf16.mxu0 %v9615_v45 }
0x25f6   :  { %v4648_v1 = vpop.f32.mrb[32].mxu0 }
0x25f7   :  { %v4650_v40 = vpop.f32.mrb[33].mxu0 }
0x25f8   :  { %v4655_v49 = vcombine.low %v4648_v1, %v4650_v40 }
0x25fa   :  { %v4662_v37 = vrot.slane %v4655_v49, %v9767_v16 }
0x25fc   :  { %v4669_v61 = vrot.slane %v4662_v37, %v9767_v16 }
0x25fe   :  { %v4671_v56 = vadd.f32 %v4669_v61, %v4578_v24 }
0x2600   :  { %v4672_v58 = vadd.f32 %v9962_v10, %v4671_v56 }
0x2602   :  { %4683 = vrot.lane.b32.xlu1 %v4672_v58, %s8868_s4  ;;  %v7157_v29 = vmul.f32 -1.442695, %v4672_v58  ;;  %v4680_v2 = vrot.slane %v4672_v58, 1 }
0x2604   :  { %8603 = vpow2.f32 %v7157_v29 }
0x2605   :  { %8605 = vtanh.f32 %v4680_v2 }
0x260e   :  { %v8604_v59 = vpop.eup %8603 }
0x260f   :  { %v4676_v28 = vadd.f32 1.0, %v8604_v59  ;;  %v8606_v13 = vpop.eup %8605  ;;  %v4838_v59 = vld [vmem:[#allocation3 + $0x22] ss:$8 sm:$0x3] }
0x2611   :  { %8607 = vrcp.f32 %v4676_v28 }
0x261b   :  { %v8608_v44 = vpop.eup %8607 }
0x261c   :  { %v4694_v22 = vmul.f32 %v8608_v44, %v8606_v13  ;;  %v4693_v25 = vmul.f32 %v8608_v44, %v4569_v12 }
0x261e   :  { %4696 = vrot.lane.b32.xlu0 %v4694_v22, %s8868_s4 }
0x2674   :  { %v4684_v27 = vpop.permute.xlu1 %4683 }
0x2675   :  { %v4685_v55 = vrot.slane %v4684_v27, 1 }
0x2677   :  { %v7158_v57 = vmul.f32 -1.442695, %v4685_v55 }
0x2690   :  { %v4697_v14 = vpop.permute.xlu0 %4696 }
0x2691   :  { %v4699_v21 = vadd.f32 %v4697_v14, %v4693_v25 }
0x2693   :  { %8609 = vtanh.f32 %v4699_v21 }
0x2694   :  { %8611 = vpow2.f32 %v7158_v57 }
0x269d   :  { %v8610_v26 = vpop.eup %8609 }
0x269e   :  { %4702 = vrot.lane.b32.xlu0 %v8610_v26, %s8868_s4  ;;  %v8612_v51 = vpop.eup %8611 }
0x269f   :  { %v4690_v35 = vadd.f32 1.0, %v8612_v51 }
0x26a1   :  { %8613 = vrcp.f32 %v4690_v35 }
0x26ab   :  { %v8614_v60 = vpop.eup %8613 }
0x2710   :  { %v4703_v32 = vpop.permute.xlu0 %4702 }
0x2711   :  { %v4705_v62 = vmul.f32 %v8614_v60, %v4703_v32 }
0x2713   :  { %4706 = vst.msk [vmem:[#allocation4 + $0x10] sm:$0x1] %vm2625_vm13, %v4705_v62  ;;  %7159 = vmatmul.mubr.msk.f32.vlgmr.msra.gmra.mrb[32].mxu1 %vm2497_vm14, %v4705_v62 }
0x2714   :  { %7744 = vmatpush1.bf16.msra.mxu1 %v9623_v48  ;;  %5036 = vmatprep.mubr.f32.mxu1 %v8856_v0 }
0x2715   :  { %7746 = vmatprep.subr.bf16.mxu1 %v9636_v46 }
0x2718   :  { %7748 = vmatpush1.bf16.msra.mxu1 %v9641_v63 }
0x2719   :  { %7750 = vmatprep.subr.bf16.mxu1 %v9651_v5 }
0x271c   :  { %7752 = vmatpush1.bf16.msra.mxu1 %v9659_v11 }
0x271d   :  { %7754 = vmatprep.subr.bf16.mxu1 %v9675_v36 }
0x2720   :  { %7756 = vmatpush1.bf16.msra.mxu1 %v9677_v4 }
0x2721   :  { %7774 = vmatprep.subr.bf16.mxu1 %v9615_v45 }
0x27e6   :  { %v4778_v3 = vpop.f32.mrb[32].mxu1 }
0x27e7   :  { %v4780_v38 = vpop.f32.mrb[33].mxu1 }
0x27e8   :  { %v4785_v30 = vcombine.low %v4778_v3, %v4780_v38 }
0x27ea   :  { %v4792_v39 = vrot.slane %v4785_v30, %v9767_v16 }
0x27ec   :  { %v4799_v7 = vrot.slane %v4792_v39, %v9767_v16 }
0x27ee   :  { %v4801_v47 = vadd.f32 %v4799_v7, %v4708_v41 }
0x27f0   :  { %v4802_v18 = vadd.f32 %v9962_v10, %v4801_v47 }
0x27f2   :  { %4813 = vrot.lane.b32.xlu0 %v4802_v18, %s8868_s4  ;;  %v7160_v20 = vmul.f32 -1.442695, %v4802_v18  ;;  %v4810_v9 = vrot.slane %v4802_v18, 1 }
0x27f4   :  { %8615 = vpow2.f32 %v7160_v20 }
0x27f5   :  { %8617 = vtanh.f32 %v4810_v9 }
0x27fe   :  { %v8616_v31 = vpop.eup %8615 }
0x27ff   :  { %v4806_v17 = vadd.f32 1.0, %v8616_v31  ;;  %v8618_v12 = vpop.eup %8617  ;;  %v4968_v31 = vld [vmem:[#allocation3 + $0x23] ss:$8 sm:$0x3] }
0x2801   :  { %8619 = vrcp.f32 %v4806_v17 }
0x280b   :  { %v8620_v33 = vpop.eup %8619 }
0x280c   :  { %v4824_v43 = vmul.f32 %v8620_v33, %v8618_v12  ;;  %v4823_v15 = vmul.f32 %v8620_v33, %v4699_v21 }
0x280e   :  { %4826 = vrot.lane.b32.xlu1 %v4824_v43, %s8868_s4 }
0x2864   :  { %v4814_v34 = vpop.permute.xlu0 %4813 }
0x2865   :  { %v4815_v50 = vrot.slane %v4814_v34, 1 }
0x2867   :  { %v7161_v42 = vmul.f32 -1.442695, %v4815_v50 }
0x2880   :  { %v4827_v52 = vpop.permute.xlu1 %4826 }
0x2881   :  { %v4829_v8 = vadd.f32 %v4827_v52, %v4823_v15 }
0x2883   :  { %8621 = vtanh.f32 %v4829_v8 }
0x2884   :  { %8623 = vpow2.f32 %v7161_v42 }
0x288d   :  { %v8622_v19 = vpop.eup %8621 }
0x288e   :  { %4832 = vrot.lane.b32.xlu1 %v8622_v19, %s8868_s4  ;;  %v8624_v1 = vpop.eup %8623 }
0x288f   :  { %v4820_v40 = vadd.f32 1.0, %v8624_v1 }
0x2891   :  { %8625 = vrcp.f32 %v4820_v40 }
0x289b   :  { %v8626_v49 = vpop.eup %8625 }
0x2900   :  { %v4833_v37 = vpop.permute.xlu1 %4832 }
0x2901   :  { %v4835_v61 = vmul.f32 %v8626_v49, %v4833_v37 }
0x2903   :  { %4836 = vst.msk [vmem:[#allocation4 + $0x11] sm:$0x1] %vm2625_vm13, %v4835_v61  ;;  %7162 = vmatmul.mubr.msk.f32.vlgmr.msra.gmra.mrb[34].mxu0 %vm2497_vm14, %v4835_v61 }
0x2904   :  { %7760 = vmatpush1.bf16.msra.mxu0 %v9623_v48  ;;  %5166 = vmatprep.mubr.f32.mxu0 %v8856_v0 }
0x2905   :  { %7762 = vmatprep.subr.bf16.mxu0 %v9636_v46 }
0x2908   :  { %7764 = vmatpush1.bf16.msra.mxu0 %v9641_v63 }
0x2909   :  { %7766 = vmatprep.subr.bf16.mxu0 %v9651_v5 }
0x290c   :  { %7768 = vmatpush1.bf16.msra.mxu0 %v9659_v11 }
0x290d   :  { %7770 = vmatprep.subr.bf16.mxu0 %v9675_v36 }
0x2910   :  { %7772 = vmatpush1.bf16.msra.mxu0 %v9677_v4 }
0x2911   :  { %7790 = vmatprep.subr.bf16.mxu0 %v9615_v45 }
0x29d6   :  { %v4908_v24 = vpop.f32.mrb[34].mxu0 }
0x29d7   :  { %v4910_v56 = vpop.f32.mrb[35].mxu0 }
0x29d8   :  { %v4915_v58 = vcombine.low %v4908_v24, %v4910_v56 }
0x29da   :  { %v4922_v29 = vrot.slane %v4915_v58, %v9767_v16 }
0x29dc   :  { %v4929_v2 = vrot.slane %v4922_v29, %v9767_v16 }
0x29de   :  { %v4931_v28 = vadd.f32 %v4929_v2, %v4838_v59 }
0x29e0   :  { %v4932_v13 = vadd.f32 %v9962_v10, %v4931_v28 }
0x29e2   :  { %4943 = vrot.lane.b32.xlu1 %v4932_v13, %s8868_s4  ;;  %v7163_v44 = vmul.f32 -1.442695, %v4932_v13  ;;  %v4940_v22 = vrot.slane %v4932_v13, 1 }
0x29e4   :  { %8627 = vpow2.f32 %v7163_v44 }
0x29e5   :  { %8629 = vtanh.f32 %v4940_v22  ;;  %v5098_v22 = vld [vmem:[#allocation3 + $0x24] ss:$8 sm:$0x3] }
0x29ee   :  { %v8628_v25 = vpop.eup %8627 }
0x29ef   :  { %v4936_v14 = vadd.f32 1.0, %v8628_v25  ;;  %v8630_v21 = vpop.eup %8629 }
0x29f1   :  { %8631 = vrcp.f32 %v4936_v14  ;;  %v10160_v14 = vld [vmem:[%s10434_s12] sm:$0x3] }
0x29fb   :  { %v8632_v26 = vpop.eup %8631 }
0x29fc   :  { %v4954_v27 = vmul.f32 %v8632_v26, %v8630_v21  ;;  %v4953_v55 = vmul.f32 %v8632_v26, %v4829_v8 }
0x29fe   :  { %4956 = vrot.lane.b32.xlu0 %v4954_v27, %s8868_s4 }
0x2a54   :  { %v4944_v60 = vpop.permute.xlu1 %4943 }
0x2a55   :  { %v4945_v32 = vrot.slane %v4944_v60, 1 }
0x2a57   :  { %v7164_v62 = vmul.f32 -1.442695, %v4945_v32 }
0x2a70   :  { %v4957_v57 = vpop.permute.xlu0 %4956 }
0x2a71   :  { %v4959_v51 = vadd.f32 %v4957_v57, %v4953_v55 }
0x2a73   :  { %8633 = vtanh.f32 %v4959_v51 }
0x2a74   :  { %8635 = vpow2.f32 %v7164_v62 }
0x2a7d   :  { %v8634_v35 = vpop.eup %8633 }
0x2a7e   :  { %4962 = vrot.lane.b32.xlu0 %v8634_v35, %s8868_s4  ;;  %v8636_v3 = vpop.eup %8635 }
0x2a7f   :  { %v4950_v38 = vadd.f32 1.0, %v8636_v3 }
0x2a81   :  { %8637 = vrcp.f32 %v4950_v38 }
0x2a8b   :  { %v8638_v30 = vpop.eup %8637 }
0x2af0   :  { %v4963_v39 = vpop.permute.xlu0 %4962 }
0x2af1   :  { %v4965_v7 = vmul.f32 %v8638_v30, %v4963_v39 }
0x2af3   :  { %4966 = vst.msk [vmem:[#allocation4 + $0x12] sm:$0x1] %vm2625_vm13, %v4965_v7  ;;  %7165 = vmatmul.mubr.msk.f32.vlgmr.msra.gmra.mrb[34].mxu1 %vm2497_vm14, %v4965_v7 }
0x2af4   :  { %7776 = vmatpush1.bf16.msra.mxu1 %v9623_v48  ;;  %5296 = vmatprep.mubr.f32.mxu1 %v8856_v0 }
0x2af5   :  { %7778 = vmatprep.subr.bf16.mxu1 %v9636_v46 }
0x2af8   :  { %7780 = vmatpush1.bf16.msra.mxu1 %v9641_v63 }
0x2af9   :  { %7782 = vmatprep.subr.bf16.mxu1 %v9651_v5 }
0x2afc   :  { %7784 = vmatpush1.bf16.msra.mxu1 %v9659_v11 }
0x2afd   :  { %7786 = vmatprep.subr.bf16.mxu1 %v9675_v36 }
0x2b00   :  { %7788 = vmatpush1.bf16.msra.mxu1 %v9677_v4 }
0x2b01   :  { %7806 = vmatprep.subr.bf16.mxu1 %v9615_v45 }
0x2bc6   :  { %v5038_v41 = vpop.f32.mrb[34].mxu1 }
0x2bc7   :  { %v5040_v47 = vpop.f32.mrb[35].mxu1 }
0x2bc8   :  { %v5045_v18 = vcombine.low %v5038_v41, %v5040_v47 }
0x2bca   :  { %v5052_v20 = vrot.slane %v5045_v18, %v9767_v16 }
0x2bcc   :  { %v5059_v9 = vrot.slane %v5052_v20, %v9767_v16 }
0x2bce   :  { %v5061_v17 = vadd.f32 %v5059_v9, %v4968_v31 }
0x2bd0   :  { %v5062_v12 = vadd.f32 %v9962_v10, %v5061_v17 }
0x2bd2   :  { %5073 = vrot.lane.b32.xlu0 %v5062_v12, %s8868_s4  ;;  %v7166_v33 = vmul.f32 -1.442695, %v5062_v12  ;;  %v5070_v43 = vrot.slane %v5062_v12, 1 }
0x2bd4   :  { %8639 = vpow2.f32 %v7166_v33 }
0x2bd5   :  { %8641 = vtanh.f32 %v5070_v43 }
0x2bde   :  { %v8640_v15 = vpop.eup %8639 }
0x2bdf   :  { %v5066_v52 = vadd.f32 1.0, %v8640_v15  ;;  %v8642_v8 = vpop.eup %8641  ;;  %v5228_v15 = vld [vmem:[#allocation3 + $0x25] ss:$8 sm:$0x3] }
0x2be1   :  { %8643 = vrcp.f32 %v5066_v52 }
0x2beb   :  { %v8644_v19 = vpop.eup %8643 }
0x2bec   :  { %v5084_v34 = vmul.f32 %v8644_v19, %v8642_v8  ;;  %v5083_v50 = vmul.f32 %v8644_v19, %v4959_v51 }
0x2bee   :  { %5086 = vrot.lane.b32.xlu1 %v5084_v34, %s8868_s4 }
0x2c44   :  { %v5074_v10 = vpop.permute.xlu0 %5073 }
0x2c45   :  { %v5075_v49 = vrot.slane %v5074_v10, 1 }
0x2c47   :  { %v7167_v37 = vmul.f32 -1.442695, %v5075_v49 }
0x2c60   :  { %v5087_v42 = vpop.permute.xlu1 %5086 }
0x2c61   :  { %v5089_v1 = vadd.f32 %v5087_v42, %v5083_v50 }
0x2c63   :  { %8645 = vtanh.f32 %v5089_v1 }
0x2c64   :  { %8647 = vpow2.f32 %v7167_v37 }
0x2c6d   :  { %v8646_v40 = vpop.eup %8645 }
0x2c6e   :  { %5092 = vrot.lane.b32.xlu1 %v8646_v40, %s8868_s4  ;;  %v8648_v61 = vpop.eup %8647 }
0x2c6f   :  { %v5080_v24 = vadd.f32 1.0, %v8648_v61 }
0x2c71   :  { %8649 = vrcp.f32 %v5080_v24 }
0x2c7b   :  { %v8650_v56 = vpop.eup %8649 }
0x2ce0   :  { %v5093_v58 = vpop.permute.xlu1 %5092 }
0x2ce1   :  { %v5095_v29 = vmul.f32 %v8650_v56, %v5093_v58 }
0x2ce3   :  { %5096 = vst.msk [vmem:[#allocation4 + $0x13] sm:$0x1] %vm2625_vm13, %v5095_v29  ;;  %7168 = vmatmul.mubr.msk.f32.vlgmr.msra.gmra.mrb[36].mxu0 %vm2497_vm14, %v5095_v29 }
0x2ce4   :  { %7792 = vmatpush1.bf16.msra.mxu0 %v9623_v48  ;;  %5426 = vmatprep.mubr.f32.mxu0 %v8856_v0 }
0x2ce5   :  { %7794 = vmatprep.subr.bf16.mxu0 %v9636_v46 }
0x2ce8   :  { %7796 = vmatpush1.bf16.msra.mxu0 %v9641_v63 }
0x2ce9   :  { %7798 = vmatprep.subr.bf16.mxu0 %v9651_v5 }
0x2cec   :  { %7800 = vmatpush1.bf16.msra.mxu0 %v9659_v11 }
0x2ced   :  { %7802 = vmatprep.subr.bf16.mxu0 %v9675_v36 }
0x2cf0   :  { %7804 = vmatpush1.bf16.msra.mxu0 %v9677_v4 }
0x2cf1   :  { %7822 = vmatprep.subr.bf16.mxu0 %v9615_v45 }
0x2db6   :  { %v5168_v2 = vpop.f32.mrb[36].mxu0 }
0x2db7   :  { %v5170_v59 = vpop.f32.mrb[37].mxu0 }
0x2db8   :  { %v5175_v28 = vcombine.low %v5168_v2, %v5170_v59 }
0x2dba   :  { %v5182_v13 = vrot.slane %v5175_v28, %v9767_v16 }
0x2dbc   :  { %v5189_v44 = vrot.slane %v5182_v13, %v9767_v16 }
0x2dbe   :  { %v5191_v25 = vadd.f32 %v5189_v44, %v5098_v22 }
0x2dc0   :  { %v5192_v21 = vadd.f32 %v10160_v14, %v5191_v25 }
0x2dc2   :  { %5203 = vrot.lane.b32.xlu1 %v5192_v21, %s8868_s4  ;;  %v7169_v26 = vmul.f32 -1.442695, %v5192_v21  ;;  %v5200_v27 = vrot.slane %v5192_v21, 1 }
0x2dc4   :  { %8651 = vpow2.f32 %v7169_v26 }
0x2dc5   :  { %8653 = vtanh.f32 %v5200_v27 }
0x2dce   :  { %v8652_v55 = vpop.eup %8651 }
0x2dcf   :  { %v5196_v57 = vadd.f32 1.0, %v8652_v55  ;;  %v8654_v51 = vpop.eup %8653  ;;  %v5358_v55 = vld [vmem:[#allocation3 + $0x26] ss:$8 sm:$0x3] }
0x2dd1   :  { %8655 = vrcp.f32 %v5196_v57 }
0x2ddb   :  { %v8656_v35 = vpop.eup %8655 }
0x2ddc   :  { %v5214_v60 = vmul.f32 %v8656_v35, %v8654_v51  ;;  %v5213_v32 = vmul.f32 %v8656_v35, %v5089_v1 }
0x2dde   :  { %5216 = vrot.lane.b32.xlu0 %v5214_v60, %s8868_s4 }
0x2e34   :  { %v5204_v30 = vpop.permute.xlu1 %5203 }
0x2e35   :  { %v5205_v39 = vrot.slane %v5204_v30, 1 }
0x2e37   :  { %v7170_v7 = vmul.f32 -1.442695, %v5205_v39 }
0x2e50   :  { %v5217_v62 = vpop.permute.xlu0 %5216 }
0x2e51   :  { %v5219_v3 = vadd.f32 %v5217_v62, %v5213_v32 }
0x2e53   :  { %8657 = vtanh.f32 %v5219_v3 }
0x2e54   :  { %8659 = vpow2.f32 %v7170_v7 }
0x2e5d   :  { %v8658_v38 = vpop.eup %8657 }
0x2e5e   :  { %5222 = vrot.lane.b32.xlu0 %v8658_v38, %s8868_s4  ;;  %v8660_v41 = vpop.eup %8659 }
0x2e5f   :  { %v5210_v47 = vadd.f32 1.0, %v8660_v41 }
0x2e61   :  { %8661 = vrcp.f32 %v5210_v47 }
0x2e6b   :  { %v8662_v18 = vpop.eup %8661 }
0x2ed0   :  { %v5223_v20 = vpop.permute.xlu0 %5222 }
0x2ed1   :  { %v5225_v9 = vmul.f32 %v8662_v18, %v5223_v20 }
0x2ed3   :  { %5226 = vst.msk [vmem:[#allocation4 + $0x14] sm:$0x1] %vm2625_vm13, %v5225_v9  ;;  %7171 = vmatmul.mubr.msk.f32.vlgmr.msra.gmra.mrb[36].mxu1 %vm2497_vm14, %v5225_v9 }
0x2ed4   :  { %7808 = vmatpush1.bf16.msra.mxu1 %v9623_v48  ;;  %5556 = vmatprep.mubr.f32.mxu1 %v8856_v0 }
0x2ed5   :  { %7810 = vmatprep.subr.bf16.mxu1 %v9636_v46 }
0x2ed8   :  { %7812 = vmatpush1.bf16.msra.mxu1 %v9641_v63 }
0x2ed9   :  { %7814 = vmatprep.subr.bf16.mxu1 %v9651_v5 }
0x2edc   :  { %7816 = vmatpush1.bf16.msra.mxu1 %v9659_v11 }
0x2edd   :  { %7818 = vmatprep.subr.bf16.mxu1 %v9675_v36 }
0x2ee0   :  { %7820 = vmatpush1.bf16.msra.mxu1 %v9677_v4 }
0x2ee1   :  { %7838 = vmatprep.subr.bf16.mxu1 %v9615_v45 }
0x2fa6   :  { %v5298_v31 = vpop.f32.mrb[36].mxu1 }
0x2fa7   :  { %v5300_v17 = vpop.f32.mrb[37].mxu1 }
0x2fa8   :  { %v5305_v12 = vcombine.low %v5298_v31, %v5300_v17 }
0x2faa   :  { %v5312_v33 = vrot.slane %v5305_v12, %v9767_v16 }
0x2fac   :  { %v5319_v43 = vrot.slane %v5312_v33, %v9767_v16 }
0x2fae   :  { %v5321_v52 = vadd.f32 %v5319_v43, %v5228_v15 }
0x2fb0   :  { %v5322_v8 = vadd.f32 %v10160_v14, %v5321_v52 }
0x2fb2   :  { %5333 = vrot.lane.b32.xlu0 %v5322_v8, %s8868_s4  ;;  %v7172_v19 = vmul.f32 -1.442695, %v5322_v8  ;;  %v5330_v34 = vrot.slane %v5322_v8, 1 }
0x2fb4   :  { %8663 = vpow2.f32 %v7172_v19 }
0x2fb5   :  { %8665 = vtanh.f32 %v5330_v34 }
0x2fbe   :  { %v8664_v50 = vpop.eup %8663 }
0x2fbf   :  { %v5326_v42 = vadd.f32 1.0, %v8664_v50  ;;  %v8666_v1 = vpop.eup %8665  ;;  %v5488_v50 = vld [vmem:[#allocation3 + $0x27] ss:$8 sm:$0x3] }
0x2fc1   :  { %8667 = vrcp.f32 %v5326_v42 }
0x2fcb   :  { %v8668_v40 = vpop.eup %8667 }
0x2fcc   :  { %v5344_v10 = vmul.f32 %v8668_v40, %v8666_v1  ;;  %v5343_v49 = vmul.f32 %v8668_v40, %v5219_v3 }
0x2fce   :  { %5346 = vrot.lane.b32.xlu1 %v5344_v10, %s8868_s4 }
0x3024   :  { %v5334_v56 = vpop.permute.xlu0 %5333 }
0x3025   :  { %v5335_v58 = vrot.slane %v5334_v56, 1 }
0x3027   :  { %v7173_v29 = vmul.f32 -1.442695, %v5335_v58 }
0x3040   :  { %v5347_v37 = vpop.permute.xlu1 %5346 }
0x3041   :  { %v5349_v61 = vadd.f32 %v5347_v37, %v5343_v49 }
0x3043   :  { %8669 = vtanh.f32 %v5349_v61 }
0x3044   :  { %8671 = vpow2.f32 %v7173_v29 }
0x304d   :  { %v8670_v24 = vpop.eup %8669 }
0x304e   :  { %5352 = vrot.lane.b32.xlu1 %v8670_v24, %s8868_s4  ;;  %v8672_v2 = vpop.eup %8671 }
0x304f   :  { %v5340_v59 = vadd.f32 1.0, %v8672_v2 }
0x3051   :  { %8673 = vrcp.f32 %v5340_v59 }
0x305b   :  { %v8674_v28 = vpop.eup %8673 }
0x30c0   :  { %v5353_v13 = vpop.permute.xlu1 %5352 }
0x30c1   :  { %v5355_v44 = vmul.f32 %v8674_v28, %v5353_v13 }
0x30c3   :  { %5356 = vst.msk [vmem:[#allocation4 + $0x15] sm:$0x1] %vm2625_vm13, %v5355_v44  ;;  %7174 = vmatmul.mubr.msk.f32.vlgmr.msra.gmra.mrb[38].mxu0 %vm2497_vm14, %v5355_v44 }
0x30c4   :  { %7824 = vmatpush1.bf16.msra.mxu0 %v9623_v48  ;;  %5686 = vmatprep.mubr.f32.mxu0 %v8856_v0 }
0x30c5   :  { %7826 = vmatprep.subr.bf16.mxu0 %v9636_v46 }
0x30c8   :  { %7828 = vmatpush1.bf16.msra.mxu0 %v9641_v63 }
0x30c9   :  { %7830 = vmatprep.subr.bf16.mxu0 %v9651_v5 }
0x30cc   :  { %7832 = vmatpush1.bf16.msra.mxu0 %v9659_v11 }
0x30cd   :  { %7834 = vmatprep.subr.bf16.mxu0 %v9675_v36 }
0x30d0   :  { %7836 = vmatpush1.bf16.msra.mxu0 %v9677_v4 }
0x30d1   :  { %7854 = vmatprep.subr.bf16.mxu0 %v9615_v45 }
0x3196   :  { %v5428_v22 = vpop.f32.mrb[38].mxu0 }
0x3197   :  { %v5430_v25 = vpop.f32.mrb[39].mxu0 }
0x3198   :  { %v5435_v21 = vcombine.low %v5428_v22, %v5430_v25 }
0x319a   :  { %v5442_v26 = vrot.slane %v5435_v21, %v9767_v16 }
0x319c   :  { %v5449_v27 = vrot.slane %v5442_v26, %v9767_v16 }
0x319e   :  { %v5451_v57 = vadd.f32 %v5449_v27, %v5358_v55 }
0x31a0   :  { %v5452_v51 = vadd.f32 %v10160_v14, %v5451_v57 }
0x31a2   :  { %5463 = vrot.lane.b32.xlu1 %v5452_v51, %s8868_s4  ;;  %v7175_v35 = vmul.f32 -1.442695, %v5452_v51  ;;  %v5460_v60 = vrot.slane %v5452_v51, 1 }
0x31a4   :  { %8675 = vpow2.f32 %v7175_v35 }
0x31a5   :  { %8677 = vtanh.f32 %v5460_v60 }
0x31ae   :  { %v8676_v32 = vpop.eup %8675 }
0x31af   :  { %v5456_v62 = vadd.f32 1.0, %v8676_v32  ;;  %v8678_v3 = vpop.eup %8677  ;;  %v5618_v32 = vld [vmem:[#allocation3 + $0x30] ss:$8 sm:$0x3] }
0x31b1   :  { %8679 = vrcp.f32 %v5456_v62 }
0x31bb   :  { %v8680_v38 = vpop.eup %8679 }
0x31bc   :  { %v5474_v30 = vmul.f32 %v8680_v38, %v8678_v3  ;;  %v5473_v39 = vmul.f32 %v8680_v38, %v5349_v61 }
0x31be   :  { %5476 = vrot.lane.b32.xlu0 %v5474_v30, %s8868_s4 }
0x3214   :  { %v5464_v18 = vpop.permute.xlu1 %5463 }
0x3215   :  { %v5465_v20 = vrot.slane %v5464_v18, 1 }
0x3217   :  { %v7176_v9 = vmul.f32 -1.442695, %v5465_v20 }
0x3230   :  { %v5477_v7 = vpop.permute.xlu0 %5476 }
0x3231   :  { %v5479_v41 = vadd.f32 %v5477_v7, %v5473_v39 }
0x3233   :  { %8681 = vtanh.f32 %v5479_v41 }
0x3234   :  { %8683 = vpow2.f32 %v7176_v9 }
0x323d   :  { %v8682_v47 = vpop.eup %8681 }
0x323e   :  { %5482 = vrot.lane.b32.xlu0 %v8682_v47, %s8868_s4  ;;  %v8684_v31 = vpop.eup %8683 }
0x323f   :  { %v5470_v17 = vadd.f32 1.0, %v8684_v31 }
0x3241   :  { %8685 = vrcp.f32 %v5470_v17 }
0x324b   :  { %v8686_v12 = vpop.eup %8685 }
0x32b0   :  { %v5483_v33 = vpop.permute.xlu0 %5482 }
0x32b1   :  { %v5485_v43 = vmul.f32 %v8686_v12, %v5483_v33 }
0x32b3   :  { %5486 = vst.msk [vmem:[#allocation4 + $0x16] sm:$0x1] %vm2625_vm13, %v5485_v43  ;;  %7177 = vmatmul.mubr.msk.f32.vlgmr.msra.gmra.mrb[38].mxu1 %vm2497_vm14, %v5485_v43 }
0x32b4   :  { %7840 = vmatpush1.bf16.msra.mxu1 %v9623_v48  ;;  %5816 = vmatprep.mubr.f32.mxu1 %v8856_v0 }
0x32b5   :  { %7842 = vmatprep.subr.bf16.mxu1 %v9636_v46 }
0x32b8   :  { %7844 = vmatpush1.bf16.msra.mxu1 %v9641_v63 }
0x32b9   :  { %7846 = vmatprep.subr.bf16.mxu1 %v9651_v5 }
0x32bc   :  { %7848 = vmatpush1.bf16.msra.mxu1 %v9659_v11 }
0x32bd   :  { %7850 = vmatprep.subr.bf16.mxu1 %v9675_v36 }
0x32c0   :  { %7852 = vmatpush1.bf16.msra.mxu1 %v9677_v4 }
0x32c1   :  { %7870 = vmatprep.subr.bf16.mxu1 %v9615_v45 }
0x3386   :  { %v5558_v15 = vpop.f32.mrb[38].mxu1 }
0x3387   :  { %v5560_v52 = vpop.f32.mrb[39].mxu1 }
0x3388   :  { %v5565_v8 = vcombine.low %v5558_v15, %v5560_v52 }
0x338a   :  { %v5572_v19 = vrot.slane %v5565_v8, %v9767_v16 }
0x338c   :  { %v5579_v34 = vrot.slane %v5572_v19, %v9767_v16 }
0x338e   :  { %v5581_v42 = vadd.f32 %v5579_v34, %v5488_v50 }
0x3390   :  { %v5582_v1 = vadd.f32 %v10160_v14, %v5581_v42 }
0x3392   :  { %5593 = vrot.lane.b32.xlu0 %v5582_v1, %s8868_s4  ;;  %v7178_v40 = vmul.f32 -1.442695, %v5582_v1  ;;  %v5590_v10 = vrot.slane %v5582_v1, 1 }
0x3394   :  { %8687 = vpow2.f32 %v7178_v40 }
0x3395   :  { %8689 = vtanh.f32 %v5590_v10 }
0x339e   :  { %v8688_v49 = vpop.eup %8687 }
0x339f   :  { %v5586_v37 = vadd.f32 1.0, %v8688_v49  ;;  %v8690_v61 = vpop.eup %8689  ;;  %v5748_v49 = vld [vmem:[#allocation3 + $0x31] ss:$8 sm:$0x3] }
0x33a1   :  { %8691 = vrcp.f32 %v5586_v37 }
0x33ab   :  { %v8692_v24 = vpop.eup %8691 }
0x33ac   :  { %v5604_v56 = vmul.f32 %v8692_v24, %v8690_v61  ;;  %v5603_v58 = vmul.f32 %v8692_v24, %v5479_v41 }
0x33ae   :  { %5606 = vrot.lane.b32.xlu1 %v5604_v56, %s8868_s4 }
0x3404   :  { %v5594_v28 = vpop.permute.xlu0 %5593 }
0x3405   :  { %v5595_v13 = vrot.slane %v5594_v28, 1 }
0x3407   :  { %v7179_v44 = vmul.f32 -1.442695, %v5595_v13 }
0x3420   :  { %v5607_v29 = vpop.permute.xlu1 %5606 }
0x3421   :  { %v5609_v2 = vadd.f32 %v5607_v29, %v5603_v58 }
0x3423   :  { %8693 = vtanh.f32 %v5609_v2 }
0x3424   :  { %8695 = vpow2.f32 %v7179_v44 }
0x342d   :  { %v8694_v59 = vpop.eup %8693 }
0x342e   :  { %5612 = vrot.lane.b32.xlu1 %v8694_v59, %s8868_s4  ;;  %v8696_v22 = vpop.eup %8695 }
0x342f   :  { %v5600_v25 = vadd.f32 1.0, %v8696_v22 }
0x3431   :  { %8697 = vrcp.f32 %v5600_v25 }
0x343b   :  { %v8698_v21 = vpop.eup %8697 }
0x34a0   :  { %v5613_v26 = vpop.permute.xlu1 %5612 }
0x34a1   :  { %v5615_v27 = vmul.f32 %v8698_v21, %v5613_v26 }
0x34a3   :  { %5616 = vst.msk [vmem:[#allocation4 + $0x17] sm:$0x1] %vm2625_vm13, %v5615_v27  ;;  %7180 = vmatmul.mubr.msk.f32.vlgmr.msra.gmra.mrb[40].mxu0 %vm2497_vm14, %v5615_v27 }
0x34a4   :  { %7856 = vmatpush1.bf16.msra.mxu0 %v9623_v48  ;;  %5946 = vmatprep.mubr.f32.mxu0 %v8856_v0 }
0x34a5   :  { %7858 = vmatprep.subr.bf16.mxu0 %v9636_v46 }
0x34a8   :  { %7860 = vmatpush1.bf16.msra.mxu0 %v9641_v63 }
0x34a9   :  { %7862 = vmatprep.subr.bf16.mxu0 %v9651_v5 }
0x34ac   :  { %7864 = vmatpush1.bf16.msra.mxu0 %v9659_v11 }
0x34ad   :  { %7866 = vmatprep.subr.bf16.mxu0 %v9675_v36 }
0x34b0   :  { %7868 = vmatpush1.bf16.msra.mxu0 %v9677_v4 }
0x34b1   :  { %7886 = vmatprep.subr.bf16.mxu0 %v9615_v45 }
0x3576   :  { %v5688_v55 = vpop.f32.mrb[40].mxu0 }
0x3577   :  { %v5690_v57 = vpop.f32.mrb[41].mxu0 }
0x3578   :  { %v5695_v51 = vcombine.low %v5688_v55, %v5690_v57 }
0x357a   :  { %v5702_v35 = vrot.slane %v5695_v51, %v9767_v16 }
0x357c   :  { %v5709_v60 = vrot.slane %v5702_v35, %v9767_v16 }
0x357e   :  { %v5711_v62 = vadd.f32 %v5709_v60, %v5618_v32 }
0x3580   :  { %v5712_v3 = vadd.f32 %v10160_v14, %v5711_v62 }
0x3582   :  { %5723 = vrot.lane.b32.xlu1 %v5712_v3, %s8868_s4  ;;  %v7181_v38 = vmul.f32 -1.442695, %v5712_v3  ;;  %v5720_v30 = vrot.slane %v5712_v3, 1 }
0x3584   :  { %8699 = vpow2.f32 %v7181_v38 }
0x3585   :  { %8701 = vtanh.f32 %v5720_v30 }
0x358e   :  { %v8700_v39 = vpop.eup %8699 }
0x358f   :  { %v5716_v7 = vadd.f32 1.0, %v8700_v39  ;;  %v8702_v41 = vpop.eup %8701  ;;  %v5878_v39 = vld [vmem:[#allocation3 + $0x32] ss:$8 sm:$0x3] }
0x3591   :  { %8703 = vrcp.f32 %v5716_v7 }
0x359b   :  { %v8704_v47 = vpop.eup %8703 }
0x359c   :  { %v5734_v18 = vmul.f32 %v8704_v47, %v8702_v41  ;;  %v5733_v20 = vmul.f32 %v8704_v47, %v5609_v2 }
0x359e   :  { %5736 = vrot.lane.b32.xlu0 %v5734_v18, %s8868_s4 }
0x35f4   :  { %v5724_v12 = vpop.permute.xlu1 %5723 }
0x35f5   :  { %v5725_v33 = vrot.slane %v5724_v12, 1 }
0x35f7   :  { %v7182_v43 = vmul.f32 -1.442695, %v5725_v33 }
0x3610   :  { %v5737_v9 = vpop.permute.xlu0 %5736 }
0x3611   :  { %v5739_v31 = vadd.f32 %v5737_v9, %v5733_v20 }
0x3613   :  { %8705 = vtanh.f32 %v5739_v31 }
0x3614   :  { %8707 = vpow2.f32 %v7182_v43 }
0x361d   :  { %v8706_v17 = vpop.eup %8705 }
0x361e   :  { %5742 = vrot.lane.b32.xlu0 %v8706_v17, %s8868_s4  ;;  %v8708_v15 = vpop.eup %8707 }
0x361f   :  { %v5730_v52 = vadd.f32 1.0, %v8708_v15 }
0x3621   :  { %8709 = vrcp.f32 %v5730_v52 }
0x362b   :  { %v8710_v8 = vpop.eup %8709 }
0x3690   :  { %v5743_v19 = vpop.permute.xlu0 %5742 }
0x3691   :  { %v5745_v34 = vmul.f32 %v8710_v8, %v5743_v19 }
0x3693   :  { %5746 = vst.msk [vmem:[#allocation4 + $0x18] sm:$0x1] %vm2625_vm13, %v5745_v34  ;;  %7183 = vmatmul.mubr.msk.f32.vlgmr.msra.gmra.mrb[40].mxu1 %vm2497_vm14, %v5745_v34 }
0x3694   :  { %7872 = vmatpush1.bf16.msra.mxu1 %v9623_v48  ;;  %6076 = vmatprep.mubr.f32.mxu1 %v8856_v0 }
0x3695   :  { %7874 = vmatprep.subr.bf16.mxu1 %v9636_v46 }
0x3698   :  { %7876 = vmatpush1.bf16.msra.mxu1 %v9641_v63 }
0x3699   :  { %7878 = vmatprep.subr.bf16.mxu1 %v9651_v5 }
0x369c   :  { %7880 = vmatpush1.bf16.msra.mxu1 %v9659_v11 }
0x369d   :  { %7882 = vmatprep.subr.bf16.mxu1 %v9675_v36 }
0x36a0   :  { %7884 = vmatpush1.bf16.msra.mxu1 %v9677_v4 }
0x36a1   :  { %7902 = vmatprep.subr.bf16.mxu1 %v9615_v45 }
0x3766   :  { %v5818_v50 = vpop.f32.mrb[40].mxu1 }
0x3767   :  { %v5820_v42 = vpop.f32.mrb[41].mxu1 }
0x3768   :  { %v5825_v1 = vcombine.low %v5818_v50, %v5820_v42 }
0x376a   :  { %v5832_v40 = vrot.slane %v5825_v1, %v9767_v16 }
0x376c   :  { %v5839_v10 = vrot.slane %v5832_v40, %v9767_v16 }
0x376e   :  { %v5841_v37 = vadd.f32 %v5839_v10, %v5748_v49 }
0x3770   :  { %v5842_v61 = vadd.f32 %v10160_v14, %v5841_v37 }
0x3772   :  { %5853 = vrot.lane.b32.xlu0 %v5842_v61, %s8868_s4  ;;  %v7184_v24 = vmul.f32 -1.442695, %v5842_v61  ;;  %v5850_v56 = vrot.slane %v5842_v61, 1 }
0x3774   :  { %8711 = vpow2.f32 %v7184_v24 }
0x3775   :  { %8713 = vtanh.f32 %v5850_v56 }
0x377e   :  { %v8712_v58 = vpop.eup %8711 }
0x377f   :  { %v5846_v29 = vadd.f32 1.0, %v8712_v58  ;;  %v8714_v2 = vpop.eup %8713  ;;  %v6008_v58 = vld [vmem:[#allocation3 + $0x33] ss:$8 sm:$0x3] }
0x3781   :  { %8715 = vrcp.f32 %v5846_v29 }
0x378b   :  { %v8716_v59 = vpop.eup %8715 }
0x378c   :  { %v5864_v28 = vmul.f32 %v8716_v59, %v8714_v2  ;;  %v5863_v13 = vmul.f32 %v8716_v59, %v5739_v31 }
0x378e   :  { %5866 = vrot.lane.b32.xlu1 %v5864_v28, %s8868_s4 }
0x37e4   :  { %v5854_v21 = vpop.permute.xlu0 %5853 }
0x37e5   :  { %v5855_v26 = vrot.slane %v5854_v21, 1 }
0x37e7   :  { %v7185_v27 = vmul.f32 -1.442695, %v5855_v26 }
0x3800   :  { %v5867_v44 = vpop.permute.xlu1 %5866 }
0x3801   :  { %v5869_v22 = vadd.f32 %v5867_v44, %v5863_v13 }
0x3803   :  { %8717 = vtanh.f32 %v5869_v22 }
0x3804   :  { %8719 = vpow2.f32 %v7185_v27 }
0x380d   :  { %v8718_v25 = vpop.eup %8717 }
0x380e   :  { %5872 = vrot.lane.b32.xlu1 %v8718_v25, %s8868_s4  ;;  %v8720_v55 = vpop.eup %8719 }
0x380f   :  { %v5860_v57 = vadd.f32 1.0, %v8720_v55 }
0x3811   :  { %8721 = vrcp.f32 %v5860_v57 }
0x381b   :  { %v8722_v51 = vpop.eup %8721 }
0x3880   :  { %v5873_v35 = vpop.permute.xlu1 %5872 }
0x3881   :  { %v5875_v60 = vmul.f32 %v8722_v51, %v5873_v35 }
0x3883   :  { %5876 = vst.msk [vmem:[#allocation4 + $0x19] sm:$0x1] %vm2625_vm13, %v5875_v60  ;;  %7186 = vmatmul.mubr.msk.f32.vlgmr.msra.gmra.mrb[42].mxu0 %vm2497_vm14, %v5875_v60 }
0x3884   :  { %7888 = vmatpush1.bf16.msra.mxu0 %v9623_v48  ;;  %6206 = vmatprep.mubr.f32.mxu0 %v8856_v0 }
0x3885   :  { %7890 = vmatprep.subr.bf16.mxu0 %v9636_v46 }
0x3888   :  { %7892 = vmatpush1.bf16.msra.mxu0 %v9641_v63 }
0x3889   :  { %7894 = vmatprep.subr.bf16.mxu0 %v9651_v5 }
0x388c   :  { %7896 = vmatpush1.bf16.msra.mxu0 %v9659_v11 }
0x388d   :  { %7898 = vmatprep.subr.bf16.mxu0 %v9675_v36 }
0x3890   :  { %7900 = vmatpush1.bf16.msra.mxu0 %v9677_v4 }
0x3891   :  { %7918 = vmatprep.subr.bf16.mxu0 %v9615_v45 }
0x3956   :  { %v5948_v32 = vpop.f32.mrb[42].mxu0 }
0x3957   :  { %v5950_v62 = vpop.f32.mrb[43].mxu0 }
0x3958   :  { %v5955_v3 = vcombine.low %v5948_v32, %v5950_v62 }
0x395a   :  { %v5962_v38 = vrot.slane %v5955_v3, %v9767_v16 }
0x395c   :  { %v5969_v30 = vrot.slane %v5962_v38, %v9767_v16 }
0x395e   :  { %v5971_v7 = vadd.f32 %v5969_v30, %v5878_v39 }
0x3960   :  { %v5972_v41 = vadd.f32 %v10160_v14, %v5971_v7 }
0x3962   :  { %5983 = vrot.lane.b32.xlu1 %v5972_v41, %s8868_s4  ;;  %v7187_v47 = vmul.f32 -1.442695, %v5972_v41  ;;  %v5980_v18 = vrot.slane %v5972_v41, 1 }
0x3964   :  { %8723 = vpow2.f32 %v7187_v47 }
0x3965   :  { %8725 = vtanh.f32 %v5980_v18  ;;  %v6138_v18 = vld [vmem:[#allocation3 + $0x34] ss:$8 sm:$0x3] }
0x396e   :  { %v8724_v20 = vpop.eup %8723 }
0x396f   :  { %v5976_v9 = vadd.f32 1.0, %v8724_v20  ;;  %v8726_v31 = vpop.eup %8725 }
0x3971   :  { %8727 = vrcp.f32 %v5976_v9 }
0x397b   :  { %v8728_v17 = vpop.eup %8727 }
0x397c   :  { %v5994_v12 = vmul.f32 %v8728_v17, %v8726_v31  ;;  %v5993_v33 = vmul.f32 %v8728_v17, %v5869_v22 }
0x397e   :  { %5996 = vrot.lane.b32.xlu0 %v5994_v12, %s8868_s4 }
0x39d4   :  { %v5984_v8 = vpop.permute.xlu1 %5983 }
0x39d5   :  { %v5985_v19 = vrot.slane %v5984_v8, 1 }
0x39d7   :  { %v7188_v34 = vmul.f32 -1.442695, %v5985_v19 }
0x39f0   :  { %v5997_v43 = vpop.permute.xlu0 %5996 }
0x39f1   :  { %v5999_v15 = vadd.f32 %v5997_v43, %v5993_v33 }
0x39f3   :  { %8729 = vtanh.f32 %v5999_v15 }
0x39f4   :  { %8731 = vpow2.f32 %v7188_v34 }
0x39fd   :  { %v8730_v52 = vpop.eup %8729 }
0x39fe   :  { %6002 = vrot.lane.b32.xlu0 %v8730_v52, %s8868_s4  ;;  %v8732_v50 = vpop.eup %8731 }
0x39ff   :  { %v5990_v42 = vadd.f32 1.0, %v8732_v50 }
0x3a01   :  { %8733 = vrcp.f32 %v5990_v42 }
0x3a0b   :  { %v8734_v1 = vpop.eup %8733 }
0x3a70   :  { %v6003_v40 = vpop.permute.xlu0 %6002 }
0x3a71   :  { %v6005_v10 = vmul.f32 %v8734_v1, %v6003_v40 }
0x3a73   :  { %6006 = vst.msk [vmem:[#allocation4 + $0x1a] sm:$0x1] %vm2625_vm13, %v6005_v10  ;;  %7189 = vmatmul.mubr.msk.f32.vlgmr.msra.gmra.mrb[42].mxu1 %vm2497_vm14, %v6005_v10 }
0x3a74   :  { %7904 = vmatpush1.bf16.msra.mxu1 %v9623_v48  ;;  %6336 = vmatprep.mubr.f32.mxu1 %v8856_v0 }
0x3a75   :  { %7906 = vmatprep.subr.bf16.mxu1 %v9636_v46 }
0x3a78   :  { %7908 = vmatpush1.bf16.msra.mxu1 %v9641_v63 }
0x3a79   :  { %7910 = vmatprep.subr.bf16.mxu1 %v9651_v5 }
0x3a7c   :  { %7912 = vmatpush1.bf16.msra.mxu1 %v9659_v11 }
0x3a7d   :  { %7914 = vmatprep.subr.bf16.mxu1 %v9675_v36 }
0x3a80   :  { %7916 = vmatpush1.bf16.msra.mxu1 %v9677_v4 }
0x3a81   :  { %7934 = vmatprep.subr.bf16.mxu1 %v9615_v45 }
0x3b46   :  { %v6078_v49 = vpop.f32.mrb[42].mxu1 }
0x3b47   :  { %v6080_v37 = vpop.f32.mrb[43].mxu1 }
0x3b48   :  { %v6085_v61 = vcombine.low %v6078_v49, %v6080_v37 }
0x3b4a   :  { %v6092_v24 = vrot.slane %v6085_v61, %v9767_v16 }
0x3b4c   :  { %v6099_v56 = vrot.slane %v6092_v24, %v9767_v16 }
0x3b4e   :  { %v6101_v29 = vadd.f32 %v6099_v56, %v6008_v58 }
0x3b50   :  { %v6102_v2 = vadd.f32 %v10160_v14, %v6101_v29 }
0x3b52   :  { %6113 = vrot.lane.b32.xlu0 %v6102_v2, %s8868_s4  ;;  %v7190_v59 = vmul.f32 -1.442695, %v6102_v2  ;;  %v6110_v28 = vrot.slane %v6102_v2, 1 }
0x3b54   :  { %8735 = vpow2.f32 %v7190_v59  ;;  %v6268_v59 = vld [vmem:[#allocation3 + $0x35] ss:$8 sm:$0x3] }
0x3b55   :  { %8737 = vtanh.f32 %v6110_v28 }
0x3b5e   :  { %v8736_v13 = vpop.eup %8735 }
0x3b5f   :  { %v6106_v44 = vadd.f32 1.0, %v8736_v13  ;;  %v8738_v45 = vpop.eup %8737 }
0x3b61   :  { %8739 = vrcp.f32 %v6106_v44 }
0x3b6b   :  { %v8740_v22 = vpop.eup %8739 }
0x3b6c   :  { %v6124_v25 = vmul.f32 %v8740_v22, %v8738_v45  ;;  %v6123_v21 = vmul.f32 %v8740_v22, %v5999_v15 }
0x3b6e   :  { %6126 = vrot.lane.b32.xlu1 %v6124_v25, %s8868_s4 }
0x3bc4   :  { %v6114_v57 = vpop.permute.xlu0 %6113 }
0x3bc5   :  { %v6115_v51 = vrot.slane %v6114_v57, 1 }
0x3bc7   :  { %v7191_v35 = vmul.f32 -1.442695, %v6115_v51 }
0x3be0   :  { %v6127_v26 = vpop.permute.xlu1 %6126 }
0x3be1   :  { %v6129_v27 = vadd.f32 %v6127_v26, %v6123_v21 }
0x3be3   :  { %8741 = vtanh.f32 %v6129_v27 }
0x3be4   :  { %8743 = vpow2.f32 %v7191_v35 }
0x3bed   :  { %v8742_v55 = vpop.eup %8741 }
0x3bee   :  { %6132 = vrot.lane.b32.xlu1 %v8742_v55, %s8868_s4  ;;  %v8744_v60 = vpop.eup %8743 }
0x3bef   :  { %v6120_v32 = vadd.f32 1.0, %v8744_v60 }
0x3bf1   :  { %8745 = vrcp.f32 %v6120_v32 }
0x3bfb   :  { %v8746_v62 = vpop.eup %8745 }
0x3c60   :  { %v6133_v3 = vpop.permute.xlu1 %6132 }
0x3c61   :  { %v6135_v38 = vmul.f32 %v8746_v62, %v6133_v3 }
0x3c63   :  { %6136 = vst.msk [vmem:[#allocation4 + $0x1b] sm:$0x1] %vm2625_vm13, %v6135_v38  ;;  %7192 = vmatmul.mubr.msk.f32.vlgmr.msra.gmra.mrb[44].mxu0 %vm2497_vm14, %v6135_v38 }
0x3c64   :  { %7920 = vmatpush1.bf16.msra.mxu0 %v9623_v48  ;;  %6466 = vmatprep.mubr.f32.mxu0 %v8856_v0 }
0x3c65   :  { %7922 = vmatprep.subr.bf16.mxu0 %v9636_v46 }
0x3c68   :  { %7924 = vmatpush1.bf16.msra.mxu0 %v9641_v63 }
0x3c69   :  { %7926 = vmatprep.subr.bf16.mxu0 %v9651_v5 }
0x3c6c   :  { %7928 = vmatpush1.bf16.msra.mxu0 %v9659_v11 }
0x3c6d   :  { %7930 = vmatprep.subr.bf16.mxu0 %v9675_v36 }
0x3c70   :  { %7932 = vmatpush1.bf16.msra.mxu0 %v9677_v4 }
0x3d36   :  { %v6208_v30 = vpop.f32.mrb[44].mxu0 }
0x3d37   :  { %v6210_v39 = vpop.f32.mrb[45].mxu0 }
0x3d38   :  { %v6215_v7 = vcombine.low %v6208_v30, %v6210_v39 }
0x3d3a   :  { %v6222_v41 = vrot.slane %v6215_v7, %v9767_v16  ;;  %v6398_v7 = vld [vmem:[#allocation3 + $0x36] ss:$8 sm:$0x3] }
0x3d3c   :  { %v6229_v47 = vrot.slane %v6222_v41, %v9767_v16 }
0x3d3e   :  { %v6231_v20 = vadd.f32 %v6229_v47, %v6138_v18 }
0x3d40   :  { %v6232_v9 = vadd.f32 %v10160_v14, %v6231_v20 }
0x3d42   :  { %6243 = vrot.lane.b32.xlu1 %v6232_v9, %s8868_s4  ;;  %v7193_v31 = vmul.f32 -1.442695, %v6232_v9  ;;  %v6240_v17 = vrot.slane %v6232_v9, 1 }
0x3d44   :  { %8747 = vpow2.f32 %v7193_v31 }
0x3d45   :  { %8749 = vtanh.f32 %v6240_v17 }
0x3d4e   :  { %v8748_v12 = vpop.eup %8747 }
0x3d4f   :  { %v6236_v33 = vadd.f32 1.0, %v8748_v12  ;;  %v8750_v43 = vpop.eup %8749 }
0x3d51   :  { %8751 = vrcp.f32 %v6236_v33 }
0x3d5b   :  { %v8752_v15 = vpop.eup %8751 }
0x3d5c   :  { %v6254_v52 = vmul.f32 %v8752_v15, %v8750_v43  ;;  %v6253_v8 = vmul.f32 %v8752_v15, %v6129_v27 }
0x3d5e   :  { %6256 = vrot.lane.b32.xlu0 %v6254_v52, %s8868_s4 }
0x3db4   :  { %v6244_v42 = vpop.permute.xlu1 %6243 }
0x3db5   :  { %v6245_v1 = vrot.slane %v6244_v42, 1 }
0x3db7   :  { %v7194_v40 = vmul.f32 -1.442695, %v6245_v1 }
0x3dd0   :  { %v6257_v19 = vpop.permute.xlu0 %6256 }
0x3dd1   :  { %v6259_v34 = vadd.f32 %v6257_v19, %v6253_v8  ;;  %v8871_v8 = vmov 0.0|0.0  }
0x3dd2   :  { %7949 = vmatprep.subr.bf16.mxu0 %v8871_v8 }
0x3dd3   :  { %8753 = vtanh.f32 %v6259_v34 }
0x3dd4   :  { %8755 = vpow2.f32 %v7194_v40 }
0x3ddd   :  { %v8754_v50 = vpop.eup %8753 }
0x3dde   :  { %6262 = vrot.lane.b32.xlu0 %v8754_v50, %s8868_s4  ;;  %v8756_v10 = vpop.eup %8755 }
0x3ddf   :  { %v6250_v49 = vadd.f32 1.0, %v8756_v10 }
0x3de1   :  { %8757 = vrcp.f32 %v6250_v49 }
0x3deb   :  { %v8758_v37 = vpop.eup %8757 }
0x3e50   :  { %v6263_v61 = vpop.permute.xlu0 %6262 }
0x3e51   :  { %v6265_v24 = vmul.f32 %v8758_v37, %v6263_v61  ;;  %v8803_v61 = vld [vmem:[#allocation4] sm:$0xff] }
0x3e53   :  { %6266 = vst.msk [vmem:[#allocation4 + $0x1c] sm:$0x1] %vm2625_vm13, %v6265_v24  ;;  %7195 = vmatmul.mubr.msk.f32.vlgmr.msra.gmra.mrb[44].mxu1 %vm2497_vm14, %v6265_v24  ;;  %v8804_v24 = vld [vmem:[#allocation4 + $0x8] sm:$0xff] }
0x3e54   :  { %7936 = vmatpush1.bf16.msra.mxu1 %v9623_v48  ;;  %6596 = vmatprep.mubr.f32.mxu1 %v8856_v0 }
0x3e55   :  { %7938 = vmatprep.subr.bf16.mxu1 %v9636_v46 }
0x3e58   :  { %7940 = vmatpush1.bf16.msra.mxu1 %v9641_v63 }
0x3e59   :  { %7942 = vmatprep.subr.bf16.mxu1 %v9651_v5 }
0x3e5c   :  { %7944 = vmatpush1.bf16.msra.mxu1 %v9659_v11 }
0x3e5d   :  { %7946 = vmatprep.subr.bf16.mxu1 %v9675_v36 }
0x3e60   :  { %7948 = vmatpush1.bf16.msra.mxu1 %v9677_v4 }
0x3e61   :  { %7961 = vmatprep.subr.bf16.mxu1 %v8871_v8 }
0x3f26   :  { %v6338_v56 = vpop.f32.mrb[44].mxu1 }
0x3f27   :  { %v6340_v58 = vpop.f32.mrb[45].mxu1 }
0x3f28   :  { %v6345_v29 = vcombine.low %v6338_v56, %v6340_v58  ;;  %v7962_v56 = vpack.c.bf16 %v8804_v24, %v8803_v61 }
0x3f2a   :  { %v6352_v2 = vrot.slane %v6345_v29, %v9767_v16 }
0x3f2c   :  { %v6359_v48 = vrot.slane %v6352_v2, %v9767_v16 }
0x3f2e   :  { %v6361_v28 = vadd.f32 %v6359_v48, %v6268_v59 }
0x3f30   :  { %v6362_v46 = vadd.f32 %v10160_v14, %v6361_v28  ;;  %v6528_v28 = vld [vmem:[#allocation3 + $0x37] ss:$8 sm:$0x3] }
0x3f32   :  { %6373 = vrot.lane.b32.xlu0 %v6362_v46, %s8868_s4  ;;  %v7196_v63 = vmul.f32 -1.442695, %v6362_v46  ;;  %v6370_v5 = vrot.slane %v6362_v46, 1 }
0x3f34   :  { %8759 = vpow2.f32 %v7196_v63 }
0x3f35   :  { %8761 = vtanh.f32 %v6370_v5 }
0x3f3e   :  { %v8760_v11 = vpop.eup %8759 }
0x3f3f   :  { %v6366_v36 = vadd.f32 1.0, %v8760_v11  ;;  %v8762_v4 = vpop.eup %8761 }
0x3f41   :  { %8763 = vrcp.f32 %v6366_v36 }
0x3f4b   :  { %v8764_v13 = vpop.eup %8763 }
0x3f4c   :  { %v6384_v44 = vmul.f32 %v8764_v13, %v8762_v4  ;;  %v6383_v45 = vmul.f32 %v8764_v13, %v6259_v34 }
0x3f4e   :  { %6386 = vrot.lane.b32.xlu1 %v6384_v44, %s8868_s4 }
0x3fa4   :  { %v6374_v26 = vpop.permute.xlu0 %6373 }
0x3fa5   :  { %v6375_v27 = vrot.slane %v6374_v26, 1 }
0x3fa7   :  { %v7197_v55 = vmul.f32 -1.442695, %v6375_v27  ;;  %v6663_v27 = vld [vmem:[%s10435_s13 + $0x30] sm:$0xff] }
0x3fc0   :  { %v6387_v22 = vpop.permute.xlu1 %6386 }
0x3fc1   :  { %v6389_v25 = vadd.f32 %v6387_v22, %v6383_v45  ;;  %v6659_v22 = vld [vmem:[%s10435_s13 + $0x10] sm:$0xff] }
0x3fc3   :  { %8765 = vtanh.f32 %v6389_v25 }
0x3fc4   :  { %8767 = vpow2.f32 %v7197_v55  ;;  %v6664_v55 = vld [vmem:[%s10435_s13 + $0x38] sm:$0xff] }
0x3fcd   :  { %v8766_v21 = vpop.eup %8765 }
0x3fce   :  { %6392 = vrot.lane.b32.xlu1 %v8766_v21, %s8868_s4  ;;  %v8768_v57 = vpop.eup %8767  ;;  %v6660_v21 = vld [vmem:[%s10435_s13 + $0x18] sm:$0xff] }
0x3fcf   :  { %v6380_v51 = vadd.f32 1.0, %v8768_v57  ;;  %v7953_v23 = vpack.c.bf16 %v6660_v21, %v6659_v22  ;;  %v7959_v57 = vpack.c.bf16 %v6664_v55, %v6663_v27 }
0x3fd1   :  { %8769 = vrcp.f32 %v6380_v51  ;;  %v6668_v51 = vsub.s32 0, %v9764_v54 }
0x3fdb   :  { %v8770_v35 = vpop.eup %8769 }
0x4040   :  { %v6393_v60 = vpop.permute.xlu1 %6392 }
0x4041   :  { %v6395_v32 = vmul.f32 %v8770_v35, %v6393_v60 }
0x4043   :  { %6396 = vst.msk [vmem:[#allocation4 + $0x1d] sm:$0x1] %vm2625_vm13, %v6395_v32  ;;  %7198 = vmatmul.mubr.msk.f32.vlgmr.msra.gmra.mrb[46].mxu0 %vm2497_vm14, %v6395_v32 }
0x4044   :  { %7265 = vmatprep.mubr.msk.f32.mxu0 %vm8872_vm15, %v8856_v0 }
0x4116   :  { %v6468_v62 = vpop.f32.mrb[46].mxu0 }
0x4117   :  { %v6470_v3 = vpop.f32.mrb[47].mxu0 }
0x4118   :  { %v6475_v38 = vcombine.low %v6468_v62, %v6470_v3 }
0x411a   :  { %v6482_v30 = vrot.slane %v6475_v38, %v9767_v16 }
0x411c   :  { %v6489_v39 = vrot.slane %v6482_v30, %v9767_v16 }
0x411e   :  { %v6491_v41 = vadd.f32 %v6489_v39, %v6398_v7 }
0x4120   :  { %v6492_v47 = vadd.f32 %v10160_v14, %v6491_v41 }
0x4122   :  { %6503 = vrot.lane.b32.xlu1 %v6492_v47, %s8868_s4  ;;  %v7199_v18 = vmul.f32 -1.442695, %v6492_v47  ;;  %v6500_v20 = vrot.slane %v6492_v47, 1 }
0x4124   :  { %8771 = vpow2.f32 %v7199_v18 }
0x4125   :  { %8773 = vtanh.f32 %v6500_v20 }
0x412e   :  { %v8772_v9 = vpop.eup %8771 }
0x412f   :  { %v6496_v31 = vadd.f32 1.0, %v8772_v9  ;;  %v8774_v17 = vpop.eup %8773  ;;  %v6747_v9 = vld [vmem:[#allocation4 + $0x10] sm:$0xff] }
0x4131   :  { %8775 = vrcp.f32 %v6496_v31 }
0x413b   :  { %v8776_v12 = vpop.eup %8775 }
0x413c   :  { %v6514_v33 = vmul.f32 %v8776_v12, %v8774_v17  ;;  %v6513_v43 = vmul.f32 %v8776_v12, %v6389_v25 }
0x413e   :  { %6516 = vrot.lane.b32.xlu0 %v6514_v33, %s8868_s4 }
0x4194   :  { %v6504_v34 = vpop.permute.xlu1 %6503 }
0x4195   :  { %v6505_v50 = vrot.slane %v6504_v34, 1 }
0x4197   :  { %v7200_v42 = vmul.f32 -1.442695, %v6505_v50 }
0x41b0   :  { %v6517_v15 = vpop.permute.xlu0 %6516 }
0x41b1   :  { %v10324_v52 = vadd.f32 %v6517_v15, %v6513_v43 }
0x41b3   :  { %8777 = vtanh.f32 %v10324_v52 }
0x41b4   :  { %8779 = vpow2.f32 %v7200_v42 }
0x41bd   :  { %v8778_v19 = vpop.eup %8777 }
0x41be   :  { %6522 = vrot.lane.b32.xlu0 %v8778_v19, %s8868_s4  ;;  %v8780_v1 = vpop.eup %8779 }
0x41bf   :  { %v6510_v40 = vadd.f32 1.0, %v8780_v1 }
0x41c1   :  { %8781 = vrcp.f32 %v6510_v40 }
0x41cb   :  { %v8782_v10 = vpop.eup %8781 }
0x4230   :  { %v6523_v49 = vpop.permute.xlu0 %6522 }
0x4231   :  { %v6525_v37 = vmul.f32 %v8782_v10, %v6523_v49  ;;  %v6917_v49 = vld [vmem:[%s10436_s14] sm:$0xff] }
0x4233   :  { %6526 = vst.msk [vmem:[#allocation4 + $0x1e] sm:$0x1] %vm2625_vm13, %v6525_v37  ;;  %7201 = vmatmul.mubr.msk.f32.vlgmr.msra.gmra.mrb[46].mxu1 %vm2497_vm14, %v6525_v37  ;;  %v6918_v37 = vld [vmem:[%s10436_s14 + $0x8] sm:$0xff] }
0x4234   :  { %7963 = vmatpush3.bf16.msra.mxu1 %v7962_v56  ;;  %7276 = vmatprep.mubr.msk.f32.mxu1 %vm8872_vm15, %v8856_v0  ;;  %v7974_v61 = vpack.c.bf16 %v6918_v37, %v6917_v49  ;;  %v6920_v56 = vld [vmem:[%s10436_s14 + $0x18] sm:$0xff] }
0x4235   :  { %7964 = vmatprep.subr.bf16.mxu1 %v8871_v8 }
0x4306   :  { %v6598_v58 = vpop.f32.mrb[46].mxu1 }
0x4307   :  { %v6600_v29 = vpop.f32.mrb[47].mxu1 }
0x4308   :  { %v6605_v2 = vcombine.low %v6598_v58, %v6600_v29 }
0x430a   :  { %v6612_v48 = vrot.slane %v6605_v2, %v9767_v16 }
0x430c   :  { %v6619_v59 = vrot.slane %v6612_v48, %v9767_v16  ;;  %v6657_v16 = vld [vmem:[%s10435_s13] sm:$0xff] }
0x430e   :  { %v6621_v46 = vadd.f32 %v6619_v59, %v6528_v28 }
0x4310   :  { %v6622_v63 = vadd.f32 %v10160_v14, %v6621_v46  ;;  %v6658_v14 = vld [vmem:[%s10435_s13 + $0x8] sm:$0xff]  ;;  %v7207_v46 = vld [vmem:[%s10437_s15] ss:$0 sm:$0xff] }
0x4311   :  { %v7950_v25 = vpack.c.bf16 %v6658_v14, %v6657_v16 }
0x4312   :  { %v7202_v5 = vmul.f32 -1.442695, %v6622_v63  ;;  %v6630_v11 = vrot.slane %v6622_v63, 1 }
0x4313   :  { %7951 = vmatpush3.bf16.msra.mxu0 %v7950_v25 }
0x4314   :  { %8783 = vpow2.f32 %v7202_v5  ;;  %7952 = vmatprep.subr.bf16.mxu0 %v8871_v8 }
0x4315   :  { %8785 = vtanh.f32 %v6630_v11 }
0x4317   :  { %7954 = vmatpush3.bf16.msra.mxu0 %v7953_v23 }
0x4318   :  { %7955 = vmatprep.subr.bf16.mxu0 %v8871_v8 }
0x431e   :  { %v8784_v36 = vpop.eup %8783 }
0x431f   :  { %v6626_v4 = vadd.f32 1.0, %v8784_v36  ;;  %v8786_v13 = vpop.eup %8785 }
0x4321   :  { %8787 = vrcp.f32 %v6626_v4 }
0x432b   :  { %v8788_v44 = vpop.eup %8787 }
0x432c   :  { %v6644_v45 = vmul.f32 %v8788_v44, %v8786_v13  ;;  %v6643_v35 = vmul.f32 %v8788_v44, %v10324_v52 }
0x432e   :  { %6646 = vrot.lane.b32.xlu1 %v6644_v45, %s8868_s4 }
0x4332   :  { %6633 = vrot.lane.b32.xlu1 %v6622_v63, %s8868_s4 }
0x4336   :  { %8305 = vrot.lane.b32.xlu1 %v8304_v53, %s8865_s28  ;;  %v6662_v53 = vld [vmem:[%s10435_s13 + $0x28] sm:$0xff] }
0x4337   :  { %v7956_v26 = vpack.c.bf16 %v6662_v53, %v6661_v6 }
0x4339   :  { %7957 = vmatpush3.bf16.msra.mxu0 %v7956_v26 }
0x433a   :  { %7958 = vmatprep.subr.bf16.mxu0 %v8871_v8 }
0x433d   :  { %7960 = vmatpush3.bf16.msra.mxu0 %v7959_v57 }
0x433e   :  { %7973 = vmatprep.subr.bf16.mxu0 %v8871_v8 }
0x43a0   :  { %v6647_v60 = vpop.permute.xlu1 %6646 }
0x43a1   :  { %v6649_v32 = vadd.f32 %v6647_v60, %v6643_v35 }
0x43a3   :  { %8789 = vtanh.f32 %v6649_v32  ;;  %v6669_v62 = vrot.slane %v6649_v32, %v6668_v51 }
0x43a4   :  { %v6634_v38 = vpop.permute.xlu1 %6633 }
0x43a5   :  { %6670 = vrot.lane.b32.xlu0 %v6669_v62, %s8868_s4  ;;  %v6635_v30 = vrot.slane %v6634_v38, 1 }
0x43a7   :  { %v7203_v39 = vmul.f32 -1.442695, %v6635_v30 }
0x43a8   :  { %v8306_v15 = vpop.permute.xlu1 %8305 }
0x43a9   :  { %8791 = vpow2.f32 %v7203_v39  ;;  %v8308_v52 = vunpack.i.h.bf16 %v8306_v15  ;;  %v8307_v19 = vunpack.i.l.bf16 %v8306_v15 }
0x43ab   :  { %v7968_v42 = vpack.c.bf16 %v8308_v52, %v8307_v19 }
0x43ad   :  { %v8790_v3 = vpop.eup %8789 }
0x43ae   :  { %6652 = vrot.lane.b32.xlu0 %v8790_v3, %s8868_s4 }
0x43b3   :  { %v8792_v7 = vpop.eup %8791 }
0x43b4   :  { %v6640_v41 = vadd.f32 1.0, %v8792_v7 }
0x43b6   :  { %8793 = vrcp.f32 %v6640_v41 }
0x43c0   :  { %v8794_v54 = vpop.eup %8793 }
0x4417   :  { %v6671_v47 = vpop.permute.xlu0 %6670 }
0x4418   :  { %7266 = vmatmul.mubr.msk.f32.vlgmr.msra.gmra.mrb[48].mxu0 %vm2497_vm14, %v6671_v47 }
0x4419   :  { %7298 = vmatprep.mubr.msk.f32.mxu0 %vm8872_vm15, %v8856_v0  ;;  %7975 = vmatpush3.bf16.msra.mxu0 %v7974_v61 }
0x441a   :  { %7976 = vmatprep.subr.bf16.mxu0 %v8871_v8 }
0x4420   :  { %v6653_v18 = vpop.permute.xlu0 %6652 }
0x4421   :  { %v6655_v20 = vmul.f32 %v8794_v54, %v6653_v18 }
0x4423   :  { %6656 = vst.msk [vmem:[#allocation4 + $0x1f] sm:$0x1] %vm2625_vm13, %v6655_v20 }
0x442a   :  { %v6748_v31 = vld [vmem:[#allocation4 + $0x18] sm:$0xff] }
0x442b   :  { %v8309_v17 = vpack.i.bf16 %v6748_v31, %v6747_v9  ;;  %v7965_v12 = vpack.c.bf16 %v6748_v31, %v6747_v9 }
0x442d   :  { %8310 = vrot.lane.b32.xlu0 %v8309_v17, %s8865_s28  ;;  %7966 = vmatpush3.bf16.msra.mxu1 %v7965_v12 }
0x442e   :  { %7967 = vmatprep.subr.bf16.mxu1 %v8871_v8 }
0x449f   :  { %v8311_v34 = vpop.permute.xlu0 %8310 }
0x44a0   :  { %v8313_v1 = vunpack.i.h.bf16 %v8311_v34  ;;  %v8312_v40 = vunpack.i.l.bf16 %v8311_v34 }
0x44a2   :  { %v7971_v10 = vpack.c.bf16 %v8313_v1, %v8312_v40 }
0x44eb   :  { %v6740_v33 = vpop.f32.mrb[48].mxu0 }
0x44ec   :  { %8795 = vtanh.f32 %v6740_v33  ;;  %v7267_v43 = vpop.f32.mrb[49].mxu0 }
0x44f6   :  { %v8796_v50 = vpop.eup %8795 }
0x44f7   :  { %6822 = vrot.lane.b32.xlu1 %v8796_v50, %s8865_s28  ;;  %7277 = vmatmul.mubr.msk.f32.vlgmr.msra.gmra.mrb[48].mxu1 %vm823_vm8, %v8796_v50 }
0x44f8   :  { %7969 = vmatpush3.bf16.msra.mxu1 %v7968_v42  ;;  %7287 = vmatprep.mubr.msk.f32.mxu1 %vm8872_vm15, %v8856_v0  ;;  %v6919_v0 = vld [vmem:[%s10436_s14 + $0x10] sm:$0xff]  ;;  %s8873_s14 = smov [#allocation8]  }
0x44f9   :  { %7970 = vmatprep.subr.bf16.mxu1 %v8871_v8  ;;  %v7977_v58 = vpack.c.bf16 %v6920_v56, %v6919_v0  ;;  %s7020_s1 = sshll.u32 %s8873_s14, 4  ;;  %s7021_s1 = int_to_ptr.vmem [resolvable:$true] %s7020_s1 }
0x44fa   :  { %s8827_s15 = scalar_lea.vmem %s7021_s1, 32  ;;  %p8832_p9 = scmp.lt.s32.totalorder %s7021_s1, %s7021_s1 }
0x44fb   :  { %7978 = vmatpush3.bf16.msra.mxu0 %v7977_v58  ;;  %p8828_p8 = scmp.ne.s32.totalorder %s7021_s1, %s8827_s15  ;;  %p8833_p10 = scmp.lt.s32.totalorder %s8827_s15, %s8827_s15 }
0x44fc   :  { %7972 = vmatpush3.bf16.msra.mxu1 %v7971_v10 }
0x44fd   :  { %p8834_p11 = por %p8833_p10, %p8832_p9 }
0x44ff   :  { %p8835_p12 = pnand %p8834_p11, %p8828_p8 }
0x4569   :  { %v6823_v24 = vpop.permute.xlu1 %6822 }
0x456a   :  { %7288 = vmatmul.mubr.msk.f32.vlgmr.msra.gmra.mrb[50].mxu1 %vm823_vm8, %v6823_v24 }
0x45ca   :  { %v6818_v29 = vpop.f32.mrb[48].mxu1 }
0x45cb   :  { %v7278_v2 = vpop.f32.mrb[49].mxu1 }
0x463d   :  { %v6908_v48 = vpop.f32.mrb[50].mxu1 }
0x463e   :  { %v6913_v59 = vrot.slane %v6908_v48, 7  ;;  %v7289_v28 = vpop.f32.mrb[51].mxu1 }
0x4640   :  { %v6916_v8 = vsel %vm6915_vm0, %v6818_v29, %v6913_v59 }
0x4641   :  { %7299 = vmatmul.mubr.msk.f32.vlgmr.msra.gmra.mrb[50].mxu0 %vm823_vm8, %v6916_v8 }
0x4714   :  { %v6997_v63 = vpop.f32.mrb[50].mxu0 }
0x4715   :  { %v6998_v5 = vadd.f32 %v7207_v46, %v6997_v63  ;;  %v7300_v11 = vpop.f32.mrb[51].mxu0 }
0x4717   :  { %v7002_v36 = vsel %vm7001_vm1, %v6998_v5, -inf }
0x4718   :  { %7003 = vmax.xlane.f32.xlu0 %v7002_v36 }
0x47a5   :  { %v7004_v4 = vpop.xlane.xlu0 %7003 }
0x47a6   :  { %v7005_v13 = vsub.f32 %v6998_v5, %v7004_v4 }
0x47a8   :  { %v7006_v44 = vmul.f32 1.442695, %v7005_v13 }
0x47aa   :  { %8797 = vpow2.f32 %v7006_v44 }
0x47b4   :  { %v8798_v45 = vpop.eup %8797 }
0x47b5   :  { %v7008_v16 = vsel %vm7001_vm1, %v8798_v45, 0.0 }
0x47b6   :  { %7009 = vadd.xlane.f32.xlu1 %v7008_v16 }
0x4843   :  { %v7010_v14 = vpop.xlane.xlu1 %7009 }
0x4844   :  { %8799 = vrcp.f32 %v7010_v14 }
0x484e   :  { %v8800_v22 = vpop.eup %8799 }
0x484f   :  { %v7012_v25 = vmul.f32 %v8800_v22, %v8798_v45 }
0x4851   :  { %7013 = vst.msk [vmem:[#allocation8] sm:$0x3] %vm7001_vm1, %v7012_v25 }
0x4852   :  { %8838 = shalt.err (!%p8835_p12)
}
0x4853   :  { %s8839_s5 = scalar_lea.hbm %s10438_s16, 32 }
0x4854   :  { %p8840_p13 = scmp.ne.s32.totalorder %s10438_s16, %s8839_s5  ;;  %p8843_p0 = scmp.lt.u32.totalorder %s8839_s5, %s10438_s16 }
0x4856   :  { %p8845_p1 = pnand %p8843_p0, %p8840_p13 }
0x4858   :  { %8848 = shalt.err (!%p8845_p1)
}
0x4859   :  { %7023 = dma.vmem_to_hbm [thread:$0]  %s7021_s1, 32, %s10438_s16, [#allocation7]  }
0x485a   :  { %8851 = dma.done.wait [#allocation7], 32  }
0x485b   :  { %8852 = vsyncadd [#allocation7], 4294967264 }
0x485c   :  { %7027 = vsyncpa [#allocation6], 1 }
0x485d   :  { %7028 = vsyncpa [#allocation7], 1 }

</bundles_post_ra>
